<compile_context>
chip_gen: v7x
topology: tpu7x:2x2x1
jax: 0.10.0
libtpu: 0.0.40
codegen_flags: <defaults>
</compile_context>

<pallas_src>
import jax
import jax.numpy as jnp
from jax.experimental import pallas as pl
from jax.experimental.pallas import tpu as pltpu


# ----------------------------------------------------------------------------
# Pallas kernels
# ----------------------------------------------------------------------------
def linear_kernel(x_ref, w_ref, b_ref, o_ref):
    """One (tn, K) @ (K, tm) tile of a bias-add matmul (bf16 in, f32 out)."""
    o_ref[...] = (
        jnp.dot(x_ref[...], w_ref[...], preferred_element_type=jnp.float32)
        + b_ref[...]
    ).astype(o_ref.dtype)


def _make_fused_lstm_kernel(num_layers, hidden, t_block):
    """Fused multi-layer LSTM recurrence over a block of Tt timesteps.

    refs = (gin, w_hh0, [w_ih_l, w_hh_l, b_l]*(L-1), h_out, h_state, c_state)
      gin   : (tb, Tt, 4H) f32   precomputed x_t @ W_ih0^T + (b_ih0 + b_hh0)
      w_hh0 : (H, 4H)      bf16
      w_ih_l: (H, 4H)      bf16   layer-l input weights (transposed)
      w_hh_l: (H, 4H)      bf16   layer-l recurrent weights (transposed)
      b_l   : (1, 4H)      f32    = b_ih_l + b_hh_l
      h_out : (tb, Tt, H)  bf16
      h_st  : (L, tb, H)   bf16 scratch (persists across the time grid axis)
      c_st  : (L, tb, H)   f32  scratch
    Gate order follows PyTorch: i, f, g, o.
    """
    H = hidden
    Tt = t_block

    def kernel(*refs):
        gin_ref = refs[0]
        w_hh0_ref = refs[1]
        n_extra = 3 * (num_layers - 1)
        extra = refs[2:2 + n_extra]
        h_out_ref = refs[2 + n_extra]
        h_st, c_st = refs[-2], refs[-1]

        @pl.when(pl.program_id(1) == 0)
        def _init():
            h_st[...] = jnp.zeros(h_st.shape, h_st.dtype)
            c_st[...] = jnp.zeros(c_st.shape, c_st.dtype)

        def cell(gates, c_prev):
            i_g = jax.nn.sigmoid(gates[:, 0 * H:1 * H])
            f_g = jax.nn.sigmoid(gates[:, 1 * H:2 * H])
            g_g = jnp.tanh(gates[:, 2 * H:3 * H])
            o_g = jax.nn.sigmoid(gates[:, 3 * H:4 * H])
            c = f_g * c_prev + i_g * g_g
            h = o_g * jnp.tanh(c)
            return h, c

        # Statically unrolled over the Tt timesteps of this block: the scheduler
        # can overlap step t+1's layer-0 matmul with step t's upper-layer work.
        for tt in range(Tt):
            # Layer 0: input projection (incl. folded bias) precomputed outside.
            gates0 = gin_ref[:, tt, :] + jnp.dot(
                h_st[0], w_hh0_ref[...], preferred_element_type=jnp.float32)
            h_f32, c = cell(gates0, c_st[0])
            h_bf = h_f32.astype(jnp.bfloat16)
            h_st[0] = h_bf
            c_st[0] = c

            # Layers 1..L-1: two small matmuls summed (no concat buffer).
            for l in range(1, num_layers):
                w_ih_ref = extra[3 * (l - 1)]
                w_hh_ref = extra[3 * (l - 1) + 1]
                b_ref = extra[3 * (l - 1) + 2]
                gates = (
                    jnp.dot(h_bf, w_ih_ref[...],
                            preferred_element_type=jnp.float32)
                    + jnp.dot(h_st[l], w_hh_ref[...],
                              preferred_element_type=jnp.float32)
                    + b_ref[...])
                h_f32, c = cell(gates, c_st[l])
                h_bf = h_f32.astype(jnp.bfloat16)
                h_st[l] = h_bf
                c_st[l] = c

            h_out_ref[:, tt, :] = h_bf

    return kernel


# ----------------------------------------------------------------------------
# Wrappers around pallas_call
# ----------------------------------------------------------------------------
def _round_up(x, m):
    return -(-x // m) * m


def _pick_tile(dim, candidates):
    for c in candidates:
        if dim % c == 0:
            return c
    return dim


def _num_tensorcores():
    # Only 2-TC parts (v7x) benefit from splitting the batch grid axis.
    try:
        kind = getattr(jax.devices()[0], "device_kind", "") or ""
        if "v7" in kind.lower():
            return 2
    except Exception:
        pass
    return 1


def linear(x_bf16, w_t_bf16, b_f32, out_dtype=jnp.float32):
    """x: (N, K) bf16, w_t: (K, M) bf16, b: (1, M) f32 -> (N, M) out_dtype, tiled.

    Rows are padded so the row tile stays large (single block for small N, else
    256-row tiles): the (K, M) weight is streamed at most N/tn times, never with
    a tiny tn forced by awkward N. Column tiles prefer 256-multiples (v6e/v7x
    MXU-native) and are capped at 512 to bound VMEM since K is untiled.
    """
    N, K = x_bf16.shape
    M = w_t_bf16.shape[1]
    if N <= 1024:
        tn = _round_up(N, 8)
        Np = tn
    else:
        tn = 256
        Np = _round_up(N, tn)
    if Np != N:
        x_bf16 = jnp.pad(x_bf16, ((0, Np - N), (0, 0)))
    # TODO(synk): for very large K on v7x (64 MiB VMEM) add a K ("arbitrary")
    # grid axis with an f32 accumulator scratch instead of keeping K untiled.
    tm = _pick_tile(M, (512, 256, 128))

    out = pl.pallas_call(
        linear_kernel,
        out_shape=jax.ShapeDtypeStruct((Np, M), out_dtype),
        grid_spec=pltpu.PrefetchScalarGridSpec(
            num_scalar_prefetch=0,
            grid=(Np // tn, M // tm),
            in_specs=[
                pl.BlockSpec((tn, K), lambda i, j: (i, 0)),
                pl.BlockSpec((K, tm), lambda i, j: (0, j)),
                pl.BlockSpec((1, tm), lambda i, j: (0, j)),
            ],
            out_specs=pl.BlockSpec((tn, tm), lambda i, j: (i, j)),
        ),
        compiler_params=pltpu.CompilerParams(
            dimension_semantics=("parallel", "parallel")),
    )(x_bf16, w_t_bf16, b_f32)
    return out[:N] if Np != N else out


def fused_lstm(gin_bm, w_hh0_t, extras, tb, t_block):
    """gin_bm: (Bp, Tp, 4H) f32 precomputed layer-0 gates -> (Bp, Tp, H) bf16."""
    Bp, Tp, H4 = gin_bm.shape
    H = w_hh0_t.shape[0]
    num_layers = len(extras) + 1

    in_specs = [
        pl.BlockSpec((tb, t_block, H4), lambda b, t: (b, t, 0)),  # layer-0 gates
        pl.BlockSpec((H, H4), lambda b, t: (0, 0)),               # W_hh layer 0
    ]
    args = [gin_bm, w_hh0_t]
    for w_ih, w_hh, bias in extras:
        in_specs.append(pl.BlockSpec((H, H4), lambda b, t: (0, 0)))
        in_specs.append(pl.BlockSpec((H, H4), lambda b, t: (0, 0)))
        in_specs.append(pl.BlockSpec((1, H4), lambda b, t: (0, 0)))
        args.extend([w_ih, w_hh, bias])

    return pl.pallas_call(
        _make_fused_lstm_kernel(num_layers, H, t_block),
        out_shape=jax.ShapeDtypeStruct((Bp, Tp, H), jnp.bfloat16),
        grid_spec=pltpu.PrefetchScalarGridSpec(
            num_scalar_prefetch=0,
            grid=(Bp // tb, Tp // t_block),
            in_specs=in_specs,
            out_specs=pl.BlockSpec((tb, t_block, H), lambda b, t: (b, t, 0)),
            scratch_shapes=[
                pltpu.VMEM((num_layers, tb, H), jnp.bfloat16),  # h state (bf16)
                pltpu.VMEM((num_layers, tb, H), jnp.float32),   # c state (f32)
            ],
        ),
        compiler_params=pltpu.CompilerParams(
            # batch chunks are independent (both TCs on v7x); time is serial.
            dimension_semantics=("parallel", "arbitrary")),
    )(*args)


# ----------------------------------------------------------------------------
# DecoderRNN forward
# ----------------------------------------------------------------------------
def decoder_rnn_forward(params, features, captions):
    """features: (B, E) f32, captions: (B, Tc) int32 -> logits (B, Tc, V) f32."""
    # Embedding gather + feature concat: plain-JAX glue (arbitrary-index gather).
    emb = jnp.take(params["embed"], captions[:, :-1], axis=0)          # (B, Tc-1, E)
    x = jnp.concatenate([features[:, None, :].astype(emb.dtype), emb], axis=1)
    B, T, E = x.shape
    H = params["w_hh0_t"].shape[0]
    V = params["lin_w_t"].shape[1]

    # Pad batch to a multiple of 8 (sublanes) and time to a multiple of the time
    # block; padded rows/steps see zero inputs and are sliced off at the end.
    Tt = 8 if T >= 8 else T
    Bp = _round_up(B, 8)
    Tp = _round_up(T, Tt)
    if Bp != B or Tp != T:
        x = jnp.pad(x, ((0, Bp - B), (0, Tp - T), (0, 0)))

    # Everything stays batch-major: no HBM transposes anywhere in the pipeline.
    x_rows = x.reshape(Bp * Tp, E).astype(jnp.bfloat16)

    # Layer-0 input projection hoisted out of the recurrence: one big MXU matmul.
    gin = linear(x_rows, params["w_ih0_t"], params["b0"]).reshape(Bp, Tp, 4 * H)

    # Batch is chunked across the grid only when a 2-TC part (v7x) is detected
    # and each chunk keeps a healthy MXU M dimension (>= 64 rows per core).
    tb = Bp // 2 if (_num_tensorcores() >= 2 and Bp % 16 == 0 and Bp >= 128) else Bp

    # Fused multi-layer recurrence, time-blocked, bf16 hidden output.
    h_bm = fused_lstm(gin, params["w_hh0_t"], params["lstm_extra"], tb, Tt)

    # Vocab projection: rows are already bf16 and batch-major -> logits written
    # directly in the (B, T, V) PyTorch layout.
    logits = linear(h_bm.reshape(Bp * Tp, H), params["lin_w_t"],
                    params["lin_b"]).reshape(Bp, Tp, V)
    return logits[:B, :T]


# ----------------------------------------------------------------------------
# Pure-JAX reference (mirrors the kernel's bf16-operand / f32-accum numerics)
# ----------------------------------------------------------------------------
def decoder_rnn_reference(params, features, captions):
    emb = jnp.take(params["embed"], captions[:, :-1], axis=0)
    x = jnp.concatenate([features[:, None, :].astype(emb.dtype), emb], axis=1)
    B, T, E = x.shape
    H = params["w_hh0_t"].shape[0]
    V = params["lin_w_t"].shape[1]
    L = len(params["lstm_extra"]) + 1

    xb = x.astype(jnp.bfloat16).reshape(B * T, E)
    gin = (jnp.dot(xb, params["w_ih0_t"], preferred_element_type=jnp.float32)
           .reshape(B, T, 4 * H) + params["b0"])
    gin_tm = jnp.transpose(gin, (1, 0, 2))                              # (T, B, 4H)

    def cell(gates, c_prev):
        i_g = jax.nn.sigmoid(gates[:, 0 * H:1 * H])
        f_g = jax.nn.sigmoid(gates[:, 1 * H:2 * H])
        g_g = jnp.tanh(gates[:, 2 * H:3 * H])
        o_g = jax.nn.sigmoid(gates[:, 3 * H:4 * H])
        c = f_g * c_prev + i_g * g_g
        return o_g * jnp.tanh(c), c

    w_hh0 = params["w_hh0_t"]

    def step(carry, g_t):
        hs, cs = carry   # hs carried in bf16 (like the kernel), cs in f32
        h, c = cell(g_t + jnp.dot(hs[0], w_hh0,
                                  preferred_element_type=jnp.float32), cs[0])
        prev = h.astype(jnp.bfloat16)
        new_h, new_c = [prev], [c]
        for l in range(1, L):
            w_ih, w_hh, b_l = params["lstm_extra"][l - 1]
            gl = (jnp.dot(prev, w_ih, preferred_element_type=jnp.float32)
                  + jnp.dot(hs[l], w_hh, preferred_element_type=jnp.float32)
                  + b_l)
            h, c = cell(gl, cs[l])
            prev = h.astype(jnp.bfloat16)
            new_h.append(prev)
            new_c.append(c)
        return (tuple(new_h), tuple(new_c)), prev

    init = (tuple(jnp.zeros((B, H), jnp.bfloat16) for _ in range(L)),
            tuple(jnp.zeros((B, H), jnp.float32) for _ in range(L)))
    _, h_seq = jax.lax.scan(step, init, gin_tm)                          # (T, B, H) bf16

    hb = jnp.transpose(h_seq, (1, 0, 2)).reshape(B * T, H)
    logits = (jnp.dot(hb, params["lin_w_t"], preferred_element_type=jnp.float32)
              + params["lin_b"])
    return logits.reshape(B, T, V)


# ----------------------------------------------------------------------------
# Deterministic parameter initialization (PyTorch-shaped, stored pre-transposed)
# ----------------------------------------------------------------------------
def init_params(key, embed_size, hidden_size, vocab_size, num_layers):
    H = hidden_size
    keys = jax.random.split(key, 3 + 4 * num_layers)
    k = 1.0 / (hidden_size ** 0.5)

    def u(kk, shape):
        return jax.random.uniform(kk, shape, jnp.float32, -k, k)

    params = {
        "embed": jax.random.normal(keys[0], (vocab_size, embed_size), jnp.float32) * 0.1,
        "lin_w_t": u(keys[1], (H, vocab_size)).astype(jnp.bfloat16),     # (H, V)
        "lin_b": u(keys[2], (1, vocab_size)),                            # (1, V) f32
    }
    # Layer 0: W_ih (4H, E) -> (E, 4H); W_hh (4H, H) -> (H, 4H); b = b_ih + b_hh.
    k0, k1, k2, k3 = keys[3:7]
    params["w_ih0_t"] = u(k0, (embed_size, 4 * H)).astype(jnp.bfloat16)
    params["w_hh0_t"] = u(k1, (H, 4 * H)).astype(jnp.bfloat16)
    params["b0"] = u(k2, (1, 4 * H)) + u(k3, (1, 4 * H))
    # Layers >= 1: W_ih^T (H, 4H), W_hh^T (H, 4H), folded bias (1, 4H).
    params["lstm_extra"] = []
    for l in range(1, num_layers):
        ka, kb, kc, kd = keys[3 + 4 * l: 7 + 4 * l]
        params["lstm_extra"].append((
            u(ka, (H, 4 * H)).astype(jnp.bfloat16),
            u(kb, (H, 4 * H)).astype(jnp.bfloat16),
            u(kc, (1, 4 * H)) + u(kd, (1, 4 * H)),
        ))
    return params


# TODO(synk): DecoderRNN.sample (20-step greedy argmax decode with embedding
# feedback) is host-side inference-loop glue and is not implemented here.

if __name__ == "__main__":
    # Small, lane-aligned demo shapes (E, H multiples of 128; V multiple of 128).
    embed_size, hidden_size, vocab_size, num_layers = 128, 128, 256, 2
    B, Tc = 2, 8   # LSTM sequence length = 1 + (Tc - 1) = Tc

    root = jax.random.PRNGKey(0)
    kp, kf, kc = jax.random.split(root, 3)
    params = init_params(kp, embed_size, hidden_size, vocab_size, num_layers)
    features = jax.random.normal(kf, (B, embed_size), jnp.float32)
    captions = jax.random.randint(kc, (B, Tc), 0, vocab_size, jnp.int32)

    fwd = jax.jit(decoder_rnn_forward)
    logits = jax.block_until_ready(fwd(params, features, captions))

    ref = decoder_rnn_reference(params, features, captions)
    assert logits.shape == (B, Tc, vocab_size), logits.shape
    err = float(jnp.max(jnp.abs(logits - ref)))
    assert jnp.allclose(logits, ref, atol=2e-3, rtol=2e-3), f"mismatch vs reference: {err}"

    print("KERNEL_OK")
</pallas_src>

<mosaic_0001>
module attributes {stable_mosaic.version = 11 : i64} {
  func.func @linear_kernel(%arg0: i32, %arg1: i32, %arg2: memref<64x128xbf16, #tpu.memory_space<vmem>>, %arg3: memref<128x512xbf16, #tpu.memory_space<vmem>>, %arg4: memref<1x512xf32, #tpu.memory_space<vmem>>, %arg5: memref<64x512xf32, #tpu.memory_space<vmem>>) attributes {dimension_semantics = [#tpu.dimension_semantics<parallel>, #tpu.dimension_semantics<parallel>], iteration_bounds = array<i64: 1, 1>, scalar_prefetch = 0 : i64, scratch_operands = 0 : i64, tpu.core_type = #tpu.core_type<tc>, window_params = [{transform_indices = @transform_0, window_bounds = array<i64: 64, 128>}, {transform_indices = @transform_1, window_bounds = array<i64: 128, 512>}, {transform_indices = @transform_2, window_bounds = array<i64: 1, 512>}, {transform_indices = @transform_3, window_bounds = array<i64: 64, 512>}]} {
    %c0 = arith.constant 0 : index
    %c0_0 = arith.constant 0 : index
    %0 = vector.load %arg2[%c0, %c0_0] : memref<64x128xbf16, #tpu.memory_space<vmem>>, vector<64x128xbf16>
    %c0_1 = arith.constant 0 : index
    %c0_2 = arith.constant 0 : index
    %1 = vector.load %arg3[%c0_1, %c0_2] : memref<128x512xbf16, #tpu.memory_space<vmem>>, vector<128x512xbf16>
    %cst = arith.constant dense<0.000000e+00> : vector<64x512xf32>
    %2 = tpu.matmul %0, %1, %cst {dimension_numbers = #tpu.dot_dimension_numbers<[1], [0], [0], [1], [0, 0, 1, 1], [], []>} : vector<64x128xbf16>, vector<128x512xbf16>, vector<64x512xf32> -> vector<64x512xf32>
    %c0_3 = arith.constant 0 : index
    %c0_4 = arith.constant 0 : index
    %3 = vector.load %arg4[%c0_3, %c0_4] : memref<1x512xf32, #tpu.memory_space<vmem>>, vector<1x512xf32>
    %4 = vector.broadcast %3 : vector<1x512xf32> to vector<64x512xf32>
    %5 = arith.addf %2, %4 : vector<64x512xf32>
    %c0_5 = arith.constant 0 : index
    %c0_6 = arith.constant 0 : index
    %6 = vector.load %arg5[%c0_5, %c0_6] : memref<64x512xf32, #tpu.memory_space<vmem>>, vector<64x512xf32>
    tpu.vector_store %arg5[%c0_5, %c0_6], %5 {strides = array<i32>} : memref<64x512xf32, #tpu.memory_space<vmem>>, vector<64x512xf32>,
    return
  }
  func.func @transform_0(%arg0: i32, %arg1: i32) -> (i32, i32) {
    %c0_i32 = arith.constant 0 : i32
    %c0_i32_0 = arith.constant 0 : i32
    return %arg0, %c0_i32 : i32, i32
  }
  func.func @transform_1(%arg0: i32, %arg1: i32) -> (i32, i32) {
    %c0_i32 = arith.constant 0 : i32
    %c0_i32_0 = arith.constant 0 : i32
    return %c0_i32, %arg1 : i32, i32
  }
  func.func @transform_2(%arg0: i32, %arg1: i32) -> (i32, i32) {
    %c0_i32 = arith.constant 0 : i32
    %c0_i32_0 = arith.constant 0 : i32
    return %c0_i32, %arg1 : i32, i32
  }
  func.func @transform_3(%arg0: i32, %arg1: i32) -> (i32, i32) {
    %c0_i32 = arith.constant 0 : i32
    return %arg0, %arg1 : i32, i32
  }
}

module attributes {stable_mosaic.version = 11 : i64} {
  func.func @linear_kernel(%arg0: i32, %arg1: i32, %arg2: memref<64x128xbf16, #tpu.memory_space<vmem>>, %arg3: memref<128x256xbf16, #tpu.memory_space<vmem>>, %arg4: memref<1x256xf32, #tpu.memory_space<vmem>>, %arg5: memref<64x256xf32, #tpu.memory_space<vmem>>) attributes {dimension_semantics = [#tpu.dimension_semantics<parallel>, #tpu.dimension_semantics<parallel>], iteration_bounds = array<i64: 1, 1>, scalar_prefetch = 0 : i64, scratch_operands = 0 : i64, tpu.core_type = #tpu.core_type<tc>, window_params = [{transform_indices = @transform_0, window_bounds = array<i64: 64, 128>}, {transform_indices = @transform_1, window_bounds = array<i64: 128, 256>}, {transform_indices = @transform_2, window_bounds = array<i64: 1, 256>}, {transform_indices = @transform_3, window_bounds = array<i64: 64, 256>}]} {
    %c0 = arith.constant 0 : index
    %c0_0 = arith.constant 0 : index
    %0 = vector.load %arg2[%c0, %c0_0] : memref<64x128xbf16, #tpu.memory_space<vmem>>, vector<64x128xbf16>
    %c0_1 = arith.constant 0 : index
    %c0_2 = arith.constant 0 : index
    %1 = vector.load %arg3[%c0_1, %c0_2] : memref<128x256xbf16, #tpu.memory_space<vmem>>, vector<128x256xbf16>
    %cst = arith.constant dense<0.000000e+00> : vector<64x256xf32>
    %2 = tpu.matmul %0, %1, %cst {dimension_numbers = #tpu.dot_dimension_numbers<[1], [0], [0], [1], [0, 0, 1, 1], [], []>} : vector<64x128xbf16>, vector<128x256xbf16>, vector<64x256xf32> -> vector<64x256xf32>
    %c0_3 = arith.constant 0 : index
    %c0_4 = arith.constant 0 : index
    %3 = vector.load %arg4[%c0_3, %c0_4] : memref<1x256xf32, #tpu.memory_space<vmem>>, vector<1x256xf32>
    %4 = vector.broadcast %3 : vector<1x256xf32> to vector<64x256xf32>
    %5 = arith.addf %2, %4 : vector<64x256xf32>
    %c0_5 = arith.constant 0 : index
    %c0_6 = arith.constant 0 : index
    %6 = vector.load %arg5[%c0_5, %c0_6] : memref<64x256xf32, #tpu.memory_space<vmem>>, vector<64x256xf32>
    tpu.vector_store %arg5[%c0_5, %c0_6], %5 {strides = array<i32>} : memref<64x256xf32, #tpu.memory_space<vmem>>, vector<64x256xf32>,
    return
  }
  func.func @transform_0(%arg0: i32, %arg1: i32) -> (i32, i32) {
    %c0_i32 = arith.constant 0 : i32
    %c0_i32_0 = arith.constant 0 : i32
    return %arg0, %c0_i32 : i32, i32
  }
  func.func @transform_1(%arg0: i32, %arg1: i32) -> (i32, i32) {
    %c0_i32 = arith.constant 0 : i32
    %c0_i32_0 = arith.constant 0 : i32
    return %c0_i32, %arg1 : i32, i32
  }
  func.func @transform_2(%arg0: i32, %arg1: i32) -> (i32, i32) {
    %c0_i32 = arith.constant 0 : i32
    %c0_i32_0 = arith.constant 0 : i32
    return %c0_i32, %arg1 : i32, i32
  }
  func.func @transform_3(%arg0: i32, %arg1: i32) -> (i32, i32) {
    %c0_i32 = arith.constant 0 : i32
    return %arg0, %arg1 : i32, i32
  }
}

module attributes {stable_mosaic.version = 11 : i64} {
  func.func @kernel(%arg0: i32, %arg1: i32, %arg2: memref<8x8x512xf32, #tpu.memory_space<vmem>>, %arg3: memref<128x512xbf16, #tpu.memory_space<vmem>>, %arg4: memref<128x512xbf16, #tpu.memory_space<vmem>>, %arg5: memref<128x512xbf16, #tpu.memory_space<vmem>>, %arg6: memref<1x512xf32, #tpu.memory_space<vmem>>, %arg7: memref<8x8x128xbf16, #tpu.memory_space<vmem>>, %arg8: memref<2x8x128xbf16, #tpu.memory_space<vmem>>, %arg9: memref<2x8x128xf32, #tpu.memory_space<vmem>>) attributes {dimension_semantics = [#tpu.dimension_semantics<parallel>, #tpu.dimension_semantics<arbitrary>], iteration_bounds = array<i64: 1, 1>, scalar_prefetch = 0 : i64, scratch_operands = 2 : i64, tpu.core_type = #tpu.core_type<tc>, window_params = [{transform_indices = @transform_0, window_bounds = array<i64: 8, 8, 512>}, {pipeline_mode = #tpu.pipeline_mode<synchronous>, transform_indices = @transform_1, window_bounds = array<i64: 128, 512>}, {pipeline_mode = #tpu.pipeline_mode<synchronous>, transform_indices = @transform_2, window_bounds = array<i64: 128, 512>}, {pipeline_mode = #tpu.pipeline_mode<synchronous>, transform_indices = @transform_3, window_bounds = array<i64: 128, 512>}, {pipeline_mode = #tpu.pipeline_mode<synchronous>, transform_indices = @transform_4, window_bounds = array<i64: 1, 512>}, {transform_indices = @transform_5, window_bounds = array<i64: 8, 8, 128>}]} {
    %c0_i32 = arith.constant 0 : i32
    %0 = arith.cmpi eq, %arg1, %c0_i32 : i32
    %1 = arith.extui %0 : i1 to i32
    %c0_i32_0 = arith.constant 0 : i32
    %2 = arith.cmpi ne, %1, %c0_i32_0 : i32
    scf.if %2 {
      %cst_368 = arith.constant 0.000000e+00 : bf16
      %707 = vector.broadcast %cst_368 : bf16 to vector<2x8x128xbf16>
      %c0_369 = arith.constant 0 : index
      %c0_370 = arith.constant 0 : index
      %c0_371 = arith.constant 0 : index
      %708 = vector.load %arg8[%c0_369, %c0_370, %c0_371] : memref<2x8x128xbf16, #tpu.memory_space<vmem>>, vector<2x8x128xbf16>
      tpu.vector_store %arg8[%c0_369, %c0_370, %c0_371], %707 {strides = array<i32>} : memref<2x8x128xbf16, #tpu.memory_space<vmem>>, vector<2x8x128xbf16>,
      %cst_372 = arith.constant 0.000000e+00 : f32
      %709 = vector.broadcast %cst_372 : f32 to vector<2x8x128xf32>
      %c0_373 = arith.constant 0 : index
      %c0_374 = arith.constant 0 : index
      %c0_375 = arith.constant 0 : index
      %710 = vector.load %arg9[%c0_373, %c0_374, %c0_375] : memref<2x8x128xf32, #tpu.memory_space<vmem>>, vector<2x8x128xf32>
      tpu.vector_store %arg9[%c0_373, %c0_374, %c0_375], %709 {strides = array<i32>} : memref<2x8x128xf32, #tpu.memory_space<vmem>>, vector<2x8x128xf32>,
    } else {
    }
    %c0 = arith.constant 0 : index
    %c0_1 = arith.constant 0 : index
    %c0_2 = arith.constant 0 : index
    %3 = vector.load %arg2[%c0, %c0_1, %c0_2] : memref<8x8x512xf32, #tpu.memory_space<vmem>>, vector<8x1x512xf32>
    %4 = vector.shape_cast %3 : vector<8x1x512xf32> to vector<8x512xf32>
    %c0_3 = arith.constant 0 : index
    %c0_4 = arith.constant 0 : index
    %c0_5 = arith.constant 0 : index
    %5 = vector.load %arg8[%c0_3, %c0_4, %c0_5] : memref<2x8x128xbf16, #tpu.memory_space<vmem>>, vector<1x8x128xbf16>
    %6 = vector.shape_cast %5 : vector<1x8x128xbf16> to vector<8x128xbf16>
    %c0_6 = arith.constant 0 : index
    %c0_7 = arith.constant 0 : index
    %7 = vector.load %arg3[%c0_6, %c0_7] : memref<128x512xbf16, #tpu.memory_space<vmem>>, vector<128x512xbf16>
    %cst = arith.constant dense<0.000000e+00> : vector<8x512xf32>
    %8 = tpu.matmul %6, %7, %cst {dimension_numbers = #tpu.dot_dimension_numbers<[1], [0], [0], [1], [0, 0, 1, 1], [], []>} : vector<8x128xbf16>, vector<128x512xbf16>, vector<8x512xf32> -> vector<8x512xf32>
    %9 = arith.addf %4, %8 : vector<8x512xf32>
    %c0_8 = arith.constant 0 : index
    %c0_9 = arith.constant 0 : index
    %c0_10 = arith.constant 0 : index
    %10 = vector.load %arg9[%c0_8, %c0_9, %c0_10] : memref<2x8x128xf32, #tpu.memory_space<vmem>>, vector<1x8x128xf32>
    %11 = vector.shape_cast %10 : vector<1x8x128xf32> to vector<8x128xf32>
    %12 = vector.extract_strided_slice %9 {offsets = [0, 0], sizes = [8, 128], strides = [1, 1]} : vector<8x512xf32> to vector<8x128xf32>
    %13 = arith.negf %12 : vector<8x128xf32>
    %14 = math.exp %13 : vector<8x128xf32>
    %cst_11 = arith.constant 1.000000e+00 : f32
    %15 = vector.broadcast %cst_11 : f32 to vector<8x128xf32>
    %16 = arith.addf %15, %14 : vector<8x128xf32>
    %17 = arith.divf %15, %16 : vector<8x128xf32>
    %18 = vector.extract_strided_slice %9 {offsets = [0, 128], sizes = [8, 128], strides = [1, 1]} : vector<8x512xf32> to vector<8x128xf32>
    %19 = arith.negf %18 : vector<8x128xf32>
    %20 = math.exp %19 : vector<8x128xf32>
    %cst_12 = arith.constant 1.000000e+00 : f32
    %21 = vector.broadcast %cst_12 : f32 to vector<8x128xf32>
    %22 = arith.addf %21, %20 : vector<8x128xf32>
    %23 = arith.divf %21, %22 : vector<8x128xf32>
    %24 = vector.extract_strided_slice %9 {offsets = [0, 256], sizes = [8, 128], strides = [1, 1]} : vector<8x512xf32> to vector<8x128xf32>
    %25 = math.tanh %24 : vector<8x128xf32>
    %26 = vector.extract_strided_slice %9 {offsets = [0, 384], sizes = [8, 128], strides = [1, 1]} : vector<8x512xf32> to vector<8x128xf32>
    %27 = arith.negf %26 : vector<8x128xf32>
    %28 = math.exp %27 : vector<8x128xf32>
    %cst_13 = arith.constant 1.000000e+00 : f32
    %29 = vector.broadcast %cst_13 : f32 to vector<8x128xf32>
    %30 = arith.addf %29, %28 : vector<8x128xf32>
    %31 = arith.divf %29, %30 : vector<8x128xf32>
    %32 = arith.mulf %23, %11 : vector<8x128xf32>
    %33 = arith.mulf %17, %25 : vector<8x128xf32>
    %34 = arith.addf %32, %33 : vector<8x128xf32>
    %35 = math.tanh %34 : vector<8x128xf32>
    %36 = arith.mulf %31, %35 : vector<8x128xf32>
    %37 = arith.truncf %36 : vector<8x128xf32> to vector<8x128xbf16>
    %c0_14 = arith.constant 0 : index
    %c0_15 = arith.constant 0 : index
    %c0_16 = arith.constant 0 : index
    %38 = vector.load %arg8[%c0_14, %c0_15, %c0_16] : memref<2x8x128xbf16, #tpu.memory_space<vmem>>, vector<1x8x128xbf16>
    %39 = vector.shape_cast %38 : vector<1x8x128xbf16> to vector<8x128xbf16>
    %40 = vector.shape_cast %37 : vector<8x128xbf16> to vector<1x8x128xbf16>
    tpu.vector_store %arg8[%c0_14, %c0_15, %c0_16], %40 {strides = array<i32>} : memref<2x8x128xbf16, #tpu.memory_space<vmem>>, vector<1x8x128xbf16>,
    %c0_17 = arith.constant 0 : index
    %c0_18 = arith.constant 0 : index
    %c0_19 = arith.constant 0 : index
    %41 = vector.load %arg9[%c0_17, %c0_18, %c0_19] : memref<2x8x128xf32, #tpu.memory_space<vmem>>, vector<1x8x128xf32>
    %42 = vector.shape_cast %41 : vector<1x8x128xf32> to vector<8x128xf32>
    %43 = vector.shape_cast %34 : vector<8x128xf32> to vector<1x8x128xf32>
    tpu.vector_store %arg9[%c0_17, %c0_18, %c0_19], %43 {strides = array<i32>} : memref<2x8x128xf32, #tpu.memory_space<vmem>>, vector<1x8x128xf32>,
    %c0_20 = arith.constant 0 : index
    %c0_21 = arith.constant 0 : index
    %44 = vector.load %arg4[%c0_20, %c0_21] : memref<128x512xbf16, #tpu.memory_space<vmem>>, vector<128x512xbf16>
    %cst_22 = arith.constant dense<0.000000e+00> : vector<8x512xf32>
    %45 = tpu.matmul %37, %44, %cst_22 {dimension_numbers = #tpu.dot_dimension_numbers<[1], [0], [0], [1], [0, 0, 1, 1], [], []>} : vector<8x128xbf16>, vector<128x512xbf16>, vector<8x512xf32> -> vector<8x512xf32>
    %c1 = arith.constant 1 : index
    %c0_23 = arith.constant 0 : index
    %c0_24 = arith.constant 0 : index
    %46 = vector.load %arg8[%c1, %c0_23, %c0_24] : memref<2x8x128xbf16, #tpu.memory_space<vmem>>, vector<1x8x128xbf16>
    %47 = vector.shape_cast %46 : vector<1x8x128xbf16> to vector<8x128xbf16>
    %c0_25 = arith.constant 0 : index
    %c0_26 = arith.constant 0 : index
    %48 = vector.load %arg5[%c0_25, %c0_26] : memref<128x512xbf16, #tpu.memory_space<vmem>>, vector<128x512xbf16>
    %cst_27 = arith.constant dense<0.000000e+00> : vector<8x512xf32>
    %49 = tpu.matmul %47, %48, %cst_27 {dimension_numbers = #tpu.dot_dimension_numbers<[1], [0], [0], [1], [0, 0, 1, 1], [], []>} : vector<8x128xbf16>, vector<128x512xbf16>, vector<8x512xf32> -> vector<8x512xf32>
    %50 = arith.addf %45, %49 : vector<8x512xf32>
    %c0_28 = arith.constant 0 : index
    %c0_29 = arith.constant 0 : index
    %51 = vector.load %arg6[%c0_28, %c0_29] : memref<1x512xf32, #tpu.memory_space<vmem>>, vector<1x512xf32>
    %52 = vector.broadcast %51 : vector<1x512xf32> to vector<8x512xf32>
    %53 = arith.addf %50, %52 : vector<8x512xf32>
    %c1_30 = arith.constant 1 : index
    %c0_31 = arith.constant 0 : index
    %c0_32 = arith.constant 0 : index
    %54 = vector.load %arg9[%c1_30, %c0_31, %c0_32] : memref<2x8x128xf32, #tpu.memory_space<vmem>>, vector<1x8x128xf32>
    %55 = vector.shape_cast %54 : vector<1x8x128xf32> to vector<8x128xf32>
    %56 = vector.extract_strided_slice %53 {offsets = [0, 0], sizes = [8, 128], strides = [1, 1]} : vector<8x512xf32> to vector<8x128xf32>
    %57 = arith.negf %56 : vector<8x128xf32>
    %58 = math.exp %57 : vector<8x128xf32>
    %cst_33 = arith.constant 1.000000e+00 : f32
    %59 = vector.broadcast %cst_33 : f32 to vector<8x128xf32>
    %60 = arith.addf %59, %58 : vector<8x128xf32>
    %61 = arith.divf %59, %60 : vector<8x128xf32>
    %62 = vector.extract_strided_slice %53 {offsets = [0, 128], sizes = [8, 128], strides = [1, 1]} : vector<8x512xf32> to vector<8x128xf32>
    %63 = arith.negf %62 : vector<8x128xf32>
    %64 = math.exp %63 : vector<8x128xf32>
    %cst_34 = arith.constant 1.000000e+00 : f32
    %65 = vector.broadcast %cst_34 : f32 to vector<8x128xf32>
    %66 = arith.addf %65, %64 : vector<8x128xf32>
    %67 = arith.divf %65, %66 : vector<8x128xf32>
    %68 = vector.extract_strided_slice %53 {offsets = [0, 256], sizes = [8, 128], strides = [1, 1]} : vector<8x512xf32> to vector<8x128xf32>
    %69 = math.tanh %68 : vector<8x128xf32>
    %70 = vector.extract_strided_slice %53 {offsets = [0, 384], sizes = [8, 128], strides = [1, 1]} : vector<8x512xf32> to vector<8x128xf32>
    %71 = arith.negf %70 : vector<8x128xf32>
    %72 = math.exp %71 : vector<8x128xf32>
    %cst_35 = arith.constant 1.000000e+00 : f32
    %73 = vector.broadcast %cst_35 : f32 to vector<8x128xf32>
    %74 = arith.addf %73, %72 : vector<8x128xf32>
    %75 = arith.divf %73, %74 : vector<8x128xf32>
    %76 = arith.mulf %67, %55 : vector<8x128xf32>
    %77 = arith.mulf %61, %69 : vector<8x128xf32>
    %78 = arith.addf %76, %77 : vector<8x128xf32>
    %79 = math.tanh %78 : vector<8x128xf32>
    %80 = arith.mulf %75, %79 : vector<8x128xf32>
    %81 = arith.truncf %80 : vector<8x128xf32> to vector<8x128xbf16>
    %c1_36 = arith.constant 1 : index
    %c0_37 = arith.constant 0 : index
    %c0_38 = arith.constant 0 : index
    %82 = vector.load %arg8[%c1_36, %c0_37, %c0_38] : memref<2x8x128xbf16, #tpu.memory_space<vmem>>, vector<1x8x128xbf16>
    %83 = vector.shape_cast %82 : vector<1x8x128xbf16> to vector<8x128xbf16>
    %84 = vector.shape_cast %81 : vector<8x128xbf16> to vector<1x8x128xbf16>
    tpu.vector_store %arg8[%c1_36, %c0_37, %c0_38], %84 {strides = array<i32>} : memref<2x8x128xbf16, #tpu.memory_space<vmem>>, vector<1x8x128xbf16>,
    %c1_39 = arith.constant 1 : index
    %c0_40 = arith.constant 0 : index
    %c0_41 = arith.constant 0 : index
    %85 = vector.load %arg9[%c1_39, %c0_40, %c0_41] : memref<2x8x128xf32, #tpu.memory_space<vmem>>, vector<1x8x128xf32>
    %86 = vector.shape_cast %85 : vector<1x8x128xf32> to vector<8x128xf32>
    %87 = vector.shape_cast %78 : vector<8x128xf32> to vector<1x8x128xf32>
    tpu.vector_store %arg9[%c1_39, %c0_40, %c0_41], %87 {strides = array<i32>} : memref<2x8x128xf32, #tpu.memory_space<vmem>>, vector<1x8x128xf32>,
    %c0_42 = arith.constant 0 : index
    %c0_43 = arith.constant 0 : index
    %c0_44 = arith.constant 0 : index
    %88 = vector.load %arg7[%c0_42, %c0_43, %c0_44] : memref<8x8x128xbf16, #tpu.memory_space<vmem>>, vector<8x1x128xbf16>
    %89 = vector.shape_cast %88 : vector<8x1x128xbf16> to vector<8x128xbf16>
    %90 = vector.shape_cast %81 : vector<8x128xbf16> to vector<8x1x128xbf16>
    tpu.vector_store %arg7[%c0_42, %c0_43, %c0_44], %90 {strides = array<i32>} : memref<8x8x128xbf16, #tpu.memory_space<vmem>>, vector<8x1x128xbf16>,
    %c0_45 = arith.constant 0 : index
    %c1_46 = arith.constant 1 : index
    %c0_47 = arith.constant 0 : index
    %91 = vector.load %arg2[%c0_45, %c1_46, %c0_47] : memref<8x8x512xf32, #tpu.memory_space<vmem>>, vector<8x1x512xf32>
    %92 = vector.shape_cast %91 : vector<8x1x512xf32> to vector<8x512xf32>
    %c0_48 = arith.constant 0 : index
    %c0_49 = arith.constant 0 : index
    %c0_50 = arith.constant 0 : index
    %93 = vector.load %arg8[%c0_48, %c0_49, %c0_50] : memref<2x8x128xbf16, #tpu.memory_space<vmem>>, vector<1x8x128xbf16>
    %94 = vector.shape_cast %93 : vector<1x8x128xbf16> to vector<8x128xbf16>
    %c0_51 = arith.constant 0 : index
    %c0_52 = arith.constant 0 : index
    %95 = vector.load %arg3[%c0_51, %c0_52] : memref<128x512xbf16, #tpu.memory_space<vmem>>, vector<128x512xbf16>
    %cst_53 = arith.constant dense<0.000000e+00> : vector<8x512xf32>
    %96 = tpu.matmul %94, %95, %cst_53 {dimension_numbers = #tpu.dot_dimension_numbers<[1], [0], [0], [1], [0, 0, 1, 1], [], []>} : vector<8x128xbf16>, vector<128x512xbf16>, vector<8x512xf32> -> vector<8x512xf32>
    %97 = arith.addf %92, %96 : vector<8x512xf32>
    %c0_54 = arith.constant 0 : index
    %c0_55 = arith.constant 0 : index
    %c0_56 = arith.constant 0 : index
    %98 = vector.load %arg9[%c0_54, %c0_55, %c0_56] : memref<2x8x128xf32, #tpu.memory_space<vmem>>, vector<1x8x128xf32>
    %99 = vector.shape_cast %98 : vector<1x8x128xf32> to vector<8x128xf32>
    %100 = vector.extract_strided_slice %97 {offsets = [0, 0], sizes = [8, 128], strides = [1, 1]} : vector<8x512xf32> to vector<8x128xf32>
    %101 = arith.negf %100 : vector<8x128xf32>
    %102 = math.exp %101 : vector<8x128xf32>
    %cst_57 = arith.constant 1.000000e+00 : f32
    %103 = vector.broadcast %cst_57 : f32 to vector<8x128xf32>
    %104 = arith.addf %103, %102 : vector<8x128xf32>
    %105 = arith.divf %103, %104 : vector<8x128xf32>
    %106 = vector.extract_strided_slice %97 {offsets = [0, 128], sizes = [8, 128], strides = [1, 1]} : vector<8x512xf32> to vector<8x128xf32>
    %107 = arith.negf %106 : vector<8x128xf32>
    %108 = math.exp %107 : vector<8x128xf32>
    %cst_58 = arith.constant 1.000000e+00 : f32
    %109 = vector.broadcast %cst_58 : f32 to vector<8x128xf32>
    %110 = arith.addf %109, %108 : vector<8x128xf32>
    %111 = arith.divf %109, %110 : vector<8x128xf32>
    %112 = vector.extract_strided_slice %97 {offsets = [0, 256], sizes = [8, 128], strides = [1, 1]} : vector<8x512xf32> to vector<8x128xf32>
    %113 = math.tanh %112 : vector<8x128xf32>
    %114 = vector.extract_strided_slice %97 {offsets = [0, 384], sizes = [8, 128], strides = [1, 1]} : vector<8x512xf32> to vector<8x128xf32>
    %115 = arith.negf %114 : vector<8x128xf32>
    %116 = math.exp %115 : vector<8x128xf32>
    %cst_59 = arith.constant 1.000000e+00 : f32
    %117 = vector.broadcast %cst_59 : f32 to vector<8x128xf32>
    %118 = arith.addf %117, %116 : vector<8x128xf32>
    %119 = arith.divf %117, %118 : vector<8x128xf32>
    %120 = arith.mulf %111, %99 : vector<8x128xf32>
    %121 = arith.mulf %105, %113 : vector<8x128xf32>
    %122 = arith.addf %120, %121 : vector<8x128xf32>
    %123 = math.tanh %122 : vector<8x128xf32>
    %124 = arith.mulf %119, %123 : vector<8x128xf32>
    %125 = arith.truncf %124 : vector<8x128xf32> to vector<8x128xbf16>
    %c0_60 = arith.constant 0 : index
    %c0_61 = arith.constant 0 : index
    %c0_62 = arith.constant 0 : index
    %126 = vector.load %arg8[%c0_60, %c0_61, %c0_62] : memref<2x8x128xbf16, #tpu.memory_space<vmem>>, vector<1x8x128xbf16>
    %127 = vector.shape_cast %126 : vector<1x8x128xbf16> to vector<8x128xbf16>
    %128 = vector.shape_cast %125 : vector<8x128xbf16> to vector<1x8x128xbf16>
    tpu.vector_store %arg8[%c0_60, %c0_61, %c0_62], %128 {strides = array<i32>} : memref<2x8x128xbf16, #tpu.memory_space<vmem>>, vector<1x8x128xbf16>,
    %c0_63 = arith.constant 0 : index
    %c0_64 = arith.constant 0 : index
    %c0_65 = arith.constant 0 : index
    %129 = vector.load %arg9[%c0_63, %c0_64, %c0_65] : memref<2x8x128xf32, #tpu.memory_space<vmem>>, vector<1x8x128xf32>
    %130 = vector.shape_cast %129 : vector<1x8x128xf32> to vector<8x128xf32>
    %131 = vector.shape_cast %122 : vector<8x128xf32> to vector<1x8x128xf32>
    tpu.vector_store %arg9[%c0_63, %c0_64, %c0_65], %131 {strides = array<i32>} : memref<2x8x128xf32, #tpu.memory_space<vmem>>, vector<1x8x128xf32>,
    %c0_66 = arith.constant 0 : index
    %c0_67 = arith.constant 0 : index
    %132 = vector.load %arg4[%c0_66, %c0_67] : memref<128x512xbf16, #tpu.memory_space<vmem>>, vector<128x512xbf16>
    %cst_68 = arith.constant dense<0.000000e+00> : vector<8x512xf32>
    %133 = tpu.matmul %125, %132, %cst_68 {dimension_numbers = #tpu.dot_dimension_numbers<[1], [0], [0], [1], [0, 0, 1, 1], [], []>} : vector<8x128xbf16>, vector<128x512xbf16>, vector<8x512xf32> -> vector<8x512xf32>
    %c1_69 = arith.constant 1 : index
    %c0_70 = arith.constant 0 : index
    %c0_71 = arith.constant 0 : index
    %134 = vector.load %arg8[%c1_69, %c0_70, %c0_71] : memref<2x8x128xbf16, #tpu.memory_space<vmem>>, vector<1x8x128xbf16>
    %135 = vector.shape_cast %134 : vector<1x8x128xbf16> to vector<8x128xbf16>
    %c0_72 = arith.constant 0 : index
    %c0_73 = arith.constant 0 : index
    %136 = vector.load %arg5[%c0_72, %c0_73] : memref<128x512xbf16, #tpu.memory_space<vmem>>, vector<128x512xbf16>
    %cst_74 = arith.constant dense<0.000000e+00> : vector<8x512xf32>
    %137 = tpu.matmul %135, %136, %cst_74 {dimension_numbers = #tpu.dot_dimension_numbers<[1], [0], [0], [1], [0, 0, 1, 1], [], []>} : vector<8x128xbf16>, vector<128x512xbf16>, vector<8x512xf32> -> vector<8x512xf32>
    %138 = arith.addf %133, %137 : vector<8x512xf32>
    %c0_75 = arith.constant 0 : index
    %c0_76 = arith.constant 0 : index
    %139 = vector.load %arg6[%c0_75, %c0_76] : memref<1x512xf32, #tpu.memory_space<vmem>>, vector<1x512xf32>
    %140 = vector.broadcast %139 : vector<1x512xf32> to vector<8x512xf32>
    %141 = arith.addf %138, %140 : vector<8x512xf32>
    %c1_77 = arith.constant 1 : index
    %c0_78 = arith.constant 0 : index
    %c0_79 = arith.constant 0 : index
    %142 = vector.load %arg9[%c1_77, %c0_78, %c0_79] : memref<2x8x128xf32, #tpu.memory_space<vmem>>, vector<1x8x128xf32>
    %143 = vector.shape_cast %142 : vector<1x8x128xf32> to vector<8x128xf32>
    %144 = vector.extract_strided_slice %141 {offsets = [0, 0], sizes = [8, 128], strides = [1, 1]} : vector<8x512xf32> to vector<8x128xf32>
    %145 = arith.negf %144 : vector<8x128xf32>
    %146 = math.exp %145 : vector<8x128xf32>
    %cst_80 = arith.constant 1.000000e+00 : f32
    %147 = vector.broadcast %cst_80 : f32 to vector<8x128xf32>
    %148 = arith.addf %147, %146 : vector<8x128xf32>
    %149 = arith.divf %147, %148 : vector<8x128xf32>
    %150 = vector.extract_strided_slice %141 {offsets = [0, 128], sizes = [8, 128], strides = [1, 1]} : vector<8x512xf32> to vector<8x128xf32>
    %151 = arith.negf %150 : vector<8x128xf32>
    %152 = math.exp %151 : vector<8x128xf32>
    %cst_81 = arith.constant 1.000000e+00 : f32
    %153 = vector.broadcast %cst_81 : f32 to vector<8x128xf32>
    %154 = arith.addf %153, %152 : vector<8x128xf32>
    %155 = arith.divf %153, %154 : vector<8x128xf32>
    %156 = vector.extract_strided_slice %141 {offsets = [0, 256], sizes = [8, 128], strides = [1, 1]} : vector<8x512xf32> to vector<8x128xf32>
    %157 = math.tanh %156 : vector<8x128xf32>
    %158 = vector.extract_strided_slice %141 {offsets = [0, 384], sizes = [8, 128], strides = [1, 1]} : vector<8x512xf32> to vector<8x128xf32>
    %159 = arith.negf %158 : vector<8x128xf32>
    %160 = math.exp %159 : vector<8x128xf32>
    %cst_82 = arith.constant 1.000000e+00 : f32
    %161 = vector.broadcast %cst_82 : f32 to vector<8x128xf32>
    %162 = arith.addf %161, %160 : vector<8x128xf32>
    %163 = arith.divf %161, %162 : vector<8x128xf32>
    %164 = arith.mulf %155, %143 : vector<8x128xf32>
    %165 = arith.mulf %149, %157 : vector<8x128xf32>
    %166 = arith.addf %164, %165 : vector<8x128xf32>
    %167 = math.tanh %166 : vector<8x128xf32>
    %168 = arith.mulf %163, %167 : vector<8x128xf32>
    %169 = arith.truncf %168 : vector<8x128xf32> to vector<8x128xbf16>
    %c1_83 = arith.constant 1 : index
    %c0_84 = arith.constant 0 : index
    %c0_85 = arith.constant 0 : index
    %170 = vector.load %arg8[%c1_83, %c0_84, %c0_85] : memref<2x8x128xbf16, #tpu.memory_space<vmem>>, vector<1x8x128xbf16>
    %171 = vector.shape_cast %170 : vector<1x8x128xbf16> to vector<8x128xbf16>
    %172 = vector.shape_cast %169 : vector<8x128xbf16> to vector<1x8x128xbf16>
    tpu.vector_store %arg8[%c1_83, %c0_84, %c0_85], %172 {strides = array<i32>} : memref<2x8x128xbf16, #tpu.memory_space<vmem>>, vector<1x8x128xbf16>,
    %c1_86 = arith.constant 1 : index
    %c0_87 = arith.constant 0 : index
    %c0_88 = arith.constant 0 : index
    %173 = vector.load %arg9[%c1_86, %c0_87, %c0_88] : memref<2x8x128xf32, #tpu.memory_space<vmem>>, vector<1x8x128xf32>
    %174 = vector.shape_cast %173 : vector<1x8x128xf32> to vector<8x128xf32>
    %175 = vector.shape_cast %166 : vector<8x128xf32> to vector<1x8x128xf32>
    tpu.vector_store %arg9[%c1_86, %c0_87, %c0_88], %175 {strides = array<i32>} : memref<2x8x128xf32, #tpu.memory_space<vmem>>, vector<1x8x128xf32>,
    %c0_89 = arith.constant 0 : index
    %c1_90 = arith.constant 1 : index
    %c0_91 = arith.constant 0 : index
    %176 = vector.load %arg7[%c0_89, %c1_90, %c0_91] : memref<8x8x128xbf16, #tpu.memory_space<vmem>>, vector<8x1x128xbf16>
    %177 = vector.shape_cast %176 : vector<8x1x128xbf16> to vector<8x128xbf16>
    %178 = vector.shape_cast %169 : vector<8x128xbf16> to vector<8x1x128xbf16>
    tpu.vector_store %arg7[%c0_89, %c1_90, %c0_91], %178 {strides = array<i32>} : memref<8x8x128xbf16, #tpu.memory_space<vmem>>, vector<8x1x128xbf16>,
    %c0_92 = arith.constant 0 : index
    %c2 = arith.constant 2 : index
    %c0_93 = arith.constant 0 : index
    %179 = vector.load %arg2[%c0_92, %c2, %c0_93] : memref<8x8x512xf32, #tpu.memory_space<vmem>>, vector<8x1x512xf32>
    %180 = vector.shape_cast %179 : vector<8x1x512xf32> to vector<8x512xf32>
    %c0_94 = arith.constant 0 : index
    %c0_95 = arith.constant 0 : index
    %c0_96 = arith.constant 0 : index
    %181 = vector.load %arg8[%c0_94, %c0_95, %c0_96] : memref<2x8x128xbf16, #tpu.memory_space<vmem>>, vector<1x8x128xbf16>
    %182 = vector.shape_cast %181 : vector<1x8x128xbf16> to vector<8x128xbf16>
    %c0_97 = arith.constant 0 : index
    %c0_98 = arith.constant 0 : index
    %183 = vector.load %arg3[%c0_97, %c0_98] : memref<128x512xbf16, #tpu.memory_space<vmem>>, vector<128x512xbf16>
    %cst_99 = arith.constant dense<0.000000e+00> : vector<8x512xf32>
    %184 = tpu.matmul %182, %183, %cst_99 {dimension_numbers = #tpu.dot_dimension_numbers<[1], [0], [0], [1], [0, 0, 1, 1], [], []>} : vector<8x128xbf16>, vector<128x512xbf16>, vector<8x512xf32> -> vector<8x512xf32>
    %185 = arith.addf %180, %184 : vector<8x512xf32>
    %c0_100 = arith.constant 0 : index
    %c0_101 = arith.constant 0 : index
    %c0_102 = arith.constant 0 : index
    %186 = vector.load %arg9[%c0_100, %c0_101, %c0_102] : memref<2x8x128xf32, #tpu.memory_space<vmem>>, vector<1x8x128xf32>
    %187 = vector.shape_cast %186 : vector<1x8x128xf32> to vector<8x128xf32>
    %188 = vector.extract_strided_slice %185 {offsets = [0, 0], sizes = [8, 128], strides = [1, 1]} : vector<8x512xf32> to vector<8x128xf32>
    %189 = arith.negf %188 : vector<8x128xf32>
    %190 = math.exp %189 : vector<8x128xf32>
    %cst_103 = arith.constant 1.000000e+00 : f32
    %191 = vector.broadcast %cst_103 : f32 to vector<8x128xf32>
    %192 = arith.addf %191, %190 : vector<8x128xf32>
    %193 = arith.divf %191, %192 : vector<8x128xf32>
    %194 = vector.extract_strided_slice %185 {offsets = [0, 128], sizes = [8, 128], strides = [1, 1]} : vector<8x512xf32> to vector<8x128xf32>
    %195 = arith.negf %194 : vector<8x128xf32>
    %196 = math.exp %195 : vector<8x128xf32>
    %cst_104 = arith.constant 1.000000e+00 : f32
    %197 = vector.broadcast %cst_104 : f32 to vector<8x128xf32>
    %198 = arith.addf %197, %196 : vector<8x128xf32>
    %199 = arith.divf %197, %198 : vector<8x128xf32>
    %200 = vector.extract_strided_slice %185 {offsets = [0, 256], sizes = [8, 128], strides = [1, 1]} : vector<8x512xf32> to vector<8x128xf32>
    %201 = math.tanh %200 : vector<8x128xf32>
    %202 = vector.extract_strided_slice %185 {offsets = [0, 384], sizes = [8, 128], strides = [1, 1]} : vector<8x512xf32> to vector<8x128xf32>
    %203 = arith.negf %202 : vector<8x128xf32>
    %204 = math.exp %203 : vector<8x128xf32>
    %cst_105 = arith.constant 1.000000e+00 : f32
    %205 = vector.broadcast %cst_105 : f32 to vector<8x128xf32>
    %206 = arith.addf %205, %204 : vector<8x128xf32>
    %207 = arith.divf %205, %206 : vector<8x128xf32>
    %208 = arith.mulf %199, %187 : vector<8x128xf32>
    %209 = arith.mulf %193, %201 : vector<8x128xf32>
    %210 = arith.addf %208, %209 : vector<8x128xf32>
    %211 = math.tanh %210 : vector<8x128xf32>
    %212 = arith.mulf %207, %211 : vector<8x128xf32>
    %213 = arith.truncf %212 : vector<8x128xf32> to vector<8x128xbf16>
    %c0_106 = arith.constant 0 : index
    %c0_107 = arith.constant 0 : index
    %c0_108 = arith.constant 0 : index
    %214 = vector.load %arg8[%c0_106, %c0_107, %c0_108] : memref<2x8x128xbf16, #tpu.memory_space<vmem>>, vector<1x8x128xbf16>
    %215 = vector.shape_cast %214 : vector<1x8x128xbf16> to vector<8x128xbf16>
    %216 = vector.shape_cast %213 : vector<8x128xbf16> to vector<1x8x128xbf16>
    tpu.vector_store %arg8[%c0_106, %c0_107, %c0_108], %216 {strides = array<i32>} : memref<2x8x128xbf16, #tpu.memory_space<vmem>>, vector<1x8x128xbf16>,
    %c0_109 = arith.constant 0 : index
    %c0_110 = arith.constant 0 : index
    %c0_111 = arith.constant 0 : index
    %217 = vector.load %arg9[%c0_109, %c0_110, %c0_111] : memref<2x8x128xf32, #tpu.memory_space<vmem>>, vector<1x8x128xf32>
    %218 = vector.shape_cast %217 : vector<1x8x128xf32> to vector<8x128xf32>
    %219 = vector.shape_cast %210 : vector<8x128xf32> to vector<1x8x128xf32>
    tpu.vector_store %arg9[%c0_109, %c0_110, %c0_111], %219 {strides = array<i32>} : memref<2x8x128xf32, #tpu.memory_space<vmem>>, vector<1x8x128xf32>,
    %c0_112 = arith.constant 0 : index
    %c0_113 = arith.constant 0 : index
    %220 = vector.load %arg4[%c0_112, %c0_113] : memref<128x512xbf16, #tpu.memory_space<vmem>>, vector<128x512xbf16>
    %cst_114 = arith.constant dense<0.000000e+00> : vector<8x512xf32>
    %221 = tpu.matmul %213, %220, %cst_114 {dimension_numbers = #tpu.dot_dimension_numbers<[1], [0], [0], [1], [0, 0, 1, 1], [], []>} : vector<8x128xbf16>, vector<128x512xbf16>, vector<8x512xf32> -> vector<8x512xf32>
    %c1_115 = arith.constant 1 : index
    %c0_116 = arith.constant 0 : index
    %c0_117 = arith.constant 0 : index
    %222 = vector.load %arg8[%c1_115, %c0_116, %c0_117] : memref<2x8x128xbf16, #tpu.memory_space<vmem>>, vector<1x8x128xbf16>
    %223 = vector.shape_cast %222 : vector<1x8x128xbf16> to vector<8x128xbf16>
    %c0_118 = arith.constant 0 : index
    %c0_119 = arith.constant 0 : index
    %224 = vector.load %arg5[%c0_118, %c0_119] : memref<128x512xbf16, #tpu.memory_space<vmem>>, vector<128x512xbf16>
    %cst_120 = arith.constant dense<0.000000e+00> : vector<8x512xf32>
    %225 = tpu.matmul %223, %224, %cst_120 {dimension_numbers = #tpu.dot_dimension_numbers<[1], [0], [0], [1], [0, 0, 1, 1], [], []>} : vector<8x128xbf16>, vector<128x512xbf16>, vector<8x512xf32> -> vector<8x512xf32>
    %226 = arith.addf %221, %225 : vector<8x512xf32>
    %c0_121 = arith.constant 0 : index
    %c0_122 = arith.constant 0 : index
    %227 = vector.load %arg6[%c0_121, %c0_122] : memref<1x512xf32, #tpu.memory_space<vmem>>, vector<1x512xf32>
    %228 = vector.broadcast %227 : vector<1x512xf32> to vector<8x512xf32>
    %229 = arith.addf %226, %228 : vector<8x512xf32>
    %c1_123 = arith.constant 1 : index
    %c0_124 = arith.constant 0 : index
    %c0_125 = arith.constant 0 : index
    %230 = vector.load %arg9[%c1_123, %c0_124, %c0_125] : memref<2x8x128xf32, #tpu.memory_space<vmem>>, vector<1x8x128xf32>
    %231 = vector.shape_cast %230 : vector<1x8x128xf32> to vector<8x128xf32>
    %232 = vector.extract_strided_slice %229 {offsets = [0, 0], sizes = [8, 128], strides = [1, 1]} : vector<8x512xf32> to vector<8x128xf32>
    %233 = arith.negf %232 : vector<8x128xf32>
    %234 = math.exp %233 : vector<8x128xf32>
    %cst_126 = arith.constant 1.000000e+00 : f32
    %235 = vector.broadcast %cst_126 : f32 to vector<8x128xf32>
    %236 = arith.addf %235, %234 : vector<8x128xf32>
    %237 = arith.divf %235, %236 : vector<8x128xf32>
    %238 = vector.extract_strided_slice %229 {offsets = [0, 128], sizes = [8, 128], strides = [1, 1]} : vector<8x512xf32> to vector<8x128xf32>
    %239 = arith.negf %238 : vector<8x128xf32>
    %240 = math.exp %239 : vector<8x128xf32>
    %cst_127 = arith.constant 1.000000e+00 : f32
    %241 = vector.broadcast %cst_127 : f32 to vector<8x128xf32>
    %242 = arith.addf %241, %240 : vector<8x128xf32>
    %243 = arith.divf %241, %242 : vector<8x128xf32>
    %244 = vector.extract_strided_slice %229 {offsets = [0, 256], sizes = [8, 128], strides = [1, 1]} : vector<8x512xf32> to vector<8x128xf32>
    %245 = math.tanh %244 : vector<8x128xf32>
    %246 = vector.extract_strided_slice %229 {offsets = [0, 384], sizes = [8, 128], strides = [1, 1]} : vector<8x512xf32> to vector<8x128xf32>
    %247 = arith.negf %246 : vector<8x128xf32>
    %248 = math.exp %247 : vector<8x128xf32>
    %cst_128 = arith.constant 1.000000e+00 : f32
    %249 = vector.broadcast %cst_128 : f32 to vector<8x128xf32>
    %250 = arith.addf %249, %248 : vector<8x128xf32>
    %251 = arith.divf %249, %250 : vector<8x128xf32>
    %252 = arith.mulf %243, %231 : vector<8x128xf32>
    %253 = arith.mulf %237, %245 : vector<8x128xf32>
    %254 = arith.addf %252, %253 : vector<8x128xf32>
    %255 = math.tanh %254 : vector<8x128xf32>
    %256 = arith.mulf %251, %255 : vector<8x128xf32>
    %257 = arith.truncf %256 : vector<8x128xf32> to vector<8x128xbf16>
    %c1_129 = arith.constant 1 : index
    %c0_130 = arith.constant 0 : index
    %c0_131 = arith.constant 0 : index
    %258 = vector.load %arg8[%c1_129, %c0_130, %c0_131] : memref<2x8x128xbf16, #tpu.memory_space<vmem>>, vector<1x8x128xbf16>
    %259 = vector.shape_cast %258 : vector<1x8x128xbf16> to vector<8x128xbf16>
    %260 = vector.shape_cast %257 : vector<8x128xbf16> to vector<1x8x128xbf16>
    tpu.vector_store %arg8[%c1_129, %c0_130, %c0_131], %260 {strides = array<i32>} : memref<2x8x128xbf16, #tpu.memory_space<vmem>>, vector<1x8x128xbf16>,
    %c1_132 = arith.constant 1 : index
    %c0_133 = arith.constant 0 : index
    %c0_134 = arith.constant 0 : index
    %261 = vector.load %arg9[%c1_132, %c0_133, %c0_134] : memref<2x8x128xf32, #tpu.memory_space<vmem>>, vector<1x8x128xf32>
    %262 = vector.shape_cast %261 : vector<1x8x128xf32> to vector<8x128xf32>
    %263 = vector.shape_cast %254 : vector<8x128xf32> to vector<1x8x128xf32>
    tpu.vector_store %arg9[%c1_132, %c0_133, %c0_134], %263 {strides = array<i32>} : memref<2x8x128xf32, #tpu.memory_space<vmem>>, vector<1x8x128xf32>,
    %c0_135 = arith.constant 0 : index
    %c2_136 = arith.constant 2 : index
    %c0_137 = arith.constant 0 : index
    %264 = vector.load %arg7[%c0_135, %c2_136, %c0_137] : memref<8x8x128xbf16, #tpu.memory_space<vmem>>, vector<8x1x128xbf16>
    %265 = vector.shape_cast %264 : vector<8x1x128xbf16> to vector<8x128xbf16>
    %266 = vector.shape_cast %257 : vector<8x128xbf16> to vector<8x1x128xbf16>
    tpu.vector_store %arg7[%c0_135, %c2_136, %c0_137], %266 {strides = array<i32>} : memref<8x8x128xbf16, #tpu.memory_space<vmem>>, vector<8x1x128xbf16>,
    %c0_138 = arith.constant 0 : index
    %c3 = arith.constant 3 : index
    %c0_139 = arith.constant 0 : index
    %267 = vector.load %arg2[%c0_138, %c3, %c0_139] : memref<8x8x512xf32, #tpu.memory_space<vmem>>, vector<8x1x512xf32>
    %268 = vector.shape_cast %267 : vector<8x1x512xf32> to vector<8x512xf32>
    %c0_140 = arith.constant 0 : index
    %c0_141 = arith.constant 0 : index
    %c0_142 = arith.constant 0 : index
    %269 = vector.load %arg8[%c0_140, %c0_141, %c0_142] : memref<2x8x128xbf16, #tpu.memory_space<vmem>>, vector<1x8x128xbf16>
    %270 = vector.shape_cast %269 : vector<1x8x128xbf16> to vector<8x128xbf16>
    %c0_143 = arith.constant 0 : index
    %c0_144 = arith.constant 0 : index
    %271 = vector.load %arg3[%c0_143, %c0_144] : memref<128x512xbf16, #tpu.memory_space<vmem>>, vector<128x512xbf16>
    %cst_145 = arith.constant dense<0.000000e+00> : vector<8x512xf32>
    %272 = tpu.matmul %270, %271, %cst_145 {dimension_numbers = #tpu.dot_dimension_numbers<[1], [0], [0], [1], [0, 0, 1, 1], [], []>} : vector<8x128xbf16>, vector<128x512xbf16>, vector<8x512xf32> -> vector<8x512xf32>
    %273 = arith.addf %268, %272 : vector<8x512xf32>
    %c0_146 = arith.constant 0 : index
    %c0_147 = arith.constant 0 : index
    %c0_148 = arith.constant 0 : index
    %274 = vector.load %arg9[%c0_146, %c0_147, %c0_148] : memref<2x8x128xf32, #tpu.memory_space<vmem>>, vector<1x8x128xf32>
    %275 = vector.shape_cast %274 : vector<1x8x128xf32> to vector<8x128xf32>
    %276 = vector.extract_strided_slice %273 {offsets = [0, 0], sizes = [8, 128], strides = [1, 1]} : vector<8x512xf32> to vector<8x128xf32>
    %277 = arith.negf %276 : vector<8x128xf32>
    %278 = math.exp %277 : vector<8x128xf32>
    %cst_149 = arith.constant 1.000000e+00 : f32
    %279 = vector.broadcast %cst_149 : f32 to vector<8x128xf32>
    %280 = arith.addf %279, %278 : vector<8x128xf32>
    %281 = arith.divf %279, %280 : vector<8x128xf32>
    %282 = vector.extract_strided_slice %273 {offsets = [0, 128], sizes = [8, 128], strides = [1, 1]} : vector<8x512xf32> to vector<8x128xf32>
    %283 = arith.negf %282 : vector<8x128xf32>
    %284 = math.exp %283 : vector<8x128xf32>
    %cst_150 = arith.constant 1.000000e+00 : f32
    %285 = vector.broadcast %cst_150 : f32 to vector<8x128xf32>
    %286 = arith.addf %285, %284 : vector<8x128xf32>
    %287 = arith.divf %285, %286 : vector<8x128xf32>
    %288 = vector.extract_strided_slice %273 {offsets = [0, 256], sizes = [8, 128], strides = [1, 1]} : vector<8x512xf32> to vector<8x128xf32>
    %289 = math.tanh %288 : vector<8x128xf32>
    %290 = vector.extract_strided_slice %273 {offsets = [0, 384], sizes = [8, 128], strides = [1, 1]} : vector<8x512xf32> to vector<8x128xf32>
    %291 = arith.negf %290 : vector<8x128xf32>
    %292 = math.exp %291 : vector<8x128xf32>
    %cst_151 = arith.constant 1.000000e+00 : f32
    %293 = vector.broadcast %cst_151 : f32 to vector<8x128xf32>
    %294 = arith.addf %293, %292 : vector<8x128xf32>
    %295 = arith.divf %293, %294 : vector<8x128xf32>
    %296 = arith.mulf %287, %275 : vector<8x128xf32>
    %297 = arith.mulf %281, %289 : vector<8x128xf32>
    %298 = arith.addf %296, %297 : vector<8x128xf32>
    %299 = math.tanh %298 : vector<8x128xf32>
    %300 = arith.mulf %295, %299 : vector<8x128xf32>
    %301 = arith.truncf %300 : vector<8x128xf32> to vector<8x128xbf16>
    %c0_152 = arith.constant 0 : index
    %c0_153 = arith.constant 0 : index
    %c0_154 = arith.constant 0 : index
    %302 = vector.load %arg8[%c0_152, %c0_153, %c0_154] : memref<2x8x128xbf16, #tpu.memory_space<vmem>>, vector<1x8x128xbf16>
    %303 = vector.shape_cast %302 : vector<1x8x128xbf16> to vector<8x128xbf16>
    %304 = vector.shape_cast %301 : vector<8x128xbf16> to vector<1x8x128xbf16>
    tpu.vector_store %arg8[%c0_152, %c0_153, %c0_154], %304 {strides = array<i32>} : memref<2x8x128xbf16, #tpu.memory_space<vmem>>, vector<1x8x128xbf16>,
    %c0_155 = arith.constant 0 : index
    %c0_156 = arith.constant 0 : index
    %c0_157 = arith.constant 0 : index
    %305 = vector.load %arg9[%c0_155, %c0_156, %c0_157] : memref<2x8x128xf32, #tpu.memory_space<vmem>>, vector<1x8x128xf32>
    %306 = vector.shape_cast %305 : vector<1x8x128xf32> to vector<8x128xf32>
    %307 = vector.shape_cast %298 : vector<8x128xf32> to vector<1x8x128xf32>
    tpu.vector_store %arg9[%c0_155, %c0_156, %c0_157], %307 {strides = array<i32>} : memref<2x8x128xf32, #tpu.memory_space<vmem>>, vector<1x8x128xf32>,
    %c0_158 = arith.constant 0 : index
    %c0_159 = arith.constant 0 : index
    %308 = vector.load %arg4[%c0_158, %c0_159] : memref<128x512xbf16, #tpu.memory_space<vmem>>, vector<128x512xbf16>
    %cst_160 = arith.constant dense<0.000000e+00> : vector<8x512xf32>
    %309 = tpu.matmul %301, %308, %cst_160 {dimension_numbers = #tpu.dot_dimension_numbers<[1], [0], [0], [1], [0, 0, 1, 1], [], []>} : vector<8x128xbf16>, vector<128x512xbf16>, vector<8x512xf32> -> vector<8x512xf32>
    %c1_161 = arith.constant 1 : index
    %c0_162 = arith.constant 0 : index
    %c0_163 = arith.constant 0 : index
    %310 = vector.load %arg8[%c1_161, %c0_162, %c0_163] : memref<2x8x128xbf16, #tpu.memory_space<vmem>>, vector<1x8x128xbf16>
    %311 = vector.shape_cast %310 : vector<1x8x128xbf16> to vector<8x128xbf16>
    %c0_164 = arith.constant 0 : index
    %c0_165 = arith.constant 0 : index
    %312 = vector.load %arg5[%c0_164, %c0_165] : memref<128x512xbf16, #tpu.memory_space<vmem>>, vector<128x512xbf16>
    %cst_166 = arith.constant dense<0.000000e+00> : vector<8x512xf32>
    %313 = tpu.matmul %311, %312, %cst_166 {dimension_numbers = #tpu.dot_dimension_numbers<[1], [0], [0], [1], [0, 0, 1, 1], [], []>} : vector<8x128xbf16>, vector<128x512xbf16>, vector<8x512xf32> -> vector<8x512xf32>
    %314 = arith.addf %309, %313 : vector<8x512xf32>
    %c0_167 = arith.constant 0 : index
    %c0_168 = arith.constant 0 : index
    %315 = vector.load %arg6[%c0_167, %c0_168] : memref<1x512xf32, #tpu.memory_space<vmem>>, vector<1x512xf32>
    %316 = vector.broadcast %315 : vector<1x512xf32> to vector<8x512xf32>
    %317 = arith.addf %314, %316 : vector<8x512xf32>
    %c1_169 = arith.constant 1 : index
    %c0_170 = arith.constant 0 : index
    %c0_171 = arith.constant 0 : index
    %318 = vector.load %arg9[%c1_169, %c0_170, %c0_171] : memref<2x8x128xf32, #tpu.memory_space<vmem>>, vector<1x8x128xf32>
    %319 = vector.shape_cast %318 : vector<1x8x128xf32> to vector<8x128xf32>
    %320 = vector.extract_strided_slice %317 {offsets = [0, 0], sizes = [8, 128], strides = [1, 1]} : vector<8x512xf32> to vector<8x128xf32>
    %321 = arith.negf %320 : vector<8x128xf32>
    %322 = math.exp %321 : vector<8x128xf32>
    %cst_172 = arith.constant 1.000000e+00 : f32
    %323 = vector.broadcast %cst_172 : f32 to vector<8x128xf32>
    %324 = arith.addf %323, %322 : vector<8x128xf32>
    %325 = arith.divf %323, %324 : vector<8x128xf32>
    %326 = vector.extract_strided_slice %317 {offsets = [0, 128], sizes = [8, 128], strides = [1, 1]} : vector<8x512xf32> to vector<8x128xf32>
    %327 = arith.negf %326 : vector<8x128xf32>
    %328 = math.exp %327 : vector<8x128xf32>
    %cst_173 = arith.constant 1.000000e+00 : f32
    %329 = vector.broadcast %cst_173 : f32 to vector<8x128xf32>
    %330 = arith.addf %329, %328 : vector<8x128xf32>
    %331 = arith.divf %329, %330 : vector<8x128xf32>
    %332 = vector.extract_strided_slice %317 {offsets = [0, 256], sizes = [8, 128], strides = [1, 1]} : vector<8x512xf32> to vector<8x128xf32>
    %333 = math.tanh %332 : vector<8x128xf32>
    %334 = vector.extract_strided_slice %317 {offsets = [0, 384], sizes = [8, 128], strides = [1, 1]} : vector<8x512xf32> to vector<8x128xf32>
    %335 = arith.negf %334 : vector<8x128xf32>
    %336 = math.exp %335 : vector<8x128xf32>
    %cst_174 = arith.constant 1.000000e+00 : f32
    %337 = vector.broadcast %cst_174 : f32 to vector<8x128xf32>
    %338 = arith.addf %337, %336 : vector<8x128xf32>
    %339 = arith.divf %337, %338 : vector<8x128xf32>
    %340 = arith.mulf %331, %319 : vector<8x128xf32>
    %341 = arith.mulf %325, %333 : vector<8x128xf32>
    %342 = arith.addf %340, %341 : vector<8x128xf32>
    %343 = math.tanh %342 : vector<8x128xf32>
    %344 = arith.mulf %339, %343 : vector<8x128xf32>
    %345 = arith.truncf %344 : vector<8x128xf32> to vector<8x128xbf16>
    %c1_175 = arith.constant 1 : index
    %c0_176 = arith.constant 0 : index
    %c0_177 = arith.constant 0 : index
    %346 = vector.load %arg8[%c1_175, %c0_176, %c0_177] : memref<2x8x128xbf16, #tpu.memory_space<vmem>>, vector<1x8x128xbf16>
    %347 = vector.shape_cast %346 : vector<1x8x128xbf16> to vector<8x128xbf16>
    %348 = vector.shape_cast %345 : vector<8x128xbf16> to vector<1x8x128xbf16>
    tpu.vector_store %arg8[%c1_175, %c0_176, %c0_177], %348 {strides = array<i32>} : memref<2x8x128xbf16, #tpu.memory_space<vmem>>, vector<1x8x128xbf16>,
    %c1_178 = arith.constant 1 : index
    %c0_179 = arith.constant 0 : index
    %c0_180 = arith.constant 0 : index
    %349 = vector.load %arg9[%c1_178, %c0_179, %c0_180] : memref<2x8x128xf32, #tpu.memory_space<vmem>>, vector<1x8x128xf32>
    %350 = vector.shape_cast %349 : vector<1x8x128xf32> to vector<8x128xf32>
    %351 = vector.shape_cast %342 : vector<8x128xf32> to vector<1x8x128xf32>
    tpu.vector_store %arg9[%c1_178, %c0_179, %c0_180], %351 {strides = array<i32>} : memref<2x8x128xf32, #tpu.memory_space<vmem>>, vector<1x8x128xf32>,
    %c0_181 = arith.constant 0 : index
    %c3_182 = arith.constant 3 : index
    %c0_183 = arith.constant 0 : index
    %352 = vector.load %arg7[%c0_181, %c3_182, %c0_183] : memref<8x8x128xbf16, #tpu.memory_space<vmem>>, vector<8x1x128xbf16>
    %353 = vector.shape_cast %352 : vector<8x1x128xbf16> to vector<8x128xbf16>
    %354 = vector.shape_cast %345 : vector<8x128xbf16> to vector<8x1x128xbf16>
    tpu.vector_store %arg7[%c0_181, %c3_182, %c0_183], %354 {strides = array<i32>} : memref<8x8x128xbf16, #tpu.memory_space<vmem>>, vector<8x1x128xbf16>,
    %c0_184 = arith.constant 0 : index
    %c4 = arith.constant 4 : index
    %c0_185 = arith.constant 0 : index
    %355 = vector.load %arg2[%c0_184, %c4, %c0_185] : memref<8x8x512xf32, #tpu.memory_space<vmem>>, vector<8x1x512xf32>
    %356 = vector.shape_cast %355 : vector<8x1x512xf32> to vector<8x512xf32>
    %c0_186 = arith.constant 0 : index
    %c0_187 = arith.constant 0 : index
    %c0_188 = arith.constant 0 : index
    %357 = vector.load %arg8[%c0_186, %c0_187, %c0_188] : memref<2x8x128xbf16, #tpu.memory_space<vmem>>, vector<1x8x128xbf16>
    %358 = vector.shape_cast %357 : vector<1x8x128xbf16> to vector<8x128xbf16>
    %c0_189 = arith.constant 0 : index
    %c0_190 = arith.constant 0 : index
    %359 = vector.load %arg3[%c0_189, %c0_190] : memref<128x512xbf16, #tpu.memory_space<vmem>>, vector<128x512xbf16>
    %cst_191 = arith.constant dense<0.000000e+00> : vector<8x512xf32>
    %360 = tpu.matmul %358, %359, %cst_191 {dimension_numbers = #tpu.dot_dimension_numbers<[1], [0], [0], [1], [0, 0, 1, 1], [], []>} : vector<8x128xbf16>, vector<128x512xbf16>, vector<8x512xf32> -> vector<8x512xf32>
    %361 = arith.addf %356, %360 : vector<8x512xf32>
    %c0_192 = arith.constant 0 : index
    %c0_193 = arith.constant 0 : index
    %c0_194 = arith.constant 0 : index
    %362 = vector.load %arg9[%c0_192, %c0_193, %c0_194] : memref<2x8x128xf32, #tpu.memory_space<vmem>>, vector<1x8x128xf32>
    %363 = vector.shape_cast %362 : vector<1x8x128xf32> to vector<8x128xf32>
    %364 = vector.extract_strided_slice %361 {offsets = [0, 0], sizes = [8, 128], strides = [1, 1]} : vector<8x512xf32> to vector<8x128xf32>
    %365 = arith.negf %364 : vector<8x128xf32>
    %366 = math.exp %365 : vector<8x128xf32>
    %cst_195 = arith.constant 1.000000e+00 : f32
    %367 = vector.broadcast %cst_195 : f32 to vector<8x128xf32>
    %368 = arith.addf %367, %366 : vector<8x128xf32>
    %369 = arith.divf %367, %368 : vector<8x128xf32>
    %370 = vector.extract_strided_slice %361 {offsets = [0, 128], sizes = [8, 128], strides = [1, 1]} : vector<8x512xf32> to vector<8x128xf32>
    %371 = arith.negf %370 : vector<8x128xf32>
    %372 = math.exp %371 : vector<8x128xf32>
    %cst_196 = arith.constant 1.000000e+00 : f32
    %373 = vector.broadcast %cst_196 : f32 to vector<8x128xf32>
    %374 = arith.addf %373, %372 : vector<8x128xf32>
    %375 = arith.divf %373, %374 : vector<8x128xf32>
    %376 = vector.extract_strided_slice %361 {offsets = [0, 256], sizes = [8, 128], strides = [1, 1]} : vector<8x512xf32> to vector<8x128xf32>
    %377 = math.tanh %376 : vector<8x128xf32>
    %378 = vector.extract_strided_slice %361 {offsets = [0, 384], sizes = [8, 128], strides = [1, 1]} : vector<8x512xf32> to vector<8x128xf32>
    %379 = arith.negf %378 : vector<8x128xf32>
    %380 = math.exp %379 : vector<8x128xf32>
    %cst_197 = arith.constant 1.000000e+00 : f32
    %381 = vector.broadcast %cst_197 : f32 to vector<8x128xf32>
    %382 = arith.addf %381, %380 : vector<8x128xf32>
    %383 = arith.divf %381, %382 : vector<8x128xf32>
    %384 = arith.mulf %375, %363 : vector<8x128xf32>
    %385 = arith.mulf %369, %377 : vector<8x128xf32>
    %386 = arith.addf %384, %385 : vector<8x128xf32>
    %387 = math.tanh %386 : vector<8x128xf32>
    %388 = arith.mulf %383, %387 : vector<8x128xf32>
    %389 = arith.truncf %388 : vector<8x128xf32> to vector<8x128xbf16>
    %c0_198 = arith.constant 0 : index
    %c0_199 = arith.constant 0 : index
    %c0_200 = arith.constant 0 : index
    %390 = vector.load %arg8[%c0_198, %c0_199, %c0_200] : memref<2x8x128xbf16, #tpu.memory_space<vmem>>, vector<1x8x128xbf16>
    %391 = vector.shape_cast %390 : vector<1x8x128xbf16> to vector<8x128xbf16>
    %392 = vector.shape_cast %389 : vector<8x128xbf16> to vector<1x8x128xbf16>
    tpu.vector_store %arg8[%c0_198, %c0_199, %c0_200], %392 {strides = array<i32>} : memref<2x8x128xbf16, #tpu.memory_space<vmem>>, vector<1x8x128xbf16>,
    %c0_201 = arith.constant 0 : index
    %c0_202 = arith.constant 0 : index
    %c0_203 = arith.constant 0 : index
    %393 = vector.load %arg9[%c0_201, %c0_202, %c0_203] : memref<2x8x128xf32, #tpu.memory_space<vmem>>, vector<1x8x128xf32>
    %394 = vector.shape_cast %393 : vector<1x8x128xf32> to vector<8x128xf32>
    %395 = vector.shape_cast %386 : vector<8x128xf32> to vector<1x8x128xf32>
    tpu.vector_store %arg9[%c0_201, %c0_202, %c0_203], %395 {strides = array<i32>} : memref<2x8x128xf32, #tpu.memory_space<vmem>>, vector<1x8x128xf32>,
    %c0_204 = arith.constant 0 : index
    %c0_205 = arith.constant 0 : index
    %396 = vector.load %arg4[%c0_204, %c0_205] : memref<128x512xbf16, #tpu.memory_space<vmem>>, vector<128x512xbf16>
    %cst_206 = arith.constant dense<0.000000e+00> : vector<8x512xf32>
    %397 = tpu.matmul %389, %396, %cst_206 {dimension_numbers = #tpu.dot_dimension_numbers<[1], [0], [0], [1], [0, 0, 1, 1], [], []>} : vector<8x128xbf16>, vector<128x512xbf16>, vector<8x512xf32> -> vector<8x512xf32>
    %c1_207 = arith.constant 1 : index
    %c0_208 = arith.constant 0 : index
    %c0_209 = arith.constant 0 : index
    %398 = vector.load %arg8[%c1_207, %c0_208, %c0_209] : memref<2x8x128xbf16, #tpu.memory_space<vmem>>, vector<1x8x128xbf16>
    %399 = vector.shape_cast %398 : vector<1x8x128xbf16> to vector<8x128xbf16>
    %c0_210 = arith.constant 0 : index
    %c0_211 = arith.constant 0 : index
    %400 = vector.load %arg5[%c0_210, %c0_211] : memref<128x512xbf16, #tpu.memory_space<vmem>>, vector<128x512xbf16>
    %cst_212 = arith.constant dense<0.000000e+00> : vector<8x512xf32>
    %401 = tpu.matmul %399, %400, %cst_212 {dimension_numbers = #tpu.dot_dimension_numbers<[1], [0], [0], [1], [0, 0, 1, 1], [], []>} : vector<8x128xbf16>, vector<128x512xbf16>, vector<8x512xf32> -> vector<8x512xf32>
    %402 = arith.addf %397, %401 : vector<8x512xf32>
    %c0_213 = arith.constant 0 : index
    %c0_214 = arith.constant 0 : index
    %403 = vector.load %arg6[%c0_213, %c0_214] : memref<1x512xf32, #tpu.memory_space<vmem>>, vector<1x512xf32>
    %404 = vector.broadcast %403 : vector<1x512xf32> to vector<8x512xf32>
    %405 = arith.addf %402, %404 : vector<8x512xf32>
    %c1_215 = arith.constant 1 : index
    %c0_216 = arith.constant 0 : index
    %c0_217 = arith.constant 0 : index
    %406 = vector.load %arg9[%c1_215, %c0_216, %c0_217] : memref<2x8x128xf32, #tpu.memory_space<vmem>>, vector<1x8x128xf32>
    %407 = vector.shape_cast %406 : vector<1x8x128xf32> to vector<8x128xf32>
    %408 = vector.extract_strided_slice %405 {offsets = [0, 0], sizes = [8, 128], strides = [1, 1]} : vector<8x512xf32> to vector<8x128xf32>
    %409 = arith.negf %408 : vector<8x128xf32>
    %410 = math.exp %409 : vector<8x128xf32>
    %cst_218 = arith.constant 1.000000e+00 : f32
    %411 = vector.broadcast %cst_218 : f32 to vector<8x128xf32>
    %412 = arith.addf %411, %410 : vector<8x128xf32>
    %413 = arith.divf %411, %412 : vector<8x128xf32>
    %414 = vector.extract_strided_slice %405 {offsets = [0, 128], sizes = [8, 128], strides = [1, 1]} : vector<8x512xf32> to vector<8x128xf32>
    %415 = arith.negf %414 : vector<8x128xf32>
    %416 = math.exp %415 : vector<8x128xf32>
    %cst_219 = arith.constant 1.000000e+00 : f32
    %417 = vector.broadcast %cst_219 : f32 to vector<8x128xf32>
    %418 = arith.addf %417, %416 : vector<8x128xf32>
    %419 = arith.divf %417, %418 : vector<8x128xf32>
    %420 = vector.extract_strided_slice %405 {offsets = [0, 256], sizes = [8, 128], strides = [1, 1]} : vector<8x512xf32> to vector<8x128xf32>
    %421 = math.tanh %420 : vector<8x128xf32>
    %422 = vector.extract_strided_slice %405 {offsets = [0, 384], sizes = [8, 128], strides = [1, 1]} : vector<8x512xf32> to vector<8x128xf32>
    %423 = arith.negf %422 : vector<8x128xf32>
    %424 = math.exp %423 : vector<8x128xf32>
    %cst_220 = arith.constant 1.000000e+00 : f32
    %425 = vector.broadcast %cst_220 : f32 to vector<8x128xf32>
    %426 = arith.addf %425, %424 : vector<8x128xf32>
    %427 = arith.divf %425, %426 : vector<8x128xf32>
    %428 = arith.mulf %419, %407 : vector<8x128xf32>
    %429 = arith.mulf %413, %421 : vector<8x128xf32>
    %430 = arith.addf %428, %429 : vector<8x128xf32>
    %431 = math.tanh %430 : vector<8x128xf32>
    %432 = arith.mulf %427, %431 : vector<8x128xf32>
    %433 = arith.truncf %432 : vector<8x128xf32> to vector<8x128xbf16>
    %c1_221 = arith.constant 1 : index
    %c0_222 = arith.constant 0 : index
    %c0_223 = arith.constant 0 : index
    %434 = vector.load %arg8[%c1_221, %c0_222, %c0_223] : memref<2x8x128xbf16, #tpu.memory_space<vmem>>, vector<1x8x128xbf16>
    %435 = vector.shape_cast %434 : vector<1x8x128xbf16> to vector<8x128xbf16>
    %436 = vector.shape_cast %433 : vector<8x128xbf16> to vector<1x8x128xbf16>
    tpu.vector_store %arg8[%c1_221, %c0_222, %c0_223], %436 {strides = array<i32>} : memref<2x8x128xbf16, #tpu.memory_space<vmem>>, vector<1x8x128xbf16>,
    %c1_224 = arith.constant 1 : index
    %c0_225 = arith.constant 0 : index
    %c0_226 = arith.constant 0 : index
    %437 = vector.load %arg9[%c1_224, %c0_225, %c0_226] : memref<2x8x128xf32, #tpu.memory_space<vmem>>, vector<1x8x128xf32>
    %438 = vector.shape_cast %437 : vector<1x8x128xf32> to vector<8x128xf32>
    %439 = vector.shape_cast %430 : vector<8x128xf32> to vector<1x8x128xf32>
    tpu.vector_store %arg9[%c1_224, %c0_225, %c0_226], %439 {strides = array<i32>} : memref<2x8x128xf32, #tpu.memory_space<vmem>>, vector<1x8x128xf32>,
    %c0_227 = arith.constant 0 : index
    %c4_228 = arith.constant 4 : index
    %c0_229 = arith.constant 0 : index
    %440 = vector.load %arg7[%c0_227, %c4_228, %c0_229] : memref<8x8x128xbf16, #tpu.memory_space<vmem>>, vector<8x1x128xbf16>
    %441 = vector.shape_cast %440 : vector<8x1x128xbf16> to vector<8x128xbf16>
    %442 = vector.shape_cast %433 : vector<8x128xbf16> to vector<8x1x128xbf16>
    tpu.vector_store %arg7[%c0_227, %c4_228, %c0_229], %442 {strides = array<i32>} : memref<8x8x128xbf16, #tpu.memory_space<vmem>>, vector<8x1x128xbf16>,
    %c0_230 = arith.constant 0 : index
    %c5 = arith.constant 5 : index
    %c0_231 = arith.constant 0 : index
    %443 = vector.load %arg2[%c0_230, %c5, %c0_231] : memref<8x8x512xf32, #tpu.memory_space<vmem>>, vector<8x1x512xf32>
    %444 = vector.shape_cast %443 : vector<8x1x512xf32> to vector<8x512xf32>
    %c0_232 = arith.constant 0 : index
    %c0_233 = arith.constant 0 : index
    %c0_234 = arith.constant 0 : index
    %445 = vector.load %arg8[%c0_232, %c0_233, %c0_234] : memref<2x8x128xbf16, #tpu.memory_space<vmem>>, vector<1x8x128xbf16>
    %446 = vector.shape_cast %445 : vector<1x8x128xbf16> to vector<8x128xbf16>
    %c0_235 = arith.constant 0 : index
    %c0_236 = arith.constant 0 : index
    %447 = vector.load %arg3[%c0_235, %c0_236] : memref<128x512xbf16, #tpu.memory_space<vmem>>, vector<128x512xbf16>
    %cst_237 = arith.constant dense<0.000000e+00> : vector<8x512xf32>
    %448 = tpu.matmul %446, %447, %cst_237 {dimension_numbers = #tpu.dot_dimension_numbers<[1], [0], [0], [1], [0, 0, 1, 1], [], []>} : vector<8x128xbf16>, vector<128x512xbf16>, vector<8x512xf32> -> vector<8x512xf32>
    %449 = arith.addf %444, %448 : vector<8x512xf32>
    %c0_238 = arith.constant 0 : index
    %c0_239 = arith.constant 0 : index
    %c0_240 = arith.constant 0 : index
    %450 = vector.load %arg9[%c0_238, %c0_239, %c0_240] : memref<2x8x128xf32, #tpu.memory_space<vmem>>, vector<1x8x128xf32>
    %451 = vector.shape_cast %450 : vector<1x8x128xf32> to vector<8x128xf32>
    %452 = vector.extract_strided_slice %449 {offsets = [0, 0], sizes = [8, 128], strides = [1, 1]} : vector<8x512xf32> to vector<8x128xf32>
    %453 = arith.negf %452 : vector<8x128xf32>
    %454 = math.exp %453 : vector<8x128xf32>
    %cst_241 = arith.constant 1.000000e+00 : f32
    %455 = vector.broadcast %cst_241 : f32 to vector<8x128xf32>
    %456 = arith.addf %455, %454 : vector<8x128xf32>
    %457 = arith.divf %455, %456 : vector<8x128xf32>
    %458 = vector.extract_strided_slice %449 {offsets = [0, 128], sizes = [8, 128], strides = [1, 1]} : vector<8x512xf32> to vector<8x128xf32>
    %459 = arith.negf %458 : vector<8x128xf32>
    %460 = math.exp %459 : vector<8x128xf32>
    %cst_242 = arith.constant 1.000000e+00 : f32
    %461 = vector.broadcast %cst_242 : f32 to vector<8x128xf32>
    %462 = arith.addf %461, %460 : vector<8x128xf32>
    %463 = arith.divf %461, %462 : vector<8x128xf32>
    %464 = vector.extract_strided_slice %449 {offsets = [0, 256], sizes = [8, 128], strides = [1, 1]} : vector<8x512xf32> to vector<8x128xf32>
    %465 = math.tanh %464 : vector<8x128xf32>
    %466 = vector.extract_strided_slice %449 {offsets = [0, 384], sizes = [8, 128], strides = [1, 1]} : vector<8x512xf32> to vector<8x128xf32>
    %467 = arith.negf %466 : vector<8x128xf32>
    %468 = math.exp %467 : vector<8x128xf32>
    %cst_243 = arith.constant 1.000000e+00 : f32
    %469 = vector.broadcast %cst_243 : f32 to vector<8x128xf32>
    %470 = arith.addf %469, %468 : vector<8x128xf32>
    %471 = arith.divf %469, %470 : vector<8x128xf32>
    %472 = arith.mulf %463, %451 : vector<8x128xf32>
    %473 = arith.mulf %457, %465 : vector<8x128xf32>
    %474 = arith.addf %472, %473 : vector<8x128xf32>
    %475 = math.tanh %474 : vector<8x128xf32>
    %476 = arith.mulf %471, %475 : vector<8x128xf32>
    %477 = arith.truncf %476 : vector<8x128xf32> to vector<8x128xbf16>
    %c0_244 = arith.constant 0 : index
    %c0_245 = arith.constant 0 : index
    %c0_246 = arith.constant 0 : index
    %478 = vector.load %arg8[%c0_244, %c0_245, %c0_246] : memref<2x8x128xbf16, #tpu.memory_space<vmem>>, vector<1x8x128xbf16>
    %479 = vector.shape_cast %478 : vector<1x8x128xbf16> to vector<8x128xbf16>
    %480 = vector.shape_cast %477 : vector<8x128xbf16> to vector<1x8x128xbf16>
    tpu.vector_store %arg8[%c0_244, %c0_245, %c0_246], %480 {strides = array<i32>} : memref<2x8x128xbf16, #tpu.memory_space<vmem>>, vector<1x8x128xbf16>,
    %c0_247 = arith.constant 0 : index
    %c0_248 = arith.constant 0 : index
    %c0_249 = arith.constant 0 : index
    %481 = vector.load %arg9[%c0_247, %c0_248, %c0_249] : memref<2x8x128xf32, #tpu.memory_space<vmem>>, vector<1x8x128xf32>
    %482 = vector.shape_cast %481 : vector<1x8x128xf32> to vector<8x128xf32>
    %483 = vector.shape_cast %474 : vector<8x128xf32> to vector<1x8x128xf32>
    tpu.vector_store %arg9[%c0_247, %c0_248, %c0_249], %483 {strides = array<i32>} : memref<2x8x128xf32, #tpu.memory_space<vmem>>, vector<1x8x128xf32>,
    %c0_250 = arith.constant 0 : index
    %c0_251 = arith.constant 0 : index
    %484 = vector.load %arg4[%c0_250, %c0_251] : memref<128x512xbf16, #tpu.memory_space<vmem>>, vector<128x512xbf16>
    %cst_252 = arith.constant dense<0.000000e+00> : vector<8x512xf32>
    %485 = tpu.matmul %477, %484, %cst_252 {dimension_numbers = #tpu.dot_dimension_numbers<[1], [0], [0], [1], [0, 0, 1, 1], [], []>} : vector<8x128xbf16>, vector<128x512xbf16>, vector<8x512xf32> -> vector<8x512xf32>
    %c1_253 = arith.constant 1 : index
    %c0_254 = arith.constant 0 : index
    %c0_255 = arith.constant 0 : index
    %486 = vector.load %arg8[%c1_253, %c0_254, %c0_255] : memref<2x8x128xbf16, #tpu.memory_space<vmem>>, vector<1x8x128xbf16>
    %487 = vector.shape_cast %486 : vector<1x8x128xbf16> to vector<8x128xbf16>
    %c0_256 = arith.constant 0 : index
    %c0_257 = arith.constant 0 : index
    %488 = vector.load %arg5[%c0_256, %c0_257] : memref<128x512xbf16, #tpu.memory_space<vmem>>, vector<128x512xbf16>
    %cst_258 = arith.constant dense<0.000000e+00> : vector<8x512xf32>
    %489 = tpu.matmul %487, %488, %cst_258 {dimension_numbers = #tpu.dot_dimension_numbers<[1], [0], [0], [1], [0, 0, 1, 1], [], []>} : vector<8x128xbf16>, vector<128x512xbf16>, vector<8x512xf32> -> vector<8x512xf32>
    %490 = arith.addf %485, %489 : vector<8x512xf32>
    %c0_259 = arith.constant 0 : index
    %c0_260 = arith.constant 0 : index
    %491 = vector.load %arg6[%c0_259, %c0_260] : memref<1x512xf32, #tpu.memory_space<vmem>>, vector<1x512xf32>
    %492 = vector.broadcast %491 : vector<1x512xf32> to vector<8x512xf32>
    %493 = arith.addf %490, %492 : vector<8x512xf32>
    %c1_261 = arith.constant 1 : index
    %c0_262 = arith.constant 0 : index
    %c0_263 = arith.constant 0 : index
    %494 = vector.load %arg9[%c1_261, %c0_262, %c0_263] : memref<2x8x128xf32, #tpu.memory_space<vmem>>, vector<1x8x128xf32>
    %495 = vector.shape_cast %494 : vector<1x8x128xf32> to vector<8x128xf32>
    %496 = vector.extract_strided_slice %493 {offsets = [0, 0], sizes = [8, 128], strides = [1, 1]} : vector<8x512xf32> to vector<8x128xf32>
    %497 = arith.negf %496 : vector<8x128xf32>
    %498 = math.exp %497 : vector<8x128xf32>
    %cst_264 = arith.constant 1.000000e+00 : f32
    %499 = vector.broadcast %cst_264 : f32 to vector<8x128xf32>
    %500 = arith.addf %499, %498 : vector<8x128xf32>
    %501 = arith.divf %499, %500 : vector<8x128xf32>
    %502 = vector.extract_strided_slice %493 {offsets = [0, 128], sizes = [8, 128], strides = [1, 1]} : vector<8x512xf32> to vector<8x128xf32>
    %503 = arith.negf %502 : vector<8x128xf32>
    %504 = math.exp %503 : vector<8x128xf32>
    %cst_265 = arith.constant 1.000000e+00 : f32
    %505 = vector.broadcast %cst_265 : f32 to vector<8x128xf32>
    %506 = arith.addf %505, %504 : vector<8x128xf32>
    %507 = arith.divf %505, %506 : vector<8x128xf32>
    %508 = vector.extract_strided_slice %493 {offsets = [0, 256], sizes = [8, 128], strides = [1, 1]} : vector<8x512xf32> to vector<8x128xf32>
    %509 = math.tanh %508 : vector<8x128xf32>
    %510 = vector.extract_strided_slice %493 {offsets = [0, 384], sizes = [8, 128], strides = [1, 1]} : vector<8x512xf32> to vector<8x128xf32>
    %511 = arith.negf %510 : vector<8x128xf32>
    %512 = math.exp %511 : vector<8x128xf32>
    %cst_266 = arith.constant 1.000000e+00 : f32
    %513 = vector.broadcast %cst_266 : f32 to vector<8x128xf32>
    %514 = arith.addf %513, %512 : vector<8x128xf32>
    %515 = arith.divf %513, %514 : vector<8x128xf32>
    %516 = arith.mulf %507, %495 : vector<8x128xf32>
    %517 = arith.mulf %501, %509 : vector<8x128xf32>
    %518 = arith.addf %516, %517 : vector<8x128xf32>
    %519 = math.tanh %518 : vector<8x128xf32>
    %520 = arith.mulf %515, %519 : vector<8x128xf32>
    %521 = arith.truncf %520 : vector<8x128xf32> to vector<8x128xbf16>
    %c1_267 = arith.constant 1 : index
    %c0_268 = arith.constant 0 : index
    %c0_269 = arith.constant 0 : index
    %522 = vector.load %arg8[%c1_267, %c0_268, %c0_269] : memref<2x8x128xbf16, #tpu.memory_space<vmem>>, vector<1x8x128xbf16>
    %523 = vector.shape_cast %522 : vector<1x8x128xbf16> to vector<8x128xbf16>
    %524 = vector.shape_cast %521 : vector<8x128xbf16> to vector<1x8x128xbf16>
    tpu.vector_store %arg8[%c1_267, %c0_268, %c0_269], %524 {strides = array<i32>} : memref<2x8x128xbf16, #tpu.memory_space<vmem>>, vector<1x8x128xbf16>,
    %c1_270 = arith.constant 1 : index
    %c0_271 = arith.constant 0 : index
    %c0_272 = arith.constant 0 : index
    %525 = vector.load %arg9[%c1_270, %c0_271, %c0_272] : memref<2x8x128xf32, #tpu.memory_space<vmem>>, vector<1x8x128xf32>
    %526 = vector.shape_cast %525 : vector<1x8x128xf32> to vector<8x128xf32>
    %527 = vector.shape_cast %518 : vector<8x128xf32> to vector<1x8x128xf32>
    tpu.vector_store %arg9[%c1_270, %c0_271, %c0_272], %527 {strides = array<i32>} : memref<2x8x128xf32, #tpu.memory_space<vmem>>, vector<1x8x128xf32>,
    %c0_273 = arith.constant 0 : index
    %c5_274 = arith.constant 5 : index
    %c0_275 = arith.constant 0 : index
    %528 = vector.load %arg7[%c0_273, %c5_274, %c0_275] : memref<8x8x128xbf16, #tpu.memory_space<vmem>>, vector<8x1x128xbf16>
    %529 = vector.shape_cast %528 : vector<8x1x128xbf16> to vector<8x128xbf16>
    %530 = vector.shape_cast %521 : vector<8x128xbf16> to vector<8x1x128xbf16>
    tpu.vector_store %arg7[%c0_273, %c5_274, %c0_275], %530 {strides = array<i32>} : memref<8x8x128xbf16, #tpu.memory_space<vmem>>, vector<8x1x128xbf16>,
    %c0_276 = arith.constant 0 : index
    %c6 = arith.constant 6 : index
    %c0_277 = arith.constant 0 : index
    %531 = vector.load %arg2[%c0_276, %c6, %c0_277] : memref<8x8x512xf32, #tpu.memory_space<vmem>>, vector<8x1x512xf32>
    %532 = vector.shape_cast %531 : vector<8x1x512xf32> to vector<8x512xf32>
    %c0_278 = arith.constant 0 : index
    %c0_279 = arith.constant 0 : index
    %c0_280 = arith.constant 0 : index
    %533 = vector.load %arg8[%c0_278, %c0_279, %c0_280] : memref<2x8x128xbf16, #tpu.memory_space<vmem>>, vector<1x8x128xbf16>
    %534 = vector.shape_cast %533 : vector<1x8x128xbf16> to vector<8x128xbf16>
    %c0_281 = arith.constant 0 : index
    %c0_282 = arith.constant 0 : index
    %535 = vector.load %arg3[%c0_281, %c0_282] : memref<128x512xbf16, #tpu.memory_space<vmem>>, vector<128x512xbf16>
    %cst_283 = arith.constant dense<0.000000e+00> : vector<8x512xf32>
    %536 = tpu.matmul %534, %535, %cst_283 {dimension_numbers = #tpu.dot_dimension_numbers<[1], [0], [0], [1], [0, 0, 1, 1], [], []>} : vector<8x128xbf16>, vector<128x512xbf16>, vector<8x512xf32> -> vector<8x512xf32>
    %537 = arith.addf %532, %536 : vector<8x512xf32>
    %c0_284 = arith.constant 0 : index
    %c0_285 = arith.constant 0 : index
    %c0_286 = arith.constant 0 : index
    %538 = vector.load %arg9[%c0_284, %c0_285, %c0_286] : memref<2x8x128xf32, #tpu.memory_space<vmem>>, vector<1x8x128xf32>
    %539 = vector.shape_cast %538 : vector<1x8x128xf32> to vector<8x128xf32>
    %540 = vector.extract_strided_slice %537 {offsets = [0, 0], sizes = [8, 128], strides = [1, 1]} : vector<8x512xf32> to vector<8x128xf32>
    %541 = arith.negf %540 : vector<8x128xf32>
    %542 = math.exp %541 : vector<8x128xf32>
    %cst_287 = arith.constant 1.000000e+00 : f32
    %543 = vector.broadcast %cst_287 : f32 to vector<8x128xf32>
    %544 = arith.addf %543, %542 : vector<8x128xf32>
    %545 = arith.divf %543, %544 : vector<8x128xf32>
    %546 = vector.extract_strided_slice %537 {offsets = [0, 128], sizes = [8, 128], strides = [1, 1]} : vector<8x512xf32> to vector<8x128xf32>
    %547 = arith.negf %546 : vector<8x128xf32>
    %548 = math.exp %547 : vector<8x128xf32>
    %cst_288 = arith.constant 1.000000e+00 : f32
    %549 = vector.broadcast %cst_288 : f32 to vector<8x128xf32>
    %550 = arith.addf %549, %548 : vector<8x128xf32>
    %551 = arith.divf %549, %550 : vector<8x128xf32>
    %552 = vector.extract_strided_slice %537 {offsets = [0, 256], sizes = [8, 128], strides = [1, 1]} : vector<8x512xf32> to vector<8x128xf32>
    %553 = math.tanh %552 : vector<8x128xf32>
    %554 = vector.extract_strided_slice %537 {offsets = [0, 384], sizes = [8, 128], strides = [1, 1]} : vector<8x512xf32> to vector<8x128xf32>
    %555 = arith.negf %554 : vector<8x128xf32>
    %556 = math.exp %555 : vector<8x128xf32>
    %cst_289 = arith.constant 1.000000e+00 : f32
    %557 = vector.broadcast %cst_289 : f32 to vector<8x128xf32>
    %558 = arith.addf %557, %556 : vector<8x128xf32>
    %559 = arith.divf %557, %558 : vector<8x128xf32>
    %560 = arith.mulf %551, %539 : vector<8x128xf32>
    %561 = arith.mulf %545, %553 : vector<8x128xf32>
    %562 = arith.addf %560, %561 : vector<8x128xf32>
    %563 = math.tanh %562 : vector<8x128xf32>
    %564 = arith.mulf %559, %563 : vector<8x128xf32>
    %565 = arith.truncf %564 : vector<8x128xf32> to vector<8x128xbf16>
    %c0_290 = arith.constant 0 : index
    %c0_291 = arith.constant 0 : index
    %c0_292 = arith.constant 0 : index
    %566 = vector.load %arg8[%c0_290, %c0_291, %c0_292] : memref<2x8x128xbf16, #tpu.memory_space<vmem>>, vector<1x8x128xbf16>
    %567 = vector.shape_cast %566 : vector<1x8x128xbf16> to vector<8x128xbf16>
    %568 = vector.shape_cast %565 : vector<8x128xbf16> to vector<1x8x128xbf16>
    tpu.vector_store %arg8[%c0_290, %c0_291, %c0_292], %568 {strides = array<i32>} : memref<2x8x128xbf16, #tpu.memory_space<vmem>>, vector<1x8x128xbf16>,
    %c0_293 = arith.constant 0 : index
    %c0_294 = arith.constant 0 : index
    %c0_295 = arith.constant 0 : index
    %569 = vector.load %arg9[%c0_293, %c0_294, %c0_295] : memref<2x8x128xf32, #tpu.memory_space<vmem>>, vector<1x8x128xf32>
    %570 = vector.shape_cast %569 : vector<1x8x128xf32> to vector<8x128xf32>
    %571 = vector.shape_cast %562 : vector<8x128xf32> to vector<1x8x128xf32>
    tpu.vector_store %arg9[%c0_293, %c0_294, %c0_295], %571 {strides = array<i32>} : memref<2x8x128xf32, #tpu.memory_space<vmem>>, vector<1x8x128xf32>,
    %c0_296 = arith.constant 0 : index
    %c0_297 = arith.constant 0 : index
    %572 = vector.load %arg4[%c0_296, %c0_297] : memref<128x512xbf16, #tpu.memory_space<vmem>>, vector<128x512xbf16>
    %cst_298 = arith.constant dense<0.000000e+00> : vector<8x512xf32>
    %573 = tpu.matmul %565, %572, %cst_298 {dimension_numbers = #tpu.dot_dimension_numbers<[1], [0], [0], [1], [0, 0, 1, 1], [], []>} : vector<8x128xbf16>, vector<128x512xbf16>, vector<8x512xf32> -> vector<8x512xf32>
    %c1_299 = arith.constant 1 : index
    %c0_300 = arith.constant 0 : index
    %c0_301 = arith.constant 0 : index
    %574 = vector.load %arg8[%c1_299, %c0_300, %c0_301] : memref<2x8x128xbf16, #tpu.memory_space<vmem>>, vector<1x8x128xbf16>
    %575 = vector.shape_cast %574 : vector<1x8x128xbf16> to vector<8x128xbf16>
    %c0_302 = arith.constant 0 : index
    %c0_303 = arith.constant 0 : index
    %576 = vector.load %arg5[%c0_302, %c0_303] : memref<128x512xbf16, #tpu.memory_space<vmem>>, vector<128x512xbf16>
    %cst_304 = arith.constant dense<0.000000e+00> : vector<8x512xf32>
    %577 = tpu.matmul %575, %576, %cst_304 {dimension_numbers = #tpu.dot_dimension_numbers<[1], [0], [0], [1], [0, 0, 1, 1], [], []>} : vector<8x128xbf16>, vector<128x512xbf16>, vector<8x512xf32> -> vector<8x512xf32>
    %578 = arith.addf %573, %577 : vector<8x512xf32>
    %c0_305 = arith.constant 0 : index
    %c0_306 = arith.constant 0 : index
    %579 = vector.load %arg6[%c0_305, %c0_306] : memref<1x512xf32, #tpu.memory_space<vmem>>, vector<1x512xf32>
    %580 = vector.broadcast %579 : vector<1x512xf32> to vector<8x512xf32>
    %581 = arith.addf %578, %580 : vector<8x512xf32>
    %c1_307 = arith.constant 1 : index
    %c0_308 = arith.constant 0 : index
    %c0_309 = arith.constant 0 : index
    %582 = vector.load %arg9[%c1_307, %c0_308, %c0_309] : memref<2x8x128xf32, #tpu.memory_space<vmem>>, vector<1x8x128xf32>
    %583 = vector.shape_cast %582 : vector<1x8x128xf32> to vector<8x128xf32>
    %584 = vector.extract_strided_slice %581 {offsets = [0, 0], sizes = [8, 128], strides = [1, 1]} : vector<8x512xf32> to vector<8x128xf32>
    %585 = arith.negf %584 : vector<8x128xf32>
    %586 = math.exp %585 : vector<8x128xf32>
    %cst_310 = arith.constant 1.000000e+00 : f32
    %587 = vector.broadcast %cst_310 : f32 to vector<8x128xf32>
    %588 = arith.addf %587, %586 : vector<8x128xf32>
    %589 = arith.divf %587, %588 : vector<8x128xf32>
    %590 = vector.extract_strided_slice %581 {offsets = [0, 128], sizes = [8, 128], strides = [1, 1]} : vector<8x512xf32> to vector<8x128xf32>
    %591 = arith.negf %590 : vector<8x128xf32>
    %592 = math.exp %591 : vector<8x128xf32>
    %cst_311 = arith.constant 1.000000e+00 : f32
    %593 = vector.broadcast %cst_311 : f32 to vector<8x128xf32>
    %594 = arith.addf %593, %592 : vector<8x128xf32>
    %595 = arith.divf %593, %594 : vector<8x128xf32>
    %596 = vector.extract_strided_slice %581 {offsets = [0, 256], sizes = [8, 128], strides = [1, 1]} : vector<8x512xf32> to vector<8x128xf32>
    %597 = math.tanh %596 : vector<8x128xf32>
    %598 = vector.extract_strided_slice %581 {offsets = [0, 384], sizes = [8, 128], strides = [1, 1]} : vector<8x512xf32> to vector<8x128xf32>
    %599 = arith.negf %598 : vector<8x128xf32>
    %600 = math.exp %599 : vector<8x128xf32>
    %cst_312 = arith.constant 1.000000e+00 : f32
    %601 = vector.broadcast %cst_312 : f32 to vector<8x128xf32>
    %602 = arith.addf %601, %600 : vector<8x128xf32>
    %603 = arith.divf %601, %602 : vector<8x128xf32>
    %604 = arith.mulf %595, %583 : vector<8x128xf32>
    %605 = arith.mulf %589, %597 : vector<8x128xf32>
    %606 = arith.addf %604, %605 : vector<8x128xf32>
    %607 = math.tanh %606 : vector<8x128xf32>
    %608 = arith.mulf %603, %607 : vector<8x128xf32>
    %609 = arith.truncf %608 : vector<8x128xf32> to vector<8x128xbf16>
    %c1_313 = arith.constant 1 : index
    %c0_314 = arith.constant 0 : index
    %c0_315 = arith.constant 0 : index
    %610 = vector.load %arg8[%c1_313, %c0_314, %c0_315] : memref<2x8x128xbf16, #tpu.memory_space<vmem>>, vector<1x8x128xbf16>
    %611 = vector.shape_cast %610 : vector<1x8x128xbf16> to vector<8x128xbf16>
    %612 = vector.shape_cast %609 : vector<8x128xbf16> to vector<1x8x128xbf16>
    tpu.vector_store %arg8[%c1_313, %c0_314, %c0_315], %612 {strides = array<i32>} : memref<2x8x128xbf16, #tpu.memory_space<vmem>>, vector<1x8x128xbf16>,
    %c1_316 = arith.constant 1 : index
    %c0_317 = arith.constant 0 : index
    %c0_318 = arith.constant 0 : index
    %613 = vector.load %arg9[%c1_316, %c0_317, %c0_318] : memref<2x8x128xf32, #tpu.memory_space<vmem>>, vector<1x8x128xf32>
    %614 = vector.shape_cast %613 : vector<1x8x128xf32> to vector<8x128xf32>
    %615 = vector.shape_cast %606 : vector<8x128xf32> to vector<1x8x128xf32>
    tpu.vector_store %arg9[%c1_316, %c0_317, %c0_318], %615 {strides = array<i32>} : memref<2x8x128xf32, #tpu.memory_space<vmem>>, vector<1x8x128xf32>,
    %c0_319 = arith.constant 0 : index
    %c6_320 = arith.constant 6 : index
    %c0_321 = arith.constant 0 : index
    %616 = vector.load %arg7[%c0_319, %c6_320, %c0_321] : memref<8x8x128xbf16, #tpu.memory_space<vmem>>, vector<8x1x128xbf16>
    %617 = vector.shape_cast %616 : vector<8x1x128xbf16> to vector<8x128xbf16>
    %618 = vector.shape_cast %609 : vector<8x128xbf16> to vector<8x1x128xbf16>
    tpu.vector_store %arg7[%c0_319, %c6_320, %c0_321], %618 {strides = array<i32>} : memref<8x8x128xbf16, #tpu.memory_space<vmem>>, vector<8x1x128xbf16>,
    %c0_322 = arith.constant 0 : index
    %c7 = arith.constant 7 : index
    %c0_323 = arith.constant 0 : index
    %619 = vector.load %arg2[%c0_322, %c7, %c0_323] : memref<8x8x512xf32, #tpu.memory_space<vmem>>, vector<8x1x512xf32>
    %620 = vector.shape_cast %619 : vector<8x1x512xf32> to vector<8x512xf32>
    %c0_324 = arith.constant 0 : index
    %c0_325 = arith.constant 0 : index
    %c0_326 = arith.constant 0 : index
    %621 = vector.load %arg8[%c0_324, %c0_325, %c0_326] : memref<2x8x128xbf16, #tpu.memory_space<vmem>>, vector<1x8x128xbf16>
    %622 = vector.shape_cast %621 : vector<1x8x128xbf16> to vector<8x128xbf16>
    %c0_327 = arith.constant 0 : index
    %c0_328 = arith.constant 0 : index
    %623 = vector.load %arg3[%c0_327, %c0_328] : memref<128x512xbf16, #tpu.memory_space<vmem>>, vector<128x512xbf16>
    %cst_329 = arith.constant dense<0.000000e+00> : vector<8x512xf32>
    %624 = tpu.matmul %622, %623, %cst_329 {dimension_numbers = #tpu.dot_dimension_numbers<[1], [0], [0], [1], [0, 0, 1, 1], [], []>} : vector<8x128xbf16>, vector<128x512xbf16>, vector<8x512xf32> -> vector<8x512xf32>
    %625 = arith.addf %620, %624 : vector<8x512xf32>
    %c0_330 = arith.constant 0 : index
    %c0_331 = arith.constant 0 : index
    %c0_332 = arith.constant 0 : index
    %626 = vector.load %arg9[%c0_330, %c0_331, %c0_332] : memref<2x8x128xf32, #tpu.memory_space<vmem>>, vector<1x8x128xf32>
    %627 = vector.shape_cast %626 : vector<1x8x128xf32> to vector<8x128xf32>
    %628 = vector.extract_strided_slice %625 {offsets = [0, 0], sizes = [8, 128], strides = [1, 1]} : vector<8x512xf32> to vector<8x128xf32>
    %629 = arith.negf %628 : vector<8x128xf32>
    %630 = math.exp %629 : vector<8x128xf32>
    %cst_333 = arith.constant 1.000000e+00 : f32
    %631 = vector.broadcast %cst_333 : f32 to vector<8x128xf32>
    %632 = arith.addf %631, %630 : vector<8x128xf32>
    %633 = arith.divf %631, %632 : vector<8x128xf32>
    %634 = vector.extract_strided_slice %625 {offsets = [0, 128], sizes = [8, 128], strides = [1, 1]} : vector<8x512xf32> to vector<8x128xf32>
    %635 = arith.negf %634 : vector<8x128xf32>
    %636 = math.exp %635 : vector<8x128xf32>
    %cst_334 = arith.constant 1.000000e+00 : f32
    %637 = vector.broadcast %cst_334 : f32 to vector<8x128xf32>
    %638 = arith.addf %637, %636 : vector<8x128xf32>
    %639 = arith.divf %637, %638 : vector<8x128xf32>
    %640 = vector.extract_strided_slice %625 {offsets = [0, 256], sizes = [8, 128], strides = [1, 1]} : vector<8x512xf32> to vector<8x128xf32>
    %641 = math.tanh %640 : vector<8x128xf32>
    %642 = vector.extract_strided_slice %625 {offsets = [0, 384], sizes = [8, 128], strides = [1, 1]} : vector<8x512xf32> to vector<8x128xf32>
    %643 = arith.negf %642 : vector<8x128xf32>
    %644 = math.exp %643 : vector<8x128xf32>
    %cst_335 = arith.constant 1.000000e+00 : f32
    %645 = vector.broadcast %cst_335 : f32 to vector<8x128xf32>
    %646 = arith.addf %645, %644 : vector<8x128xf32>
    %647 = arith.divf %645, %646 : vector<8x128xf32>
    %648 = arith.mulf %639, %627 : vector<8x128xf32>
    %649 = arith.mulf %633, %641 : vector<8x128xf32>
    %650 = arith.addf %648, %649 : vector<8x128xf32>
    %651 = math.tanh %650 : vector<8x128xf32>
    %652 = arith.mulf %647, %651 : vector<8x128xf32>
    %653 = arith.truncf %652 : vector<8x128xf32> to vector<8x128xbf16>
    %c0_336 = arith.constant 0 : index
    %c0_337 = arith.constant 0 : index
    %c0_338 = arith.constant 0 : index
    %654 = vector.load %arg8[%c0_336, %c0_337, %c0_338] : memref<2x8x128xbf16, #tpu.memory_space<vmem>>, vector<1x8x128xbf16>
    %655 = vector.shape_cast %654 : vector<1x8x128xbf16> to vector<8x128xbf16>
    %656 = vector.shape_cast %653 : vector<8x128xbf16> to vector<1x8x128xbf16>
    tpu.vector_store %arg8[%c0_336, %c0_337, %c0_338], %656 {strides = array<i32>} : memref<2x8x128xbf16, #tpu.memory_space<vmem>>, vector<1x8x128xbf16>,
    %c0_339 = arith.constant 0 : index
    %c0_340 = arith.constant 0 : index
    %c0_341 = arith.constant 0 : index
    %657 = vector.load %arg9[%c0_339, %c0_340, %c0_341] : memref<2x8x128xf32, #tpu.memory_space<vmem>>, vector<1x8x128xf32>
    %658 = vector.shape_cast %657 : vector<1x8x128xf32> to vector<8x128xf32>
    %659 = vector.shape_cast %650 : vector<8x128xf32> to vector<1x8x128xf32>
    tpu.vector_store %arg9[%c0_339, %c0_340, %c0_341], %659 {strides = array<i32>} : memref<2x8x128xf32, #tpu.memory_space<vmem>>, vector<1x8x128xf32>,
    %c0_342 = arith.constant 0 : index
    %c0_343 = arith.constant 0 : index
    %660 = vector.load %arg4[%c0_342, %c0_343] : memref<128x512xbf16, #tpu.memory_space<vmem>>, vector<128x512xbf16>
    %cst_344 = arith.constant dense<0.000000e+00> : vector<8x512xf32>
    %661 = tpu.matmul %653, %660, %cst_344 {dimension_numbers = #tpu.dot_dimension_numbers<[1], [0], [0], [1], [0, 0, 1, 1], [], []>} : vector<8x128xbf16>, vector<128x512xbf16>, vector<8x512xf32> -> vector<8x512xf32>
    %c1_345 = arith.constant 1 : index
    %c0_346 = arith.constant 0 : index
    %c0_347 = arith.constant 0 : index
    %662 = vector.load %arg8[%c1_345, %c0_346, %c0_347] : memref<2x8x128xbf16, #tpu.memory_space<vmem>>, vector<1x8x128xbf16>
    %663 = vector.shape_cast %662 : vector<1x8x128xbf16> to vector<8x128xbf16>
    %c0_348 = arith.constant 0 : index
    %c0_349 = arith.constant 0 : index
    %664 = vector.load %arg5[%c0_348, %c0_349] : memref<128x512xbf16, #tpu.memory_space<vmem>>, vector<128x512xbf16>
    %cst_350 = arith.constant dense<0.000000e+00> : vector<8x512xf32>
    %665 = tpu.matmul %663, %664, %cst_350 {dimension_numbers = #tpu.dot_dimension_numbers<[1], [0], [0], [1], [0, 0, 1, 1], [], []>} : vector<8x128xbf16>, vector<128x512xbf16>, vector<8x512xf32> -> vector<8x512xf32>
    %666 = arith.addf %661, %665 : vector<8x512xf32>
    %c0_351 = arith.constant 0 : index
    %c0_352 = arith.constant 0 : index
    %667 = vector.load %arg6[%c0_351, %c0_352] : memref<1x512xf32, #tpu.memory_space<vmem>>, vector<1x512xf32>
    %668 = vector.broadcast %667 : vector<1x512xf32> to vector<8x512xf32>
    %669 = arith.addf %666, %668 : vector<8x512xf32>
    %c1_353 = arith.constant 1 : index
    %c0_354 = arith.constant 0 : index
    %c0_355 = arith.constant 0 : index
    %670 = vector.load %arg9[%c1_353, %c0_354, %c0_355] : memref<2x8x128xf32, #tpu.memory_space<vmem>>, vector<1x8x128xf32>
    %671 = vector.shape_cast %670 : vector<1x8x128xf32> to vector<8x128xf32>
    %672 = vector.extract_strided_slice %669 {offsets = [0, 0], sizes = [8, 128], strides = [1, 1]} : vector<8x512xf32> to vector<8x128xf32>
    %673 = arith.negf %672 : vector<8x128xf32>
    %674 = math.exp %673 : vector<8x128xf32>
    %cst_356 = arith.constant 1.000000e+00 : f32
    %675 = vector.broadcast %cst_356 : f32 to vector<8x128xf32>
    %676 = arith.addf %675, %674 : vector<8x128xf32>
    %677 = arith.divf %675, %676 : vector<8x128xf32>
    %678 = vector.extract_strided_slice %669 {offsets = [0, 128], sizes = [8, 128], strides = [1, 1]} : vector<8x512xf32> to vector<8x128xf32>
    %679 = arith.negf %678 : vector<8x128xf32>
    %680 = math.exp %679 : vector<8x128xf32>
    %cst_357 = arith.constant 1.000000e+00 : f32
    %681 = vector.broadcast %cst_357 : f32 to vector<8x128xf32>
    %682 = arith.addf %681, %680 : vector<8x128xf32>
    %683 = arith.divf %681, %682 : vector<8x128xf32>
    %684 = vector.extract_strided_slice %669 {offsets = [0, 256], sizes = [8, 128], strides = [1, 1]} : vector<8x512xf32> to vector<8x128xf32>
    %685 = math.tanh %684 : vector<8x128xf32>
    %686 = vector.extract_strided_slice %669 {offsets = [0, 384], sizes = [8, 128], strides = [1, 1]} : vector<8x512xf32> to vector<8x128xf32>
    %687 = arith.negf %686 : vector<8x128xf32>
    %688 = math.exp %687 : vector<8x128xf32>
    %cst_358 = arith.constant 1.000000e+00 : f32
    %689 = vector.broadcast %cst_358 : f32 to vector<8x128xf32>
    %690 = arith.addf %689, %688 : vector<8x128xf32>
    %691 = arith.divf %689, %690 : vector<8x128xf32>
    %692 = arith.mulf %683, %671 : vector<8x128xf32>
    %693 = arith.mulf %677, %685 : vector<8x128xf32>
    %694 = arith.addf %692, %693 : vector<8x128xf32>
    %695 = math.tanh %694 : vector<8x128xf32>
    %696 = arith.mulf %691, %695 : vector<8x128xf32>
    %697 = arith.truncf %696 : vector<8x128xf32> to vector<8x128xbf16>
    %c1_359 = arith.constant 1 : index
    %c0_360 = arith.constant 0 : index
    %c0_361 = arith.constant 0 : index
    %698 = vector.load %arg8[%c1_359, %c0_360, %c0_361] : memref<2x8x128xbf16, #tpu.memory_space<vmem>>, vector<1x8x128xbf16>
    %699 = vector.shape_cast %698 : vector<1x8x128xbf16> to vector<8x128xbf16>
    %700 = vector.shape_cast %697 : vector<8x128xbf16> to vector<1x8x128xbf16>
    tpu.vector_store %arg8[%c1_359, %c0_360, %c0_361], %700 {strides = array<i32>} : memref<2x8x128xbf16, #tpu.memory_space<vmem>>, vector<1x8x128xbf16>,
    %c1_362 = arith.constant 1 : index
    %c0_363 = arith.constant 0 : index
    %c0_364 = arith.constant 0 : index
    %701 = vector.load %arg9[%c1_362, %c0_363, %c0_364] : memref<2x8x128xf32, #tpu.memory_space<vmem>>, vector<1x8x128xf32>
    %702 = vector.shape_cast %701 : vector<1x8x128xf32> to vector<8x128xf32>
    %703 = vector.shape_cast %694 : vector<8x128xf32> to vector<1x8x128xf32>
    tpu.vector_store %arg9[%c1_362, %c0_363, %c0_364], %703 {strides = array<i32>} : memref<2x8x128xf32, #tpu.memory_space<vmem>>, vector<1x8x128xf32>,
    %c0_365 = arith.constant 0 : index
    %c7_366 = arith.constant 7 : index
    %c0_367 = arith.constant 0 : index
    %704 = vector.load %arg7[%c0_365, %c7_366, %c0_367] : memref<8x8x128xbf16, #tpu.memory_space<vmem>>, vector<8x1x128xbf16>
    %705 = vector.shape_cast %704 : vector<8x1x128xbf16> to vector<8x128xbf16>
    %706 = vector.shape_cast %697 : vector<8x128xbf16> to vector<8x1x128xbf16>
    tpu.vector_store %arg7[%c0_365, %c7_366, %c0_367], %706 {strides = array<i32>} : memref<8x8x128xbf16, #tpu.memory_space<vmem>>, vector<8x1x128xbf16>,
    return
  }
  func.func @transform_0(%arg0: i32, %arg1: i32) -> (i32, i32, i32) {
    %c0_i32 = arith.constant 0 : i32
    %c0_i32_0 = arith.constant 0 : i32
    return %arg0, %arg1, %c0_i32 : i32, i32, i32
  }
  func.func @transform_1(%arg0: i32, %arg1: i32) -> (i32, i32) {
    %c0_i32 = arith.constant 0 : i32
    %c0_i32_0 = arith.constant 0 : i32
    %c0_i32_1 = arith.constant 0 : i32
    return %c0_i32, %c0_i32_0 : i32, i32
  }
  func.func @transform_2(%arg0: i32, %arg1: i32) -> (i32, i32) {
    %c0_i32 = arith.constant 0 : i32
    %c0_i32_0 = arith.constant 0 : i32
    %c0_i32_1 = arith.constant 0 : i32
    return %c0_i32, %c0_i32_0 : i32, i32
  }
  func.func @transform_3(%arg0: i32, %arg1: i32) -> (i32, i32) {
    %c0_i32 = arith.constant 0 : i32
    %c0_i32_0 = arith.constant 0 : i32
    %c0_i32_1 = arith.constant 0 : i32
    return %c0_i32, %c0_i32_0 : i32, i32
  }
  func.func @transform_4(%arg0: i32, %arg1: i32) -> (i32, i32) {
    %c0_i32 = arith.constant 0 : i32
    %c0_i32_0 = arith.constant 0 : i32
    %c0_i32_1 = arith.constant 0 : i32
    return %c0_i32, %c0_i32_0 : i32, i32
  }
  func.func @transform_5(%arg0: i32, %arg1: i32) -> (i32, i32, i32) {
    %c0_i32 = arith.constant 0 : i32
    %c0_i32_0 = arith.constant 0 : i32
    return %arg0, %arg1, %c0_i32 : i32, i32, i32
  }
}

</mosaic_0001>

<bundles_post_ra>
// kernel: decoder_rnn_forward.5
= control target key start
LH: loop header
LB: loop body
LE: loop exit
PB: predicated region body
PF: predicated region fallthrough
CT: control target
= control target key end

     0   :  { %v313_v1 = vmov 0   ;;  %v41_v21 = vlaneseq  ;;  %s445_s1 = inlined_call_operand.vmem [shape: bf16[128,256], index: 1, kind: input, shape index: {}]   ;;  %s446_s0 = inlined_call_operand.vmem [shape: bf16[64,128], index: 0, kind: input, shape index: {}]   ;;  %s447_s2 = inlined_call_operand.vmem [shape: f32[1,256], index: 2, kind: input, shape index: {}]   ;;  %s448_s3 = inlined_call_operand.vmem [shape: f32[64,256], index: 3, kind: output, shape index: {}]  }
   0x1   :  { %v285_v0 = vld [vmem:[%s445_s1 + $0x4] ss:$8 sps:$4 sm:$0xff]   ;;  %187 = vmatprep.mubr.bf16.mxu0 %v313_v1  ;;  %207 = vmatprep.mubr.bf16.mxu1 %v313_v1  ;;  %v287_v2 = vld [vmem:[%s445_s1] ss:$8 sps:$4 sm:$0xff]   ;;  %v288_v3 = vld [vmem:[%s445_s1 + $0x14] ss:$8 sps:$4 sm:$0xff]  }
   0x2   :  { %155 = vmatprep.subr.bf16.mxu0 %v285_v0  ;;  %268 = vmatprep.subr.bf16.mxu1 %v285_v0  ;;  %v290_v4 = vld [vmem:[%s445_s1 + $0x10] ss:$8 sps:$4 sm:$0xff]   ;;  %v291_v5 = vld [vmem:[%s445_s1 + $0x24] ss:$8 sps:$4 sm:$0xff]   ;;  %v293_v6 = vld [vmem:[%s445_s1 + $0x20] ss:$8 sps:$4 sm:$0xff]  }
   0x3   :  { %156 = vmatpush1.bf16.msra.mxu0 %v287_v2  ;;  %276 = vmatpush1.bf16.msra.mxu1 %v287_v2  ;;  %v294_v7 = vld [vmem:[%s445_s1 + $0x34] ss:$8 sps:$4 sm:$0xff]   ;;  %v296_v8 = vld [vmem:[%s445_s1 + $0x30] ss:$8 sps:$4 sm:$0xff]   ;;  %v297_v9 = vld [vmem:[%s445_s1 + $0x44] ss:$8 sps:$4 sm:$0xff]  }
   0x4   :  { %157 = vmatprep.subr.bf16.mxu0 %v288_v3  ;;  %269 = vmatprep.subr.bf16.mxu1 %v288_v3  ;;  %v299_v10 = vld [vmem:[%s445_s1 + $0x40] ss:$8 sps:$4 sm:$0xff]   ;;  %v300_v11 = vld [vmem:[%s445_s1 + $0x54] ss:$8 sps:$4 sm:$0xff]   ;;  %v302_v12 = vld [vmem:[%s445_s1 + $0x50] ss:$8 sps:$4 sm:$0xff]  }
   0x5   :  { %v303_v13 = vld [vmem:[%s445_s1 + $0x64] ss:$8 sps:$4 sm:$0xff]   ;;  %v305_v14 = vld [vmem:[%s445_s1 + $0x60] ss:$8 sps:$4 sm:$0xff]   ;;  %v306_v15 = vld [vmem:[%s445_s1 + $0x74] ss:$8 sps:$4 sm:$0xff]  }
   0x6   :  { %v308_v16 = vld [vmem:[%s445_s1 + $0x70] ss:$8 sps:$4 sm:$0xff]   ;;  %v309_v17 = vld [vmem:[%s446_s0] sm:$0xff]   ;;  %v311_v19 = vld [vmem:[%s446_s0 + $0x8] sm:$0xff]   ;;  %v42_v22 = vshrl.u32 %v41_v21, 7 }
   0x7   :  { %158 = vmatpush1.bf16.msra.mxu0 %v290_v4  ;;  %277 = vmatpush1.bf16.msra.mxu1 %v290_v4  ;;  %v310_v18 = vld [vmem:[%s446_s0 + $0x10] sm:$0xff]   ;;  %v312_v20 = vld [vmem:[%s446_s0 + $0x18] sm:$0xff]   ;;  %v39_v24 = vld [vmem:[%s447_s2] sm:$0x3] }
   0x8   :  { %159 = vmatprep.subr.bf16.mxu0 %v291_v5  ;;  %270 = vmatprep.subr.bf16.mxu1 %v291_v5  ;;  %v43_v23 = vsub.s32 0, %v42_v22  ;;  %v47_v25 = vsub.s32 1, %v42_v22 }
   0xa   :  { %v44_v26 = vrot.slane %v39_v24, %v43_v23  ;;  %v48_v27 = vrot.slane %v39_v24, %v47_v25 }
   0xb   :  { %160 = vmatpush1.bf16.msra.mxu0 %v293_v6  ;;  %278 = vmatpush1.bf16.msra.mxu1 %v293_v6 }
   0xc   :  { %161 = vmatprep.subr.bf16.mxu0 %v294_v7  ;;  %271 = vmatprep.subr.bf16.mxu1 %v294_v7 }
   0xf   :  { %162 = vmatpush1.bf16.msra.mxu0 %v296_v8  ;;  %279 = vmatpush1.bf16.msra.mxu1 %v296_v8 }
  0x10   :  { %163 = vmatprep.subr.bf16.mxu0 %v297_v9  ;;  %272 = vmatprep.subr.bf16.mxu1 %v297_v9 }
  0x13   :  { %164 = vmatpush1.bf16.msra.mxu0 %v299_v10  ;;  %280 = vmatpush1.bf16.msra.mxu1 %v299_v10 }
  0x14   :  { %165 = vmatprep.subr.bf16.mxu0 %v300_v11  ;;  %273 = vmatprep.subr.bf16.mxu1 %v300_v11 }
  0x17   :  { %166 = vmatpush1.bf16.msra.mxu0 %v302_v12  ;;  %281 = vmatpush1.bf16.msra.mxu1 %v302_v12 }
  0x18   :  { %167 = vmatprep.subr.bf16.mxu0 %v303_v13  ;;  %274 = vmatprep.subr.bf16.mxu1 %v303_v13 }
  0x1b   :  { %168 = vmatpush1.bf16.msra.mxu0 %v305_v14  ;;  %282 = vmatpush1.bf16.msra.mxu1 %v305_v14 }
  0x1c   :  { %169 = vmatprep.subr.bf16.mxu0 %v306_v15  ;;  %275 = vmatprep.subr.bf16.mxu1 %v306_v15 }
  0x1f   :  { %170 = vmatpush1.bf16.msra.mxu0 %v308_v16  ;;  %283 = vmatpush1.bf16.msra.mxu1 %v308_v16 }
  0x22   :  { %188 = vmatmul.mubr.bf16.vlgmr.msra.gmra.mrb[0].mxu0 %v309_v17  ;;  %208 = vmatmul.mubr.bf16.vlgmr.msra.gmra.mrb[0].mxu1 %v310_v18 }
  0x23   :  { %197 = vmatprep.mubr.bf16.mxu0 %v313_v1  ;;  %217 = vmatprep.mubr.bf16.mxu1 %v313_v1 }
  0x2a   :  { %198 = vmatmul.mubr.bf16.gmra.mrb[4].mxu0 %v311_v19  ;;  %218 = vmatmul.mubr.bf16.gmra.mrb[4].mxu1 %v312_v20 }
  0xf5   :  { %v189_v28 = vpop.f32.mrb[0].mxu0  ;;  %v209_v29 = vpop.f32.mrb[0].mxu1 }
  0xf6   :  { %v190_v30 = vadd.f32 %v189_v28, %v44_v26  ;;  %v210_v31 = vadd.f32 %v209_v29, %v44_v26  ;;  %v191_v32 = vpop.f32.mrb[1].mxu0  ;;  %v211_v33 = vpop.f32.mrb[1].mxu1 }
  0xf7   :  { %v192_v34 = vadd.f32 %v191_v32, %v48_v27  ;;  %v212_v35 = vadd.f32 %v211_v33, %v48_v27  ;;  %v193_v36 = vpop.f32.mrb[2].mxu0  ;;  %v213_v37 = vpop.f32.mrb[2].mxu1 }
  0xf8   :  { %228 = vst [vmem:[%s448_s3] sm:$0xff] %v190_v30  ;;  %236 = vst [vmem:[%s448_s3 + $0x40] sm:$0xff] %v210_v31  ;;  %v194_v38 = vadd.f32 %v193_v36, %v44_v26  ;;  %v214_v39 = vadd.f32 %v213_v37, %v44_v26  ;;  %v195_v40 = vpop.f32.mrb[3].mxu0  ;;  %v215_v41 = vpop.f32.mrb[3].mxu1 }
  0xf9   :  { %229 = vst [vmem:[%s448_s3 + $0x8] sm:$0xff] %v192_v34  ;;  %237 = vst [vmem:[%s448_s3 + $0x48] sm:$0xff] %v212_v35  ;;  %v196_v42 = vadd.f32 %v195_v40, %v48_v27  ;;  %v216_v43 = vadd.f32 %v215_v41, %v48_v27 }
  0xfa   :  { %230 = vst [vmem:[%s448_s3 + $0x10] sm:$0xff] %v194_v38  ;;  %238 = vst [vmem:[%s448_s3 + $0x50] sm:$0xff] %v214_v39 }
  0xfb   :  { %231 = vst [vmem:[%s448_s3 + $0x18] sm:$0xff] %v196_v42  ;;  %239 = vst [vmem:[%s448_s3 + $0x58] sm:$0xff] %v216_v43 }
  0xfd   :  { %v199_v44 = vpop.f32.mrb[4].mxu0  ;;  %v219_v45 = vpop.f32.mrb[4].mxu1 }
  0xfe   :  { %v200_v46 = vadd.f32 %v199_v44, %v44_v26  ;;  %v220_v47 = vadd.f32 %v219_v45, %v44_v26  ;;  %v201_v48 = vpop.f32.mrb[5].mxu0  ;;  %v221_v49 = vpop.f32.mrb[5].mxu1 }
  0xff   :  { %v202_v50 = vadd.f32 %v201_v48, %v48_v27  ;;  %v222_v51 = vadd.f32 %v221_v49, %v48_v27  ;;  %v203_v52 = vpop.f32.mrb[6].mxu0  ;;  %v223_v53 = vpop.f32.mrb[6].mxu1 }
 0x100   :  { %232 = vst [vmem:[%s448_s3 + $0x20] sm:$0xff] %v200_v46  ;;  %240 = vst [vmem:[%s448_s3 + $0x60] sm:$0xff] %v220_v47  ;;  %v204_v54 = vadd.f32 %v203_v52, %v44_v26  ;;  %v224_v55 = vadd.f32 %v223_v53, %v44_v26  ;;  %v205_v56 = vpop.f32.mrb[7].mxu0  ;;  %v225_v57 = vpop.f32.mrb[7].mxu1 }
 0x101   :  { %233 = vst [vmem:[%s448_s3 + $0x28] sm:$0xff] %v202_v50  ;;  %241 = vst [vmem:[%s448_s3 + $0x68] sm:$0xff] %v222_v51  ;;  %v206_v58 = vadd.f32 %v205_v56, %v48_v27  ;;  %v226_v59 = vadd.f32 %v225_v57, %v48_v27 }
 0x102   :  { %234 = vst [vmem:[%s448_s3 + $0x30] sm:$0xff] %v204_v54  ;;  %242 = vst [vmem:[%s448_s3 + $0x70] sm:$0xff] %v224_v55 }
 0x103   :  { %235 = vst [vmem:[%s448_s3 + $0x38] sm:$0xff] %v206_v58  ;;  %243 = vst [vmem:[%s448_s3 + $0x78] sm:$0xff] %v226_v59 }

// kernel: decoder_rnn_forward.3
= control target key start
LH: loop header
LB: loop body
LE: loop exit
PB: predicated region body
PF: predicated region fallthrough
CT: control target
= control target key end

     0   :  { %8 = vsyncpa [#allocation3], 0  ;;  %s574_s12 = smov [#allocation2]   ;;  %s769_s0 = inlined_call_operand.vmem [shape: bf16[64,128], index: 0, kind: input, shape index: {}]   ;;  %s770_s1 = inlined_call_operand.hbm [shape: bf16[128,512], index: 1, kind: input, shape index: {}]   ;;  %s771_s2 = inlined_call_operand.vmem [shape: f32[1,512], index: 2, kind: input, shape index: {}]   ;;  %s772_s3 = inlined_call_operand.vmem [shape: f32[64,512], index: 3, kind: output, shape index: {}]  }
   0x1   :  { %s16_s13 = sshll.u32 %s574_s12, 4  ;;  %s550_s16 = scalar_lea.hbm %s770_s1, 4096  ;;  %s17_s13 = int_to_ptr.vmem [resolvable:$true] %s16_s13 }
   0x2   :  { %p551_p0 = scmp.ne.s32.totalorder %s770_s1, %s550_s16  ;;  %p554_p1 = scmp.lt.u32.totalorder %s550_s16, %s770_s1 }
   0x4   :  { %p556_p2 = pnand %p554_p1, %p551_p0 }
   0x6   :  { %559 = shalt.err (!%p556_p2)
}
   0x7   :  { %s560_s21 = scalar_lea.vmem %s17_s13, 4096  ;;  %p565_p4 = scmp.lt.s32.totalorder %s17_s13, %s17_s13 }
   0x8   :  { %p561_p3 = scmp.ne.s32.totalorder %s17_s13, %s560_s21  ;;  %p566_p5 = scmp.lt.s32.totalorder %s560_s21, %s560_s21 }
   0xa   :  { %p567_p6 = por %p566_p5, %p565_p4 }
   0xc   :  { %p568_p7 = pnand %p567_p6, %p561_p3 }
   0xe   :  { %571 = shalt.err (!%p568_p7)
}
   0xf   :  { %s575_s22 = smov 256   ;;  %s576_s23 = smov 16  }
  0x10   :  { %22 = dma.hbm_to_vmem [thread:$0]  %s770_s1, 4096, %s17_s13, [#allocation3], %s575_s22, %s575_s22, %s576_s23  }
  0x11   :  { %572 = dma.done.wait [#allocation3], 4096  }
  0x12   :  { %573 = vsyncadd [#allocation3], 4294963200  ;;  %v577_v0 = vmov 0   ;;  %v498_v1 = vld [vmem:[#allocation2 + $0x4] ss:$16 sps:$4 sm:$0xff]   ;;  %v547_v34 = vld [vmem:[%s769_s0 + $0x8] sm:$0xff]   ;;  %v71_v37 = vlaneseq }
  0x13   :  { %307 = vmatprep.mubr.bf16.mxu0 %v577_v0  ;;  %380 = vmatprep.mubr.bf16.mxu1 %v577_v0  ;;  %v500_v2 = vld [vmem:[#allocation2 + $0xc] ss:$16 sps:$4 sm:$0xff]   ;;  %v502_v3 = vld [vmem:[#allocation2] ss:$16 sps:$4 sm:$0xff]   ;;  %v503_v4 = vld [vmem:[#allocation2 + $0x8] ss:$16 sps:$4 sm:$0xff]  }
  0x14   :  { %275 = vmatprep.subr.bf16.mxu0 %v498_v1  ;;  %348 = vmatprep.subr.bf16.mxu1 %v500_v2  ;;  %v504_v5 = vld [vmem:[#allocation2 + $0x24] ss:$16 sps:$4 sm:$0xff]   ;;  %v506_v6 = vld [vmem:[#allocation2 + $0x2c] ss:$16 sps:$4 sm:$0xff]   ;;  %v508_v7 = vld [vmem:[#allocation2 + $0x20] ss:$16 sps:$4 sm:$0xff]  }
  0x15   :  { %276 = vmatpush1.bf16.msra.mxu0 %v502_v3  ;;  %349 = vmatpush1.bf16.msra.mxu1 %v503_v4  ;;  %v509_v8 = vld [vmem:[#allocation2 + $0x28] ss:$16 sps:$4 sm:$0xff]   ;;  %v510_v9 = vld [vmem:[#allocation2 + $0x44] ss:$16 sps:$4 sm:$0xff]   ;;  %v512_v10 = vld [vmem:[#allocation2 + $0x4c] ss:$16 sps:$4 sm:$0xff]  }
  0x16   :  { %277 = vmatprep.subr.bf16.mxu0 %v504_v5  ;;  %350 = vmatprep.subr.bf16.mxu1 %v506_v6  ;;  %v514_v11 = vld [vmem:[#allocation2 + $0x40] ss:$16 sps:$4 sm:$0xff]   ;;  %v515_v12 = vld [vmem:[#allocation2 + $0x48] ss:$16 sps:$4 sm:$0xff]   ;;  %v516_v13 = vld [vmem:[#allocation2 + $0x64] ss:$16 sps:$4 sm:$0xff]  }
  0x17   :  { %v518_v14 = vld [vmem:[#allocation2 + $0x6c] ss:$16 sps:$4 sm:$0xff]   ;;  %v520_v15 = vld [vmem:[#allocation2 + $0x60] ss:$16 sps:$4 sm:$0xff]   ;;  %v521_v16 = vld [vmem:[#allocation2 + $0x68] ss:$16 sps:$4 sm:$0xff]  }
  0x18   :  { %v522_v17 = vld [vmem:[#allocation2 + $0x84] ss:$16 sps:$4 sm:$0xff]   ;;  %v524_v18 = vld [vmem:[#allocation2 + $0x8c] ss:$16 sps:$4 sm:$0xff]   ;;  %v526_v19 = vld [vmem:[#allocation2 + $0x80] ss:$16 sps:$4 sm:$0xff]  }
  0x19   :  { %278 = vmatpush1.bf16.msra.mxu0 %v508_v7  ;;  %351 = vmatpush1.bf16.msra.mxu1 %v509_v8  ;;  %v527_v20 = vld [vmem:[#allocation2 + $0x88] ss:$16 sps:$4 sm:$0xff]   ;;  %v528_v21 = vld [vmem:[#allocation2 + $0xa4] ss:$16 sps:$4 sm:$0xff]   ;;  %v530_v22 = vld [vmem:[#allocation2 + $0xac] ss:$16 sps:$4 sm:$0xff]  }
  0x1a   :  { %279 = vmatprep.subr.bf16.mxu0 %v510_v9  ;;  %352 = vmatprep.subr.bf16.mxu1 %v512_v10  ;;  %v532_v23 = vld [vmem:[#allocation2 + $0xa0] ss:$16 sps:$4 sm:$0xff]   ;;  %v533_v24 = vld [vmem:[#allocation2 + $0xa8] ss:$16 sps:$4 sm:$0xff]   ;;  %v534_v25 = vld [vmem:[#allocation2 + $0xc4] ss:$16 sps:$4 sm:$0xff]  }
  0x1b   :  { %v536_v26 = vld [vmem:[#allocation2 + $0xcc] ss:$16 sps:$4 sm:$0xff]   ;;  %v538_v27 = vld [vmem:[#allocation2 + $0xc0] ss:$16 sps:$4 sm:$0xff]   ;;  %v539_v28 = vld [vmem:[#allocation2 + $0xc8] ss:$16 sps:$4 sm:$0xff]  }
  0x1c   :  { %v540_v29 = vld [vmem:[#allocation2 + $0xe4] ss:$16 sps:$4 sm:$0xff]   ;;  %v542_v30 = vld [vmem:[#allocation2 + $0xec] ss:$16 sps:$4 sm:$0xff]   ;;  %v544_v31 = vld [vmem:[#allocation2 + $0xe0] ss:$16 sps:$4 sm:$0xff]  }
  0x1d   :  { %280 = vmatpush1.bf16.msra.mxu0 %v514_v11  ;;  %353 = vmatpush1.bf16.msra.mxu1 %v515_v12  ;;  %v545_v32 = vld [vmem:[#allocation2 + $0xe8] ss:$16 sps:$4 sm:$0xff]   ;;  %v546_v33 = vld [vmem:[%s769_s0] sm:$0xff]   ;;  %v548_v35 = vld [vmem:[%s769_s0 + $0x10] sm:$0xff]   ;;  %v72_v38 = vshrl.u32 %v71_v37, 7 }
  0x1e   :  { %281 = vmatprep.subr.bf16.mxu0 %v516_v13  ;;  %354 = vmatprep.subr.bf16.mxu1 %v518_v14  ;;  %v549_v36 = vld [vmem:[%s769_s0 + $0x18] sm:$0xff]   ;;  %v69_v41 = vld [vmem:[%s771_s2] sm:$0xf] }
  0x1f   :  { %v73_v39 = vsub.s32 0, %v72_v38  ;;  %v81_v40 = vsub.s32 2, %v72_v38  ;;  %v77_v42 = vsub.s32 1, %v72_v38  ;;  %v85_v43 = vsub.s32 3, %v72_v38 }
  0x21   :  { %282 = vmatpush1.bf16.msra.mxu0 %v520_v15  ;;  %355 = vmatpush1.bf16.msra.mxu1 %v521_v16  ;;  %v633_v44 = vrot.slane %v69_v41, %v73_v39  ;;  %v635_v45 = vrot.slane %v69_v41, %v81_v40  ;;  %v637_v46 = vrot.slane %v69_v41, %v77_v42 }
  0x22   :  { %283 = vmatprep.subr.bf16.mxu0 %v522_v17  ;;  %356 = vmatprep.subr.bf16.mxu1 %v524_v18  ;;  %v639_v47 = vrot.slane %v69_v41, %v85_v43 }
  0x25   :  { %284 = vmatpush1.bf16.msra.mxu0 %v526_v19  ;;  %357 = vmatpush1.bf16.msra.mxu1 %v527_v20 }
  0x26   :  { %285 = vmatprep.subr.bf16.mxu0 %v528_v21  ;;  %358 = vmatprep.subr.bf16.mxu1 %v530_v22 }
  0x29   :  { %286 = vmatpush1.bf16.msra.mxu0 %v532_v23  ;;  %359 = vmatpush1.bf16.msra.mxu1 %v533_v24 }
  0x2a   :  { %287 = vmatprep.subr.bf16.mxu0 %v534_v25  ;;  %360 = vmatprep.subr.bf16.mxu1 %v536_v26 }
  0x2d   :  { %288 = vmatpush1.bf16.msra.mxu0 %v538_v27  ;;  %361 = vmatpush1.bf16.msra.mxu1 %v539_v28 }
  0x2e   :  { %289 = vmatprep.subr.bf16.mxu0 %v540_v29  ;;  %362 = vmatprep.subr.bf16.mxu1 %v542_v30 }
  0x31   :  { %290 = vmatpush1.bf16.msra.mxu0 %v544_v31  ;;  %363 = vmatpush1.bf16.msra.mxu1 %v545_v32 }
  0x34   :  { %308 = vmatmul.mubr.bf16.vlgmr.msra.gmra.mrb[0].mxu0 %v546_v33  ;;  %381 = vmatmul.mubr.bf16.vlgmr.msra.gmra.mrb[0].mxu1 %v546_v33 }
  0x35   :  { %317 = vmatprep.mubr.bf16.mxu0 %v577_v0  ;;  %390 = vmatprep.mubr.bf16.mxu1 %v577_v0 }
  0x3c   :  { %318 = vmatmul.mubr.bf16.gmra.mrb[4].mxu0 %v547_v34  ;;  %391 = vmatmul.mubr.bf16.gmra.mrb[4].mxu1 %v547_v34 }
  0x3d   :  { %327 = vmatprep.mubr.bf16.mxu0 %v577_v0  ;;  %400 = vmatprep.mubr.bf16.mxu1 %v577_v0 }
  0x44   :  { %328 = vmatmul.mubr.bf16.gmra.mrb[8].mxu0 %v548_v35  ;;  %401 = vmatmul.mubr.bf16.gmra.mrb[8].mxu1 %v548_v35 }
  0x45   :  { %337 = vmatprep.mubr.bf16.mxu0 %v577_v0  ;;  %410 = vmatprep.mubr.bf16.mxu1 %v577_v0 }
  0x4c   :  { %338 = vmatmul.mubr.bf16.gmra.mrb[12].mxu0 %v549_v36  ;;  %411 = vmatmul.mubr.bf16.gmra.mrb[12].mxu1 %v549_v36 }
 0x107   :  { %v309_v48 = vpop.f32.mrb[0].mxu0  ;;  %v382_v49 = vpop.f32.mrb[0].mxu1 }
 0x108   :  { %v310_v50 = vadd.f32 %v309_v48, %v633_v44  ;;  %v383_v51 = vadd.f32 %v382_v49, %v635_v45  ;;  %v311_v52 = vpop.f32.mrb[1].mxu0  ;;  %v384_v53 = vpop.f32.mrb[1].mxu1 }
 0x109   :  { %v312_v54 = vadd.f32 %v311_v52, %v637_v46  ;;  %v385_v55 = vadd.f32 %v384_v53, %v639_v47  ;;  %v313_v56 = vpop.f32.mrb[2].mxu0  ;;  %v386_v57 = vpop.f32.mrb[2].mxu1 }
 0x10a   :  { %421 = vst [vmem:[%s772_s3] sm:$0xff] %v310_v50  ;;  %423 = vst [vmem:[%s772_s3 + $0x10] sm:$0xff] %v383_v51  ;;  %v314_v58 = vadd.f32 %v313_v56, %v633_v44  ;;  %v387_v59 = vadd.f32 %v386_v57, %v635_v45  ;;  %v315_v60 = vpop.f32.mrb[3].mxu0  ;;  %v388_v61 = vpop.f32.mrb[3].mxu1 }
 0x10b   :  { %422 = vst [vmem:[%s772_s3 + $0x8] sm:$0xff] %v312_v54  ;;  %424 = vst [vmem:[%s772_s3 + $0x18] sm:$0xff] %v385_v55  ;;  %v316_v62 = vadd.f32 %v315_v60, %v637_v46  ;;  %v389_v63 = vadd.f32 %v388_v61, %v639_v47 }
 0x10c   :  { %425 = vst [vmem:[%s772_s3 + $0x20] sm:$0xff] %v314_v58  ;;  %427 = vst [vmem:[%s772_s3 + $0x30] sm:$0xff] %v387_v59 }
 0x10d   :  { %426 = vst [vmem:[%s772_s3 + $0x28] sm:$0xff] %v316_v62  ;;  %428 = vst [vmem:[%s772_s3 + $0x38] sm:$0xff] %v389_v63 }
 0x10f   :  { %v319_v0 = vpop.f32.mrb[4].mxu0  ;;  %v392_v1 = vpop.f32.mrb[4].mxu1 }
 0x110   :  { %v320_v2 = vadd.f32 %v319_v0, %v633_v44  ;;  %v393_v3 = vadd.f32 %v392_v1, %v635_v45  ;;  %v321_v4 = vpop.f32.mrb[5].mxu0  ;;  %v394_v5 = vpop.f32.mrb[5].mxu1 }
 0x111   :  { %v322_v6 = vadd.f32 %v321_v4, %v637_v46  ;;  %v395_v7 = vadd.f32 %v394_v5, %v639_v47  ;;  %v323_v8 = vpop.f32.mrb[6].mxu0  ;;  %v396_v9 = vpop.f32.mrb[6].mxu1 }
 0x112   :  { %429 = vst [vmem:[%s772_s3 + $0x40] sm:$0xff] %v320_v2  ;;  %431 = vst [vmem:[%s772_s3 + $0x50] sm:$0xff] %v393_v3  ;;  %v324_v10 = vadd.f32 %v323_v8, %v633_v44  ;;  %v397_v11 = vadd.f32 %v396_v9, %v635_v45  ;;  %v325_v12 = vpop.f32.mrb[7].mxu0  ;;  %v398_v13 = vpop.f32.mrb[7].mxu1 }
 0x113   :  { %430 = vst [vmem:[%s772_s3 + $0x48] sm:$0xff] %v322_v6  ;;  %432 = vst [vmem:[%s772_s3 + $0x58] sm:$0xff] %v395_v7  ;;  %v326_v14 = vadd.f32 %v325_v12, %v637_v46  ;;  %v399_v15 = vadd.f32 %v398_v13, %v639_v47 }
 0x114   :  { %433 = vst [vmem:[%s772_s3 + $0x60] sm:$0xff] %v324_v10  ;;  %435 = vst [vmem:[%s772_s3 + $0x70] sm:$0xff] %v397_v11 }
 0x115   :  { %434 = vst [vmem:[%s772_s3 + $0x68] sm:$0xff] %v326_v14  ;;  %436 = vst [vmem:[%s772_s3 + $0x78] sm:$0xff] %v399_v15 }
 0x117   :  { %v329_v16 = vpop.f32.mrb[8].mxu0  ;;  %v402_v17 = vpop.f32.mrb[8].mxu1 }
 0x118   :  { %v330_v18 = vadd.f32 %v329_v16, %v633_v44  ;;  %v403_v19 = vadd.f32 %v402_v17, %v635_v45  ;;  %v331_v20 = vpop.f32.mrb[9].mxu0  ;;  %v404_v21 = vpop.f32.mrb[9].mxu1 }
 0x119   :  { %v332_v22 = vadd.f32 %v331_v20, %v637_v46  ;;  %v405_v23 = vadd.f32 %v404_v21, %v639_v47  ;;  %v333_v24 = vpop.f32.mrb[10].mxu0  ;;  %v406_v25 = vpop.f32.mrb[10].mxu1 }
 0x11a   :  { %437 = vst [vmem:[%s772_s3 + $0x80] sm:$0xff] %v330_v18  ;;  %439 = vst [vmem:[%s772_s3 + $0x90] sm:$0xff] %v403_v19  ;;  %v334_v26 = vadd.f32 %v333_v24, %v633_v44  ;;  %v407_v27 = vadd.f32 %v406_v25, %v635_v45  ;;  %v335_v28 = vpop.f32.mrb[11].mxu0  ;;  %v408_v29 = vpop.f32.mrb[11].mxu1 }
 0x11b   :  { %438 = vst [vmem:[%s772_s3 + $0x88] sm:$0xff] %v332_v22  ;;  %440 = vst [vmem:[%s772_s3 + $0x98] sm:$0xff] %v405_v23  ;;  %v336_v30 = vadd.f32 %v335_v28, %v637_v46  ;;  %v409_v31 = vadd.f32 %v408_v29, %v639_v47 }
 0x11c   :  { %441 = vst [vmem:[%s772_s3 + $0xa0] sm:$0xff] %v334_v26  ;;  %443 = vst [vmem:[%s772_s3 + $0xb0] sm:$0xff] %v407_v27 }
 0x11d   :  { %442 = vst [vmem:[%s772_s3 + $0xa8] sm:$0xff] %v336_v30  ;;  %444 = vst [vmem:[%s772_s3 + $0xb8] sm:$0xff] %v409_v31 }
 0x11f   :  { %v339_v32 = vpop.f32.mrb[12].mxu0  ;;  %v412_v33 = vpop.f32.mrb[12].mxu1 }
 0x120   :  { %v340_v34 = vadd.f32 %v339_v32, %v633_v44  ;;  %v413_v35 = vadd.f32 %v412_v33, %v635_v45  ;;  %v341_v36 = vpop.f32.mrb[13].mxu0  ;;  %v414_v37 = vpop.f32.mrb[13].mxu1 }
 0x121   :  { %v342_v38 = vadd.f32 %v341_v36, %v637_v46  ;;  %v415_v39 = vadd.f32 %v414_v37, %v639_v47  ;;  %v343_v40 = vpop.f32.mrb[14].mxu0  ;;  %v416_v41 = vpop.f32.mrb[14].mxu1 }
 0x122   :  { %445 = vst [vmem:[%s772_s3 + $0xc0] sm:$0xff] %v340_v34  ;;  %447 = vst [vmem:[%s772_s3 + $0xd0] sm:$0xff] %v413_v35  ;;  %v344_v42 = vadd.f32 %v343_v40, %v633_v44  ;;  %v417_v43 = vadd.f32 %v416_v41, %v635_v45  ;;  %v345_v48 = vpop.f32.mrb[15].mxu0  ;;  %v418_v49 = vpop.f32.mrb[15].mxu1 }
 0x123   :  { %446 = vst [vmem:[%s772_s3 + $0xc8] sm:$0xff] %v342_v38  ;;  %448 = vst [vmem:[%s772_s3 + $0xd8] sm:$0xff] %v415_v39  ;;  %v346_v50 = vadd.f32 %v345_v48, %v637_v46  ;;  %v419_v51 = vadd.f32 %v418_v49, %v639_v47 }
 0x124   :  { %449 = vst [vmem:[%s772_s3 + $0xe0] sm:$0xff] %v344_v42  ;;  %451 = vst [vmem:[%s772_s3 + $0xf0] sm:$0xff] %v417_v43 }
 0x125   :  { %450 = vst [vmem:[%s772_s3 + $0xe8] sm:$0xff] %v346_v50  ;;  %452 = vst [vmem:[%s772_s3 + $0xf8] sm:$0xff] %v419_v51 }
 0x126   :  { %457 = vsyncpa [#allocation3], 1 }

// kernel: decoder_rnn_forward.4
= control target key start
LH: loop header
LB: loop body
LE: loop exit
PB: predicated region body
PF: predicated region fallthrough
CT: control target
= control target key end

     0   :  { %10 = vsyncpa [#allocation5], 0  ;;  %s16021_s18 = smov [#allocation4]   ;;  %s19687_s0 = inlined_call_operand.vmem [shape: f32[8,8,512], index: 0, kind: input, shape index: {}]   ;;  %s19688_s1 = inlined_call_operand.vmem [shape: bf16[128,512], index: 1, kind: input, shape index: {}]   ;;  %s19689_s2 = inlined_call_operand.vmem [shape: bf16[128,512], index: 2, kind: input, shape index: {}]   ;;  %s19690_s3 = inlined_call_operand.hbm [shape: bf16[128,512], index: 3, kind: input, shape index: {}]   ;;  %s19691_s4 = inlined_call_operand.vmem [shape: f32[1,512], index: 4, kind: input, shape index: {}]   ;;  %s19692_s5 = inlined_call_operand.vmem [shape: bf16[8,8,128], index: 5, kind: output, shape index: {}]  }
   0x1   :  { %s22_s19 = sshll.u32 %s16021_s18, 4  ;;  %s15997_s22 = scalar_lea.hbm %s19690_s3, 4096  ;;  %s23_s19 = int_to_ptr.vmem [resolvable:$true] %s22_s19 }
   0x2   :  { %p15998_p0 = scmp.ne.s32.totalorder %s19690_s3, %s15997_s22  ;;  %p16001_p1 = scmp.lt.u32.totalorder %s15997_s22, %s19690_s3 }
   0x4   :  { %p16003_p2 = pnand %p16001_p1, %p15998_p0 }
   0x6   :  { %16006 = shalt.err (!%p16003_p2)
}
   0x7   :  { %s16007_s27 = scalar_lea.vmem %s23_s19, 4096  ;;  %p16012_p4 = scmp.lt.s32.totalorder %s23_s19, %s23_s19 }
   0x8   :  { %p16008_p3 = scmp.ne.s32.totalorder %s23_s19, %s16007_s27  ;;  %p16013_p5 = scmp.lt.s32.totalorder %s16007_s27, %s16007_s27 }
   0xa   :  { %p16014_p6 = por %p16013_p5, %p16012_p4 }
   0xc   :  { %p16015_p7 = pnand %p16014_p6, %p16008_p3 }
   0xe   :  { %16018 = shalt.err (!%p16015_p7)
}
   0xf   :  { %s16022_s28 = smov 256   ;;  %s16023_s29 = smov 16  }
  0x10   :  { %28 = dma.hbm_to_vmem [thread:$0]  %s19690_s3, 4096, %s23_s19, [#allocation5], %s16022_s28, %s16022_s28, %s16023_s29  }
  0x11   :  { %16019 = dma.done.wait [#allocation5], 4096  }
  0x12   :  { %16020 = vsyncadd [#allocation5], 4294963200  ;;  %v16024_v0 = vmov 0   ;;  %v13697_v1 = vld [vmem:[%s19688_s1 + $0x4] ss:$16 sps:$4 sm:$0xff]   ;;  %vm769_vm0 = vcmask 1041409  }
  0x13   :  { %283 = vmatprep.mubr.bf16.mxu0 %v16024_v0  ;;  %39 = vst [vmem:[#allocation2] sm:$0xf] %v16024_v0  ;;  %40 = vst [vmem:[#allocation2 + $0x4] sm:$0xf] %v16024_v0  ;;  %324 = vmatprep.mubr.bf16.mxu1 %v16024_v0  ;;  %v13699_v2 = vld [vmem:[%s19688_s1 + $0xc] ss:$16 sps:$4 sm:$0xff]  }
  0x14   :  { %251 = vmatprep.subr.bf16.mxu0 %v13697_v1  ;;  %v13701_v3 = vld [vmem:[%s19688_s1] ss:$16 sps:$4 sm:$0xff]   ;;  %v13702_v4 = vld [vmem:[%s19688_s1 + $0x8] ss:$16 sps:$4 sm:$0xff]   ;;  %292 = vmatprep.subr.bf16.mxu1 %v13699_v2  ;;  %v13703_v5 = vld [vmem:[%s19688_s1 + $0x24] ss:$16 sps:$4 sm:$0xff]  }
  0x15   :  { %252 = vmatpush1.bf16.msra.mxu0 %v13701_v3  ;;  %293 = vmatpush1.bf16.msra.mxu1 %v13702_v4  ;;  %v13705_v6 = vld [vmem:[%s19688_s1 + $0x2c] ss:$16 sps:$4 sm:$0xff]   ;;  %v13707_v7 = vld [vmem:[%s19688_s1 + $0x20] ss:$16 sps:$4 sm:$0xff]   ;;  %v13708_v8 = vld [vmem:[%s19688_s1 + $0x28] ss:$16 sps:$4 sm:$0xff]  }
  0x16   :  { %253 = vmatprep.subr.bf16.mxu0 %v13703_v5  ;;  %294 = vmatprep.subr.bf16.mxu1 %v13705_v6  ;;  %v13709_v9 = vld [vmem:[%s19688_s1 + $0x44] ss:$16 sps:$4 sm:$0xff]   ;;  %v13711_v10 = vld [vmem:[%s19688_s1 + $0x4c] ss:$16 sps:$4 sm:$0xff]   ;;  %v13713_v11 = vld [vmem:[%s19688_s1 + $0x40] ss:$16 sps:$4 sm:$0xff]  }
  0x17   :  { %v13714_v12 = vld [vmem:[%s19688_s1 + $0x48] ss:$16 sps:$4 sm:$0xff]   ;;  %v13715_v13 = vld [vmem:[%s19688_s1 + $0x64] ss:$16 sps:$4 sm:$0xff]   ;;  %v13717_v14 = vld [vmem:[%s19688_s1 + $0x6c] ss:$16 sps:$4 sm:$0xff]  }
  0x18   :  { %v13719_v15 = vld [vmem:[%s19688_s1 + $0x60] ss:$16 sps:$4 sm:$0xff]   ;;  %v13720_v16 = vld [vmem:[%s19688_s1 + $0x68] ss:$16 sps:$4 sm:$0xff]   ;;  %v13721_v17 = vld [vmem:[%s19688_s1 + $0x84] ss:$16 sps:$4 sm:$0xff]  }
  0x19   :  { %254 = vmatpush1.bf16.msra.mxu0 %v13707_v7  ;;  %295 = vmatpush1.bf16.msra.mxu1 %v13708_v8  ;;  %v13723_v18 = vld [vmem:[%s19688_s1 + $0x8c] ss:$16 sps:$4 sm:$0xff]   ;;  %v13725_v19 = vld [vmem:[%s19688_s1 + $0x80] ss:$16 sps:$4 sm:$0xff]   ;;  %v13726_v20 = vld [vmem:[%s19688_s1 + $0x88] ss:$16 sps:$4 sm:$0xff]  }
  0x1a   :  { %255 = vmatprep.subr.bf16.mxu0 %v13709_v9  ;;  %296 = vmatprep.subr.bf16.mxu1 %v13711_v10  ;;  %v13727_v21 = vld [vmem:[%s19688_s1 + $0xa4] ss:$16 sps:$4 sm:$0xff]   ;;  %v13729_v22 = vld [vmem:[%s19688_s1 + $0xac] ss:$16 sps:$4 sm:$0xff]   ;;  %v13731_v23 = vld [vmem:[%s19688_s1 + $0xa0] ss:$16 sps:$4 sm:$0xff]  }
  0x1b   :  { %v13732_v24 = vld [vmem:[%s19688_s1 + $0xa8] ss:$16 sps:$4 sm:$0xff]   ;;  %v13733_v25 = vld [vmem:[%s19688_s1 + $0xc4] ss:$16 sps:$4 sm:$0xff]   ;;  %v13735_v26 = vld [vmem:[%s19688_s1 + $0xcc] ss:$16 sps:$4 sm:$0xff]  }
  0x1c   :  { %v13737_v27 = vld [vmem:[%s19688_s1 + $0xc0] ss:$16 sps:$4 sm:$0xff]   ;;  %v13738_v28 = vld [vmem:[%s19688_s1 + $0xc8] ss:$16 sps:$4 sm:$0xff]   ;;  %v13739_v29 = vld [vmem:[%s19688_s1 + $0xe4] ss:$16 sps:$4 sm:$0xff]  }
  0x1d   :  { %256 = vmatpush1.bf16.msra.mxu0 %v13713_v11  ;;  %297 = vmatpush1.bf16.msra.mxu1 %v13714_v12  ;;  %v13741_v30 = vld [vmem:[%s19688_s1 + $0xec] ss:$16 sps:$4 sm:$0xff]   ;;  %v13743_v31 = vld [vmem:[%s19688_s1 + $0xe0] ss:$16 sps:$4 sm:$0xff]   ;;  %v13744_v32 = vld [vmem:[%s19688_s1 + $0xe8] ss:$16 sps:$4 sm:$0xff]  }
  0x1e   :  { %257 = vmatprep.subr.bf16.mxu0 %v13715_v13  ;;  %298 = vmatprep.subr.bf16.mxu1 %v13717_v14  ;;  %v58_v33 = vld [vmem:[#allocation2] sm:$0xf]  ;;  %v13747_v34 = vld [vmem:[#allocation4 + $0x4] ss:$16 sps:$4 sm:$0xff]   ;;  %v13750_v35 = vld [vmem:[#allocation4 + $0xc] ss:$16 sps:$4 sm:$0xff]  }
  0x1f   :  { %v13745_v36 = vld [vmem:[#allocation4] ss:$16 sps:$4 sm:$0xff]   ;;  %v13748_v37 = vld [vmem:[#allocation4 + $0x8] ss:$16 sps:$4 sm:$0xff]   ;;  %v13753_v38 = vld [vmem:[#allocation4 + $0x24] ss:$16 sps:$4 sm:$0xff]  }
  0x20   :  { %v13756_v39 = vld [vmem:[#allocation4 + $0x2c] ss:$16 sps:$4 sm:$0xff]   ;;  %v13751_v40 = vld [vmem:[#allocation4 + $0x20] ss:$16 sps:$4 sm:$0xff]   ;;  %v13754_v41 = vld [vmem:[#allocation4 + $0x28] ss:$16 sps:$4 sm:$0xff]  }
  0x21   :  { %258 = vmatpush1.bf16.msra.mxu0 %v13719_v15  ;;  %299 = vmatpush1.bf16.msra.mxu1 %v13720_v16  ;;  %v13759_v42 = vld [vmem:[#allocation4 + $0x44] ss:$16 sps:$4 sm:$0xff]   ;;  %v13762_v43 = vld [vmem:[#allocation4 + $0x4c] ss:$16 sps:$4 sm:$0xff]   ;;  %v13757_v44 = vld [vmem:[#allocation4 + $0x40] ss:$16 sps:$4 sm:$0xff]  }
  0x22   :  { %259 = vmatprep.subr.bf16.mxu0 %v13721_v17  ;;  %300 = vmatprep.subr.bf16.mxu1 %v13723_v18  ;;  %v13760_v45 = vld [vmem:[#allocation4 + $0x48] ss:$16 sps:$4 sm:$0xff]   ;;  %v13765_v46 = vld [vmem:[#allocation4 + $0x64] ss:$16 sps:$4 sm:$0xff]   ;;  %v13768_v47 = vld [vmem:[#allocation4 + $0x6c] ss:$16 sps:$4 sm:$0xff]  }
  0x23   :  { %v13763_v48 = vld [vmem:[#allocation4 + $0x60] ss:$16 sps:$4 sm:$0xff]   ;;  %v13766_v49 = vld [vmem:[#allocation4 + $0x68] ss:$16 sps:$4 sm:$0xff]   ;;  %v13771_v50 = vld [vmem:[#allocation4 + $0x84] ss:$16 sps:$4 sm:$0xff]  }
  0x24   :  { %v13774_v51 = vld [vmem:[#allocation4 + $0x8c] ss:$16 sps:$4 sm:$0xff]   ;;  %v13769_v52 = vld [vmem:[#allocation4 + $0x80] ss:$16 sps:$4 sm:$0xff]   ;;  %v13772_v53 = vld [vmem:[#allocation4 + $0x88] ss:$16 sps:$4 sm:$0xff]  }
  0x25   :  { %260 = vmatpush1.bf16.msra.mxu0 %v13725_v19  ;;  %301 = vmatpush1.bf16.msra.mxu1 %v13726_v20  ;;  %v13777_v54 = vld [vmem:[#allocation4 + $0xa4] ss:$16 sps:$4 sm:$0xff]   ;;  %v13780_v55 = vld [vmem:[#allocation4 + $0xac] ss:$16 sps:$4 sm:$0xff]   ;;  %v13775_v56 = vld [vmem:[#allocation4 + $0xa0] ss:$16 sps:$4 sm:$0xff]  }
  0x26   :  { %261 = vmatprep.subr.bf16.mxu0 %v13727_v21  ;;  %302 = vmatprep.subr.bf16.mxu1 %v13729_v22  ;;  %v13778_v57 = vld [vmem:[#allocation4 + $0xa8] ss:$16 sps:$4 sm:$0xff]   ;;  %v13783_v58 = vld [vmem:[#allocation4 + $0xc4] ss:$16 sps:$4 sm:$0xff]   ;;  %v13786_v59 = vld [vmem:[#allocation4 + $0xcc] ss:$16 sps:$4 sm:$0xff]  }
  0x27   :  { %v13781_v60 = vld [vmem:[#allocation4 + $0xc0] ss:$16 sps:$4 sm:$0xff]   ;;  %v13784_v61 = vld [vmem:[#allocation4 + $0xc8] ss:$16 sps:$4 sm:$0xff]   ;;  %v13789_v63 = vld [vmem:[#allocation4 + $0xe4] ss:$16 sps:$4 sm:$0xff]  }
  0x28   :  { %v13787_v62 = vld [vmem:[#allocation4 + $0xe0] ss:$16 sps:$4 sm:$0xff]   ;;  %v13790_v1 = vld [vmem:[#allocation4 + $0xe8] ss:$16 sps:$4 sm:$0xff]   ;;  %v13792_v2 = vld [vmem:[#allocation4 + $0xec] ss:$16 sps:$4 sm:$0xff]  }
  0x29   :  { %262 = vmatpush1.bf16.msra.mxu0 %v13731_v23  ;;  %303 = vmatpush1.bf16.msra.mxu1 %v13732_v24  ;;  %v13795_v3 = vld [vmem:[%s19689_s2 + $0x4] ss:$16 sps:$4 sm:$0xff]   ;;  %v13798_v4 = vld [vmem:[%s19689_s2 + $0xc] ss:$16 sps:$4 sm:$0xff]   ;;  %v13793_v6 = vld [vmem:[%s19689_s2] ss:$16 sps:$4 sm:$0xff]  }
  0x2a   :  { %263 = vmatprep.subr.bf16.mxu0 %v13733_v25  ;;  %304 = vmatprep.subr.bf16.mxu1 %v13735_v26  ;;  %v884_v5 = vld [vmem:[#allocation2 + $0x4] sm:$0xf]  ;;  %v13796_v7 = vld [vmem:[%s19689_s2 + $0x8] ss:$16 sps:$4 sm:$0xff]   ;;  %v13804_v9 = vld [vmem:[%s19689_s2 + $0x2c] ss:$16 sps:$4 sm:$0xff]  }
  0x2b   :  { %v13801_v8 = vld [vmem:[%s19689_s2 + $0x24] ss:$16 sps:$4 sm:$0xff]   ;;  %v13799_v10 = vld [vmem:[%s19689_s2 + $0x20] ss:$16 sps:$4 sm:$0xff]   ;;  %v13802_v11 = vld [vmem:[%s19689_s2 + $0x28] ss:$16 sps:$4 sm:$0xff]  }
  0x2c   :  { %v13807_v12 = vld [vmem:[%s19689_s2 + $0x44] ss:$16 sps:$4 sm:$0xff]   ;;  %v13810_v13 = vld [vmem:[%s19689_s2 + $0x4c] ss:$16 sps:$4 sm:$0xff]   ;;  %v13805_v14 = vld [vmem:[%s19689_s2 + $0x40] ss:$16 sps:$4 sm:$0xff]  }
  0x2d   :  { %264 = vmatpush1.bf16.msra.mxu0 %v13737_v27  ;;  %305 = vmatpush1.bf16.msra.mxu1 %v13738_v28  ;;  %v13808_v15 = vld [vmem:[%s19689_s2 + $0x48] ss:$16 sps:$4 sm:$0xff]   ;;  %v13813_v16 = vld [vmem:[%s19689_s2 + $0x64] ss:$16 sps:$4 sm:$0xff]   ;;  %v13816_v17 = vld [vmem:[%s19689_s2 + $0x6c] ss:$16 sps:$4 sm:$0xff]  }
  0x2e   :  { %265 = vmatprep.subr.bf16.mxu0 %v13739_v29  ;;  %306 = vmatprep.subr.bf16.mxu1 %v13741_v30  ;;  %v13811_v18 = vld [vmem:[%s19689_s2 + $0x60] ss:$16 sps:$4 sm:$0xff]   ;;  %v13814_v19 = vld [vmem:[%s19689_s2 + $0x68] ss:$16 sps:$4 sm:$0xff]   ;;  %v13819_v20 = vld [vmem:[%s19689_s2 + $0x84] ss:$16 sps:$4 sm:$0xff]  }
  0x2f   :  { %v13822_v21 = vld [vmem:[%s19689_s2 + $0x8c] ss:$16 sps:$4 sm:$0xff]   ;;  %v13817_v22 = vld [vmem:[%s19689_s2 + $0x80] ss:$16 sps:$4 sm:$0xff]   ;;  %v13820_v23 = vld [vmem:[%s19689_s2 + $0x88] ss:$16 sps:$4 sm:$0xff]  }
  0x30   :  { %v13825_v24 = vld [vmem:[%s19689_s2 + $0xa4] ss:$16 sps:$4 sm:$0xff]   ;;  %v13828_v25 = vld [vmem:[%s19689_s2 + $0xac] ss:$16 sps:$4 sm:$0xff]   ;;  %v13823_v26 = vld [vmem:[%s19689_s2 + $0xa0] ss:$16 sps:$4 sm:$0xff]  }
  0x31   :  { %266 = vmatpush1.bf16.msra.mxu0 %v13743_v31  ;;  %307 = vmatpush1.bf16.msra.mxu1 %v13744_v32  ;;  %v13826_v27 = vld [vmem:[%s19689_s2 + $0xa8] ss:$16 sps:$4 sm:$0xff]   ;;  %v13831_v28 = vld [vmem:[%s19689_s2 + $0xc4] ss:$16 sps:$4 sm:$0xff]   ;;  %v13834_v29 = vld [vmem:[%s19689_s2 + $0xcc] ss:$16 sps:$4 sm:$0xff]  }
  0x32   :  { %1077 = vmatprep.subr.bf16.mxu0 %v13747_v34  ;;  %1118 = vmatprep.subr.bf16.mxu1 %v13750_v35  ;;  %v13829_v30 = vld [vmem:[%s19689_s2 + $0xc0] ss:$16 sps:$4 sm:$0xff]   ;;  %v13832_v31 = vld [vmem:[%s19689_s2 + $0xc8] ss:$16 sps:$4 sm:$0xff]   ;;  %v13837_v32 = vld [vmem:[%s19689_s2 + $0xe4] ss:$16 sps:$4 sm:$0xff]  }
  0x33   :  { %v13835_v34 = vld [vmem:[%s19689_s2 + $0xe0] ss:$16 sps:$4 sm:$0xff]   ;;  %v13838_v35 = vld [vmem:[%s19689_s2 + $0xe8] ss:$16 sps:$4 sm:$0xff]   ;;  %vm772_vm1 = vcmask 1042434   ;;  %vm775_vm2 = vcmask 1043459  }
  0x34   :  { %284 = vmatmul.mubr.bf16.vlgmr.msra.gmra.mrb[0].mxu0 %v58_v33  ;;  %325 = vmatmul.mubr.bf16.vlgmr.msra.gmra.mrb[0].mxu1 %v58_v33  ;;  %v13840_v33 = vld [vmem:[%s19689_s2 + $0xec] ss:$16 sps:$4 sm:$0xff]   ;;  %vm778_vm3 = vcmask 1044484   ;;  %vm781_vm4 = vcmask 1045509   ;;  %vm784_vm5 = vcmask 1046534   ;;  %vm787_vm6 = vcmask 1047559  }
  0x35   :  { %1109 = vmatprep.mubr.bf16.mxu0 %v16024_v0  ;;  %1150 = vmatprep.mubr.bf16.mxu1 %v16024_v0  ;;  %vm1577_vm7 = vcmask 1040384   ;;  %vm1578_vm8 = vsmask.f32 256  ;;  %vm3130_vm10 = vsmask.f32 7938 }
  0x36   :  { %1078 = vmatpush1.bf16.msra.mxu0 %v13745_v36  ;;  %1119 = vmatpush1.bf16.msra.mxu1 %v13748_v37  ;;  %v13843_v36 = vld [vmem:[%s19688_s1 + $0x4] ss:$16 sps:$4 sm:$0xff]   ;;  %v13846_v37 = vld [vmem:[%s19688_s1 + $0xc] ss:$16 sps:$4 sm:$0xff]   ;;  %vm16614_vm9 = vmand %vm1577_vm7, %vm1578_vm8  ;;  %vm4683_vm12 = vsmask.f32 1280 }
  0x37   :  { %1079 = vmatprep.subr.bf16.mxu0 %v13753_v38  ;;  %1120 = vmatprep.subr.bf16.mxu1 %v13756_v39  ;;  %v16025_v38 = vmov 1966171168   ;;  %vm17072_vm11 = vmand %vm1577_vm7, %vm3130_vm10  ;;  %vm6235_vm14 = vsmask.f32 7942  ;;  %vm7788_vm7 = vsmask.f32 2304 }
  0x38   :  { %v342_v39 = vunpack.c.l.s4 %v16025_v38  ;;  %vm17531_vm13 = vmand %vm769_vm0, %vm4683_vm12 }
  0x39   :  { %vm17983_vm15 = vmand %vm769_vm0, %vm6235_vm14 }
  0x3a   :  { %1080 = vmatpush1.bf16.msra.mxu0 %v13751_v40  ;;  %1121 = vmatpush1.bf16.msra.mxu1 %v13754_v41  ;;  %v344_v40 = vlaneseq  ;;  %v343_v41 = vunpack.c.0.s8 %v342_v39  ;;  %vm18442_vm8 = vmand %vm772_vm1, %vm7788_vm7 }
  0x3b   :  { %1081 = vmatprep.subr.bf16.mxu0 %v13759_v42  ;;  %1122 = vmatprep.subr.bf16.mxu1 %v13762_v43 }
  0x3c   :  { %v16276_v42 = vshrl.u32 %v344_v40, 7 }
  0x3e   :  { %1082 = vmatpush1.bf16.msra.mxu0 %v13757_v44  ;;  %1123 = vmatpush1.bf16.msra.mxu1 %v13760_v45  ;;  %v16279_v45 = vsub.s32 %v343_v41, %v16276_v42 }
  0x3f   :  { %1083 = vmatprep.subr.bf16.mxu0 %v13765_v46  ;;  %1124 = vmatprep.subr.bf16.mxu1 %v13768_v47 }
  0x42   :  { %1084 = vmatpush1.bf16.msra.mxu0 %v13763_v48  ;;  %1125 = vmatpush1.bf16.msra.mxu1 %v13766_v49 }
  0x43   :  { %1085 = vmatprep.subr.bf16.mxu0 %v13771_v50  ;;  %1126 = vmatprep.subr.bf16.mxu1 %v13774_v51 }
  0x46   :  { %1086 = vmatpush1.bf16.msra.mxu0 %v13769_v52  ;;  %1127 = vmatpush1.bf16.msra.mxu1 %v13772_v53 }
  0x47   :  { %1087 = vmatprep.subr.bf16.mxu0 %v13777_v54  ;;  %1128 = vmatprep.subr.bf16.mxu1 %v13780_v55 }
  0x4a   :  { %1088 = vmatpush1.bf16.msra.mxu0 %v13775_v56  ;;  %1129 = vmatpush1.bf16.msra.mxu1 %v13778_v57 }
  0x4b   :  { %1089 = vmatprep.subr.bf16.mxu0 %v13783_v58  ;;  %1130 = vmatprep.subr.bf16.mxu1 %v13786_v59 }
  0x4e   :  { %1090 = vmatpush1.bf16.msra.mxu0 %v13781_v60  ;;  %1131 = vmatpush1.bf16.msra.mxu1 %v13784_v61  ;;  %v43_v60 = vld [vmem:[%s19687_s0] ss:$8 sm:$0xf] }
  0x4f   :  { %1091 = vmatprep.subr.bf16.mxu0 %v13789_v63  ;;  %1132 = vmatprep.subr.bf16.mxu1 %v13792_v2  ;;  %v12476_v61 = vld [vmem:[%s19687_s0 + $0x20] ss:$8 sm:$0xf] }
  0x52   :  { %1092 = vmatpush1.bf16.msra.mxu0 %v13787_v62  ;;  %1133 = vmatpush1.bf16.msra.mxu1 %v13790_v1  ;;  %v12479_v62 = vld [vmem:[%s19687_s0 + $0x80] ss:$8 sm:$0xf] }
  0x53   :  { %1335 = vmatprep.subr.bf16.mxu0 %v13795_v3  ;;  %1376 = vmatprep.subr.bf16.mxu1 %v13798_v4  ;;  %v12477_v4 = vld [vmem:[%s19687_s0 + $0x40] ss:$8 sm:$0xf] }
  0x55   :  { %1110 = vmatmul.mubr.bf16.vlgmr.msra.gmra.mrb[4].mxu0 %v884_v5  ;;  %1151 = vmatmul.mubr.bf16.vlgmr.msra.gmra.mrb[4].mxu1 %v884_v5  ;;  %v12478_v5 = vld [vmem:[%s19687_s0 + $0x60] ss:$8 sm:$0xf] }
  0x56   :  { %1336 = vmatpush1.bf16.msra.mxu0 %v13793_v6  ;;  %1377 = vmatpush1.bf16.msra.mxu1 %v13796_v7  ;;  %v12480_v6 = vld [vmem:[%s19687_s0 + $0xa0] ss:$8 sm:$0xf] }
  0x57   :  { %1337 = vmatprep.subr.bf16.mxu0 %v13801_v8  ;;  %1378 = vmatprep.subr.bf16.mxu1 %v13804_v9  ;;  %v12481_v7 = vld [vmem:[%s19687_s0 + $0xc0] ss:$8 sm:$0xf] }
  0x58   :  { %1367 = vmatprep.mubr.bf16.mxu0 %v16024_v0  ;;  %1408 = vmatprep.mubr.bf16.mxu1 %v16024_v0 }
  0x5a   :  { %1338 = vmatpush1.bf16.msra.mxu0 %v13799_v10  ;;  %1379 = vmatpush1.bf16.msra.mxu1 %v13802_v11 }
  0x5b   :  { %1339 = vmatprep.subr.bf16.mxu0 %v13807_v12  ;;  %1380 = vmatprep.subr.bf16.mxu1 %v13810_v13  ;;  %v12482_v12 = vld [vmem:[%s19687_s0 + $0xe0] ss:$8 sm:$0xf] }
  0x5e   :  { %1340 = vmatpush1.bf16.msra.mxu0 %v13805_v14  ;;  %1381 = vmatpush1.bf16.msra.mxu1 %v13808_v15 }
  0x5f   :  { %1341 = vmatprep.subr.bf16.mxu0 %v13813_v16  ;;  %1382 = vmatprep.subr.bf16.mxu1 %v13816_v17 }
  0x62   :  { %1342 = vmatpush1.bf16.msra.mxu0 %v13811_v18  ;;  %1383 = vmatpush1.bf16.msra.mxu1 %v13814_v19 }
  0x63   :  { %1343 = vmatprep.subr.bf16.mxu0 %v13819_v20  ;;  %1384 = vmatprep.subr.bf16.mxu1 %v13822_v21 }
  0x66   :  { %1344 = vmatpush1.bf16.msra.mxu0 %v13817_v22  ;;  %1385 = vmatpush1.bf16.msra.mxu1 %v13820_v23 }
  0x67   :  { %1345 = vmatprep.subr.bf16.mxu0 %v13825_v24  ;;  %1386 = vmatprep.subr.bf16.mxu1 %v13828_v25 }
  0x6a   :  { %1346 = vmatpush1.bf16.msra.mxu0 %v13823_v26  ;;  %1387 = vmatpush1.bf16.msra.mxu1 %v13826_v27 }
  0x6b   :  { %1347 = vmatprep.subr.bf16.mxu0 %v13831_v28  ;;  %1388 = vmatprep.subr.bf16.mxu1 %v13834_v29 }
  0x6e   :  { %1348 = vmatpush1.bf16.msra.mxu0 %v13829_v30  ;;  %1389 = vmatpush1.bf16.msra.mxu1 %v13832_v31 }
  0x6f   :  { %1349 = vmatprep.subr.bf16.mxu0 %v13837_v32  ;;  %1390 = vmatprep.subr.bf16.mxu1 %v13840_v33 }
  0x72   :  { %1350 = vmatpush1.bf16.msra.mxu0 %v13835_v34  ;;  %1391 = vmatpush1.bf16.msra.mxu1 %v13838_v35 }
  0x73   :  { %1813 = vmatprep.subr.bf16.mxu0 %v13843_v36  ;;  %1854 = vmatprep.subr.bf16.mxu1 %v13846_v37 }
 0x107   :  { %v285_v43 = vpop.f32.mrb[0].mxu0  ;;  %v326_v44 = vpop.f32.mrb[0].mxu1 }
 0x108   :  { %v287_v46 = vpop.f32.mrb[1].mxu0  ;;  %v328_v47 = vpop.f32.mrb[1].mxu1 }
 0x109   :  { %v337_v48 = vcombine.low %v285_v43, %v287_v46  ;;  %v338_v49 = vcombine.high %v285_v43, %v287_v46  ;;  %v339_v50 = vcombine.low %v326_v44, %v328_v47  ;;  %v340_v51 = vcombine.high %v326_v44, %v328_v47  ;;  %v289_v52 = vpop.f32.mrb[2].mxu0  ;;  %v330_v53 = vpop.f32.mrb[2].mxu1 }
 0x10a   :  { %v290_v54 = vpop.f32.mrb[3].mxu0  ;;  %v331_v55 = vpop.f32.mrb[3].mxu1 }
 0x10b   :  { %v347_v56 = vrot.slane %v337_v48, %v16279_v45  ;;  %v354_v57 = vrot.slane %v338_v49, %v16279_v45  ;;  %v361_v58 = vrot.slane %v339_v50, %v16279_v45  ;;  %v368_v59 = vrot.slane %v340_v51, %v16279_v45 }
 0x10d   :  { %v369_v63 = vcombine.low %v347_v56, %v361_v58  ;;  %v370_v1 = vcombine.high %v347_v56, %v361_v58  ;;  %v371_v2 = vcombine.low %v354_v57, %v368_v59  ;;  %v372_v3 = vcombine.high %v354_v57, %v368_v59 }
 0x10f   :  { %v379_v8 = vrot.slane %v369_v63, %v16279_v45  ;;  %v386_v9 = vrot.slane %v371_v2, %v16279_v45  ;;  %v393_v10 = vrot.slane %v370_v1, %v16279_v45  ;;  %v400_v11 = vrot.slane %v372_v3, %v16279_v45 }
 0x111   :  { %v401_v13 = vcombine.high %v379_v8, %v379_v8  ;;  %v402_v14 = vcombine.high %v386_v9, %v386_v9  ;;  %v403_v15 = vcombine.high %v393_v10, %v393_v10  ;;  %v404_v16 = vcombine.high %v400_v11, %v400_v11 }
 0x112   :  { %v16313_v17 = vadd.f32 %v379_v8, %v43_v60  ;;  %v16315_v18 = vadd.f32 %v12476_v61, %v393_v10  ;;  %v16317_v19 = vadd.f32 %v12479_v62, %v386_v9  ;;  %v16323_v22 = vadd.f32 %v12480_v6, %v400_v11 }
 0x113   :  { %v16319_v20 = vadd.f32 %v12477_v4, %v401_v13  ;;  %v16321_v21 = vadd.f32 %v12478_v5, %v403_v15  ;;  %v16325_v23 = vadd.f32 %v12481_v7, %v402_v14  ;;  %v16329_v26 = vadd.f32 %v12482_v12, %v404_v16 }
 0x114   :  { %v12515_v24 = vmul.f32 -1.442695, %v16313_v17  ;;  %v12516_v25 = vmul.f32 -1.442695, %v16315_v18  ;;  %v12519_v29 = vmul.f32 -1.442695, %v16317_v19 }
 0x115   :  { %v12517_v27 = vmul.f32 -1.442695, %v16319_v20  ;;  %v12518_v28 = vmul.f32 -1.442695, %v16321_v21  ;;  %v478_v30 = vrot.slane %v16313_v17, 1  ;;  %v479_v32 = vrot.slane %v16315_v18, 1 }
 0x116   :  { %14837 = vpow2.f32 %v12515_v24  ;;  %v12520_v31 = vmul.f32 -1.442695, %v16323_v22  ;;  %v12521_v33 = vmul.f32 -1.442695, %v16325_v23  ;;  %v480_v34 = vrot.slane %v16319_v20, 1 }
 0x117   :  { %14839 = vpow2.f32 %v12516_v25  ;;  %v12522_v35 = vmul.f32 -1.442695, %v16329_v26  ;;  %v481_v36 = vrot.slane %v16321_v21, 1  ;;  %v482_v37 = vrot.slane %v16317_v19, 1 }
 0x118   :  { %14841 = vpow2.f32 %v12517_v27  ;;  %v12523_v38 = vmul.f32 -1.442695, %v478_v30  ;;  %v12524_v39 = vmul.f32 -1.442695, %v479_v32  ;;  %v12525_v40 = vmul.f32 -1.442695, %v480_v34 }
 0x119   :  { %14843 = vpow2.f32 %v12518_v28  ;;  %v12526_v41 = vmul.f32 -1.442695, %v481_v36  ;;  %v12527_v43 = vmul.f32 -1.442695, %v482_v37  ;;  %v483_v52 = vrot.slane %v16323_v22, 1 }
 0x11a   :  { %14845 = vpow2.f32 %v12519_v29  ;;  %v484_v55 = vrot.slane %v16325_v23, 1  ;;  %v485_v58 = vrot.slane %v16329_v26, 1  ;;  %v16026_v14 = vmov 0.0  }
 0x11b   :  { %14847 = vpow2.f32 %v12520_v31  ;;  %v12528_v63 = vmul.f32 -1.442695, %v483_v52  ;;  %v638_v15 = vrot.slane %v16026_v14, %v16279_v45  ;;  %v631_v25 = vcombine.high %v16026_v14, %v16026_v14 }
 0x11c   :  { %14849 = vpow2.f32 %v12521_v33  ;;  %v12529_v3 = vmul.f32 -1.442695, %v484_v55  ;;  %v12530_v5 = vmul.f32 -1.442695, %v485_v58  ;;  %v542_v28 = vrot.slane %v16313_v17, 2 }
 0x11d   :  { %14851 = vpow2.f32 %v12522_v35  ;;  %v543_v30 = vrot.slane %v16315_v18, 2  ;;  %v544_v32 = vrot.slane %v16319_v20, 2  ;;  %v646_v33 = vcombine.high %v638_v15, %v638_v15 }
 0x11e   :  { %14853 = vpow2.f32 %v12523_v38  ;;  %v654_v34 = vrot.slane %v638_v15, %v16279_v45  ;;  %v545_v36 = vrot.slane %v16321_v21, 2  ;;  %v645_v37 = vrot.slane %v631_v25, %v16279_v45 }
 0x11f   :  { %14855 = vpow2.f32 %v12524_v39  ;;  %v546_v39 = vrot.slane %v16317_v19, 2  ;;  %v568_v58 = vrot.slane %v16319_v20, 3 }
 0x120   :  { %v14838_v44 = vpop.eup %14837  ;;  %14857 = vpow2.f32 %v12525_v40 }
 0x121   :  { %v14840_v46 = vpop.eup %14839  ;;  %v446_v47 = vadd.f32 1.0, %v14838_v44  ;;  %14859 = vpow2.f32 %v12526_v41  ;;  %v668_v44 = vrot.slane %v646_v33, %v16279_v45 }
 0x122   :  { %v14842_v48 = vpop.eup %14841  ;;  %v447_v49 = vadd.f32 1.0, %v14840_v46  ;;  %14861 = vpow2.f32 %v12527_v43  ;;  %v16370_v43 = vrot.slane %v645_v37, %v16279_v45  ;;  %v676_v46 = vcombine.high %v654_v34, %v654_v34 }
 0x123   :  { %v14844_v50 = vpop.eup %14843  ;;  %v448_v51 = vadd.f32 1.0, %v14842_v48  ;;  %14863 = vrcp.f32 %v446_v47 }
 0x124   :  { %v14846_v53 = vpop.eup %14845  ;;  %v449_v54 = vadd.f32 1.0, %v14844_v50  ;;  %14865 = vrcp.f32 %v447_v49  ;;  %v566_v49 = vrot.slane %v16313_v17, 3  ;;  %v647_v50 = vcombine.high %v645_v37, %v645_v37 }
 0x125   :  { %v14848_v56 = vpop.eup %14847  ;;  %v450_v57 = vadd.f32 1.0, %v14846_v53  ;;  %14867 = vrcp.f32 %v448_v51  ;;  %v547_v53 = vrot.slane %v16323_v22, 2  ;;  %v569_v17 = vrot.slane %v16321_v21, 3 }
 0x126   :  { %v14850_v59 = vpop.eup %14849  ;;  %v451_v60 = vadd.f32 1.0, %v14848_v56  ;;  %14869 = vrcp.f32 %v449_v54  ;;  %v567_v54 = vrot.slane %v16315_v18, 3  ;;  %v677_v18 = vcombine.high %v16370_v43, %v16370_v43 }
 0x127   :  { %v14852_v61 = vpop.eup %14851  ;;  %v452_v62 = vadd.f32 1.0, %v14850_v59  ;;  %14871 = vrcp.f32 %v450_v57  ;;  %v548_v57 = vrot.slane %v16325_v23, 2  ;;  %v572_v21 = vrot.slane %v16325_v23, 3 }
 0x128   :  { %v14854_v1 = vpop.eup %14853  ;;  %v453_v2 = vadd.f32 1.0, %v14852_v61  ;;  %14873 = vrcp.f32 %v451_v60  ;;  %v549_v60 = vrot.slane %v16329_v26, 2  ;;  %v678_v61 = vcombine.high %v668_v44, %v668_v44 }
 0x129   :  { %v14856_v4 = vpop.eup %14855  ;;  %14875 = vrcp.f32 %v452_v62  ;;  %v518_v7 = vadd.f32 1.0, %v14854_v1  ;;  %v12531_v1 = vmul.f32 -1.442695, %v566_v49  ;;  %v12532_v20 = vmul.f32 -1.442695, %v567_v54 }
 0x12a   :  { %v14858_v6 = vpop.eup %14857  ;;  %14877 = vrcp.f32 %v453_v2  ;;  %v519_v9 = vadd.f32 1.0, %v14856_v4  ;;  %v675_v4 = vrot.slane %v647_v50, %v16279_v45 }
 0x12b   :  { %v14860_v8 = vpop.eup %14859  ;;  %14879 = vpow2.f32 %v12528_v63  ;;  %v520_v11 = vadd.f32 1.0, %v14858_v6  ;;  %v570_v63 = vrot.slane %v16317_v19, 3  ;;  %v12533_v6 = vmul.f32 -1.442695, %v568_v58 }
 0x12c   :  { %v14862_v10 = vpop.eup %14861  ;;  %14881 = vpow2.f32 %v12529_v3  ;;  %v521_v13 = vadd.f32 1.0, %v14860_v8  ;;  %v571_v3 = vrot.slane %v16323_v22, 3  ;;  %v573_v19 = vrot.slane %v16329_v26, 3 }
 0x12d   :  { %v16345_v12 = vpop.eup %14863  ;;  %14883 = vpow2.f32 %v12530_v5  ;;  %v522_v24 = vadd.f32 1.0, %v14862_v10 }
 0x12e   :  { %v16348_v16 = vpop.eup %14865  ;;  %14885 = vrcp.f32 %v518_v7 }
 0x12f   :  { %v16350_v27 = vpop.eup %14867  ;;  %14887 = vrcp.f32 %v519_v9  ;;  %v12534_v9 = vmul.f32 -1.442695, %v569_v17 }
 0x130   :  { %v16353_v29 = vpop.eup %14869  ;;  %14889 = vrcp.f32 %v520_v11 }
 0x131   :  { %v16356_v31 = vpop.eup %14871  ;;  %14891 = vrcp.f32 %v521_v13  ;;  %v12535_v13 = vmul.f32 -1.442695, %v570_v63 }
 0x132   :  { %v16360_v35 = vpop.eup %14873  ;;  %14893 = vrcp.f32 %v522_v24  ;;  %v12536_v24 = vmul.f32 -1.442695, %v571_v3 }
 0x133   :  { %v16364_v38 = vpop.eup %14875  ;;  %14895 = vtanh.f32 %v542_v28 }
 0x134   :  { %v16367_v40 = vpop.eup %14877  ;;  %14897 = vtanh.f32 %v543_v30  ;;  %v12537_v30 = vmul.f32 -1.442695, %v572_v21 }
 0x135   :  { %v14880_v41 = vpop.eup %14879  ;;  %14899 = vtanh.f32 %v544_v32 }
 0x136   :  { %v14882_v47 = vpop.eup %14881  ;;  %v523_v48 = vadd.f32 1.0, %v14880_v41  ;;  %14901 = vtanh.f32 %v545_v36 }
 0x137   :  { %v14884_v51 = vpop.eup %14883  ;;  %v524_v52 = vadd.f32 1.0, %v14882_v47  ;;  %14903 = vtanh.f32 %v546_v39 }
 0x138   :  { %v14886_v55 = vpop.eup %14885  ;;  %v525_v56 = vadd.f32 1.0, %v14884_v51  ;;  %14905 = vrcp.f32 %v523_v48 }
 0x139   :  { %v14888_v59 = vpop.eup %14887  ;;  %14907 = vrcp.f32 %v524_v52  ;;  %v688_v7 = vmul.f32 %v14886_v55, %v654_v34  ;;  %v12538_v34 = vmul.f32 -1.442695, %v573_v19 }
 0x13a   :  { %v14890_v62 = vpop.eup %14889  ;;  %14909 = vrcp.f32 %v525_v56  ;;  %v689_v10 = vmul.f32 %v14888_v59, %v668_v44  ;;  %v679_v44 = vcombine.high %v675_v4, %v675_v4 }
 0x13b   :  { %v14892_v2 = vpop.eup %14891  ;;  %14911 = vtanh.f32 %v547_v53  ;;  %v690_v14 = vmul.f32 %v14890_v62, %v676_v46 }
 0x13c   :  { %v14894_v5 = vpop.eup %14893  ;;  %14913 = vtanh.f32 %v548_v57  ;;  %v691_v25 = vmul.f32 %v14892_v2, %v678_v61 }
 0x13d   :  { %v14896_v8 = vpop.eup %14895  ;;  %14915 = vtanh.f32 %v549_v60 }
 0x13e   :  { %v14898_v11 = vpop.eup %14897  ;;  %14917 = vpow2.f32 %v12531_v1  ;;  %v696_v22 = vmul.f32 %v14896_v8, %v16345_v12  ;;  %v692_v12 = vmul.f32 %v14894_v5, %v16370_v43 }
 0x13f   :  { %v14900_v15 = vpop.eup %14899  ;;  %14919 = vpow2.f32 %v12532_v20  ;;  %v697_v23 = vmul.f32 %v14898_v11, %v16348_v16 }
 0x140   :  { %v14902_v28 = vpop.eup %14901  ;;  %14921 = vpow2.f32 %v12533_v6  ;;  %v698_v32 = vmul.f32 %v14900_v15, %v16350_v27  ;;  %v704_v26 = vadd.f32 %v696_v22, %v688_v7 }
 0x141   :  { %v14904_v33 = vpop.eup %14903  ;;  %14923 = vpow2.f32 %v12534_v9  ;;  %v699_v36 = vmul.f32 %v14902_v28, %v16353_v29  ;;  %v705_v37 = vadd.f32 %v697_v23, %v689_v10 }
 0x142   :  { %v14906_v39 = vpop.eup %14905  ;;  %14925 = vpow2.f32 %v12535_v13  ;;  %v706_v41 = vadd.f32 %v698_v32, %v690_v14  ;;  %v700_v27 = vmul.f32 %v14904_v33, %v16356_v31 }
 0x143   :  { %v14908_v46 = vpop.eup %14907  ;;  %14927 = vpow2.f32 %v12536_v24  ;;  %v707_v16 = vadd.f32 %v699_v36, %v691_v25  ;;  %v800_v47 = vcombine.low %v704_v26, %v705_v37  ;;  %v693_v49 = vmul.f32 %v14906_v39, %v675_v4 }
 0x144   :  { %v14910_v48 = vpop.eup %14909  ;;  %14929 = vpow2.f32 %v12537_v30  ;;  %v694_v29 = vmul.f32 %v14908_v46, %v677_v18  ;;  %v708_v54 = vadd.f32 %v700_v27, %v692_v12 }
 0x145   :  { %v14912_v50 = vpop.eup %14911  ;;  %14931 = vpow2.f32 %v12538_v34  ;;  %v801_v51 = vcombine.low %v706_v41, %v707_v16  ;;  %v695_v43 = vmul.f32 %v14910_v48, %v679_v44  ;;  %v810_v56 = vrot.slane %v800_v47, %v16279_v45 }
 0x146   :  { %v14914_v52 = vpop.eup %14913  ;;  %v701_v53 = vmul.f32 %v14912_v50, %v16360_v35  ;;  %14933 = vtanh.f32 %v704_v26 }
 0x147   :  { %v14916_v55 = vpop.eup %14915  ;;  %14935 = vtanh.f32 %v705_v37  ;;  %v817_v57 = vrot.slane %v801_v51, %v16279_v45  ;;  %v702_v58 = vmul.f32 %v14914_v52, %v16364_v38 }
 0x148   :  { %v14918_v31 = vpop.eup %14917  ;;  %14937 = vtanh.f32 %v706_v41  ;;  %v703_v59 = vmul.f32 %v14916_v55, %v16367_v40  ;;  %v709_v60 = vadd.f32 %v701_v53, %v693_v49 }
 0x149   :  { %v14920_v17 = vpop.eup %14919  ;;  %v606_v61 = vadd.f32 1.0, %v14918_v31  ;;  %v832_v62 = vcombine.low %v810_v56, %v817_v57  ;;  %v710_v35 = vadd.f32 %v702_v58, %v694_v29  ;;  %14939 = vtanh.f32 %v707_v16 }
 0x14a   :  { %v14922_v63 = vpop.eup %14921  ;;  %v607_v1 = vadd.f32 1.0, %v14920_v17  ;;  %v711_v18 = vadd.f32 %v703_v59, %v695_v43  ;;  %14941 = vtanh.f32 %v708_v54  ;;  %v802_v2 = vcombine.low %v708_v54, %v709_v60 }
 0x14b   :  { %v14924_v3 = vpop.eup %14923  ;;  %v608_v20 = vadd.f32 1.0, %v14922_v63  ;;  %14943 = vrcp.f32 %v606_v61  ;;  %v16401_v22 = vrot.slane %v832_v62, %v16279_v45 }
 0x14c   :  { %v14926_v4 = vpop.eup %14925  ;;  %v609_v38 = vadd.f32 1.0, %v14924_v3  ;;  %14945 = vrcp.f32 %v607_v1  ;;  %v803_v5 = vcombine.low %v710_v35, %v711_v18  ;;  %v824_v8 = vrot.slane %v802_v2, %v16279_v45 }
 0x14d   :  { %v14928_v21 = vpop.eup %14927  ;;  %v610_v40 = vadd.f32 1.0, %v14926_v4  ;;  %14947 = vrcp.f32 %v608_v20 }
 0x14e   :  { %v14930_v6 = vpop.eup %14929  ;;  %v611_v7 = vadd.f32 1.0, %v14928_v21  ;;  %14949 = vrcp.f32 %v609_v38  ;;  %v831_v19 = vrot.slane %v803_v5, %v16279_v45 }
 0x14f   :  { %v14932_v9 = vpop.eup %14931  ;;  %v612_v10 = vadd.f32 1.0, %v14930_v6  ;;  %14951 = vrcp.f32 %v610_v40 }
 0x150   :  { %v14934_v11 = vpop.eup %14933  ;;  %v613_v13 = vadd.f32 1.0, %v14932_v9  ;;  %14953 = vrcp.f32 %v611_v7  ;;  %v833_v14 = vcombine.low %v824_v8, %v831_v19  ;;  %v13841_v19 = vld [vmem:[%s19688_s1] ss:$16 sps:$4 sm:$0xff]   ;;  %v13844_v9 = vld [vmem:[%s19688_s1 + $0x8] ss:$16 sps:$4 sm:$0xff]  }
 0x151   :  { %v14936_v15 = vpop.eup %14935  ;;  %14955 = vrcp.f32 %v612_v10 }
 0x152   :  { %v14938_v24 = vpop.eup %14937  ;;  %14957 = vrcp.f32 %v613_v13  ;;  %v16404_v25 = vrot.slane %v833_v14, %v16279_v45  ;;  %v13849_v13 = vld [vmem:[%s19688_s1 + $0x24] ss:$16 sps:$4 sm:$0xff]   ;;  %v13852_v14 = vld [vmem:[%s19688_s1 + $0x2c] ss:$16 sps:$4 sm:$0xff]  }
 0x153   :  { %v14940_v23 = vpop.eup %14939  ;;  %14959 = vtanh.f32 %v709_v60 }
 0x154   :  { %v14942_v28 = vpop.eup %14941  ;;  %14961 = vtanh.f32 %v710_v35  ;;  %v848_v30 = vcombine.low %v16401_v22, %v16404_v25  ;;  %v13961_v22 = vld [vmem:[%s19689_s2 + $0xc0] ss:$16 sps:$4 sm:$0xff]  }
 0x155   :  { %v14944_v32 = vpop.eup %14943  ;;  %14963 = vtanh.f32 %v711_v18 }
 0x156   :  { %v14946_v26 = vpop.eup %14945  ;;  %v720_v33 = vmul.f32 %v14944_v32, %v14934_v11  ;;  %v13853_v32 = vld [vmem:[%s19688_s1 + $0x40] ss:$16 sps:$4 sm:$0xff]  }
 0x157   :  { %v14948_v34 = vpop.eup %14947  ;;  %v721_v36 = vmul.f32 %v14946_v26, %v14936_v15  ;;  %v13847_v15 = vld [vmem:[%s19688_s1 + $0x20] ss:$16 sps:$4 sm:$0xff]   ;;  %v13856_v26 = vld [vmem:[%s19688_s1 + $0x48] ss:$16 sps:$4 sm:$0xff]  }
 0x158   :  { %v14950_v37 = vpop.eup %14949  ;;  %v722_v39 = vmul.f32 %v14948_v34, %v14938_v24  ;;  %v728_v44 = vpack.c.bf16 %v720_v33, %v720_v33  ;;  %v13850_v24 = vld [vmem:[%s19688_s1 + $0x28] ss:$16 sps:$4 sm:$0xff]   ;;  %v13861_v33 = vld [vmem:[%s19688_s1 + $0x64] ss:$16 sps:$4 sm:$0xff]   ;;  %v13864_v34 = vld [vmem:[%s19688_s1 + $0x6c] ss:$16 sps:$4 sm:$0xff]  }
 0x159   :  { %v14952_v12 = vpop.eup %14951  ;;  %v723_v41 = vmul.f32 %v14950_v37, %v14940_v23  ;;  %v729_v46 = vpack.c.bf16 %v721_v36, %v721_v36  ;;  %v13855_v23 = vld [vmem:[%s19688_s1 + $0x44] ss:$16 sps:$4 sm:$0xff]   ;;  %v13859_v36 = vld [vmem:[%s19688_s1 + $0x60] ss:$16 sps:$4 sm:$0xff]   ;;  %v13862_v37 = vld [vmem:[%s19688_s1 + $0x68] ss:$16 sps:$4 sm:$0xff]  }
 0x15a   :  { %v14954_v16 = vpop.eup %14953  ;;  %v724_v47 = vmul.f32 %v14952_v12, %v14942_v28  ;;  %v730_v48 = vpack.c.bf16 %v722_v39, %v722_v39  ;;  %v744_v54 = vunpack.c.l.b16 %v728_v44  ;;  %v13858_v28 = vld [vmem:[%s19688_s1 + $0x4c] ss:$16 sps:$4 sm:$0xff]   ;;  %v13867_v39 = vld [vmem:[%s19688_s1 + $0x84] ss:$16 sps:$4 sm:$0xff]   ;;  %v13868_v44 = vld [vmem:[%s19688_s1 + $0x88] ss:$16 sps:$4 sm:$0xff]  }
 0x15b   :  { %v14956_v27 = vpop.eup %14955  ;;  %v731_v49 = vpack.c.bf16 %v723_v41, %v723_v41  ;;  %v745_v50 = vunpack.c.l.b16 %v729_v46  ;;  %v13870_v12 = vld [vmem:[%s19688_s1 + $0x8c] ss:$16 sps:$4 sm:$0xff]   ;;  %v13865_v41 = vld [vmem:[%s19688_s1 + $0x80] ss:$16 sps:$4 sm:$0xff]   ;;  %v13873_v46 = vld [vmem:[%s19688_s1 + $0xa4] ss:$16 sps:$4 sm:$0xff]  }
 0x15c   :  { %v14958_v51 = vpop.eup %14957  ;;  %v732_v29 = vpack.c.bf16 %v724_v47, %v724_v47  ;;  %v746_v52 = vunpack.c.l.b16 %v730_v48  ;;  %v13871_v47 = vld [vmem:[%s19688_s1 + $0xa0] ss:$16 sps:$4 sm:$0xff]   ;;  %v13874_v48 = vld [vmem:[%s19688_s1 + $0xa8] ss:$16 sps:$4 sm:$0xff]  }
 0x15d   :  { %v14960_v53 = vpop.eup %14959  ;;  %v747_v43 = vunpack.c.l.b16 %v731_v49  ;;  %v768_v55 = vrot.slane %v745_v50, 7  ;;  %v13882_v49 = vld [vmem:[%s19688_s1 + $0xcc] ss:$16 sps:$4 sm:$0xff]   ;;  %v13877_v50 = vld [vmem:[%s19688_s1 + $0xc0] ss:$16 sps:$4 sm:$0xff]  }
 0x15e   :  { %v14962_v56 = vpop.eup %14961  ;;  %v725_v57 = vmul.f32 %v14960_v53, %v14954_v16  ;;  %v748_v58 = vunpack.c.l.b16 %v732_v29  ;;  %v771_v31 = vrot.slane %v746_v52, 6  ;;  %v13876_v16 = vld [vmem:[%s19688_s1 + $0xac] ss:$16 sps:$4 sm:$0xff]   ;;  %v13885_v29 = vld [vmem:[%s19688_s1 + $0xe4] ss:$16 sps:$4 sm:$0xff]  }
 0x15f   :  { %v14964_v59 = vpop.eup %14963  ;;  %v726_v60 = vmul.f32 %v14962_v56, %v14956_v27  ;;  %v770_v17 = vsel %vm769_vm0, %v768_v55, %v744_v54  ;;  %v774_v61 = vrot.slane %v747_v43, 5  ;;  %v13879_v27 = vld [vmem:[%s19688_s1 + $0xc4] ss:$16 sps:$4 sm:$0xff]   ;;  %v13888_v52 = vld [vmem:[%s19688_s1 + $0xec] ss:$16 sps:$4 sm:$0xff]  }
 0x160   :  { %v727_v62 = vmul.f32 %v14964_v59, %v14958_v51  ;;  %v733_v35 = vpack.c.bf16 %v725_v57, %v725_v57  ;;  %v773_v63 = vsel %vm772_vm1, %v771_v31, %v770_v17  ;;  %v777_v1 = vrot.slane %v748_v58, 4  ;;  %v13880_v51 = vld [vmem:[%s19688_s1 + $0xc8] ss:$16 sps:$4 sm:$0xff]   ;;  %v13883_v53 = vld [vmem:[%s19688_s1 + $0xe0] ss:$16 sps:$4 sm:$0xff]  }
 0x161   :  { %v734_v18 = vpack.c.bf16 %v726_v60, %v726_v60  ;;  %v776_v2 = vsel %vm775_vm2, %v774_v61, %v773_v63  ;;  %v13886_v54 = vld [vmem:[%s19688_s1 + $0xe8] ss:$16 sps:$4 sm:$0xff]   ;;  %v15989_v43 = vld [vmem:[#allocation4 + $0x4] ss:$16 sps:$4 sm:$0xff]   ;;  %v15990_v55 = vld [vmem:[#allocation4 + $0xc] ss:$16 sps:$4 sm:$0xff]  }
 0x162   :  { %v735_v3 = vpack.c.bf16 %v727_v62, %v727_v62  ;;  %v749_v20 = vunpack.c.l.b16 %v733_v35  ;;  %v779_v4 = vsel %vm778_vm3, %v777_v1, %v776_v2  ;;  %v15991_v57 = vld [vmem:[#allocation4] ss:$16 sps:$4 sm:$0xff]   ;;  %v15992_v58 = vld [vmem:[#allocation4 + $0x8] ss:$16 sps:$4 sm:$0xff]   ;;  %v15993_v31 = vld [vmem:[#allocation4 + $0x24] ss:$16 sps:$4 sm:$0xff]  }
 0x163   :  { %v750_v38 = vunpack.c.l.b16 %v734_v18  ;;  %v15994_v59 = vld [vmem:[#allocation4 + $0x2c] ss:$16 sps:$4 sm:$0xff]   ;;  %v15995_v60 = vld [vmem:[#allocation4 + $0x20] ss:$16 sps:$4 sm:$0xff]   ;;  %v15996_v17 = vld [vmem:[#allocation4 + $0x28] ss:$16 sps:$4 sm:$0xff]  }
 0x164   :  { %v751_v5 = vunpack.c.l.b16 %v735_v3  ;;  %v780_v21 = vrot.slane %v749_v20, 3  ;;  %v16509_v61 = vpop.f32.mrb[4].mxu0  ;;  %v16511_v62 = vpop.f32.mrb[4].mxu1  ;;  %v13891_v20 = vld [vmem:[#allocation4 + $0x44] ss:$16 sps:$4 sm:$0xff]  }
 0x165   :  { %v783_v40 = vrot.slane %v750_v38, 2  ;;  %v16513_v35 = vpop.f32.mrb[5].mxu0  ;;  %v16515_v63 = vpop.f32.mrb[5].mxu1  ;;  %v13889_v38 = vld [vmem:[#allocation4 + $0x40] ss:$16 sps:$4 sm:$0xff]  }
 0x166   :  { %v782_v6 = vsel %vm781_vm4, %v780_v21, %v779_v4  ;;  %v786_v7 = vrot.slane %v751_v5, 1  ;;  %v1115_v1 = vpop.f32.mrb[6].mxu0  ;;  %v1156_v18 = vpop.f32.mrb[6].mxu1  ;;  %v13894_v4 = vld [vmem:[#allocation4 + $0x4c] ss:$16 sps:$4 sm:$0xff]  }
 0x167   :  { %v785_v8 = vsel %vm784_vm5, %v783_v40, %v782_v6  ;;  %v1116_v2 = vpop.f32.mrb[7].mxu0  ;;  %v1157_v3 = vpop.f32.mrb[7].mxu1  ;;  %v13892_v5 = vld [vmem:[#allocation4 + $0x48] ss:$16 sps:$4 sm:$0xff]   ;;  %v13897_v21 = vld [vmem:[#allocation4 + $0x64] ss:$16 sps:$4 sm:$0xff]  }
 0x168   :  { %v788_v10 = vsel %vm787_vm6, %v786_v7, %v785_v8  ;;  %v13900_v40 = vld [vmem:[#allocation4 + $0x6c] ss:$16 sps:$4 sm:$0xff]   ;;  %v13895_v6 = vld [vmem:[#allocation4 + $0x60] ss:$16 sps:$4 sm:$0xff]   ;;  %v13898_v7 = vld [vmem:[#allocation4 + $0x68] ss:$16 sps:$4 sm:$0xff]  }
 0x169   :  { %v789_v11 = vpack.c.b16 %v788_v10, %v788_v10  ;;  %v13903_v8 = vld [vmem:[#allocation4 + $0x84] ss:$16 sps:$4 sm:$0xff]   ;;  %v13904_v10 = vld [vmem:[#allocation4 + $0x88] ss:$16 sps:$4 sm:$0xff]  }
 0x16b   :  { %791 = vst [vmem:[#allocation2] sm:$0xf] %v789_v11  ;;  %1368 = vmatmul.mubr.bf16.vlgmr.msra.gmra.mrb[8].mxu0 %v789_v11  ;;  %1409 = vmatmul.mubr.bf16.vlgmr.msra.gmra.mrb[8].mxu1 %v789_v11  ;;  %v13909_v11 = vld [vmem:[#allocation4 + $0xa4] ss:$16 sps:$4 sm:$0xff]  }
 0x16c   :  { %1814 = vmatpush1.bf16.msra.mxu0 %v13841_v19  ;;  %1855 = vmatpush1.bf16.msra.mxu1 %v13844_v9  ;;  %v13906_v19 = vld [vmem:[#allocation4 + $0x8c] ss:$16 sps:$4 sm:$0xff]   ;;  %v13901_v9 = vld [vmem:[#allocation4 + $0x80] ss:$16 sps:$4 sm:$0xff]  }
 0x16d   :  { %1815 = vmatprep.subr.bf16.mxu0 %v13849_v13  ;;  %1856 = vmatprep.subr.bf16.mxu1 %v13852_v14  ;;  %v13912_v13 = vld [vmem:[#allocation4 + $0xac] ss:$16 sps:$4 sm:$0xff]   ;;  %v13907_v14 = vld [vmem:[#allocation4 + $0xa0] ss:$16 sps:$4 sm:$0xff]  }
 0x16e   :  { %1845 = vmatprep.mubr.bf16.mxu0 %v16024_v0  ;;  %1886 = vmatprep.mubr.bf16.mxu1 %v16024_v0 }
 0x170   :  { %1816 = vmatpush1.bf16.msra.mxu0 %v13847_v15  ;;  %1857 = vmatpush1.bf16.msra.mxu1 %v13850_v24  ;;  %v13910_v15 = vld [vmem:[#allocation4 + $0xa8] ss:$16 sps:$4 sm:$0xff]   ;;  %v13915_v24 = vld [vmem:[#allocation4 + $0xc4] ss:$16 sps:$4 sm:$0xff]  }
 0x171   :  { %1817 = vmatprep.subr.bf16.mxu0 %v13855_v23  ;;  %1858 = vmatprep.subr.bf16.mxu1 %v13858_v28  ;;  %v13918_v23 = vld [vmem:[#allocation4 + $0xcc] ss:$16 sps:$4 sm:$0xff]   ;;  %v13913_v28 = vld [vmem:[#allocation4 + $0xc0] ss:$16 sps:$4 sm:$0xff]  }
 0x172   :  { %v1620_v56 = vld [vmem:[#allocation2] sm:$0xf] }
 0x174   :  { %1818 = vmatpush1.bf16.msra.mxu0 %v13853_v32  ;;  %1859 = vmatpush1.bf16.msra.mxu1 %v13856_v26  ;;  %v13916_v32 = vld [vmem:[#allocation4 + $0xc8] ss:$16 sps:$4 sm:$0xff]   ;;  %v13921_v26 = vld [vmem:[#allocation4 + $0xe4] ss:$16 sps:$4 sm:$0xff]  }
 0x175   :  { %1819 = vmatprep.subr.bf16.mxu0 %v13861_v33  ;;  %1860 = vmatprep.subr.bf16.mxu1 %v13864_v34  ;;  %v13924_v33 = vld [vmem:[#allocation4 + $0xec] ss:$16 sps:$4 sm:$0xff]   ;;  %v13919_v34 = vld [vmem:[#allocation4 + $0xe0] ss:$16 sps:$4 sm:$0xff]  }
 0x178   :  { %1820 = vmatpush1.bf16.msra.mxu0 %v13859_v36  ;;  %1861 = vmatpush1.bf16.msra.mxu1 %v13862_v37  ;;  %v13922_v36 = vld [vmem:[#allocation4 + $0xe8] ss:$16 sps:$4 sm:$0xff]   ;;  %v13927_v37 = vld [vmem:[%s19689_s2 + $0x4] ss:$16 sps:$4 sm:$0xff]  }
 0x179   :  { %1821 = vmatprep.subr.bf16.mxu0 %v13867_v39  ;;  %1862 = vmatprep.subr.bf16.mxu1 %v13870_v12  ;;  %v13930_v39 = vld [vmem:[%s19689_s2 + $0xc] ss:$16 sps:$4 sm:$0xff]   ;;  %v16524_v12 = vsub.s32 0, %v16276_v42 }
 0x17c   :  { %1822 = vmatpush1.bf16.msra.mxu0 %v13865_v41  ;;  %1863 = vmatpush1.bf16.msra.mxu1 %v13868_v44  ;;  %v1417_v41 = vld [vmem:[%s19691_s4] sm:$0xf]  ;;  %v16530_v44 = vsub.s32 1, %v16276_v42 }
 0x17d   :  { %1823 = vmatprep.subr.bf16.mxu0 %v13873_v46  ;;  %1864 = vmatprep.subr.bf16.mxu1 %v13876_v16  ;;  %v1422_v46 = vrot.slane %v1417_v41, %v16524_v12 }
 0x180   :  { %1824 = vmatpush1.bf16.msra.mxu0 %v13871_v47  ;;  %1865 = vmatpush1.bf16.msra.mxu1 %v13874_v48  ;;  %v1426_v48 = vrot.slane %v1417_v41, %v16530_v44 }
 0x181   :  { %1825 = vmatprep.subr.bf16.mxu0 %v13879_v27  ;;  %1866 = vmatprep.subr.bf16.mxu1 %v13882_v49 }
 0x184   :  { %1826 = vmatpush1.bf16.msra.mxu0 %v13877_v50  ;;  %1867 = vmatpush1.bf16.msra.mxu1 %v13880_v51 }
 0x185   :  { %1827 = vmatprep.subr.bf16.mxu0 %v13885_v29  ;;  %1868 = vmatprep.subr.bf16.mxu1 %v13888_v52 }
 0x188   :  { %1828 = vmatpush1.bf16.msra.mxu0 %v13883_v53  ;;  %1869 = vmatpush1.bf16.msra.mxu1 %v13886_v54  ;;  %v16539_v53 = vsub.s32 3, %v16276_v42 }
 0x189   :  { %2631 = vmatprep.subr.bf16.mxu0 %v15989_v43  ;;  %2672 = vmatprep.subr.bf16.mxu1 %v15990_v55 }
 0x18b   :  { %1846 = vmatmul.mubr.bf16.vlgmr.msra.gmra.mrb[12].mxu0 %v1620_v56  ;;  %1887 = vmatmul.mubr.bf16.vlgmr.msra.gmra.mrb[12].mxu1 %v1620_v56 }
 0x18c   :  { %2632 = vmatpush1.bf16.msra.mxu0 %v15991_v57  ;;  %2673 = vmatpush1.bf16.msra.mxu1 %v15992_v58 }
 0x18d   :  { %2633 = vmatprep.subr.bf16.mxu0 %v15993_v31  ;;  %2674 = vmatprep.subr.bf16.mxu1 %v15994_v59 }
 0x18e   :  { %2663 = vmatprep.mubr.bf16.mxu0 %v16024_v0  ;;  %2704 = vmatprep.mubr.bf16.mxu1 %v16024_v0 }
 0x190   :  { %2634 = vmatpush1.bf16.msra.mxu0 %v15995_v60  ;;  %2675 = vmatpush1.bf16.msra.mxu1 %v15996_v17  ;;  %v1434_v60 = vrot.slane %v1417_v41, %v16539_v53  ;;  %v16543_v17 = vsub.s32 2, %v16276_v42 }
 0x191   :  { %2635 = vmatprep.subr.bf16.mxu0 %v13891_v20  ;;  %2676 = vmatprep.subr.bf16.mxu1 %v13894_v4 }
 0x194   :  { %2636 = vmatpush1.bf16.msra.mxu0 %v13889_v38  ;;  %2677 = vmatpush1.bf16.msra.mxu1 %v13892_v5 }
 0x195   :  { %2637 = vmatprep.subr.bf16.mxu0 %v13897_v21  ;;  %2678 = vmatprep.subr.bf16.mxu1 %v13900_v40 }
 0x198   :  { %2638 = vmatpush1.bf16.msra.mxu0 %v13895_v6  ;;  %2679 = vmatpush1.bf16.msra.mxu1 %v13898_v7 }
 0x199   :  { %2639 = vmatprep.subr.bf16.mxu0 %v13903_v8  ;;  %2680 = vmatprep.subr.bf16.mxu1 %v13906_v19 }
 0x19c   :  { %2640 = vmatpush1.bf16.msra.mxu0 %v13901_v9  ;;  %2681 = vmatpush1.bf16.msra.mxu1 %v13904_v10 }
 0x19d   :  { %2641 = vmatprep.subr.bf16.mxu0 %v13909_v11  ;;  %2682 = vmatprep.subr.bf16.mxu1 %v13912_v13 }
 0x1a0   :  { %2642 = vmatpush1.bf16.msra.mxu0 %v13907_v14  ;;  %2683 = vmatpush1.bf16.msra.mxu1 %v13910_v15 }
 0x1a1   :  { %2643 = vmatprep.subr.bf16.mxu0 %v13915_v24  ;;  %2684 = vmatprep.subr.bf16.mxu1 %v13918_v23 }
 0x1a4   :  { %2644 = vmatpush1.bf16.msra.mxu0 %v13913_v28  ;;  %2685 = vmatpush1.bf16.msra.mxu1 %v13916_v32 }
 0x1a5   :  { %2645 = vmatprep.subr.bf16.mxu0 %v13921_v26  ;;  %2686 = vmatprep.subr.bf16.mxu1 %v13924_v33 }
 0x1a8   :  { %2646 = vmatpush1.bf16.msra.mxu0 %v13919_v34  ;;  %2687 = vmatpush1.bf16.msra.mxu1 %v13922_v36 }
 0x1a9   :  { %2889 = vmatprep.subr.bf16.mxu0 %v13927_v37  ;;  %2930 = vmatprep.subr.bf16.mxu1 %v13930_v39  ;;  %v12618_v37 = vld [vmem:[%s19687_s0 + $0x1] ss:$8 sm:$0xf] }
 0x23e   :  { %v1369_v16 = vpop.f32.mrb[8].mxu0  ;;  %v1410_v47 = vpop.f32.mrb[8].mxu1 }
 0x23f   :  { %v1370_v27 = vadd.f32 %v1369_v16, %v16509_v61  ;;  %v1411_v49 = vadd.f32 %v1410_v47, %v16511_v62  ;;  %v1371_v50 = vpop.f32.mrb[9].mxu0  ;;  %v1412_v51 = vpop.f32.mrb[9].mxu1  ;;  %v1430_v62 = vrot.slane %v1417_v41, %v16543_v17  ;;  %v12622_v16 = vld [vmem:[%s19687_s0 + $0x81] ss:$8 sm:$0xf] }
 0x240   :  { %v1372_v29 = vadd.f32 %v1371_v50, %v16513_v35  ;;  %v1413_v52 = vadd.f32 %v1412_v51, %v16515_v63  ;;  %v1373_v54 = vpop.f32.mrb[10].mxu0  ;;  %v1414_v43 = vpop.f32.mrb[10].mxu1 }
 0x241   :  { %v1439_v55 = vadd.f32 %v1422_v46, %v1370_v27  ;;  %v1374_v56 = vpop.f32.mrb[11].mxu0  ;;  %v1415_v57 = vpop.f32.mrb[11].mxu1  ;;  %v1441_v63 = vadd.f32 %v1430_v62, %v1411_v49  ;;  %v12619_v46 = vld [vmem:[%s19687_s0 + $0x21] ss:$8 sm:$0xf] }
 0x242   :  { %v1440_v58 = vadd.f32 %v1426_v48, %v1372_v29  ;;  %v1442_v61 = vadd.f32 %v1434_v60, %v1413_v52  ;;  %v12620_v27 = vld [vmem:[%s19687_s0 + $0x41] ss:$8 sm:$0xf] }
 0x243   :  { %v12611_v31 = vmul.f32 -1.442695, %v1439_v55  ;;  %v12623_v49 = vld [vmem:[%s19687_s0 + $0xa1] ss:$8 sm:$0xf] }
 0x244   :  { %v12612_v59 = vmul.f32 -1.442695, %v1440_v58  ;;  %v12613_v35 = vmul.f32 -1.442695, %v1442_v61 }
 0x245   :  { %14965 = vpow2.f32 %v12611_v31  ;;  %v12621_v29 = vld [vmem:[%s19687_s0 + $0x61] ss:$8 sm:$0xf] }
 0x246   :  { %14967 = vpow2.f32 %v12612_v59  ;;  %v12624_v43 = vld [vmem:[%s19687_s0 + $0xc1] ss:$8 sm:$0xf] }
 0x247   :  { %14969 = vpow2.f32 %v12613_v35  ;;  %v12625_v55 = vld [vmem:[%s19687_s0 + $0xe1] ss:$8 sm:$0xf] }
 0x248   :  { %14971 = vtanh.f32 %v1441_v63 }
 0x24f   :  { %v14966_v1 = vpop.eup %14965 }
 0x250   :  { %v14968_v18 = vpop.eup %14967  ;;  %v1448_v2 = vadd.f32 1.0, %v14966_v1 }
 0x251   :  { %v1454_v3 = vadd.f32 1.0, %v14968_v18  ;;  %v14970_v20 = vpop.eup %14969 }
 0x252   :  { %14973 = vrcp.f32 %v1448_v2  ;;  %v14972_v4 = vpop.eup %14971  ;;  %v1461_v40 = vadd.f32 1.0, %v14970_v20 }
 0x253   :  { %14975 = vrcp.f32 %v1454_v3  ;;  %v16027_v3 = vmov 286326784  }
 0x254   :  { %14977 = vrcp.f32 %v1461_v40  ;;  %v1514_v20 = vunpack.c.l.s4 %v16027_v3 }
 0x25c   :  { %v14974_v38 = vpop.eup %14973 }
 0x25d   :  { %v14976_v5 = vpop.eup %14975  ;;  %v1465_v21 = vmul.f32 %v14974_v38, %v14972_v4 }
 0x25e   :  { %v1464_v6 = vmul.f32 0.0, %v14976_v5  ;;  %v1847_v7 = vpop.f32.mrb[12].mxu0  ;;  %v1888_v8 = vpop.f32.mrb[12].mxu1 }
 0x25f   :  { %v1849_v19 = vpop.f32.mrb[13].mxu0  ;;  %v1890_v9 = vpop.f32.mrb[13].mxu1 }
 0x260   :  { %v16546_v10 = vadd.f32 %v1465_v21, %v1464_v6  ;;  %v1899_v11 = vcombine.low %v1847_v7, %v1849_v19  ;;  %v1900_v13 = vcombine.high %v1847_v7, %v1849_v19  ;;  %v1901_v14 = vcombine.low %v1888_v8, %v1890_v9  ;;  %v1851_v15 = vpop.f32.mrb[14].mxu0  ;;  %v1892_v24 = vpop.f32.mrb[14].mxu1 }
 0x261   :  { %v1902_v23 = vcombine.high %v1888_v8, %v1890_v9  ;;  %v1852_v28 = vpop.f32.mrb[15].mxu0  ;;  %v1893_v32 = vpop.f32.mrb[15].mxu1  ;;  %v1515_v15 = vunpack.c.0.s8 %v1514_v20 }
 0x262   :  { %14979 = vtanh.f32 %v16546_v10  ;;  %v1909_v26 = vrot.slane %v1899_v11, %v16279_v45  ;;  %v1916_v33 = vrot.slane %v1900_v13, %v16279_v45  ;;  %v1923_v34 = vrot.slane %v1901_v14, %v16279_v45  ;;  %v14978_v2 = vpop.eup %14977 }
 0x263   :  { %v1930_v36 = vrot.slane %v1902_v23, %v16279_v45 }
 0x264   :  { %v1931_v39 = vcombine.low %v1909_v26, %v1923_v34  ;;  %v1932_v41 = vcombine.high %v1909_v26, %v1923_v34 }
 0x265   :  { %v1933_v47 = vcombine.low %v1916_v33, %v1930_v36  ;;  %v1934_v48 = vcombine.high %v1916_v33, %v1930_v36  ;;  %v16610_v33 = vsub.s32 %v1515_v15, %v16276_v42  ;;  %v13925_v42 = vld [vmem:[%s19689_s2] ss:$16 sps:$4 sm:$0xff]  }
 0x266   :  { %v1941_v50 = vrot.slane %v1931_v39, %v16279_v45  ;;  %v1955_v51 = vrot.slane %v1932_v41, %v16279_v45 }
 0x267   :  { %v1948_v52 = vrot.slane %v1933_v47, %v16279_v45  ;;  %v1962_v54 = vrot.slane %v1934_v48, %v16279_v45 }
 0x268   :  { %v1963_v56 = vcombine.high %v1941_v50, %v1941_v50  ;;  %v1965_v57 = vcombine.high %v1955_v51, %v1955_v51  ;;  %v16581_v58 = vadd.f32 %v12618_v37, %v1941_v50  ;;  %v16583_v31 = vadd.f32 %v12619_v46, %v1955_v51  ;;  %v1583_v51 = vld [vmem:[%s19692_s5 + $0x4] sm:$0x1] }
 0x269   :  { %v1964_v59 = vcombine.high %v1948_v52, %v1948_v52  ;;  %v1966_v60 = vcombine.high %v1962_v54, %v1962_v54  ;;  %v16585_v61 = vadd.f32 %v12622_v16, %v1948_v52  ;;  %v16587_v62 = vadd.f32 %v12623_v49, %v1962_v54  ;;  %v1580_v16 = vld [vmem:[%s19692_s5] sm:$0x1]  ;;  %v13933_v52 = vld [vmem:[%s19689_s2 + $0x24] ss:$16 sps:$4 sm:$0xff]  }
 0x26a   :  { %v16589_v35 = vadd.f32 %v12620_v27, %v1963_v56  ;;  %v16591_v63 = vadd.f32 %v12621_v29, %v1965_v57  ;;  %v12658_v1 = vmul.f32 -1.442695, %v16581_v58  ;;  %v12659_v18 = vmul.f32 -1.442695, %v16583_v31  ;;  %v13928_v29 = vld [vmem:[%s19689_s2 + $0x8] ss:$16 sps:$4 sm:$0xff]  }
 0x26b   :  { %v16595_v4 = vadd.f32 %v12624_v43, %v1964_v59  ;;  %v16597_v38 = vadd.f32 %v12625_v55, %v1966_v60  ;;  %v12662_v5 = vmul.f32 -1.442695, %v16585_v61  ;;  %v2040_v7 = vrot.slane %v16581_v58, 1  ;;  %v13936_v60 = vld [vmem:[%s19689_s2 + $0x2c] ss:$16 sps:$4 sm:$0xff]  }
 0x26c   :  { %v14980_v21 = vpop.eup %14979  ;;  %14981 = vpow2.f32 %v12658_v1  ;;  %v12660_v40 = vmul.f32 -1.442695, %v16589_v35  ;;  %v12661_v6 = vmul.f32 -1.442695, %v16591_v63  ;;  %v12663_v19 = vmul.f32 -1.442695, %v16587_v62 }
 0x26d   :  { %v1468_v8 = vmul.f32 %v14980_v21, %v14978_v2  ;;  %14983 = vpow2.f32 %v12659_v18  ;;  %v12664_v9 = vmul.f32 -1.442695, %v16595_v4  ;;  %v2041_v11 = vrot.slane %v16583_v31, 1  ;;  %v1589_v21 = vld [vmem:[%s19692_s5 + $0xc] sm:$0x1] }
 0x26e   :  { %14985 = vpow2.f32 %v12660_v40  ;;  %v12665_v14 = vmul.f32 -1.442695, %v16597_v38  ;;  %v12666_v24 = vmul.f32 -1.442695, %v2040_v7  ;;  %v1592_v40 = vld [vmem:[%s19692_s5 + $0x10] sm:$0x1] }
 0x26f   :  { %v1469_v13 = vpack.c.bf16 %v1468_v8, %v1468_v8  ;;  %14987 = vpow2.f32 %v12661_v6  ;;  %v12667_v28 = vmul.f32 -1.442695, %v2041_v11  ;;  %v1595_v11 = vld [vmem:[%s19692_s5 + $0x14] sm:$0x1] }
 0x270   :  { %14989 = vpow2.f32 %v12662_v5  ;;  %v1586_v5 = vld [vmem:[%s19692_s5 + $0x8] sm:$0x1] }
 0x271   :  { %1470 = vst [vmem:[#allocation2 + $0x4] sm:$0xf] %v1469_v13  ;;  %v1479_v23 = vrot.slane %v1469_v13, %v16279_v45  ;;  %14991 = vpow2.f32 %v12663_v19  ;;  %v1598_v13 = vld [vmem:[%s19692_s5 + $0x18] sm:$0x1] }
 0x272   :  { %14993 = vpow2.f32 %v12664_v9 }
 0x273   :  { %v1480_v32 = vcombine.high %v1479_v23, %v1479_v23  ;;  %v1487_v26 = vrot.slane %v1479_v23, %v16279_v45  ;;  %14995 = vpow2.f32 %v12665_v14  ;;  %v13931_v14 = vld [vmem:[%s19689_s2 + $0x20] ss:$16 sps:$4 sm:$0xff]  }
 0x274   :  { %14997 = vpow2.f32 %v12666_v24 }
 0x275   :  { %v1494_v34 = vrot.slane %v1480_v32, %v16279_v45  ;;  %v1495_v36 = vcombine.high %v1487_v26, %v1487_v26  ;;  %v1498_v37 = vunpack.i.h.s16 %v1487_v26  ;;  %v12614_v39 = vpack.i.b16 %v1487_v26, %v1487_v26  ;;  %v13934_v26 = vld [vmem:[%s19689_s2 + $0x28] ss:$16 sps:$4 sm:$0xff]  }
 0x276   :  { %v14982_v41 = vpop.eup %14981  ;;  %14999 = vpow2.f32 %v12667_v28 }
 0x277   :  { %v14984_v47 = vpop.eup %14983  ;;  %v1496_v48 = vcombine.high %v1494_v34, %v1494_v34  ;;  %v1500_v27 = vunpack.i.h.s16 %v1494_v34  ;;  %v1502_v49 = vunpack.i.h.s16 %v1495_v36  ;;  %v1506_v50 = vpack.i.b16 %v1498_v37, %v1498_v37 }
 0x278   :  { %v14986_v54 = vpop.eup %14985  ;;  %v12615_v43 = vpack.i.b16 %v1494_v34, %v1494_v34  ;;  %v12616_v55 = vpack.i.b16 %v1495_v36, %v1495_v36  ;;  %v1519_v56 = vrot.slane %v12614_v39, %v16610_v33  ;;  %v2008_v57 = vadd.f32 1.0, %v14982_v41  ;;  %v2438_v59 = vld [vmem:[#allocation2 + $0x4] sm:$0xf] }
 0x279   :  { %v14988_v1 = vpop.eup %14987  ;;  %v1504_v18 = vunpack.i.h.s16 %v1496_v48  ;;  %v1508_v2 = vpack.i.b16 %v1500_v27, %v1500_v27  ;;  %v1510_v3 = vpack.i.b16 %v1502_v49, %v1502_v49  ;;  %v12617_v20 = vpack.i.b16 %v1496_v48, %v1496_v48  ;;  %2664 = vmatmul.mubr.bf16.vlgmr.msra.gmra.mrb[16].mxu0 %v2438_v59  ;;  %2705 = vmatmul.mubr.bf16.vlgmr.msra.gmra.mrb[16].mxu1 %v2438_v59  ;;  %v13939_v34 = vld [vmem:[%s19689_s2 + $0x44] ss:$16 sps:$4 sm:$0xff]   ;;  %v13942_v48 = vld [vmem:[%s19689_s2 + $0x4c] ss:$16 sps:$4 sm:$0xff]  }
 0x27a   :  { %v14990_v6 = vpop.eup %14989  ;;  %v1526_v7 = vrot.slane %v1506_v50, %v16610_v33  ;;  %v1533_v8 = vrot.slane %v12615_v43, %v16610_v33  ;;  %v1547_v19 = vrot.slane %v12616_v55, %v16610_v33  ;;  %v1581_v9 = vsel %vm16614_vm9, %v1519_v56, %v1580_v16  ;;  %2890 = vmatpush1.bf16.msra.mxu0 %v13925_v42  ;;  %v1601_v16 = vld [vmem:[%s19692_s5 + $0x1c] sm:$0x1]  ;;  %v13937_v55 = vld [vmem:[%s19689_s2 + $0x40] ss:$16 sps:$4 sm:$0xff]  }
 0x27b   :  { %v14992_v15 = vpop.eup %14991  ;;  %v1512_v24 = vpack.i.b16 %v1504_v18, %v1504_v18  ;;  %v1540_v23 = vrot.slane %v1508_v2, %v16610_v33  ;;  %v1554_v28 = vrot.slane %v1510_v3, %v16610_v33  ;;  %v1561_v32 = vrot.slane %v12617_v20, %v16610_v33  ;;  %1582 = vst [vmem:[%s19692_s5] sm:$0x1] %v1581_v9  ;;  %v13948_v2 = vld [vmem:[%s19689_s2 + $0x6c] ss:$16 sps:$4 sm:$0xff]  }
 0x27c   :  { %2931 = vmatpush1.bf16.msra.mxu1 %v13928_v29  ;;  %v14994_v36 = vpop.eup %14993  ;;  %v1584_v37 = vsel %vm16614_vm9, %v1526_v7, %v1583_v51  ;;  %v1587_v39 = vsel %vm16614_vm9, %v1533_v8, %v1586_v5  ;;  %v1593_v41 = vsel %vm16614_vm9, %v1547_v19, %v1592_v40  ;;  %v2009_v42 = vadd.f32 1.0, %v14984_v47  ;;  %2891 = vmatprep.subr.bf16.mxu0 %v13933_v52  ;;  %v13943_v40 = vld [vmem:[%s19689_s2 + $0x60] ss:$16 sps:$4 sm:$0xff]   ;;  %v13951_v19 = vld [vmem:[%s19689_s2 + $0x84] ss:$16 sps:$4 sm:$0xff]  }
 0x27d   :  { %2932 = vmatprep.subr.bf16.mxu1 %v13936_v60  ;;  %v14996_v27 = vpop.eup %14995  ;;  %v1568_v49 = vrot.slane %v1512_v24, %v16610_v33  ;;  %1585 = vst [vmem:[%s19692_s5 + $0x4] sm:$0x1] %v1584_v37  ;;  %1588 = vst [vmem:[%s19692_s5 + $0x8] sm:$0x1] %v1587_v39  ;;  %v1590_v47 = vsel %vm16614_vm9, %v1540_v23, %v1589_v21  ;;  %v1596_v50 = vsel %vm16614_vm9, %v1554_v28, %v1595_v11  ;;  %v13949_v24 = vld [vmem:[%s19689_s2 + $0x80] ss:$16 sps:$4 sm:$0xff]  }
 0x27e   :  { %1594 = vst [vmem:[%s19692_s5 + $0x10] sm:$0x1] %v1593_v41  ;;  %v1599_v51 = vsel %vm16614_vm9, %v1561_v32, %v1598_v13  ;;  %2921 = vmatprep.mubr.bf16.mxu0 %v16024_v0  ;;  %v14998_v29 = vpop.eup %14997  ;;  %1591 = vst [vmem:[%s19692_s5 + $0xc] sm:$0x1] %v1590_v47  ;;  %v2010_v52 = vadd.f32 1.0, %v14986_v54  ;;  %v2011_v43 = vadd.f32 1.0, %v14988_v1  ;;  %2892 = vmatpush1.bf16.msra.mxu0 %v13931_v14  ;;  %15001 = vrcp.f32 %v2008_v57 }
 0x27f   :  { %1597 = vst [vmem:[%s19692_s5 + $0x14] sm:$0x1] %v1596_v50  ;;  %1600 = vst [vmem:[%s19692_s5 + $0x18] sm:$0x1] %v1599_v51  ;;  %2962 = vmatprep.mubr.bf16.mxu1 %v16024_v0  ;;  %v1602_v56 = vsel %vm16614_vm9, %v1568_v49, %v1601_v16  ;;  %v2012_v59 = vadd.f32 1.0, %v14990_v6  ;;  %v2042_v60 = vrot.slane %v16589_v35, 1  ;;  %2893 = vmatprep.subr.bf16.mxu0 %v13939_v34  ;;  %15003 = vrcp.f32 %v2009_v42 }
 0x280   :  { %2933 = vmatpush1.bf16.msra.mxu1 %v13934_v26  ;;  %v13940_v54 = vld [vmem:[%s19689_s2 + $0x48] ss:$16 sps:$4 sm:$0xff]   ;;  %v13945_v1 = vld [vmem:[%s19689_s2 + $0x64] ss:$16 sps:$4 sm:$0xff]   ;;  %v15000_v18 = vpop.eup %14999  ;;  %1603 = vst [vmem:[%s19692_s5 + $0x1c] sm:$0x1] %v1602_v56  ;;  %15005 = vrcp.f32 %v2010_v52 }
 0x281   :  { %v2013_v46 = vadd.f32 1.0, %v14992_v15  ;;  %v2043_v57 = vrot.slane %v16591_v63, 1  ;;  %2934 = vmatprep.subr.bf16.mxu1 %v13942_v48  ;;  %v2014_v3 = vadd.f32 1.0, %v14994_v36  ;;  %v2044_v20 = vrot.slane %v16585_v61, 1  ;;  %v13946_v6 = vld [vmem:[%s19689_s2 + $0x68] ss:$16 sps:$4 sm:$0xff]  }
 0x282   :  { %v2015_v5 = vadd.f32 1.0, %v14996_v27  ;;  %15007 = vrcp.f32 %v2011_v43  ;;  %v2045_v21 = vrot.slane %v16587_v62, 1  ;;  %2894 = vmatpush1.bf16.msra.mxu0 %v13937_v55  ;;  %v2046_v7 = vrot.slane %v16595_v4, 1  ;;  %v13954_v13 = vld [vmem:[%s19689_s2 + $0x8c] ss:$16 sps:$4 sm:$0xff]  }
 0x283   :  { %15009 = vrcp.f32 %v2012_v59  ;;  %v12668_v8 = vmul.f32 -1.442695, %v2042_v60  ;;  %2895 = vmatprep.subr.bf16.mxu0 %v13945_v1  ;;  %v2047_v9 = vrot.slane %v16597_v38, 1  ;;  %v12669_v11 = vmul.f32 -1.442695, %v2043_v57 }
 0x284   :  { %2935 = vmatpush1.bf16.msra.mxu1 %v13940_v54  ;;  %15011 = vrcp.f32 %v2013_v46  ;;  %v12670_v14 = vmul.f32 -1.442695, %v2044_v20  ;;  %v12671_v15 = vmul.f32 -1.442695, %v2045_v21  ;;  %v12672_v23 = vmul.f32 -1.442695, %v2046_v7 }
 0x285   :  { %2936 = vmatprep.subr.bf16.mxu1 %v13948_v2  ;;  %15013 = vrcp.f32 %v2014_v3  ;;  %v13952_v28 = vld [vmem:[%s19689_s2 + $0x88] ss:$16 sps:$4 sm:$0xff]   ;;  %v13957_v32 = vld [vmem:[%s19689_s2 + $0xa4] ss:$16 sps:$4 sm:$0xff]   ;;  %v12673_v26 = vmul.f32 -1.442695, %v2047_v9  ;;  %v13683_v48 = vcombine.low %v16404_v25, %v16404_v25 }
 0x286   :  { %15015 = vrcp.f32 %v2015_v5  ;;  %2896 = vmatpush1.bf16.msra.mxu0 %v13943_v40  ;;  %v13960_v34 = vld [vmem:[%s19689_s2 + $0xac] ss:$16 sps:$4 sm:$0xff]   ;;  %v2080_v37 = vadd.f32 1.0, %v14998_v29  ;;  %v2081_v41 = vadd.f32 1.0, %v15000_v18  ;;  %v13955_v16 = vld [vmem:[%s19689_s2 + $0xa0] ss:$16 sps:$4 sm:$0xff]   ;;  %v2200_v29 = vrot.slane %v848_v30, %v16279_v45 }
 0x287   :  { %15017 = vpow2.f32 %v12668_v8  ;;  %2897 = vmatprep.subr.bf16.mxu0 %v13951_v19  ;;  %v2104_v27 = vrot.slane %v16581_v58, 2  ;;  %v13958_v49 = vld [vmem:[%s19689_s2 + $0xa8] ss:$16 sps:$4 sm:$0xff]   ;;  %v13963_v47 = vld [vmem:[%s19689_s2 + $0xc4] ss:$16 sps:$4 sm:$0xff]   ;;  %v2105_v51 = vrot.slane %v16583_v31, 2  ;;  %v16799_v60 = vrot.slane %v13683_v48, %v16279_v45 }
 0x288   :  { %2937 = vmatpush1.bf16.msra.mxu1 %v13946_v6  ;;  %15019 = vpow2.f32 %v12669_v11  ;;  %v16758_v36 = vpop.eup %15001  ;;  %v13966_v52 = vld [vmem:[%s19689_s2 + $0xcc] ss:$16 sps:$4 sm:$0xff]   ;;  %v2106_v55 = vrot.slane %v16589_v35, 2  ;;  %v2107_v59 = vrot.slane %v16591_v63, 2  ;;  %v2108_v30 = vrot.slane %v16585_v61, 2 }
 0x289   :  { %2938 = vmatprep.subr.bf16.mxu1 %v13954_v13  ;;  %15021 = vpow2.f32 %v12670_v14  ;;  %v16760_v39 = vpop.eup %15003  ;;  %v13964_v54 = vld [vmem:[%s19689_s2 + $0xc8] ss:$16 sps:$4 sm:$0xff]   ;;  %v13969_v1 = vld [vmem:[%s19689_s2 + $0xe4] ss:$16 sps:$4 sm:$0xff]   ;;  %v2208_v46 = vcombine.high %v2200_v29, %v2200_v29  ;;  %v16810_v57 = vrot.slane %v2200_v29, %v16279_v45  ;;  %v13972_v2 = vld [vmem:[%s19689_s2 + $0xec] ss:$16 sps:$4 sm:$0xff]   ;;  %v16820_v7 = vrot.slane %v16799_v60, %v16279_v45 }
 0x28a   :  { %15023 = vpow2.f32 %v12671_v15  ;;  %2898 = vmatpush1.bf16.msra.mxu0 %v13949_v24  ;;  %v16765_v42 = vpop.eup %15005  ;;  %v13967_v21 = vld [vmem:[%s19689_s2 + $0xe0] ss:$16 sps:$4 sm:$0xff]   ;;  %v13970_v8 = vld [vmem:[%s19689_s2 + $0xe8] ss:$16 sps:$4 sm:$0xff]   ;;  %v13975_v19 = vld [vmem:[%s19688_s1 + $0x4] ss:$16 sps:$4 sm:$0xff]   ;;  %v2209_v9 = vcombine.high %v16799_v60, %v16799_v60 }
 0x28b   :  { %15025 = vpow2.f32 %v12672_v23  ;;  %2899 = vmatprep.subr.bf16.mxu0 %v13957_v32  ;;  %v16831_v14 = vrot.slane %v2208_v46, %v16279_v45  ;;  %v2238_v15 = vcombine.high %v16810_v57, %v16810_v57  ;;  %v13978_v24 = vld [vmem:[%s19688_s1 + $0xc] ss:$16 sps:$4 sm:$0xff]   ;;  %v2109_v32 = vrot.slane %v16587_v62, 2 }
 0x28c   :  { %2939 = vmatpush1.bf16.msra.mxu1 %v13952_v28  ;;  %v16776_v50 = vpop.eup %15007  ;;  %15027 = vpow2.f32 %v12673_v26  ;;  %v2128_v26 = vrot.slane %v16581_v58, 3  ;;  %v2131_v58 = vrot.slane %v16591_v63, 3  ;;  %v2132_v29 = vrot.slane %v16585_v61, 3 }
 0x28d   :  { %2940 = vmatprep.subr.bf16.mxu1 %v13960_v34  ;;  %v16786_v43 = vpop.eup %15009  ;;  %15029 = vrcp.f32 %v2080_v37  ;;  %v2237_v46 = vrot.slane %v2209_v9, %v16279_v45  ;;  %vm9340_vm9 = vsmask.f32 7946 }
 0x28e   :  { %v16789_v56 = vpop.eup %15011  ;;  %15031 = vrcp.f32 %v2081_v41  ;;  %2900 = vmatpush1.bf16.msra.mxu0 %v13955_v16  ;;  %v2110_v41 = vrot.slane %v16595_v4, 2  ;;  %v2129_v16 = vrot.slane %v16583_v31, 3  ;;  %vm18894_vm10 = vmand %vm772_vm1, %vm9340_vm9 }
 0x28f   :  { %v16795_v25 = vpop.eup %15013  ;;  %15033 = vtanh.f32 %v2104_v27  ;;  %2901 = vmatprep.subr.bf16.mxu0 %v13963_v47  ;;  %v2130_v47 = vrot.slane %v16589_v35, 3  ;;  %v2134_v35 = vrot.slane %v16595_v4, 3  ;;  %v2240_v4 = vcombine.high %v16831_v14, %v16831_v14 }
 0x290   :  { %2941 = vmatpush1.bf16.msra.mxu1 %v13958_v49  ;;  %v16807_v18 = vpop.eup %15015  ;;  %15035 = vtanh.f32 %v2105_v51  ;;  %v2111_v49 = vrot.slane %v16597_v38, 2  ;;  %v12675_v60 = vmul.f32 -1.442695, %v2129_v16 }
 0x291   :  { %2942 = vmatprep.subr.bf16.mxu1 %v13966_v52  ;;  %v15018_v3 = vpop.eup %15017  ;;  %15037 = vtanh.f32 %v2106_v55  ;;  %v2133_v55 = vrot.slane %v16587_v62, 3  ;;  %v12676_v61 = vmul.f32 -1.442695, %v2130_v47  ;;  %v2135_v62 = vrot.slane %v16597_v38, 3 }
 0x292   :  { %v15020_v20 = vpop.eup %15019  ;;  %v2082_v5 = vadd.f32 1.0, %v15018_v3  ;;  %15039 = vtanh.f32 %v2107_v59  ;;  %2902 = vmatpush1.bf16.msra.mxu0 %v13961_v22  ;;  %v12674_v59 = vmul.f32 -1.442695, %v2128_v26 }
 0x293   :  { %v15022_v40 = vpop.eup %15021  ;;  %v2083_v6 = vadd.f32 1.0, %v15020_v20  ;;  %15041 = vtanh.f32 %v2108_v30  ;;  %2903 = vmatprep.subr.bf16.mxu0 %v13969_v1 }
 0x294   :  { %2943 = vmatpush1.bf16.msra.mxu1 %v13964_v54  ;;  %v15024_v11 = vpop.eup %15023  ;;  %v2084_v13 = vadd.f32 1.0, %v15022_v40  ;;  %15043 = vrcp.f32 %v2082_v5  ;;  %v12678_v5 = vmul.f32 -1.442695, %v2132_v29  ;;  %v12679_v40 = vmul.f32 -1.442695, %v2133_v55 }
 0x295   :  { %2944 = vmatprep.subr.bf16.mxu1 %v13972_v2  ;;  %v15026_v23 = vpop.eup %15025  ;;  %v2085_v28 = vadd.f32 1.0, %v15024_v11  ;;  %15045 = vrcp.f32 %v2083_v6  ;;  %v12677_v2 = vmul.f32 -1.442695, %v2131_v58  ;;  %v12680_v6 = vmul.f32 -1.442695, %v2134_v35 }
 0x296   :  { %v15028_v34 = vpop.eup %15027  ;;  %v2086_v37 = vadd.f32 1.0, %v15026_v23  ;;  %15047 = vrcp.f32 %v2084_v13  ;;  %2904 = vmatpush1.bf16.msra.mxu0 %v13967_v21  ;;  %v12681_v13 = vmul.f32 -1.442695, %v2135_v62 }
 0x297   :  { %v15030_v48 = vpop.eup %15029  ;;  %v2087_v27 = vadd.f32 1.0, %v15028_v34  ;;  %15049 = vrcp.f32 %v2085_v28  ;;  %3365 = vmatprep.subr.bf16.mxu0 %v13975_v19 }
 0x298   :  { %2945 = vmatpush1.bf16.msra.mxu1 %v13970_v8  ;;  %v15032_v51 = vpop.eup %15031  ;;  %15051 = vrcp.f32 %v2086_v37  ;;  %v2250_v52 = vmul.f32 %v15030_v48, %v16810_v57 }
 0x299   :  { %3406 = vmatprep.subr.bf16.mxu1 %v13978_v24  ;;  %v15034_v31 = vpop.eup %15033  ;;  %15053 = vrcp.f32 %v2087_v27  ;;  %v2251_v22 = vmul.f32 %v15032_v51, %v16831_v14 }
 0x29a   :  { %v15036_v30 = vpop.eup %15035  ;;  %15055 = vtanh.f32 %v2109_v32  ;;  %v2258_v54 = vmul.f32 %v15034_v31, %v16758_v36 }
 0x29b   :  { %v15038_v63 = vpop.eup %15037  ;;  %15057 = vtanh.f32 %v2110_v41  ;;  %v2259_v1 = vmul.f32 %v15036_v30, %v16760_v39  ;;  %v2239_v39 = vcombine.high %v16820_v7, %v16820_v7 }
 0x29c   :  { %v15040_v57 = vpop.eup %15039  ;;  %15059 = vtanh.f32 %v2111_v49  ;;  %v2266_v3 = vadd.f32 %v2258_v54, %v2250_v52  ;;  %v2260_v38 = vmul.f32 %v15038_v63, %v16765_v42 }
 0x29d   :  { %v15042_v20 = vpop.eup %15041  ;;  %15061 = vpow2.f32 %v12674_v59  ;;  %v2267_v36 = vadd.f32 %v2259_v1, %v2251_v22  ;;  %v2261_v14 = vmul.f32 %v15040_v57, %v16776_v50 }
 0x29e   :  { %v15044_v21 = vpop.eup %15043  ;;  %15063 = vpow2.f32 %v12675_v60  ;;  %v2262_v32 = vmul.f32 %v15042_v20, %v16786_v43 }
 0x29f   :  { %v15046_v8 = vpop.eup %15045  ;;  %15065 = vpow2.f32 %v12676_v61  ;;  %v2252_v19 = vmul.f32 %v15044_v21, %v2238_v15  ;;  %v2355_v9 = vcombine.low %v2266_v3, %v2267_v36  ;;  %v2241_v15 = vcombine.high %v2237_v46, %v2237_v46 }
 0x2a0   :  { %v15048_v11 = vpop.eup %15047  ;;  %15067 = vpow2.f32 %v12677_v2  ;;  %v2253_v24 = vmul.f32 %v15046_v8, %v2240_v4 }
 0x2a1   :  { %v15050_v23 = vpop.eup %15049  ;;  %15069 = vpow2.f32 %v12678_v5  ;;  %v2254_v28 = vmul.f32 %v15048_v11, %v16820_v7  ;;  %v2268_v26 = vadd.f32 %v2260_v38, %v2252_v19  ;;  %v2365_v43 = vrot.slane %v2355_v9, %v16279_v45 }
 0x2a2   :  { %v15052_v34 = vpop.eup %15051  ;;  %15071 = vpow2.f32 %v12679_v40  ;;  %v2269_v37 = vadd.f32 %v2261_v14, %v2253_v24  ;;  %v2255_v41 = vmul.f32 %v15050_v23, %v2237_v46 }
 0x2a3   :  { %v15054_v42 = vpop.eup %15053  ;;  %15073 = vpow2.f32 %v12680_v6  ;;  %v2270_v16 = vadd.f32 %v2262_v32, %v2254_v28  ;;  %v2256_v48 = vmul.f32 %v15052_v34, %v2239_v39 }
 0x2a4   :  { %v15056_v27 = vpop.eup %15055  ;;  %15075 = vpow2.f32 %v12681_v13  ;;  %v2356_v49 = vcombine.low %v2268_v26, %v2269_v37  ;;  %v2257_v50 = vmul.f32 %v15054_v42, %v2241_v15 }
 0x2a5   :  { %v15058_v47 = vpop.eup %15057  ;;  %v2263_v51 = vmul.f32 %v15056_v27, %v16789_v56  ;;  %15077 = vtanh.f32 %v2266_v3 }
 0x2a6   :  { %v15060_v7 = vpop.eup %15059  ;;  %15079 = vtanh.f32 %v2267_v36  ;;  %v2372_v58 = vrot.slane %v2356_v49, %v16279_v45  ;;  %v2264_v29 = vmul.f32 %v15058_v47, %v16795_v25 }
 0x2a7   :  { %v15062_v52 = vpop.eup %15061  ;;  %15081 = vtanh.f32 %v2268_v26  ;;  %v2265_v31 = vmul.f32 %v15060_v7, %v16807_v18  ;;  %v2271_v55 = vadd.f32 %v2263_v51, %v2255_v41 }
 0x2a8   :  { %v15064_v59 = vpop.eup %15063  ;;  %v2168_v22 = vadd.f32 1.0, %v15062_v52  ;;  %v2387_v30 = vcombine.low %v2365_v43, %v2372_v58  ;;  %v2272_v35 = vadd.f32 %v2264_v29, %v2256_v48  ;;  %15083 = vtanh.f32 %v2269_v37 }
 0x2a9   :  { %v15066_v56 = vpop.eup %15065  ;;  %v2169_v60 = vadd.f32 1.0, %v15064_v59  ;;  %v2273_v54 = vadd.f32 %v2265_v31, %v2257_v50  ;;  %15085 = vtanh.f32 %v2270_v16  ;;  %v2357_v63 = vcombine.low %v2270_v16, %v2271_v55 }
 0x2aa   :  { %v15068_v61 = vpop.eup %15067  ;;  %v2170_v1 = vadd.f32 1.0, %v15066_v56  ;;  %15087 = vrcp.f32 %v2168_v22  ;;  %v16870_v39 = vrot.slane %v2387_v30, %v16279_v45 }
 0x2ab   :  { %v15070_v46 = vpop.eup %15069  ;;  %v2171_v25 = vadd.f32 1.0, %v15068_v61  ;;  %15089 = vrcp.f32 %v2169_v60  ;;  %v2358_v57 = vcombine.low %v2272_v35, %v2273_v54  ;;  %v2379_v20 = vrot.slane %v2357_v63, %v16279_v45 }
 0x2ac   :  { %v15072_v62 = vpop.eup %15071  ;;  %v2172_v18 = vadd.f32 1.0, %v15070_v46  ;;  %15091 = vrcp.f32 %v2170_v1 }
 0x2ad   :  { %v15074_v2 = vpop.eup %15073  ;;  %v2173_v3 = vadd.f32 1.0, %v15072_v62  ;;  %15093 = vrcp.f32 %v2171_v25  ;;  %v2386_v5 = vrot.slane %v2358_v57, %v16279_v45 }
 0x2ae   :  { %v15076_v4 = vpop.eup %15075  ;;  %v2174_v36 = vadd.f32 1.0, %v15074_v2  ;;  %15095 = vrcp.f32 %v2172_v18 }
 0x2af   :  { %v15078_v21 = vpop.eup %15077  ;;  %v2175_v40 = vadd.f32 1.0, %v15076_v4  ;;  %15097 = vrcp.f32 %v2173_v3  ;;  %v2388_v6 = vcombine.low %v2379_v20, %v2386_v5 }
 0x2b0   :  { %v15080_v8 = vpop.eup %15079  ;;  %15099 = vrcp.f32 %v2174_v36 }
 0x2b1   :  { %v15082_v19 = vpop.eup %15081  ;;  %15101 = vrcp.f32 %v2175_v40  ;;  %v16873_v38 = vrot.slane %v2388_v6, %v16279_v45  ;;  %v13973_v6 = vld [vmem:[%s19688_s1] ss:$16 sps:$4 sm:$0xff]  }
 0x2b2   :  { %v15084_v9 = vpop.eup %15083  ;;  %15103 = vtanh.f32 %v2271_v55 }
 0x2b3   :  { %v15086_v11 = vpop.eup %15085  ;;  %15105 = vtanh.f32 %v2272_v35  ;;  %v2403_v13 = vcombine.low %v16870_v39, %v16873_v38  ;;  %v14105_v39 = vld [vmem:[%s19689_s2 + $0xc0] ss:$16 sps:$4 sm:$0xff]  }
 0x2b4   :  { %v15088_v24 = vpop.eup %15087  ;;  %15107 = vtanh.f32 %v2273_v54 }
 0x2b5   :  { %v15090_v14 = vpop.eup %15089  ;;  %v2282_v23 = vmul.f32 %v15088_v24, %v15078_v21  ;;  %v13984_v24 = vld [vmem:[%s19688_s1 + $0x2c] ss:$16 sps:$4 sm:$0xff]  }
 0x2b6   :  { %v15092_v28 = vpop.eup %15091  ;;  %v2283_v32 = vmul.f32 %v15090_v14, %v15080_v8  ;;  %v13976_v8 = vld [vmem:[%s19688_s1 + $0x8] ss:$16 sps:$4 sm:$0xff]   ;;  %v13979_v14 = vld [vmem:[%s19688_s1 + $0x20] ss:$16 sps:$4 sm:$0xff]  }
 0x2b7   :  { %v15094_v26 = vpop.eup %15093  ;;  %v2284_v34 = vmul.f32 %v15092_v28, %v15082_v19  ;;  %v2290_v41 = vpack.c.bf16 %v2282_v23, %v2282_v23  ;;  %v13982_v23 = vld [vmem:[%s19688_s1 + $0x28] ss:$16 sps:$4 sm:$0xff]   ;;  %v13987_v28 = vld [vmem:[%s19688_s1 + $0x44] ss:$16 sps:$4 sm:$0xff]  }
 0x2b8   :  { %v15096_v37 = vpop.eup %15095  ;;  %v2285_v15 = vmul.f32 %v15094_v26, %v15084_v9  ;;  %v2291_v42 = vpack.c.bf16 %v2283_v32, %v2283_v32  ;;  %v13990_v32 = vld [vmem:[%s19688_s1 + $0x4c] ss:$16 sps:$4 sm:$0xff]   ;;  %v13985_v26 = vld [vmem:[%s19688_s1 + $0x40] ss:$16 sps:$4 sm:$0xff]  }
 0x2b9   :  { %v15098_v16 = vpop.eup %15097  ;;  %v2286_v48 = vmul.f32 %v15096_v37, %v15086_v11  ;;  %v2292_v27 = vpack.c.bf16 %v2284_v34, %v2284_v34  ;;  %v2306_v29 = vunpack.c.l.b16 %v2290_v41  ;;  %v13981_v11 = vld [vmem:[%s19688_s1 + $0x24] ss:$16 sps:$4 sm:$0xff]   ;;  %v13988_v34 = vld [vmem:[%s19688_s1 + $0x48] ss:$16 sps:$4 sm:$0xff]   ;;  %v13991_v41 = vld [vmem:[%s19688_s1 + $0x60] ss:$16 sps:$4 sm:$0xff]  }
 0x2ba   :  { %v15100_v49 = vpop.eup %15099  ;;  %v2293_v50 = vpack.c.bf16 %v2285_v15, %v2285_v15  ;;  %v2307_v47 = vunpack.c.l.b16 %v2291_v42  ;;  %v13993_v37 = vld [vmem:[%s19688_s1 + $0x64] ss:$16 sps:$4 sm:$0xff]   ;;  %v13996_v15 = vld [vmem:[%s19688_s1 + $0x6c] ss:$16 sps:$4 sm:$0xff]   ;;  %v13994_v42 = vld [vmem:[%s19688_s1 + $0x68] ss:$16 sps:$4 sm:$0xff]  }
 0x2bb   :  { %v15102_v51 = vpop.eup %15101  ;;  %v2294_v7 = vpack.c.bf16 %v2286_v48, %v2286_v48  ;;  %v2308_v43 = vunpack.c.l.b16 %v2292_v27  ;;  %v14002_v48 = vld [vmem:[%s19688_s1 + $0x8c] ss:$16 sps:$4 sm:$0xff]   ;;  %v13997_v27 = vld [vmem:[%s19688_s1 + $0x80] ss:$16 sps:$4 sm:$0xff]  }
 0x2bc   :  { %v15104_v58 = vpop.eup %15103  ;;  %v2309_v52 = vunpack.c.l.b16 %v2293_v50  ;;  %v2330_v31 = vrot.slane %v2307_v47, 7  ;;  %v14005_v50 = vld [vmem:[%s19688_s1 + $0xa4] ss:$16 sps:$4 sm:$0xff]   ;;  %v14008_v47 = vld [vmem:[%s19688_s1 + $0xac] ss:$16 sps:$4 sm:$0xff]  }
 0x2bd   :  { %v15106_v55 = vpop.eup %15105  ;;  %v2287_v59 = vmul.f32 %v15104_v58, %v15098_v16  ;;  %v2310_v22 = vunpack.c.l.b16 %v2294_v7  ;;  %v2332_v30 = vrot.slane %v2308_v43, 6  ;;  %v13999_v16 = vld [vmem:[%s19688_s1 + $0x84] ss:$16 sps:$4 sm:$0xff]   ;;  %v14006_v7 = vld [vmem:[%s19688_s1 + $0xa8] ss:$16 sps:$4 sm:$0xff]  }
 0x2be   :  { %v15108_v35 = vpop.eup %15107  ;;  %v2288_v56 = vmul.f32 %v15106_v55, %v15100_v49  ;;  %v2331_v60 = vsel %vm769_vm0, %v2330_v31, %v2306_v29  ;;  %v2334_v54 = vrot.slane %v2309_v52, 5  ;;  %v14000_v49 = vld [vmem:[%s19688_s1 + $0x88] ss:$16 sps:$4 sm:$0xff]   ;;  %v14011_v43 = vld [vmem:[%s19688_s1 + $0xc4] ss:$16 sps:$4 sm:$0xff]  }
 0x2bf   :  { %v2289_v63 = vmul.f32 %v15108_v35, %v15102_v51  ;;  %v2295_v61 = vpack.c.bf16 %v2287_v59, %v2287_v59  ;;  %v2333_v1 = vsel %vm772_vm1, %v2332_v30, %v2331_v60  ;;  %v2336_v46 = vrot.slane %v2310_v22, 4  ;;  %v14003_v51 = vld [vmem:[%s19688_s1 + $0xa0] ss:$16 sps:$4 sm:$0xff]   ;;  %v14014_v58 = vld [vmem:[%s19688_s1 + $0xcc] ss:$16 sps:$4 sm:$0xff]  }
 0x2c0   :  { %v2296_v25 = vpack.c.bf16 %v2288_v56, %v2288_v56  ;;  %v2335_v57 = vsel %vm775_vm2, %v2334_v54, %v2333_v1  ;;  %v14009_v29 = vld [vmem:[%s19688_s1 + $0xc0] ss:$16 sps:$4 sm:$0xff]   ;;  %v14012_v52 = vld [vmem:[%s19688_s1 + $0xc8] ss:$16 sps:$4 sm:$0xff]   ;;  %v14017_v31 = vld [vmem:[%s19688_s1 + $0xe4] ss:$16 sps:$4 sm:$0xff]  }
 0x2c1   :  { %v2297_v62 = vpack.c.bf16 %v2289_v63, %v2289_v63  ;;  %v2311_v18 = vunpack.c.l.b16 %v2295_v61  ;;  %v2337_v2 = vsel %vm778_vm3, %v2336_v46, %v2335_v57  ;;  %v14020_v55 = vld [vmem:[%s19688_s1 + $0xec] ss:$16 sps:$4 sm:$0xff]   ;;  %v14015_v59 = vld [vmem:[%s19688_s1 + $0xe0] ss:$16 sps:$4 sm:$0xff]   ;;  %v14018_v22 = vld [vmem:[%s19688_s1 + $0xe8] ss:$16 sps:$4 sm:$0xff]  }
 0x2c2   :  { %v2312_v3 = vunpack.c.l.b16 %v2296_v25  ;;  %v14023_v35 = vld [vmem:[#allocation4 + $0x4] ss:$16 sps:$4 sm:$0xff]   ;;  %v14026_v56 = vld [vmem:[#allocation4 + $0xc] ss:$16 sps:$4 sm:$0xff]   ;;  %v14021_v60 = vld [vmem:[#allocation4] ss:$16 sps:$4 sm:$0xff]  }
 0x2c3   :  { %v2313_v20 = vunpack.c.l.b16 %v2297_v62  ;;  %v2338_v5 = vrot.slane %v2311_v18, 3  ;;  %v14024_v54 = vld [vmem:[#allocation4 + $0x8] ss:$16 sps:$4 sm:$0xff]   ;;  %v14029_v63 = vld [vmem:[#allocation4 + $0x24] ss:$16 sps:$4 sm:$0xff]  }
 0x2c4   :  { %v2340_v4 = vrot.slane %v2312_v3, 2  ;;  %v14032_v61 = vld [vmem:[#allocation4 + $0x2c] ss:$16 sps:$4 sm:$0xff]   ;;  %v14027_v25 = vld [vmem:[#allocation4 + $0x20] ss:$16 sps:$4 sm:$0xff]  }
 0x2c5   :  { %v2339_v36 = vsel %vm781_vm4, %v2338_v5, %v2337_v2  ;;  %v2342_v21 = vrot.slane %v2313_v20, 1  ;;  %v14030_v57 = vld [vmem:[#allocation4 + $0x28] ss:$16 sps:$4 sm:$0xff]  }
 0x2c6   :  { %v2341_v40 = vsel %vm784_vm5, %v2340_v4, %v2339_v36  ;;  %v14035_v4 = vld [vmem:[#allocation4 + $0x44] ss:$16 sps:$4 sm:$0xff]   ;;  %v14038_v36 = vld [vmem:[#allocation4 + $0x4c] ss:$16 sps:$4 sm:$0xff]  }
 0x2c7   :  { %v2343_v19 = vsel %vm787_vm6, %v2342_v21, %v2341_v40  ;;  %v14033_v21 = vld [vmem:[#allocation4 + $0x40] ss:$16 sps:$4 sm:$0xff]   ;;  %v14036_v40 = vld [vmem:[#allocation4 + $0x48] ss:$16 sps:$4 sm:$0xff]  }
 0x2c8   :  { %v2344_v9 = vpack.c.b16 %v2343_v19, %v2343_v19  ;;  %v14039_v19 = vld [vmem:[#allocation4 + $0x60] ss:$16 sps:$4 sm:$0xff]  }
 0x2ca   :  { %2346 = vst [vmem:[#allocation2] sm:$0xf] %v2344_v9  ;;  %2922 = vmatmul.mubr.bf16.vlgmr.msra.gmra.mrb[20].mxu0 %v2344_v9  ;;  %2963 = vmatmul.mubr.bf16.vlgmr.msra.gmra.mrb[20].mxu1 %v2344_v9  ;;  %v14042_v9 = vld [vmem:[#allocation4 + $0x68] ss:$16 sps:$4 sm:$0xff]  }
 0x2cb   :  { %3366 = vmatpush1.bf16.msra.mxu0 %v13973_v6  ;;  %3407 = vmatpush1.bf16.msra.mxu1 %v13976_v8  ;;  %v14041_v6 = vld [vmem:[#allocation4 + $0x64] ss:$16 sps:$4 sm:$0xff]   ;;  %v14044_v8 = vld [vmem:[#allocation4 + $0x6c] ss:$16 sps:$4 sm:$0xff]  }
 0x2cc   :  { %3367 = vmatprep.subr.bf16.mxu0 %v13981_v11  ;;  %3408 = vmatprep.subr.bf16.mxu1 %v13984_v24  ;;  %v14047_v11 = vld [vmem:[#allocation4 + $0x84] ss:$16 sps:$4 sm:$0xff]   ;;  %v14050_v24 = vld [vmem:[#allocation4 + $0x8c] ss:$16 sps:$4 sm:$0xff]  }
 0x2cd   :  { %3397 = vmatprep.mubr.bf16.mxu0 %v16024_v0  ;;  %3438 = vmatprep.mubr.bf16.mxu1 %v16024_v0 }
 0x2cf   :  { %3368 = vmatpush1.bf16.msra.mxu0 %v13979_v14  ;;  %3409 = vmatpush1.bf16.msra.mxu1 %v13982_v23  ;;  %v14045_v14 = vld [vmem:[#allocation4 + $0x80] ss:$16 sps:$4 sm:$0xff]   ;;  %v14048_v23 = vld [vmem:[#allocation4 + $0x88] ss:$16 sps:$4 sm:$0xff]  }
 0x2d0   :  { %3369 = vmatprep.subr.bf16.mxu0 %v13987_v28  ;;  %3410 = vmatprep.subr.bf16.mxu1 %v13990_v32  ;;  %v14053_v28 = vld [vmem:[#allocation4 + $0xa4] ss:$16 sps:$4 sm:$0xff]   ;;  %v14056_v32 = vld [vmem:[#allocation4 + $0xac] ss:$16 sps:$4 sm:$0xff]  }
 0x2d1   :  { %v3172_v30 = vld [vmem:[#allocation2] sm:$0xf] }
 0x2d3   :  { %3370 = vmatpush1.bf16.msra.mxu0 %v13985_v26  ;;  %3411 = vmatpush1.bf16.msra.mxu1 %v13988_v34  ;;  %v14051_v26 = vld [vmem:[#allocation4 + $0xa0] ss:$16 sps:$4 sm:$0xff]   ;;  %v14054_v34 = vld [vmem:[#allocation4 + $0xa8] ss:$16 sps:$4 sm:$0xff]  }
 0x2d4   :  { %3371 = vmatprep.subr.bf16.mxu0 %v13993_v37  ;;  %3412 = vmatprep.subr.bf16.mxu1 %v13996_v15  ;;  %v14059_v37 = vld [vmem:[#allocation4 + $0xc4] ss:$16 sps:$4 sm:$0xff]   ;;  %v14062_v15 = vld [vmem:[#allocation4 + $0xcc] ss:$16 sps:$4 sm:$0xff]  }
 0x2d7   :  { %3372 = vmatpush1.bf16.msra.mxu0 %v13991_v41  ;;  %3413 = vmatpush1.bf16.msra.mxu1 %v13994_v42  ;;  %v14057_v41 = vld [vmem:[#allocation4 + $0xc0] ss:$16 sps:$4 sm:$0xff]   ;;  %v14060_v42 = vld [vmem:[#allocation4 + $0xc8] ss:$16 sps:$4 sm:$0xff]  }
 0x2d8   :  { %3373 = vmatprep.subr.bf16.mxu0 %v13999_v16  ;;  %3414 = vmatprep.subr.bf16.mxu1 %v14002_v48  ;;  %v14065_v16 = vld [vmem:[#allocation4 + $0xe4] ss:$16 sps:$4 sm:$0xff]   ;;  %v14068_v48 = vld [vmem:[#allocation4 + $0xec] ss:$16 sps:$4 sm:$0xff]  }
 0x2db   :  { %3374 = vmatpush1.bf16.msra.mxu0 %v13997_v27  ;;  %3415 = vmatpush1.bf16.msra.mxu1 %v14000_v49  ;;  %v14063_v27 = vld [vmem:[#allocation4 + $0xe0] ss:$16 sps:$4 sm:$0xff]   ;;  %v14066_v49 = vld [vmem:[#allocation4 + $0xe8] ss:$16 sps:$4 sm:$0xff]  }
 0x2dc   :  { %3375 = vmatprep.subr.bf16.mxu0 %v14005_v50  ;;  %3416 = vmatprep.subr.bf16.mxu1 %v14008_v47  ;;  %v14071_v50 = vld [vmem:[%s19689_s2 + $0x4] ss:$16 sps:$4 sm:$0xff]   ;;  %v14074_v47 = vld [vmem:[%s19689_s2 + $0xc] ss:$16 sps:$4 sm:$0xff]  }
 0x2df   :  { %3376 = vmatpush1.bf16.msra.mxu0 %v14003_v51  ;;  %3417 = vmatpush1.bf16.msra.mxu1 %v14006_v7  ;;  %v2971_v51 = vld [vmem:[%s19691_s4] sm:$0xf] }
 0x2e0   :  { %3377 = vmatprep.subr.bf16.mxu0 %v14011_v43  ;;  %3418 = vmatprep.subr.bf16.mxu1 %v14014_v58  ;;  %v2976_v7 = vrot.slane %v2971_v51, %v16524_v12 }
 0x2e3   :  { %3378 = vmatpush1.bf16.msra.mxu0 %v14009_v29  ;;  %3419 = vmatpush1.bf16.msra.mxu1 %v14012_v52  ;;  %v2980_v29 = vrot.slane %v2971_v51, %v16530_v44 }
 0x2e4   :  { %3379 = vmatprep.subr.bf16.mxu0 %v14017_v31  ;;  %3420 = vmatprep.subr.bf16.mxu1 %v14020_v55 }
 0x2e7   :  { %3380 = vmatpush1.bf16.msra.mxu0 %v14015_v59  ;;  %3421 = vmatpush1.bf16.msra.mxu1 %v14018_v22 }
 0x2e8   :  { %4183 = vmatprep.subr.bf16.mxu0 %v14023_v35  ;;  %4224 = vmatprep.subr.bf16.mxu1 %v14026_v56 }
 0x2ea   :  { %3398 = vmatmul.mubr.bf16.vlgmr.msra.gmra.mrb[24].mxu0 %v3172_v30  ;;  %3439 = vmatmul.mubr.bf16.vlgmr.msra.gmra.mrb[24].mxu1 %v3172_v30 }
 0x2eb   :  { %4215 = vmatprep.mubr.bf16.mxu0 %v16024_v0  ;;  %4256 = vmatprep.mubr.bf16.mxu1 %v16024_v0 }
 0x2ec   :  { %4184 = vmatpush1.bf16.msra.mxu0 %v14021_v60  ;;  %4225 = vmatpush1.bf16.msra.mxu1 %v14024_v54 }
 0x2ed   :  { %4185 = vmatprep.subr.bf16.mxu0 %v14029_v63  ;;  %4226 = vmatprep.subr.bf16.mxu1 %v14032_v61 }
 0x2f0   :  { %4186 = vmatpush1.bf16.msra.mxu0 %v14027_v25  ;;  %4227 = vmatpush1.bf16.msra.mxu1 %v14030_v57 }
 0x2f1   :  { %4187 = vmatprep.subr.bf16.mxu0 %v14035_v4  ;;  %4228 = vmatprep.subr.bf16.mxu1 %v14038_v36 }
 0x2f4   :  { %4188 = vmatpush1.bf16.msra.mxu0 %v14033_v21  ;;  %4229 = vmatpush1.bf16.msra.mxu1 %v14036_v40 }
 0x2f5   :  { %4189 = vmatprep.subr.bf16.mxu0 %v14041_v6  ;;  %4230 = vmatprep.subr.bf16.mxu1 %v14044_v8 }
 0x2f8   :  { %4190 = vmatpush1.bf16.msra.mxu0 %v14039_v19  ;;  %4231 = vmatpush1.bf16.msra.mxu1 %v14042_v9 }
 0x2f9   :  { %4191 = vmatprep.subr.bf16.mxu0 %v14047_v11  ;;  %4232 = vmatprep.subr.bf16.mxu1 %v14050_v24 }
 0x2fc   :  { %4192 = vmatpush1.bf16.msra.mxu0 %v14045_v14  ;;  %4233 = vmatpush1.bf16.msra.mxu1 %v14048_v23 }
 0x2fd   :  { %4193 = vmatprep.subr.bf16.mxu0 %v14053_v28  ;;  %4234 = vmatprep.subr.bf16.mxu1 %v14056_v32 }
 0x300   :  { %4194 = vmatpush1.bf16.msra.mxu0 %v14051_v26  ;;  %4235 = vmatpush1.bf16.msra.mxu1 %v14054_v34 }
 0x301   :  { %4195 = vmatprep.subr.bf16.mxu0 %v14059_v37  ;;  %4236 = vmatprep.subr.bf16.mxu1 %v14062_v15 }
 0x304   :  { %4196 = vmatpush1.bf16.msra.mxu0 %v14057_v41  ;;  %4237 = vmatpush1.bf16.msra.mxu1 %v14060_v42 }
 0x305   :  { %4197 = vmatprep.subr.bf16.mxu0 %v14065_v16  ;;  %4238 = vmatprep.subr.bf16.mxu1 %v14068_v48 }
 0x308   :  { %4198 = vmatpush1.bf16.msra.mxu0 %v14063_v27  ;;  %4239 = vmatpush1.bf16.msra.mxu1 %v14066_v49 }
 0x309   :  { %4441 = vmatprep.subr.bf16.mxu0 %v14071_v50  ;;  %4482 = vmatprep.subr.bf16.mxu1 %v14074_v47 }
 0x34c   :  { %v16978_v1 = vpop.f32.mrb[16].mxu0  ;;  %v16980_v46 = vpop.f32.mrb[16].mxu1 }
 0x34d   :  { %v16982_v62 = vpop.f32.mrb[17].mxu0  ;;  %v16984_v18 = vpop.f32.mrb[17].mxu1 }
 0x34e   :  { %v2669_v2 = vpop.f32.mrb[18].mxu0  ;;  %v2710_v3 = vpop.f32.mrb[18].mxu1 }
 0x34f   :  { %v2670_v20 = vpop.f32.mrb[19].mxu0  ;;  %v2711_v5 = vpop.f32.mrb[19].mxu1  ;;  %v2988_v2 = vrot.slane %v2971_v51, %v16539_v53 }
 0x39d   :  { %v2923_v43 = vpop.f32.mrb[20].mxu0  ;;  %v2964_v58 = vpop.f32.mrb[20].mxu1 }
 0x39e   :  { %v2924_v52 = vadd.f32 %v2923_v43, %v16978_v1  ;;  %v2965_v31 = vadd.f32 %v2964_v58, %v16980_v46  ;;  %v2925_v55 = vpop.f32.mrb[21].mxu0  ;;  %v2966_v59 = vpop.f32.mrb[21].mxu1  ;;  %v2984_v46 = vrot.slane %v2971_v51, %v16543_v17  ;;  %v12761_v51 = vld [vmem:[%s19687_s0 + $0x2] ss:$8 sm:$0xf] }
 0x39f   :  { %v2926_v22 = vadd.f32 %v2925_v55, %v16982_v62  ;;  %v2967_v30 = vadd.f32 %v2966_v59, %v16984_v18  ;;  %v2927_v35 = vpop.f32.mrb[22].mxu0  ;;  %v2968_v56 = vpop.f32.mrb[22].mxu1  ;;  %v12763_v59 = vld [vmem:[%s19687_s0 + $0x42] ss:$8 sm:$0xf] }
 0x3a0   :  { %v2993_v60 = vadd.f32 %v2976_v7, %v2924_v52  ;;  %v2928_v54 = vpop.f32.mrb[23].mxu0  ;;  %v2969_v63 = vpop.f32.mrb[23].mxu1  ;;  %v2995_v20 = vadd.f32 %v2984_v46, %v2965_v31  ;;  %v12762_v7 = vld [vmem:[%s19687_s0 + $0x22] ss:$8 sm:$0xf] }
 0x3a1   :  { %v2994_v61 = vadd.f32 %v2980_v29, %v2926_v22  ;;  %v2996_v1 = vadd.f32 %v2988_v2, %v2967_v30  ;;  %v12765_v29 = vld [vmem:[%s19687_s0 + $0x82] ss:$8 sm:$0xf] }
 0x3a2   :  { %v12754_v25 = vmul.f32 -1.442695, %v2993_v60  ;;  %v12766_v52 = vld [vmem:[%s19687_s0 + $0xa2] ss:$8 sm:$0xf] }
 0x3a3   :  { %v12755_v57 = vmul.f32 -1.442695, %v2994_v61  ;;  %v12756_v3 = vmul.f32 -1.442695, %v2996_v1 }
 0x3a4   :  { %15109 = vpow2.f32 %v12754_v25  ;;  %v12764_v22 = vld [vmem:[%s19687_s0 + $0x62] ss:$8 sm:$0xf] }
 0x3a5   :  { %15111 = vpow2.f32 %v12755_v57  ;;  %v12767_v56 = vld [vmem:[%s19687_s0 + $0xc2] ss:$8 sm:$0xf] }
 0x3a6   :  { %15113 = vpow2.f32 %v12756_v3  ;;  %v12768_v60 = vld [vmem:[%s19687_s0 + $0xe2] ss:$8 sm:$0xf] }
 0x3a7   :  { %15115 = vtanh.f32 %v2995_v20 }
 0x3ae   :  { %v15110_v62 = vpop.eup %15109 }
 0x3af   :  { %v15112_v5 = vpop.eup %15111  ;;  %v3001_v18 = vadd.f32 1.0, %v15110_v62 }
 0x3b0   :  { %v3007_v4 = vadd.f32 1.0, %v15112_v5  ;;  %v15114_v36 = vpop.eup %15113 }
 0x3b1   :  { %15117 = vrcp.f32 %v3001_v18  ;;  %v15116_v21 = vpop.eup %15115  ;;  %v3014_v19 = vadd.f32 1.0, %v15114_v36 }
 0x3b2   :  { %15119 = vrcp.f32 %v3007_v4 }
 0x3b3   :  { %15121 = vrcp.f32 %v3014_v19 }
 0x3bb   :  { %v15118_v40 = vpop.eup %15117 }
 0x3bc   :  { %v15120_v6 = vpop.eup %15119  ;;  %v3018_v8 = vmul.f32 %v15118_v40, %v15116_v21 }
 0x3bd   :  { %v3017_v9 = vmul.f32 %v15120_v6, %v16546_v10  ;;  %v3399_v11 = vpop.f32.mrb[24].mxu0  ;;  %v3440_v24 = vpop.f32.mrb[24].mxu1 }
 0x3be   :  { %v3401_v14 = vpop.f32.mrb[25].mxu0  ;;  %v3442_v23 = vpop.f32.mrb[25].mxu1 }
 0x3bf   :  { %v17004_v28 = vadd.f32 %v3018_v8, %v3017_v9  ;;  %v3451_v32 = vcombine.low %v3399_v11, %v3401_v14  ;;  %v3452_v26 = vcombine.high %v3399_v11, %v3401_v14  ;;  %v3453_v34 = vcombine.low %v3440_v24, %v3442_v23  ;;  %v3403_v37 = vpop.f32.mrb[26].mxu0  ;;  %v3444_v15 = vpop.f32.mrb[26].mxu1 }
 0x3c0   :  { %v3454_v41 = vcombine.high %v3440_v24, %v3442_v23  ;;  %v3404_v42 = vpop.f32.mrb[27].mxu0  ;;  %v3445_v16 = vpop.f32.mrb[27].mxu1 }
 0x3c1   :  { %15123 = vtanh.f32 %v17004_v28  ;;  %v3461_v48 = vrot.slane %v3451_v32, %v16279_v45  ;;  %v3468_v10 = vrot.slane %v3452_v26, %v16279_v45  ;;  %v3475_v27 = vrot.slane %v3453_v34, %v16279_v45  ;;  %v15122_v18 = vpop.eup %15121 }
 0x3c2   :  { %v3482_v49 = vrot.slane %v3454_v41, %v16279_v45 }
 0x3c3   :  { %v3483_v50 = vcombine.low %v3461_v48, %v3475_v27  ;;  %v3484_v47 = vcombine.high %v3461_v48, %v3475_v27 }
 0x3c4   :  { %v3485_v43 = vcombine.low %v3468_v10, %v3482_v49  ;;  %v3486_v58 = vcombine.high %v3468_v10, %v3482_v49  ;;  %v14069_v49 = vld [vmem:[%s19689_s2] ss:$16 sps:$4 sm:$0xff]  }
 0x3c5   :  { %v3493_v31 = vrot.slane %v3483_v50, %v16279_v45  ;;  %v3507_v55 = vrot.slane %v3484_v47, %v16279_v45 }
 0x3c6   :  { %v3500_v30 = vrot.slane %v3485_v43, %v16279_v45  ;;  %v3514_v35 = vrot.slane %v3486_v58, %v16279_v45 }
 0x3c7   :  { %v3515_v54 = vcombine.high %v3493_v31, %v3493_v31  ;;  %v3517_v63 = vcombine.high %v3507_v55, %v3507_v55  ;;  %v17039_v61 = vadd.f32 %v12761_v51, %v3493_v31  ;;  %v17041_v25 = vadd.f32 %v12762_v7, %v3507_v55 }
 0x3c8   :  { %v3516_v57 = vcombine.high %v3500_v30, %v3500_v30  ;;  %v3518_v2 = vcombine.high %v3514_v35, %v3514_v35  ;;  %v17043_v1 = vadd.f32 %v12765_v29, %v3500_v30  ;;  %v17045_v46 = vadd.f32 %v12766_v52, %v3514_v35  ;;  %v14072_v29 = vld [vmem:[%s19689_s2 + $0x8] ss:$16 sps:$4 sm:$0xff]   ;;  %v14077_v52 = vld [vmem:[%s19689_s2 + $0x24] ss:$16 sps:$4 sm:$0xff]  }
 0x3c9   :  { %v17047_v3 = vadd.f32 %v12763_v59, %v3515_v54  ;;  %v17049_v20 = vadd.f32 %v12764_v22, %v3517_v63  ;;  %v12801_v62 = vmul.f32 -1.442695, %v17039_v61  ;;  %v12802_v5 = vmul.f32 -1.442695, %v17041_v25 }
 0x3ca   :  { %v17053_v4 = vadd.f32 %v12767_v56, %v3516_v57  ;;  %v17055_v36 = vadd.f32 %v12768_v60, %v3518_v2  ;;  %v12805_v21 = vmul.f32 -1.442695, %v17043_v1  ;;  %v3592_v19 = vrot.slane %v17039_v61, 1  ;;  %v14080_v56 = vld [vmem:[%s19689_s2 + $0x2c] ss:$16 sps:$4 sm:$0xff]  }
 0x3cb   :  { %v15124_v40 = vpop.eup %15123  ;;  %15125 = vpow2.f32 %v12801_v62  ;;  %v12803_v6 = vmul.f32 -1.442695, %v17047_v3  ;;  %v12804_v8 = vmul.f32 -1.442695, %v17049_v20  ;;  %v12806_v11 = vmul.f32 -1.442695, %v17045_v46 }
 0x3cc   :  { %v3021_v9 = vmul.f32 %v15124_v40, %v15122_v18  ;;  %15127 = vpow2.f32 %v12802_v5  ;;  %v12807_v24 = vmul.f32 -1.442695, %v17053_v4  ;;  %v3593_v14 = vrot.slane %v17041_v25, 1  ;;  %v3132_v62 = vld [vmem:[%s19692_s5] sm:$0x1] }
 0x3cd   :  { %15129 = vpow2.f32 %v12803_v6  ;;  %v12808_v32 = vmul.f32 -1.442695, %v17055_v36  ;;  %v12809_v26 = vmul.f32 -1.442695, %v3592_v19  ;;  %v3135_v5 = vld [vmem:[%s19692_s5 + $0x4] sm:$0x1] }
 0x3ce   :  { %v3022_v23 = vpack.c.bf16 %v3021_v9, %v3021_v9  ;;  %15131 = vpow2.f32 %v12804_v8  ;;  %v12810_v37 = vmul.f32 -1.442695, %v3593_v14  ;;  %v3138_v18 = vld [vmem:[%s19692_s5 + $0x8] sm:$0x1]  ;;  %v3141_v9 = vld [vmem:[%s19692_s5 + $0xc] sm:$0x1] }
 0x3cf   :  { %15133 = vpow2.f32 %v12805_v21 }
 0x3d0   :  { %3023 = vst [vmem:[#allocation2 + $0x4] sm:$0xf] %v3022_v23  ;;  %v3032_v34 = vrot.slane %v3022_v23, %v16279_v45  ;;  %15135 = vpow2.f32 %v12806_v11  ;;  %v3144_v11 = vld [vmem:[%s19692_s5 + $0x10] sm:$0x1] }
 0x3d1   :  { %15137 = vpow2.f32 %v12807_v24  ;;  %v14075_v24 = vld [vmem:[%s19689_s2 + $0x20] ss:$16 sps:$4 sm:$0xff]  }
 0x3d2   :  { %v3033_v15 = vcombine.high %v3032_v34, %v3032_v34  ;;  %v3040_v41 = vrot.slane %v3032_v34, %v16279_v45  ;;  %15139 = vpow2.f32 %v12808_v32 }
 0x3d3   :  { %15141 = vpow2.f32 %v12809_v26 }
 0x3d4   :  { %v3047_v42 = vrot.slane %v3033_v15, %v16279_v45  ;;  %v3048_v16 = vcombine.high %v3040_v41, %v3040_v41  ;;  %v3051_v48 = vunpack.i.h.s16 %v3040_v41  ;;  %v12757_v10 = vpack.i.b16 %v3040_v41, %v3040_v41  ;;  %v14078_v15 = vld [vmem:[%s19689_s2 + $0x28] ss:$16 sps:$4 sm:$0xff]   ;;  %v14083_v41 = vld [vmem:[%s19689_s2 + $0x44] ss:$16 sps:$4 sm:$0xff]  }
 0x3d5   :  { %v15126_v27 = vpop.eup %15125  ;;  %15143 = vpow2.f32 %v12810_v37  ;;  %v3147_v37 = vld [vmem:[%s19692_s5 + $0x14] sm:$0x1] }
 0x3d6   :  { %v15128_v50 = vpop.eup %15127  ;;  %v3049_v47 = vcombine.high %v3047_v42, %v3047_v42  ;;  %v3053_v51 = vunpack.i.h.s16 %v3047_v42  ;;  %v3055_v7 = vunpack.i.h.s16 %v3048_v16  ;;  %v3059_v43 = vpack.i.b16 %v3051_v48, %v3051_v48 }
 0x3d7   :  { %v15130_v31 = vpop.eup %15129  ;;  %v12758_v55 = vpack.i.b16 %v3047_v42, %v3047_v42  ;;  %v12759_v59 = vpack.i.b16 %v3048_v16, %v3048_v16  ;;  %v3072_v22 = vrot.slane %v12757_v10, %v16610_v33  ;;  %v3560_v30 = vadd.f32 1.0, %v15126_v27  ;;  %v3990_v35 = vld [vmem:[#allocation2 + $0x4] sm:$0xf]  ;;  %v3150_v27 = vld [vmem:[%s19692_s5 + $0x18] sm:$0x1] }
 0x3d8   :  { %v15132_v60 = vpop.eup %15131  ;;  %v3057_v54 = vunpack.i.h.s16 %v3049_v47  ;;  %v3061_v63 = vpack.i.b16 %v3053_v51, %v3053_v51  ;;  %v3063_v57 = vpack.i.b16 %v3055_v7, %v3055_v7  ;;  %v12760_v2 = vpack.i.b16 %v3049_v47, %v3049_v47  ;;  %4216 = vmatmul.mubr.bf16.vlgmr.msra.gmra.mrb[28].mxu0 %v3990_v35  ;;  %4257 = vmatmul.mubr.bf16.vlgmr.msra.gmra.mrb[28].mxu1 %v3990_v35  ;;  %v14086_v47 = vld [vmem:[%s19689_s2 + $0x4c] ss:$16 sps:$4 sm:$0xff]   ;;  %v14081_v35 = vld [vmem:[%s19689_s2 + $0x40] ss:$16 sps:$4 sm:$0xff]  }
 0x3d9   :  { %v15134_v21 = vpop.eup %15133  ;;  %v3079_v40 = vrot.slane %v3059_v43, %v16610_v33  ;;  %v3086_v6 = vrot.slane %v12758_v55, %v16610_v33  ;;  %v3100_v8 = vrot.slane %v12759_v59, %v16610_v33  ;;  %v3133_v19 = vsel %vm17072_vm11, %v3072_v22, %v3132_v62  ;;  %4442 = vmatpush1.bf16.msra.mxu0 %v14069_v49  ;;  %v3153_v55 = vld [vmem:[%s19692_s5 + $0x1c] sm:$0x1] }
 0x3da   :  { %v15136_v14 = vpop.eup %15135  ;;  %v3065_v23 = vpack.i.b16 %v3057_v54, %v3057_v54  ;;  %v3093_v32 = vrot.slane %v3061_v63, %v16610_v33  ;;  %v3107_v26 = vrot.slane %v3063_v57, %v16610_v33  ;;  %v3114_v34 = vrot.slane %v12760_v2, %v16610_v33  ;;  %3134 = vst [vmem:[%s19692_s5] sm:$0x1] %v3133_v19  ;;  %v14092_v2 = vld [vmem:[%s19689_s2 + $0x6c] ss:$16 sps:$4 sm:$0xff]  }
 0x3db   :  { %4483 = vmatpush1.bf16.msra.mxu1 %v14072_v29  ;;  %v15138_v42 = vpop.eup %15137  ;;  %v3136_v16 = vsel %vm17072_vm11, %v3079_v40, %v3135_v5  ;;  %v3139_v48 = vsel %vm17072_vm11, %v3086_v6, %v3138_v18  ;;  %v3145_v10 = vsel %vm17072_vm11, %v3100_v8, %v3144_v11  ;;  %v3561_v49 = vadd.f32 1.0, %v15128_v50  ;;  %4443 = vmatprep.subr.bf16.mxu0 %v14077_v52  ;;  %v14087_v40 = vld [vmem:[%s19689_s2 + $0x60] ss:$16 sps:$4 sm:$0xff]   ;;  %v14090_v6 = vld [vmem:[%s19689_s2 + $0x68] ss:$16 sps:$4 sm:$0xff]  }
 0x3dc   :  { %4484 = vmatprep.subr.bf16.mxu1 %v14080_v56  ;;  %v15140_v51 = vpop.eup %15139  ;;  %v3121_v7 = vrot.slane %v3065_v23, %v16610_v33  ;;  %3137 = vst [vmem:[%s19692_s5 + $0x4] sm:$0x1] %v3136_v16  ;;  %3140 = vst [vmem:[%s19692_s5 + $0x8] sm:$0x1] %v3139_v48  ;;  %v3142_v50 = vsel %vm17072_vm11, %v3093_v32, %v3141_v9  ;;  %v3148_v43 = vsel %vm17072_vm11, %v3107_v26, %v3147_v37  ;;  %v14095_v9 = vld [vmem:[%s19689_s2 + $0x84] ss:$16 sps:$4 sm:$0xff]  }
 0x3dd   :  { %3146 = vst [vmem:[%s19692_s5 + $0x10] sm:$0x1] %v3145_v10  ;;  %v3151_v29 = vsel %vm17072_vm11, %v3114_v34, %v3150_v27  ;;  %4473 = vmatprep.mubr.bf16.mxu0 %v16024_v0  ;;  %v15142_v52 = vpop.eup %15141  ;;  %3143 = vst [vmem:[%s19692_s5 + $0xc] sm:$0x1] %v3142_v50  ;;  %v3562_v59 = vadd.f32 1.0, %v15130_v31  ;;  %v3563_v22 = vadd.f32 1.0, %v15132_v60  ;;  %4444 = vmatpush1.bf16.msra.mxu0 %v14075_v24  ;;  %15145 = vrcp.f32 %v3560_v30 }
 0x3de   :  { %3149 = vst [vmem:[%s19692_s5 + $0x14] sm:$0x1] %v3148_v43  ;;  %3152 = vst [vmem:[%s19692_s5 + $0x18] sm:$0x1] %v3151_v29  ;;  %4514 = vmatprep.mubr.bf16.mxu1 %v16024_v0  ;;  %v3154_v56 = vsel %vm17072_vm11, %v3121_v7, %v3153_v55  ;;  %v3564_v54 = vadd.f32 1.0, %v15134_v21  ;;  %v3594_v63 = vrot.slane %v17047_v3, 1  ;;  %4445 = vmatprep.subr.bf16.mxu0 %v14083_v41  ;;  %15147 = vrcp.f32 %v3561_v49 }
 0x3df   :  { %4485 = vmatpush1.bf16.msra.mxu1 %v14078_v15  ;;  %v14084_v31 = vld [vmem:[%s19689_s2 + $0x48] ss:$16 sps:$4 sm:$0xff]   ;;  %v14089_v60 = vld [vmem:[%s19689_s2 + $0x64] ss:$16 sps:$4 sm:$0xff]   ;;  %v15144_v57 = vpop.eup %15143  ;;  %3155 = vst [vmem:[%s19692_s5 + $0x1c] sm:$0x1] %v3154_v56  ;;  %15149 = vrcp.f32 %v3562_v59  ;;  %v3752_v55 = vrot.slane %v2403_v13, %v16279_v45 }
 0x3e0   :  { %v3565_v58 = vadd.f32 1.0, %v15136_v14  ;;  %v3595_v30 = vrot.slane %v17049_v20, 1  ;;  %4486 = vmatprep.subr.bf16.mxu1 %v14086_v47  ;;  %v3566_v62 = vadd.f32 1.0, %v15138_v42  ;;  %v3596_v5 = vrot.slane %v17043_v1, 1  ;;  %v14098_v14 = vld [vmem:[%s19689_s2 + $0x8c] ss:$16 sps:$4 sm:$0xff]  }
 0x3e1   :  { %v3567_v18 = vadd.f32 1.0, %v15140_v51  ;;  %15151 = vrcp.f32 %v3563_v22  ;;  %v3597_v21 = vrot.slane %v17045_v46, 1  ;;  %4446 = vmatpush1.bf16.msra.mxu0 %v14081_v35  ;;  %v3598_v8 = vrot.slane %v17053_v4, 1  ;;  %v14093_v26 = vld [vmem:[%s19689_s2 + $0x80] ss:$16 sps:$4 sm:$0xff]  }
 0x3e2   :  { %15153 = vrcp.f32 %v3564_v54  ;;  %v12811_v19 = vmul.f32 -1.442695, %v3594_v63  ;;  %4447 = vmatprep.subr.bf16.mxu0 %v14089_v60  ;;  %v3599_v11 = vrot.slane %v17055_v36, 1  ;;  %v12812_v24 = vmul.f32 -1.442695, %v3595_v30 }
 0x3e3   :  { %4487 = vmatpush1.bf16.msra.mxu1 %v14084_v31  ;;  %15155 = vrcp.f32 %v3565_v58  ;;  %v12813_v23 = vmul.f32 -1.442695, %v3596_v5  ;;  %v12814_v32 = vmul.f32 -1.442695, %v3597_v21  ;;  %v12815_v34 = vmul.f32 -1.442695, %v3598_v8 }
 0x3e4   :  { %4488 = vmatprep.subr.bf16.mxu1 %v14092_v2  ;;  %15157 = vrcp.f32 %v3566_v62  ;;  %v14096_v37 = vld [vmem:[%s19689_s2 + $0x88] ss:$16 sps:$4 sm:$0xff]   ;;  %v14101_v15 = vld [vmem:[%s19689_s2 + $0xa4] ss:$16 sps:$4 sm:$0xff]   ;;  %v12816_v41 = vmul.f32 -1.442695, %v3599_v11  ;;  %v13684_v51 = vcombine.low %v16873_v38, %v16873_v38  ;;  %v3760_v58 = vcombine.high %v3752_v55, %v3752_v55 }
 0x3e5   :  { %15159 = vrcp.f32 %v3567_v18  ;;  %4448 = vmatpush1.bf16.msra.mxu0 %v14087_v40  ;;  %v14104_v42 = vld [vmem:[%s19689_s2 + $0xac] ss:$16 sps:$4 sm:$0xff]   ;;  %v3632_v48 = vadd.f32 1.0, %v15142_v52  ;;  %v3633_v27 = vadd.f32 1.0, %v15144_v57  ;;  %v14099_v49 = vld [vmem:[%s19689_s2 + $0xa0] ss:$16 sps:$4 sm:$0xff]   ;;  %v17265_v30 = vrot.slane %v3752_v55, %v16279_v45 }
 0x3e6   :  { %15161 = vpow2.f32 %v12811_v19  ;;  %4449 = vmatprep.subr.bf16.mxu0 %v14095_v9  ;;  %v3656_v7 = vrot.slane %v17039_v61, 2  ;;  %v14102_v50 = vld [vmem:[%s19689_s2 + $0xa8] ss:$16 sps:$4 sm:$0xff]   ;;  %v14107_v43 = vld [vmem:[%s19689_s2 + $0xc4] ss:$16 sps:$4 sm:$0xff]   ;;  %v3657_v52 = vrot.slane %v17041_v25, 2  ;;  %v17254_v63 = vrot.slane %v13684_v51, %v16279_v45 }
 0x3e7   :  { %4489 = vmatpush1.bf16.msra.mxu1 %v14090_v6  ;;  %15163 = vpow2.f32 %v12812_v24  ;;  %v17213_v16 = vpop.eup %15145  ;;  %v14110_v59 = vld [vmem:[%s19689_s2 + $0xcc] ss:$16 sps:$4 sm:$0xff]   ;;  %v3658_v35 = vrot.slane %v17047_v3, 2  ;;  %v3659_v54 = vrot.slane %v17049_v20, 2  ;;  %v3660_v13 = vrot.slane %v17043_v1, 2 }
 0x3e8   :  { %4490 = vmatprep.subr.bf16.mxu1 %v14098_v14  ;;  %15165 = vpow2.f32 %v12813_v23  ;;  %v17215_v10 = vpop.eup %15147  ;;  %v14108_v31 = vld [vmem:[%s19689_s2 + $0xc8] ss:$16 sps:$4 sm:$0xff]   ;;  %v14113_v60 = vld [vmem:[%s19689_s2 + $0xe4] ss:$16 sps:$4 sm:$0xff]   ;;  %v14116_v2 = vld [vmem:[%s19689_s2 + $0xec] ss:$16 sps:$4 sm:$0xff]   ;;  %v17275_v8 = vrot.slane %v17254_v63, %v16279_v45  ;;  %v3761_v11 = vcombine.high %v17254_v63, %v17254_v63  ;;  %v17286_v23 = vrot.slane %v3760_v58, %v16279_v45 }
 0x3e9   :  { %15167 = vpow2.f32 %v12814_v32  ;;  %4450 = vmatpush1.bf16.msra.mxu0 %v14093_v26  ;;  %v17220_v47 = vpop.eup %15149  ;;  %v14111_v21 = vld [vmem:[%s19689_s2 + $0xe0] ss:$16 sps:$4 sm:$0xff]   ;;  %v14114_v19 = vld [vmem:[%s19689_s2 + $0xe8] ss:$16 sps:$4 sm:$0xff]   ;;  %v14119_v9 = vld [vmem:[%s19688_s1 + $0x4] ss:$16 sps:$4 sm:$0xff]   ;;  %v3790_v32 = vcombine.high %v17265_v30, %v17265_v30 }
 0x3ea   :  { %15169 = vpow2.f32 %v12815_v34  ;;  %4451 = vmatprep.subr.bf16.mxu0 %v14101_v15  ;;  %v14122_v26 = vld [vmem:[%s19688_s1 + $0xc] ss:$16 sps:$4 sm:$0xff]   ;;  %v3661_v15 = vrot.slane %v17045_v46, 2  ;;  %v3684_v55 = vrot.slane %v17043_v1, 3  ;;  %v3789_v58 = vrot.slane %v3761_v11, %v16279_v45 }
 0x3eb   :  { %4491 = vmatpush1.bf16.msra.mxu1 %v14096_v37  ;;  %v17231_v29 = vpop.eup %15151  ;;  %15171 = vpow2.f32 %v12816_v41  ;;  %v3680_v41 = vrot.slane %v17039_v61, 3  ;;  %v3683_v61 = vrot.slane %v17049_v20, 3  ;;  %vm10893_vm11 = vsmask.f32 3328 }
 0x3ec   :  { %4492 = vmatprep.subr.bf16.mxu1 %v14104_v42  ;;  %v17241_v22 = vpop.eup %15153  ;;  %15173 = vrcp.f32 %v3632_v48  ;;  %vm19353_vm12 = vmand %vm775_vm2, %vm10893_vm11 }
 0x3ed   :  { %v17244_v56 = vpop.eup %15155  ;;  %15175 = vrcp.f32 %v3633_v27  ;;  %4452 = vmatpush1.bf16.msra.mxu0 %v14099_v49  ;;  %v3662_v27 = vrot.slane %v17053_v4, 2  ;;  %v3681_v49 = vrot.slane %v17041_v25, 3 }
 0x3ee   :  { %v17250_v38 = vpop.eup %15157  ;;  %15177 = vtanh.f32 %v3656_v7  ;;  %4453 = vmatprep.subr.bf16.mxu0 %v14107_v43  ;;  %v3682_v43 = vrot.slane %v17047_v3, 3  ;;  %v3686_v3 = vrot.slane %v17053_v4, 3  ;;  %v3792_v4 = vcombine.high %v17286_v23, %v17286_v23 }
 0x3ef   :  { %4493 = vmatpush1.bf16.msra.mxu1 %v14102_v50  ;;  %v17262_v57 = vpop.eup %15159  ;;  %15179 = vtanh.f32 %v3657_v52  ;;  %v3663_v50 = vrot.slane %v17055_v36, 2  ;;  %v12818_v63 = vmul.f32 -1.442695, %v3681_v49 }
 0x3f0   :  { %4494 = vmatprep.subr.bf16.mxu1 %v14110_v59  ;;  %v15162_v62 = vpop.eup %15161  ;;  %15181 = vtanh.f32 %v3658_v35  ;;  %v3685_v35 = vrot.slane %v17045_v46, 3  ;;  %v12819_v1 = vmul.f32 -1.442695, %v3682_v43  ;;  %v3687_v46 = vrot.slane %v17055_v36, 3 }
 0x3f1   :  { %v15164_v5 = vpop.eup %15163  ;;  %v3634_v18 = vadd.f32 1.0, %v15162_v62  ;;  %15183 = vtanh.f32 %v3659_v54  ;;  %4454 = vmatpush1.bf16.msra.mxu0 %v14105_v39  ;;  %v12817_v54 = vmul.f32 -1.442695, %v3680_v41 }
 0x3f2   :  { %v15166_v40 = vpop.eup %15165  ;;  %v3635_v6 = vadd.f32 1.0, %v15164_v5  ;;  %15185 = vtanh.f32 %v3660_v13  ;;  %4455 = vmatprep.subr.bf16.mxu0 %v14113_v60 }
 0x3f3   :  { %4495 = vmatpush1.bf16.msra.mxu1 %v14108_v31  ;;  %v15168_v24 = vpop.eup %15167  ;;  %v3636_v14 = vadd.f32 1.0, %v15166_v40  ;;  %15187 = vrcp.f32 %v3634_v18  ;;  %v12821_v18 = vmul.f32 -1.442695, %v3684_v55  ;;  %v12822_v40 = vmul.f32 -1.442695, %v3685_v35 }
 0x3f4   :  { %4496 = vmatprep.subr.bf16.mxu1 %v14116_v2  ;;  %v15170_v34 = vpop.eup %15169  ;;  %v3637_v37 = vadd.f32 1.0, %v15168_v24  ;;  %15189 = vrcp.f32 %v3635_v6  ;;  %v12820_v2 = vmul.f32 -1.442695, %v3683_v61  ;;  %v12823_v6 = vmul.f32 -1.442695, %v3686_v3 }
 0x3f5   :  { %v15172_v42 = vpop.eup %15171  ;;  %v3638_v48 = vadd.f32 1.0, %v15170_v34  ;;  %15191 = vrcp.f32 %v3636_v14  ;;  %4456 = vmatpush1.bf16.msra.mxu0 %v14111_v21  ;;  %v12824_v14 = vmul.f32 -1.442695, %v3687_v46 }
 0x3f6   :  { %v15174_v51 = vpop.eup %15173  ;;  %v3639_v7 = vadd.f32 1.0, %v15172_v42  ;;  %15193 = vrcp.f32 %v3637_v37  ;;  %4918 = vmatprep.subr.bf16.mxu0 %v14119_v9 }
 0x3f7   :  { %4497 = vmatpush1.bf16.msra.mxu1 %v14114_v19  ;;  %v15176_v52 = vpop.eup %15175  ;;  %15195 = vrcp.f32 %v3638_v48  ;;  %v3802_v59 = vmul.f32 %v15174_v51, %v17265_v30 }
 0x3f8   :  { %4959 = vmatprep.subr.bf16.mxu1 %v14122_v26  ;;  %v15178_v25 = vpop.eup %15177  ;;  %15197 = vrcp.f32 %v3639_v7  ;;  %v3803_v39 = vmul.f32 %v15176_v52, %v17286_v23 }
 0x3f9   :  { %v15180_v13 = vpop.eup %15179  ;;  %15199 = vtanh.f32 %v3661_v15  ;;  %v3810_v31 = vmul.f32 %v15178_v25, %v17213_v16 }
 0x3fa   :  { %v15182_v20 = vpop.eup %15181  ;;  %15201 = vtanh.f32 %v3662_v27  ;;  %v3811_v60 = vmul.f32 %v15180_v13, %v17215_v10  ;;  %v3791_v10 = vcombine.high %v17275_v8, %v17275_v8 }
 0x3fb   :  { %v15184_v30 = vpop.eup %15183  ;;  %15203 = vtanh.f32 %v3663_v50  ;;  %v3818_v62 = vadd.f32 %v3810_v31, %v3802_v59  ;;  %v3812_v36 = vmul.f32 %v15182_v20, %v17220_v47 }
 0x3fc   :  { %v15186_v5 = vpop.eup %15185  ;;  %15205 = vpow2.f32 %v12817_v54  ;;  %v3819_v16 = vadd.f32 %v3811_v60, %v3803_v39  ;;  %v3813_v23 = vmul.f32 %v15184_v30, %v17231_v29 }
 0x3fd   :  { %v15188_v21 = vpop.eup %15187  ;;  %15207 = vpow2.f32 %v12818_v63  ;;  %v3814_v15 = vmul.f32 %v15186_v5, %v17241_v22 }
 0x3fe   :  { %v15190_v19 = vpop.eup %15189  ;;  %15209 = vpow2.f32 %v12819_v1  ;;  %v3804_v9 = vmul.f32 %v15188_v21, %v3790_v32  ;;  %v3907_v11 = vcombine.low %v3818_v62, %v3819_v16  ;;  %v3793_v32 = vcombine.high %v3789_v58, %v3789_v58 }
 0x3ff   :  { %v15192_v24 = vpop.eup %15191  ;;  %15211 = vpow2.f32 %v12820_v2  ;;  %v3805_v26 = vmul.f32 %v15190_v19, %v3792_v4 }
 0x400   :  { %v15194_v34 = vpop.eup %15193  ;;  %15213 = vpow2.f32 %v12821_v18  ;;  %v3806_v37 = vmul.f32 %v15192_v24, %v17275_v8  ;;  %v3820_v41 = vadd.f32 %v3812_v36, %v3804_v9  ;;  %v3917_v22 = vrot.slane %v3907_v11, %v16279_v45 }
 0x401   :  { %v15196_v42 = vpop.eup %15195  ;;  %15215 = vpow2.f32 %v12822_v40  ;;  %v3821_v48 = vadd.f32 %v3813_v23, %v3805_v26  ;;  %v3807_v27 = vmul.f32 %v15194_v34, %v3789_v58 }
 0x402   :  { %v15198_v47 = vpop.eup %15197  ;;  %15217 = vpow2.f32 %v12823_v6  ;;  %v3822_v49 = vadd.f32 %v3814_v15, %v3806_v37  ;;  %v3808_v51 = vmul.f32 %v15196_v42, %v3791_v10 }
 0x403   :  { %v15200_v7 = vpop.eup %15199  ;;  %15219 = vpow2.f32 %v12824_v14  ;;  %v3908_v50 = vcombine.low %v3820_v41, %v3821_v48  ;;  %v3809_v29 = vmul.f32 %v15198_v47, %v3793_v32 }
 0x404   :  { %v15202_v43 = vpop.eup %15201  ;;  %v3815_v52 = vmul.f32 %v15200_v7, %v17244_v56  ;;  %15221 = vtanh.f32 %v3818_v62 }
 0x405   :  { %v15204_v8 = vpop.eup %15203  ;;  %15223 = vtanh.f32 %v3819_v16  ;;  %v3924_v61 = vrot.slane %v3908_v50, %v16279_v45  ;;  %v3816_v55 = vmul.f32 %v15202_v43, %v17250_v38 }
 0x406   :  { %v15206_v59 = vpop.eup %15205  ;;  %15225 = vtanh.f32 %v3820_v41  ;;  %v3817_v25 = vmul.f32 %v15204_v8, %v17262_v57  ;;  %v3823_v35 = vadd.f32 %v3815_v52, %v3807_v27 }
 0x407   :  { %v15208_v54 = vpop.eup %15207  ;;  %v3720_v39 = vadd.f32 1.0, %v15206_v59  ;;  %v3939_v13 = vcombine.low %v3917_v22, %v3924_v61  ;;  %v3824_v3 = vadd.f32 %v3816_v55, %v3808_v51  ;;  %15227 = vtanh.f32 %v3821_v48 }
 0x408   :  { %v15210_v56 = vpop.eup %15209  ;;  %v3721_v63 = vadd.f32 1.0, %v15208_v54  ;;  %v3825_v31 = vadd.f32 %v3817_v25, %v3809_v29  ;;  %15229 = vtanh.f32 %v3822_v49  ;;  %v3909_v20 = vcombine.low %v3822_v49, %v3823_v35 }
 0x409   :  { %v15212_v1 = vpop.eup %15211  ;;  %v3722_v60 = vadd.f32 1.0, %v15210_v56  ;;  %15231 = vrcp.f32 %v3720_v39  ;;  %v17325_v10 = vrot.slane %v3939_v13, %v16279_v45 }
 0x40a   :  { %v15214_v58 = vpop.eup %15213  ;;  %v3723_v38 = vadd.f32 1.0, %v15212_v1  ;;  %15233 = vrcp.f32 %v3721_v63  ;;  %v3910_v30 = vcombine.low %v3824_v3, %v3825_v31  ;;  %v3931_v5 = vrot.slane %v3909_v20, %v16279_v45 }
 0x40b   :  { %v15216_v46 = vpop.eup %15215  ;;  %v3724_v57 = vadd.f32 1.0, %v15214_v58  ;;  %15235 = vrcp.f32 %v3722_v60 }
 0x40c   :  { %v15218_v2 = vpop.eup %15217  ;;  %v3725_v62 = vadd.f32 1.0, %v15216_v46  ;;  %15237 = vrcp.f32 %v3723_v38  ;;  %v3938_v18 = vrot.slane %v3910_v30, %v16279_v45 }
 0x40d   :  { %v15220_v4 = vpop.eup %15219  ;;  %v3726_v16 = vadd.f32 1.0, %v15218_v2  ;;  %15239 = vrcp.f32 %v3724_v57 }
 0x40e   :  { %v15222_v21 = vpop.eup %15221  ;;  %v3727_v40 = vadd.f32 1.0, %v15220_v4  ;;  %15241 = vrcp.f32 %v3725_v62  ;;  %v3940_v6 = vcombine.low %v3931_v5, %v3938_v18 }
 0x40f   :  { %v15224_v19 = vpop.eup %15223  ;;  %15243 = vrcp.f32 %v3726_v16 }
 0x410   :  { %v15226_v9 = vpop.eup %15225  ;;  %15245 = vrcp.f32 %v3727_v40  ;;  %v17328_v36 = vrot.slane %v3940_v6, %v16279_v45  ;;  %v14117_v6 = vld [vmem:[%s19688_s1] ss:$16 sps:$4 sm:$0xff]  }
 0x411   :  { %v15228_v11 = vpop.eup %15227  ;;  %15247 = vtanh.f32 %v3823_v35 }
 0x412   :  { %v15230_v24 = vpop.eup %15229  ;;  %15249 = vtanh.f32 %v3824_v3  ;;  %v3955_v14 = vcombine.low %v17325_v10, %v17328_v36  ;;  %v14249_v10 = vld [vmem:[%s19689_s2 + $0xc0] ss:$16 sps:$4 sm:$0xff]  }
 0x413   :  { %v15232_v26 = vpop.eup %15231  ;;  %15251 = vtanh.f32 %v3825_v31 }
 0x414   :  { %v15234_v23 = vpop.eup %15233  ;;  %v3834_v34 = vmul.f32 %v15232_v26, %v15222_v21  ;;  %v14128_v26 = vld [vmem:[%s19688_s1 + $0x2c] ss:$16 sps:$4 sm:$0xff]  }
 0x415   :  { %v15236_v37 = vpop.eup %15235  ;;  %v3835_v15 = vmul.f32 %v15234_v23, %v15224_v19  ;;  %v14120_v19 = vld [vmem:[%s19688_s1 + $0x8] ss:$16 sps:$4 sm:$0xff]   ;;  %v14123_v23 = vld [vmem:[%s19688_s1 + $0x20] ss:$16 sps:$4 sm:$0xff]  }
 0x416   :  { %v15238_v41 = vpop.eup %15237  ;;  %v3836_v42 = vmul.f32 %v15236_v37, %v15226_v9  ;;  %v3842_v27 = vpack.c.bf16 %v3834_v34, %v3834_v34  ;;  %v14126_v34 = vld [vmem:[%s19688_s1 + $0x28] ss:$16 sps:$4 sm:$0xff]   ;;  %v14131_v37 = vld [vmem:[%s19688_s1 + $0x44] ss:$16 sps:$4 sm:$0xff]  }
 0x417   :  { %v15240_v48 = vpop.eup %15239  ;;  %v3837_v32 = vmul.f32 %v15238_v41, %v15228_v11  ;;  %v3843_v47 = vpack.c.bf16 %v3835_v15, %v3835_v15  ;;  %v14134_v15 = vld [vmem:[%s19688_s1 + $0x4c] ss:$16 sps:$4 sm:$0xff]   ;;  %v14129_v41 = vld [vmem:[%s19688_s1 + $0x40] ss:$16 sps:$4 sm:$0xff]  }
 0x418   :  { %v15242_v49 = vpop.eup %15241  ;;  %v3838_v51 = vmul.f32 %v15240_v48, %v15230_v24  ;;  %v3844_v7 = vpack.c.bf16 %v3836_v42, %v3836_v42  ;;  %v3858_v55 = vunpack.c.l.b16 %v3842_v27  ;;  %v14125_v24 = vld [vmem:[%s19688_s1 + $0x24] ss:$16 sps:$4 sm:$0xff]   ;;  %v14132_v42 = vld [vmem:[%s19688_s1 + $0x48] ss:$16 sps:$4 sm:$0xff]   ;;  %v14135_v27 = vld [vmem:[%s19688_s1 + $0x60] ss:$16 sps:$4 sm:$0xff]  }
 0x419   :  { %v15244_v50 = vpop.eup %15243  ;;  %v3845_v29 = vpack.c.bf16 %v3837_v32, %v3837_v32  ;;  %v3859_v43 = vunpack.c.l.b16 %v3843_v47  ;;  %v14137_v48 = vld [vmem:[%s19688_s1 + $0x64] ss:$16 sps:$4 sm:$0xff]   ;;  %v14140_v32 = vld [vmem:[%s19688_s1 + $0x6c] ss:$16 sps:$4 sm:$0xff]   ;;  %v14138_v47 = vld [vmem:[%s19688_s1 + $0x68] ss:$16 sps:$4 sm:$0xff]  }
 0x41a   :  { %v15246_v52 = vpop.eup %15245  ;;  %v3846_v8 = vpack.c.bf16 %v3838_v51, %v3838_v51  ;;  %v3860_v22 = vunpack.c.l.b16 %v3844_v7  ;;  %v14146_v51 = vld [vmem:[%s19688_s1 + $0x8c] ss:$16 sps:$4 sm:$0xff]   ;;  %v14141_v7 = vld [vmem:[%s19688_s1 + $0x80] ss:$16 sps:$4 sm:$0xff]  }
 0x41b   :  { %v15248_v61 = vpop.eup %15247  ;;  %v3861_v59 = vunpack.c.l.b16 %v3845_v29  ;;  %v3882_v25 = vrot.slane %v3859_v43, 7  ;;  %v14149_v29 = vld [vmem:[%s19688_s1 + $0xa4] ss:$16 sps:$4 sm:$0xff]   ;;  %v14152_v43 = vld [vmem:[%s19688_s1 + $0xac] ss:$16 sps:$4 sm:$0xff]  }
 0x41c   :  { %v15250_v35 = vpop.eup %15249  ;;  %v3839_v54 = vmul.f32 %v15248_v61, %v15242_v49  ;;  %v3862_v39 = vunpack.c.l.b16 %v3846_v8  ;;  %v3884_v13 = vrot.slane %v3860_v22, 6  ;;  %v14143_v49 = vld [vmem:[%s19688_s1 + $0x84] ss:$16 sps:$4 sm:$0xff]   ;;  %v14150_v8 = vld [vmem:[%s19688_s1 + $0xa8] ss:$16 sps:$4 sm:$0xff]  }
 0x41d   :  { %v15252_v3 = vpop.eup %15251  ;;  %v3840_v56 = vmul.f32 %v15250_v35, %v15244_v50  ;;  %v3883_v63 = vsel %vm769_vm0, %v3882_v25, %v3858_v55  ;;  %v3886_v31 = vrot.slane %v3861_v59, 5  ;;  %v14144_v50 = vld [vmem:[%s19688_s1 + $0x88] ss:$16 sps:$4 sm:$0xff]   ;;  %v14155_v22 = vld [vmem:[%s19688_s1 + $0xc4] ss:$16 sps:$4 sm:$0xff]  }
 0x41e   :  { %v3841_v20 = vmul.f32 %v15252_v3, %v15246_v52  ;;  %v3847_v1 = vpack.c.bf16 %v3839_v54, %v3839_v54  ;;  %v3885_v60 = vsel %vm772_vm1, %v3884_v13, %v3883_v63  ;;  %v3888_v58 = vrot.slane %v3862_v39, 4  ;;  %v14147_v52 = vld [vmem:[%s19688_s1 + $0xa0] ss:$16 sps:$4 sm:$0xff]   ;;  %v14158_v61 = vld [vmem:[%s19688_s1 + $0xcc] ss:$16 sps:$4 sm:$0xff]  }
 0x41f   :  { %v3848_v38 = vpack.c.bf16 %v3840_v56, %v3840_v56  ;;  %v3887_v30 = vsel %vm775_vm2, %v3886_v31, %v3885_v60  ;;  %v14153_v55 = vld [vmem:[%s19688_s1 + $0xc0] ss:$16 sps:$4 sm:$0xff]   ;;  %v14156_v59 = vld [vmem:[%s19688_s1 + $0xc8] ss:$16 sps:$4 sm:$0xff]   ;;  %v14161_v25 = vld [vmem:[%s19688_s1 + $0xe4] ss:$16 sps:$4 sm:$0xff]  }
 0x420   :  { %v3849_v46 = vpack.c.bf16 %v3841_v20, %v3841_v20  ;;  %v3863_v57 = vunpack.c.l.b16 %v3847_v1  ;;  %v3889_v2 = vsel %vm778_vm3, %v3888_v58, %v3887_v30  ;;  %v14164_v35 = vld [vmem:[%s19688_s1 + $0xec] ss:$16 sps:$4 sm:$0xff]   ;;  %v14159_v54 = vld [vmem:[%s19688_s1 + $0xe0] ss:$16 sps:$4 sm:$0xff]   ;;  %v14162_v39 = vld [vmem:[%s19688_s1 + $0xe8] ss:$16 sps:$4 sm:$0xff]  }
 0x421   :  { %v3864_v62 = vunpack.c.l.b16 %v3848_v38  ;;  %v14167_v3 = vld [vmem:[#allocation4 + $0x4] ss:$16 sps:$4 sm:$0xff]   ;;  %v14170_v56 = vld [vmem:[#allocation4 + $0xc] ss:$16 sps:$4 sm:$0xff]   ;;  %v14165_v63 = vld [vmem:[#allocation4] ss:$16 sps:$4 sm:$0xff]  }
 0x422   :  { %v3865_v5 = vunpack.c.l.b16 %v3849_v46  ;;  %v3890_v18 = vrot.slane %v3863_v57, 3  ;;  %v14168_v31 = vld [vmem:[#allocation4 + $0x8] ss:$16 sps:$4 sm:$0xff]   ;;  %v14173_v20 = vld [vmem:[#allocation4 + $0x24] ss:$16 sps:$4 sm:$0xff]  }
 0x423   :  { %v3892_v4 = vrot.slane %v3864_v62, 2  ;;  %v14176_v1 = vld [vmem:[#allocation4 + $0x2c] ss:$16 sps:$4 sm:$0xff]   ;;  %v14171_v38 = vld [vmem:[#allocation4 + $0x20] ss:$16 sps:$4 sm:$0xff]  }
 0x424   :  { %v3891_v16 = vsel %vm781_vm4, %v3890_v18, %v3889_v2  ;;  %v3894_v21 = vrot.slane %v3865_v5, 1  ;;  %v14174_v30 = vld [vmem:[#allocation4 + $0x28] ss:$16 sps:$4 sm:$0xff]  }
 0x425   :  { %v3893_v40 = vsel %vm784_vm5, %v3892_v4, %v3891_v16  ;;  %v14179_v4 = vld [vmem:[#allocation4 + $0x44] ss:$16 sps:$4 sm:$0xff]   ;;  %v14182_v16 = vld [vmem:[#allocation4 + $0x4c] ss:$16 sps:$4 sm:$0xff]  }
 0x426   :  { %v3895_v9 = vsel %vm787_vm6, %v3894_v21, %v3893_v40  ;;  %v14177_v21 = vld [vmem:[#allocation4 + $0x40] ss:$16 sps:$4 sm:$0xff]   ;;  %v14180_v40 = vld [vmem:[#allocation4 + $0x48] ss:$16 sps:$4 sm:$0xff]  }
 0x427   :  { %v3896_v11 = vpack.c.b16 %v3895_v9, %v3895_v9  ;;  %v14183_v9 = vld [vmem:[#allocation4 + $0x60] ss:$16 sps:$4 sm:$0xff]  }
 0x429   :  { %3898 = vst [vmem:[#allocation2] sm:$0xf] %v3896_v11  ;;  %4474 = vmatmul.mubr.bf16.vlgmr.msra.gmra.mrb[32].mxu0 %v3896_v11  ;;  %4515 = vmatmul.mubr.bf16.vlgmr.msra.gmra.mrb[32].mxu1 %v3896_v11  ;;  %v14186_v11 = vld [vmem:[#allocation4 + $0x68] ss:$16 sps:$4 sm:$0xff]  }
 0x42a   :  { %4919 = vmatpush1.bf16.msra.mxu0 %v14117_v6  ;;  %4960 = vmatpush1.bf16.msra.mxu1 %v14120_v19  ;;  %v14185_v6 = vld [vmem:[#allocation4 + $0x64] ss:$16 sps:$4 sm:$0xff]   ;;  %v14188_v19 = vld [vmem:[#allocation4 + $0x6c] ss:$16 sps:$4 sm:$0xff]  }
 0x42b   :  { %4920 = vmatprep.subr.bf16.mxu0 %v14125_v24  ;;  %4961 = vmatprep.subr.bf16.mxu1 %v14128_v26  ;;  %v14191_v24 = vld [vmem:[#allocation4 + $0x84] ss:$16 sps:$4 sm:$0xff]   ;;  %v14194_v26 = vld [vmem:[#allocation4 + $0x8c] ss:$16 sps:$4 sm:$0xff]  }
 0x42c   :  { %4950 = vmatprep.mubr.bf16.mxu0 %v16024_v0  ;;  %4991 = vmatprep.mubr.bf16.mxu1 %v16024_v0 }
 0x42e   :  { %4921 = vmatpush1.bf16.msra.mxu0 %v14123_v23  ;;  %4962 = vmatpush1.bf16.msra.mxu1 %v14126_v34  ;;  %v14189_v23 = vld [vmem:[#allocation4 + $0x80] ss:$16 sps:$4 sm:$0xff]   ;;  %v14192_v34 = vld [vmem:[#allocation4 + $0x88] ss:$16 sps:$4 sm:$0xff]  }
 0x42f   :  { %4922 = vmatprep.subr.bf16.mxu0 %v14131_v37  ;;  %4963 = vmatprep.subr.bf16.mxu1 %v14134_v15  ;;  %v14197_v37 = vld [vmem:[#allocation4 + $0xa4] ss:$16 sps:$4 sm:$0xff]   ;;  %v14200_v15 = vld [vmem:[#allocation4 + $0xac] ss:$16 sps:$4 sm:$0xff]  }
 0x430   :  { %v4725_v13 = vld [vmem:[#allocation2] sm:$0xf] }
 0x432   :  { %4923 = vmatpush1.bf16.msra.mxu0 %v14129_v41  ;;  %4964 = vmatpush1.bf16.msra.mxu1 %v14132_v42  ;;  %v14195_v41 = vld [vmem:[#allocation4 + $0xa0] ss:$16 sps:$4 sm:$0xff]   ;;  %v14198_v42 = vld [vmem:[#allocation4 + $0xa8] ss:$16 sps:$4 sm:$0xff]  }
 0x433   :  { %4924 = vmatprep.subr.bf16.mxu0 %v14137_v48  ;;  %4965 = vmatprep.subr.bf16.mxu1 %v14140_v32  ;;  %v14203_v48 = vld [vmem:[#allocation4 + $0xc4] ss:$16 sps:$4 sm:$0xff]   ;;  %v14206_v32 = vld [vmem:[#allocation4 + $0xcc] ss:$16 sps:$4 sm:$0xff]  }
 0x436   :  { %4925 = vmatpush1.bf16.msra.mxu0 %v14135_v27  ;;  %4966 = vmatpush1.bf16.msra.mxu1 %v14138_v47  ;;  %v14201_v27 = vld [vmem:[#allocation4 + $0xc0] ss:$16 sps:$4 sm:$0xff]   ;;  %v14204_v47 = vld [vmem:[#allocation4 + $0xc8] ss:$16 sps:$4 sm:$0xff]  }
 0x437   :  { %4926 = vmatprep.subr.bf16.mxu0 %v14143_v49  ;;  %4967 = vmatprep.subr.bf16.mxu1 %v14146_v51  ;;  %v14209_v49 = vld [vmem:[#allocation4 + $0xe4] ss:$16 sps:$4 sm:$0xff]   ;;  %v14212_v51 = vld [vmem:[#allocation4 + $0xec] ss:$16 sps:$4 sm:$0xff]  }
 0x43a   :  { %4927 = vmatpush1.bf16.msra.mxu0 %v14141_v7  ;;  %4968 = vmatpush1.bf16.msra.mxu1 %v14144_v50  ;;  %v14207_v7 = vld [vmem:[#allocation4 + $0xe0] ss:$16 sps:$4 sm:$0xff]   ;;  %v14210_v50 = vld [vmem:[#allocation4 + $0xe8] ss:$16 sps:$4 sm:$0xff]  }
 0x43b   :  { %4928 = vmatprep.subr.bf16.mxu0 %v14149_v29  ;;  %4969 = vmatprep.subr.bf16.mxu1 %v14152_v43  ;;  %v14215_v29 = vld [vmem:[%s19689_s2 + $0x4] ss:$16 sps:$4 sm:$0xff]   ;;  %v14218_v43 = vld [vmem:[%s19689_s2 + $0xc] ss:$16 sps:$4 sm:$0xff]  }
 0x43e   :  { %4929 = vmatpush1.bf16.msra.mxu0 %v14147_v52  ;;  %4970 = vmatpush1.bf16.msra.mxu1 %v14150_v8  ;;  %v4523_v52 = vld [vmem:[%s19691_s4] sm:$0xf] }
 0x43f   :  { %4930 = vmatprep.subr.bf16.mxu0 %v14155_v22  ;;  %4971 = vmatprep.subr.bf16.mxu1 %v14158_v61  ;;  %v4528_v8 = vrot.slane %v4523_v52, %v16524_v12 }
 0x442   :  { %4931 = vmatpush1.bf16.msra.mxu0 %v14153_v55  ;;  %4972 = vmatpush1.bf16.msra.mxu1 %v14156_v59  ;;  %v4532_v55 = vrot.slane %v4523_v52, %v16530_v44 }
 0x443   :  { %4932 = vmatprep.subr.bf16.mxu0 %v14161_v25  ;;  %4973 = vmatprep.subr.bf16.mxu1 %v14164_v35 }
 0x446   :  { %4933 = vmatpush1.bf16.msra.mxu0 %v14159_v54  ;;  %4974 = vmatpush1.bf16.msra.mxu1 %v14162_v39 }
 0x447   :  { %5736 = vmatprep.subr.bf16.mxu0 %v14167_v3  ;;  %5777 = vmatprep.subr.bf16.mxu1 %v14170_v56 }
 0x449   :  { %4951 = vmatmul.mubr.bf16.vlgmr.msra.gmra.mrb[36].mxu0 %v4725_v13  ;;  %4992 = vmatmul.mubr.bf16.vlgmr.msra.gmra.mrb[36].mxu1 %v4725_v13 }
 0x44a   :  { %5768 = vmatprep.mubr.bf16.mxu0 %v16024_v0  ;;  %5809 = vmatprep.mubr.bf16.mxu1 %v16024_v0 }
 0x44b   :  { %5737 = vmatpush1.bf16.msra.mxu0 %v14165_v63  ;;  %5778 = vmatpush1.bf16.msra.mxu1 %v14168_v31 }
 0x44c   :  { %5738 = vmatprep.subr.bf16.mxu0 %v14173_v20  ;;  %5779 = vmatprep.subr.bf16.mxu1 %v14176_v1 }
 0x44f   :  { %5739 = vmatpush1.bf16.msra.mxu0 %v14171_v38  ;;  %5780 = vmatpush1.bf16.msra.mxu1 %v14174_v30 }
 0x450   :  { %5740 = vmatprep.subr.bf16.mxu0 %v14179_v4  ;;  %5781 = vmatprep.subr.bf16.mxu1 %v14182_v16 }
 0x453   :  { %5741 = vmatpush1.bf16.msra.mxu0 %v14177_v21  ;;  %5782 = vmatpush1.bf16.msra.mxu1 %v14180_v40 }
 0x454   :  { %5742 = vmatprep.subr.bf16.mxu0 %v14185_v6  ;;  %5783 = vmatprep.subr.bf16.mxu1 %v14188_v19 }
 0x457   :  { %5743 = vmatpush1.bf16.msra.mxu0 %v14183_v9  ;;  %5784 = vmatpush1.bf16.msra.mxu1 %v14186_v11 }
 0x458   :  { %5744 = vmatprep.subr.bf16.mxu0 %v14191_v24  ;;  %5785 = vmatprep.subr.bf16.mxu1 %v14194_v26 }
 0x45b   :  { %5745 = vmatpush1.bf16.msra.mxu0 %v14189_v23  ;;  %5786 = vmatpush1.bf16.msra.mxu1 %v14192_v34 }
 0x45c   :  { %5746 = vmatprep.subr.bf16.mxu0 %v14197_v37  ;;  %5787 = vmatprep.subr.bf16.mxu1 %v14200_v15 }
 0x45f   :  { %5747 = vmatpush1.bf16.msra.mxu0 %v14195_v41  ;;  %5788 = vmatpush1.bf16.msra.mxu1 %v14198_v42 }
 0x460   :  { %5748 = vmatprep.subr.bf16.mxu0 %v14203_v48  ;;  %5789 = vmatprep.subr.bf16.mxu1 %v14206_v32 }
 0x463   :  { %5749 = vmatpush1.bf16.msra.mxu0 %v14201_v27  ;;  %5790 = vmatpush1.bf16.msra.mxu1 %v14204_v47 }
 0x464   :  { %5750 = vmatprep.subr.bf16.mxu0 %v14209_v49  ;;  %5791 = vmatprep.subr.bf16.mxu1 %v14212_v51 }
 0x467   :  { %5751 = vmatpush1.bf16.msra.mxu0 %v14207_v7  ;;  %5792 = vmatpush1.bf16.msra.mxu1 %v14210_v50 }
 0x468   :  { %5994 = vmatprep.subr.bf16.mxu0 %v14215_v29  ;;  %6035 = vmatprep.subr.bf16.mxu1 %v14218_v43 }
 0x4ab   :  { %v17433_v60 = vpop.f32.mrb[28].mxu0  ;;  %v17435_v58 = vpop.f32.mrb[28].mxu1 }
 0x4ac   :  { %v17437_v46 = vpop.f32.mrb[29].mxu0  ;;  %v17439_v57 = vpop.f32.mrb[29].mxu1 }
 0x4ad   :  { %v4221_v2 = vpop.f32.mrb[30].mxu0  ;;  %v4262_v62 = vpop.f32.mrb[30].mxu1 }
 0x4ae   :  { %v4222_v5 = vpop.f32.mrb[31].mxu0  ;;  %v4263_v18 = vpop.f32.mrb[31].mxu1  ;;  %v4540_v2 = vrot.slane %v4523_v52, %v16539_v53 }
 0x4fc   :  { %v4475_v22 = vpop.f32.mrb[32].mxu0  ;;  %v4516_v61 = vpop.f32.mrb[32].mxu1 }
 0x4fd   :  { %v4476_v59 = vadd.f32 %v4475_v22, %v17433_v60  ;;  %v4517_v25 = vadd.f32 %v4516_v61, %v17435_v58  ;;  %v4477_v35 = vpop.f32.mrb[33].mxu0  ;;  %v4518_v54 = vpop.f32.mrb[33].mxu1  ;;  %v4536_v58 = vrot.slane %v4523_v52, %v16543_v17  ;;  %v12904_v52 = vld [vmem:[%s19687_s0 + $0x3] ss:$8 sm:$0xf] }
 0x4fe   :  { %v4478_v39 = vadd.f32 %v4477_v35, %v17437_v46  ;;  %v4519_v13 = vadd.f32 %v4518_v54, %v17439_v57  ;;  %v4479_v3 = vpop.f32.mrb[34].mxu0  ;;  %v4520_v56 = vpop.f32.mrb[34].mxu1  ;;  %v12906_v54 = vld [vmem:[%s19687_s0 + $0x43] ss:$8 sm:$0xf] }
 0x4ff   :  { %v4545_v63 = vadd.f32 %v4528_v8, %v4476_v59  ;;  %v4480_v31 = vpop.f32.mrb[35].mxu0  ;;  %v4521_v20 = vpop.f32.mrb[35].mxu1  ;;  %v4547_v5 = vadd.f32 %v4536_v58, %v4517_v25  ;;  %v12905_v8 = vld [vmem:[%s19687_s0 + $0x23] ss:$8 sm:$0xf] }
 0x500   :  { %v4546_v1 = vadd.f32 %v4532_v55, %v4478_v39  ;;  %v4548_v60 = vadd.f32 %v4540_v2, %v4519_v13  ;;  %v12908_v55 = vld [vmem:[%s19687_s0 + $0x83] ss:$8 sm:$0xf] }
 0x501   :  { %v12897_v38 = vmul.f32 -1.442695, %v4545_v63  ;;  %v12909_v59 = vld [vmem:[%s19687_s0 + $0xa3] ss:$8 sm:$0xf] }
 0x502   :  { %v12898_v30 = vmul.f32 -1.442695, %v4546_v1  ;;  %v12899_v62 = vmul.f32 -1.442695, %v4548_v60 }
 0x503   :  { %15253 = vpow2.f32 %v12897_v38  ;;  %v12907_v39 = vld [vmem:[%s19687_s0 + $0x63] ss:$8 sm:$0xf] }
 0x504   :  { %15255 = vpow2.f32 %v12898_v30  ;;  %v12910_v56 = vld [vmem:[%s19687_s0 + $0xc3] ss:$8 sm:$0xf] }
 0x505   :  { %15257 = vpow2.f32 %v12899_v62  ;;  %v12911_v63 = vld [vmem:[%s19687_s0 + $0xe3] ss:$8 sm:$0xf] }
 0x506   :  { %15259 = vtanh.f32 %v4547_v5 }
 0x50d   :  { %v15254_v46 = vpop.eup %15253 }
 0x50e   :  { %v15256_v18 = vpop.eup %15255  ;;  %v4553_v57 = vadd.f32 1.0, %v15254_v46 }
 0x50f   :  { %v4559_v4 = vadd.f32 1.0, %v15256_v18  ;;  %v15258_v16 = vpop.eup %15257 }
 0x510   :  { %15261 = vrcp.f32 %v4553_v57  ;;  %v15260_v21 = vpop.eup %15259  ;;  %v4566_v9 = vadd.f32 1.0, %v15258_v16 }
 0x511   :  { %15263 = vrcp.f32 %v4559_v4 }
 0x512   :  { %15265 = vrcp.f32 %v4566_v9 }
 0x51a   :  { %v15262_v40 = vpop.eup %15261 }
 0x51b   :  { %v15264_v6 = vpop.eup %15263  ;;  %v4570_v19 = vmul.f32 %v15262_v40, %v15260_v21 }
 0x51c   :  { %v4569_v11 = vmul.f32 %v15264_v6, %v17004_v28  ;;  %v4952_v24 = vpop.f32.mrb[36].mxu0  ;;  %v4993_v26 = vpop.f32.mrb[36].mxu1 }
 0x51d   :  { %v4954_v23 = vpop.f32.mrb[37].mxu0  ;;  %v4995_v34 = vpop.f32.mrb[37].mxu1 }
 0x51e   :  { %v17459_v37 = vadd.f32 %v4570_v19, %v4569_v11  ;;  %v5004_v15 = vcombine.low %v4952_v24, %v4954_v23  ;;  %v5005_v41 = vcombine.high %v4952_v24, %v4954_v23  ;;  %v5006_v42 = vcombine.low %v4993_v26, %v4995_v34  ;;  %v4956_v48 = vpop.f32.mrb[38].mxu0  ;;  %v4997_v32 = vpop.f32.mrb[38].mxu1 }
 0x51f   :  { %v5007_v27 = vcombine.high %v4993_v26, %v4995_v34  ;;  %v4957_v47 = vpop.f32.mrb[39].mxu0  ;;  %v4998_v49 = vpop.f32.mrb[39].mxu1 }
 0x520   :  { %15267 = vtanh.f32 %v17459_v37  ;;  %v5014_v51 = vrot.slane %v5004_v15, %v16279_v45  ;;  %v5021_v28 = vrot.slane %v5005_v41, %v16279_v45  ;;  %v5028_v7 = vrot.slane %v5006_v42, %v16279_v45  ;;  %v15266_v57 = vpop.eup %15265 }
 0x521   :  { %v5035_v50 = vrot.slane %v5007_v27, %v16279_v45 }
 0x522   :  { %v5036_v29 = vcombine.low %v5014_v51, %v5028_v7  ;;  %v5037_v43 = vcombine.high %v5014_v51, %v5028_v7 }
 0x523   :  { %v5038_v22 = vcombine.low %v5021_v28, %v5035_v50  ;;  %v5039_v61 = vcombine.high %v5021_v28, %v5035_v50  ;;  %v4685_v50 = vld [vmem:[%s19692_s5] sm:$0x2] }
 0x524   :  { %v5046_v25 = vrot.slane %v5036_v29, %v16279_v45  ;;  %v5060_v35 = vrot.slane %v5037_v43, %v16279_v45  ;;  %v14213_v29 = vld [vmem:[%s19689_s2] ss:$16 sps:$4 sm:$0xff]  }
 0x525   :  { %v5053_v13 = vrot.slane %v5038_v22, %v16279_v45  ;;  %v5067_v3 = vrot.slane %v5039_v61, %v16279_v45 }
 0x526   :  { %v5068_v31 = vcombine.high %v5046_v25, %v5046_v25  ;;  %v5070_v20 = vcombine.high %v5060_v35, %v5060_v35  ;;  %v17494_v1 = vadd.f32 %v12904_v52, %v5046_v25  ;;  %v17496_v38 = vadd.f32 %v12905_v8, %v5060_v35  ;;  %v14216_v25 = vld [vmem:[%s19689_s2 + $0x8] ss:$16 sps:$4 sm:$0xff]   ;;  %v14221_v35 = vld [vmem:[%s19689_s2 + $0x24] ss:$16 sps:$4 sm:$0xff]  }
 0x527   :  { %v5069_v30 = vcombine.high %v5053_v13, %v5053_v13  ;;  %v5071_v2 = vcombine.high %v5067_v3, %v5067_v3  ;;  %v17498_v60 = vadd.f32 %v12908_v55, %v5053_v13  ;;  %v17500_v58 = vadd.f32 %v12909_v59, %v5067_v3  ;;  %v4688_v59 = vld [vmem:[%s19692_s5 + $0x4] sm:$0x2] }
 0x528   :  { %v17502_v62 = vadd.f32 %v12906_v54, %v5068_v31  ;;  %v17504_v5 = vadd.f32 %v12907_v39, %v5070_v20  ;;  %v12944_v46 = vmul.f32 -1.442695, %v17494_v1  ;;  %v12945_v18 = vmul.f32 -1.442695, %v17496_v38  ;;  %v14224_v31 = vld [vmem:[%s19689_s2 + $0x2c] ss:$16 sps:$4 sm:$0xff]  }
 0x529   :  { %v17508_v4 = vadd.f32 %v12910_v56, %v5069_v30  ;;  %v17510_v16 = vadd.f32 %v12911_v63, %v5071_v2  ;;  %v12948_v21 = vmul.f32 -1.442695, %v17498_v60  ;;  %v5145_v9 = vrot.slane %v17494_v1, 1 }
 0x52a   :  { %v15268_v40 = vpop.eup %15267  ;;  %15269 = vpow2.f32 %v12944_v46  ;;  %v12946_v6 = vmul.f32 -1.442695, %v17502_v62  ;;  %v12947_v19 = vmul.f32 -1.442695, %v17504_v5  ;;  %v12949_v24 = vmul.f32 -1.442695, %v17500_v58 }
 0x52b   :  { %v4573_v11 = vmul.f32 %v15268_v40, %v15266_v57  ;;  %15271 = vpow2.f32 %v12945_v18  ;;  %v12950_v26 = vmul.f32 -1.442695, %v17508_v4  ;;  %v5146_v23 = vrot.slane %v17496_v38, 1  ;;  %v4691_v57 = vld [vmem:[%s19692_s5 + $0x8] sm:$0x2] }
 0x52c   :  { %15273 = vpow2.f32 %v12946_v6  ;;  %v12951_v15 = vmul.f32 -1.442695, %v17510_v16  ;;  %v12952_v41 = vmul.f32 -1.442695, %v5145_v9  ;;  %v4697_v40 = vld [vmem:[%s19692_s5 + $0x10] sm:$0x2] }
 0x52d   :  { %v4574_v34 = vpack.c.bf16 %v4573_v11, %v4573_v11  ;;  %15275 = vpow2.f32 %v12947_v19  ;;  %v12953_v48 = vmul.f32 -1.442695, %v5146_v23  ;;  %v4703_v23 = vld [vmem:[%s19692_s5 + $0x18] sm:$0x2] }
 0x52e   :  { %15277 = vpow2.f32 %v12948_v21  ;;  %v4694_v21 = vld [vmem:[%s19692_s5 + $0xc] sm:$0x2] }
 0x52f   :  { %4575 = vst [vmem:[#allocation2 + $0x4] sm:$0xf] %v4574_v34  ;;  %v4584_v42 = vrot.slane %v4574_v34, %v16279_v45  ;;  %15279 = vpow2.f32 %v12949_v24  ;;  %v14219_v34 = vld [vmem:[%s19689_s2 + $0x20] ss:$16 sps:$4 sm:$0xff]  }
 0x530   :  { %15281 = vpow2.f32 %v12950_v26  ;;  %v4700_v26 = vld [vmem:[%s19692_s5 + $0x14] sm:$0x2] }
 0x531   :  { %v4585_v32 = vcombine.high %v4584_v42, %v4584_v42  ;;  %v4592_v27 = vrot.slane %v4584_v42, %v16279_v45  ;;  %15283 = vpow2.f32 %v12951_v15 }
 0x532   :  { %15285 = vpow2.f32 %v12952_v41 }
 0x533   :  { %v4599_v47 = vrot.slane %v4585_v32, %v16279_v45  ;;  %v4600_v49 = vcombine.high %v4592_v27, %v4592_v27  ;;  %v4603_v51 = vunpack.i.h.s16 %v4592_v27  ;;  %v12900_v28 = vpack.i.b16 %v4592_v27, %v4592_v27  ;;  %v14222_v27 = vld [vmem:[%s19689_s2 + $0x28] ss:$16 sps:$4 sm:$0xff]  }
 0x534   :  { %v15270_v7 = vpop.eup %15269  ;;  %15287 = vpow2.f32 %v12953_v48 }
 0x535   :  { %v15272_v43 = vpop.eup %15271  ;;  %v4601_v52 = vcombine.high %v4599_v47, %v4599_v47  ;;  %v4605_v8 = vunpack.i.h.s16 %v4599_v47  ;;  %v4607_v22 = vunpack.i.h.s16 %v4600_v49  ;;  %v4611_v61 = vpack.i.b16 %v4603_v51, %v4603_v51 }
 0x536   :  { %v15274_v54 = vpop.eup %15273  ;;  %v12901_v39 = vpack.i.b16 %v4599_v47, %v4599_v47  ;;  %v12902_v13 = vpack.i.b16 %v4600_v49, %v4600_v49  ;;  %v4624_v3 = vrot.slane %v12900_v28, %v16610_v33  ;;  %v5113_v56 = vadd.f32 1.0, %v15270_v7  ;;  %v5543_v63 = vld [vmem:[#allocation2 + $0x4] sm:$0xf] }
 0x537   :  { %v15276_v20 = vpop.eup %15275  ;;  %v4609_v30 = vunpack.i.h.s16 %v4601_v52  ;;  %v4613_v2 = vpack.i.b16 %v4605_v8, %v4605_v8  ;;  %v4615_v46 = vpack.i.b16 %v4607_v22, %v4607_v22  ;;  %v12903_v18 = vpack.i.b16 %v4601_v52, %v4601_v52  ;;  %5769 = vmatmul.mubr.bf16.vlgmr.msra.gmra.mrb[40].mxu0 %v5543_v63  ;;  %5810 = vmatmul.mubr.bf16.vlgmr.msra.gmra.mrb[40].mxu1 %v5543_v63  ;;  %v14227_v47 = vld [vmem:[%s19689_s2 + $0x44] ss:$16 sps:$4 sm:$0xff]   ;;  %v14230_v52 = vld [vmem:[%s19689_s2 + $0x4c] ss:$16 sps:$4 sm:$0xff]  }
 0x538   :  { %v15278_v6 = vpop.eup %15277  ;;  %v4631_v19 = vrot.slane %v4611_v61, %v16610_v33  ;;  %v4638_v9 = vrot.slane %v12901_v39, %v16610_v33  ;;  %v4652_v11 = vrot.slane %v12902_v13, %v16610_v33  ;;  %v4686_v24 = vsel %vm17531_vm13, %v4624_v3, %v4685_v50  ;;  %5995 = vmatpush1.bf16.msra.mxu0 %v14213_v29  ;;  %v4706_v50 = vld [vmem:[%s19692_s5 + $0x1c] sm:$0x2]  ;;  %v14225_v13 = vld [vmem:[%s19689_s2 + $0x40] ss:$16 sps:$4 sm:$0xff]  }
 0x539   :  { %v15280_v15 = vpop.eup %15279  ;;  %v4617_v41 = vpack.i.b16 %v4609_v30, %v4609_v30  ;;  %v4645_v42 = vrot.slane %v4613_v2, %v16610_v33  ;;  %v4659_v48 = vrot.slane %v4615_v46, %v16610_v33  ;;  %v4666_v32 = vrot.slane %v12903_v18, %v16610_v33  ;;  %4687 = vst [vmem:[%s19692_s5] sm:$0x2] %v4686_v24  ;;  %v14236_v2 = vld [vmem:[%s19689_s2 + $0x6c] ss:$16 sps:$4 sm:$0xff]  }
 0x53a   :  { %6036 = vmatpush1.bf16.msra.mxu1 %v14216_v25  ;;  %v15282_v49 = vpop.eup %15281  ;;  %v4689_v51 = vsel %vm17531_vm13, %v4631_v19, %v4688_v59  ;;  %v4692_v28 = vsel %vm17531_vm13, %v4638_v9, %v4691_v57  ;;  %v4698_v7 = vsel %vm17531_vm13, %v4652_v11, %v4697_v40  ;;  %v5114_v29 = vadd.f32 1.0, %v15272_v43  ;;  %5996 = vmatprep.subr.bf16.mxu0 %v14221_v35  ;;  %v14231_v40 = vld [vmem:[%s19689_s2 + $0x60] ss:$16 sps:$4 sm:$0xff]   ;;  %v14239_v11 = vld [vmem:[%s19689_s2 + $0x84] ss:$16 sps:$4 sm:$0xff]  }
 0x53b   :  { %6037 = vmatprep.subr.bf16.mxu1 %v14224_v31  ;;  %v15284_v8 = vpop.eup %15283  ;;  %v4673_v22 = vrot.slane %v4617_v41, %v16610_v33  ;;  %4690 = vst [vmem:[%s19692_s5 + $0x4] sm:$0x2] %v4689_v51  ;;  %4693 = vst [vmem:[%s19692_s5 + $0x8] sm:$0x2] %v4692_v28  ;;  %v4695_v43 = vsel %vm17531_vm13, %v4645_v42, %v4694_v21  ;;  %v4701_v61 = vsel %vm17531_vm13, %v4659_v48, %v4700_v26  ;;  %v14237_v41 = vld [vmem:[%s19689_s2 + $0x80] ss:$16 sps:$4 sm:$0xff]  }
 0x53c   :  { %4699 = vst [vmem:[%s19692_s5 + $0x10] sm:$0x2] %v4698_v7  ;;  %v4704_v59 = vsel %vm17531_vm13, %v4666_v32, %v4703_v23  ;;  %6026 = vmatprep.mubr.bf16.mxu0 %v16024_v0  ;;  %v15286_v25 = vpop.eup %15285  ;;  %4696 = vst [vmem:[%s19692_s5 + $0xc] sm:$0x2] %v4695_v43  ;;  %v5115_v35 = vadd.f32 1.0, %v15274_v54  ;;  %v5116_v39 = vadd.f32 1.0, %v15276_v20  ;;  %5997 = vmatpush1.bf16.msra.mxu0 %v14219_v34  ;;  %15289 = vrcp.f32 %v5113_v56 }
 0x53d   :  { %4702 = vst [vmem:[%s19692_s5 + $0x14] sm:$0x2] %v4701_v61  ;;  %4705 = vst [vmem:[%s19692_s5 + $0x18] sm:$0x2] %v4704_v59  ;;  %6067 = vmatprep.mubr.bf16.mxu1 %v16024_v0  ;;  %v4707_v3 = vsel %vm17531_vm13, %v4673_v22, %v4706_v50  ;;  %v5117_v63 = vadd.f32 1.0, %v15278_v6  ;;  %v5147_v31 = vrot.slane %v17502_v62, 1  ;;  %5998 = vmatprep.subr.bf16.mxu0 %v14227_v47  ;;  %15291 = vrcp.f32 %v5114_v29 }
 0x53e   :  { %6038 = vmatpush1.bf16.msra.mxu1 %v14222_v27  ;;  %v14228_v54 = vld [vmem:[%s19689_s2 + $0x48] ss:$16 sps:$4 sm:$0xff]   ;;  %v14233_v20 = vld [vmem:[%s19689_s2 + $0x64] ss:$16 sps:$4 sm:$0xff]   ;;  %v15288_v30 = vpop.eup %15287  ;;  %4708 = vst [vmem:[%s19692_s5 + $0x1c] sm:$0x2] %v4707_v3  ;;  %15293 = vrcp.f32 %v5115_v35 }
 0x53f   :  { %v5118_v55 = vadd.f32 1.0, %v15280_v15  ;;  %v5148_v56 = vrot.slane %v17504_v5, 1  ;;  %6039 = vmatprep.subr.bf16.mxu1 %v14230_v52  ;;  %v5119_v46 = vadd.f32 1.0, %v15282_v49  ;;  %v5149_v18 = vrot.slane %v17498_v60, 1  ;;  %v14234_v6 = vld [vmem:[%s19689_s2 + $0x68] ss:$16 sps:$4 sm:$0xff]  }
 0x540   :  { %v5120_v57 = vadd.f32 1.0, %v15284_v8  ;;  %15295 = vrcp.f32 %v5116_v39  ;;  %v5150_v21 = vrot.slane %v17500_v58, 1  ;;  %5999 = vmatpush1.bf16.msra.mxu0 %v14225_v13  ;;  %v5151_v19 = vrot.slane %v17508_v4, 1  ;;  %v14242_v23 = vld [vmem:[%s19689_s2 + $0x8c] ss:$16 sps:$4 sm:$0xff]  }
 0x541   :  { %15297 = vrcp.f32 %v5117_v63  ;;  %v12954_v9 = vmul.f32 -1.442695, %v5147_v31  ;;  %6000 = vmatprep.subr.bf16.mxu0 %v14233_v20  ;;  %v5152_v24 = vrot.slane %v17510_v16, 1  ;;  %v12955_v26 = vmul.f32 -1.442695, %v5148_v56 }
 0x542   :  { %6040 = vmatpush1.bf16.msra.mxu1 %v14228_v54  ;;  %15299 = vrcp.f32 %v5118_v55  ;;  %v12956_v34 = vmul.f32 -1.442695, %v5149_v18  ;;  %v12957_v15 = vmul.f32 -1.442695, %v5150_v21  ;;  %v12958_v42 = vmul.f32 -1.442695, %v5151_v19 }
 0x543   :  { %6041 = vmatprep.subr.bf16.mxu1 %v14236_v2  ;;  %15301 = vrcp.f32 %v5119_v46  ;;  %v14240_v48 = vld [vmem:[%s19689_s2 + $0x88] ss:$16 sps:$4 sm:$0xff]   ;;  %v14245_v32 = vld [vmem:[%s19689_s2 + $0xa4] ss:$16 sps:$4 sm:$0xff]   ;;  %v12959_v27 = vmul.f32 -1.442695, %v5152_v24  ;;  %v13685_v52 = vcombine.low %v17328_v36, %v17328_v36 }
 0x544   :  { %15303 = vrcp.f32 %v5120_v57  ;;  %6001 = vmatpush1.bf16.msra.mxu0 %v14231_v40  ;;  %v14248_v47 = vld [vmem:[%s19689_s2 + $0xac] ss:$16 sps:$4 sm:$0xff]   ;;  %v5185_v51 = vadd.f32 1.0, %v15286_v25  ;;  %v5186_v7 = vadd.f32 1.0, %v15288_v30  ;;  %v14243_v50 = vld [vmem:[%s19689_s2 + $0xa0] ss:$16 sps:$4 sm:$0xff]   ;;  %v5305_v25 = vrot.slane %v3955_v14, %v16279_v45 }
 0x545   :  { %15305 = vpow2.f32 %v12954_v9  ;;  %6002 = vmatprep.subr.bf16.mxu0 %v14239_v11  ;;  %v5209_v8 = vrot.slane %v17494_v1, 2  ;;  %v14246_v22 = vld [vmem:[%s19689_s2 + $0xa8] ss:$16 sps:$4 sm:$0xff]   ;;  %v14251_v43 = vld [vmem:[%s19689_s2 + $0xc4] ss:$16 sps:$4 sm:$0xff]   ;;  %v5210_v59 = vrot.slane %v17496_v38, 2  ;;  %v17710_v31 = vrot.slane %v13685_v52, %v16279_v45 }
 0x546   :  { %6042 = vmatpush1.bf16.msra.mxu1 %v14234_v6  ;;  %15307 = vpow2.f32 %v12955_v26  ;;  %v17669_v49 = vpop.eup %15289  ;;  %v14254_v35 = vld [vmem:[%s19689_s2 + $0xcc] ss:$16 sps:$4 sm:$0xff]   ;;  %v5211_v13 = vrot.slane %v17502_v62, 2  ;;  %v5212_v63 = vrot.slane %v17504_v5, 2  ;;  %v5213_v14 = vrot.slane %v17498_v60, 2 }
 0x547   :  { %6043 = vmatprep.subr.bf16.mxu1 %v14242_v23  ;;  %15309 = vpow2.f32 %v12956_v34  ;;  %v17671_v28 = vpop.eup %15291  ;;  %v14252_v54 = vld [vmem:[%s19689_s2 + $0xc8] ss:$16 sps:$4 sm:$0xff]   ;;  %v14257_v20 = vld [vmem:[%s19689_s2 + $0xe4] ss:$16 sps:$4 sm:$0xff]   ;;  %v5313_v55 = vcombine.high %v5305_v25, %v5305_v25  ;;  %v17721_v56 = vrot.slane %v5305_v25, %v16279_v45  ;;  %v14260_v2 = vld [vmem:[%s19689_s2 + $0xec] ss:$16 sps:$4 sm:$0xff]   ;;  %v17731_v19 = vrot.slane %v17710_v31, %v16279_v45 }
 0x548   :  { %15311 = vpow2.f32 %v12957_v15  ;;  %6003 = vmatpush1.bf16.msra.mxu0 %v14237_v41  ;;  %v17676_v29 = vpop.eup %15293  ;;  %v14255_v21 = vld [vmem:[%s19689_s2 + $0xe0] ss:$16 sps:$4 sm:$0xff]   ;;  %v14258_v9 = vld [vmem:[%s19689_s2 + $0xe8] ss:$16 sps:$4 sm:$0xff]   ;;  %v14263_v11 = vld [vmem:[%s19688_s1 + $0x4] ss:$16 sps:$4 sm:$0xff]   ;;  %v5314_v24 = vcombine.high %v17710_v31, %v17710_v31 }
 0x549   :  { %15313 = vpow2.f32 %v12958_v42  ;;  %6004 = vmatprep.subr.bf16.mxu0 %v14245_v32  ;;  %v17742_v34 = vrot.slane %v5313_v55, %v16279_v45  ;;  %v5343_v15 = vcombine.high %v17721_v56, %v17721_v56  ;;  %v14266_v41 = vld [vmem:[%s19688_s1 + $0xc] ss:$16 sps:$4 sm:$0xff]   ;;  %v5214_v32 = vrot.slane %v17500_v58, 2 }
 0x54a   :  { %6044 = vmatpush1.bf16.msra.mxu1 %v14240_v48  ;;  %v17687_v61 = vpop.eup %15295  ;;  %15315 = vpow2.f32 %v12959_v27  ;;  %v5233_v27 = vrot.slane %v17494_v1, 3  ;;  %v5236_v1 = vrot.slane %v17504_v5, 3  ;;  %v5237_v25 = vrot.slane %v17498_v60, 3 }
 0x54b   :  { %6045 = vmatprep.subr.bf16.mxu1 %v14248_v47  ;;  %v17697_v39 = vpop.eup %15297  ;;  %15317 = vrcp.f32 %v5185_v51  ;;  %v5342_v55 = vrot.slane %v5314_v24, %v16279_v45 }
 0x54c   :  { %v17700_v3 = vpop.eup %15299  ;;  %15319 = vrcp.f32 %v5186_v7  ;;  %6005 = vmatpush1.bf16.msra.mxu0 %v14243_v50  ;;  %v5215_v7 = vrot.slane %v17508_v4, 2  ;;  %v5234_v50 = vrot.slane %v17496_v38, 3 }
 0x54d   :  { %v17706_v36 = vpop.eup %15301  ;;  %15321 = vtanh.f32 %v5209_v8  ;;  %6006 = vmatprep.subr.bf16.mxu0 %v14251_v43  ;;  %v5235_v43 = vrot.slane %v17502_v62, 3  ;;  %v5239_v62 = vrot.slane %v17508_v4, 3  ;;  %v5345_v4 = vcombine.high %v17742_v34, %v17742_v34 }
 0x54e   :  { %6046 = vmatpush1.bf16.msra.mxu1 %v14246_v22  ;;  %v17718_v30 = vpop.eup %15303  ;;  %15323 = vtanh.f32 %v5210_v59  ;;  %v5216_v22 = vrot.slane %v17510_v16, 2  ;;  %v12961_v31 = vmul.f32 -1.442695, %v5234_v50 }
 0x54f   :  { %6047 = vmatprep.subr.bf16.mxu1 %v14254_v35  ;;  %v15306_v46 = vpop.eup %15305  ;;  %15325 = vtanh.f32 %v5211_v13  ;;  %v5238_v13 = vrot.slane %v17500_v58, 3  ;;  %v12962_v60 = vmul.f32 -1.442695, %v5235_v43  ;;  %v5240_v58 = vrot.slane %v17510_v16, 3 }
 0x550   :  { %v15308_v18 = vpop.eup %15307  ;;  %v5187_v57 = vadd.f32 1.0, %v15306_v46  ;;  %15327 = vtanh.f32 %v5212_v63  ;;  %6007 = vmatpush1.bf16.msra.mxu0 %v14249_v10  ;;  %v12960_v63 = vmul.f32 -1.442695, %v5233_v27 }
 0x551   :  { %v15310_v40 = vpop.eup %15309  ;;  %v5188_v6 = vadd.f32 1.0, %v15308_v18  ;;  %15329 = vtanh.f32 %v5213_v14  ;;  %6008 = vmatprep.subr.bf16.mxu0 %v14257_v20 }
 0x552   :  { %6048 = vmatpush1.bf16.msra.mxu1 %v14252_v54  ;;  %v15312_v26 = vpop.eup %15311  ;;  %v5189_v23 = vadd.f32 1.0, %v15310_v40  ;;  %15331 = vrcp.f32 %v5187_v57  ;;  %v12964_v57 = vmul.f32 -1.442695, %v5237_v25  ;;  %v12965_v40 = vmul.f32 -1.442695, %v5238_v13 }
 0x553   :  { %6049 = vmatprep.subr.bf16.mxu1 %v14260_v2  ;;  %v15314_v42 = vpop.eup %15313  ;;  %v5190_v48 = vadd.f32 1.0, %v15312_v26  ;;  %15333 = vrcp.f32 %v5188_v6  ;;  %v12963_v2 = vmul.f32 -1.442695, %v5236_v1  ;;  %v12966_v6 = vmul.f32 -1.442695, %v5239_v62 }
 0x554   :  { %v15316_v47 = vpop.eup %15315  ;;  %v5191_v51 = vadd.f32 1.0, %v15314_v42  ;;  %15335 = vrcp.f32 %v5189_v23  ;;  %6009 = vmatpush1.bf16.msra.mxu0 %v14255_v21  ;;  %v12967_v23 = vmul.f32 -1.442695, %v5240_v58 }
 0x555   :  { %v15318_v52 = vpop.eup %15317  ;;  %v5192_v8 = vadd.f32 1.0, %v15316_v47  ;;  %15337 = vrcp.f32 %v5190_v48  ;;  %6470 = vmatprep.subr.bf16.mxu0 %v14263_v11 }
 0x556   :  { %6050 = vmatpush1.bf16.msra.mxu1 %v14258_v9  ;;  %v15320_v59 = vpop.eup %15319  ;;  %15339 = vrcp.f32 %v5191_v51  ;;  %v5355_v35 = vmul.f32 %v15318_v52, %v17721_v56 }
 0x557   :  { %6511 = vmatprep.subr.bf16.mxu1 %v14266_v41  ;;  %v15322_v38 = vpop.eup %15321  ;;  %15341 = vrcp.f32 %v5192_v8  ;;  %v5356_v10 = vmul.f32 %v15320_v59, %v17742_v34 }
 0x558   :  { %v15324_v14 = vpop.eup %15323  ;;  %15343 = vtanh.f32 %v5214_v32  ;;  %v5363_v54 = vmul.f32 %v15322_v38, %v17669_v49 }
 0x559   :  { %v15326_v5 = vpop.eup %15325  ;;  %15345 = vtanh.f32 %v5215_v7  ;;  %v5364_v20 = vmul.f32 %v15324_v14, %v17671_v28  ;;  %v5344_v28 = vcombine.high %v17731_v19, %v17731_v19 }
 0x55a   :  { %v15328_v56 = vpop.eup %15327  ;;  %15347 = vtanh.f32 %v5216_v22  ;;  %v5371_v46 = vadd.f32 %v5363_v54, %v5355_v35  ;;  %v5365_v16 = vmul.f32 %v15326_v5, %v17676_v29 }
 0x55b   :  { %v15330_v18 = vpop.eup %15329  ;;  %15349 = vpow2.f32 %v12960_v63  ;;  %v5372_v49 = vadd.f32 %v5364_v20, %v5356_v10  ;;  %v5366_v34 = vmul.f32 %v15328_v56, %v17687_v61 }
 0x55c   :  { %v15332_v21 = vpop.eup %15331  ;;  %15351 = vpow2.f32 %v12961_v31  ;;  %v5367_v32 = vmul.f32 %v15330_v18, %v17697_v39 }
 0x55d   :  { %v15334_v9 = vpop.eup %15333  ;;  %15353 = vpow2.f32 %v12962_v60  ;;  %v5357_v11 = vmul.f32 %v15332_v21, %v5343_v15  ;;  %v5460_v24 = vcombine.low %v5371_v46, %v5372_v49  ;;  %v5346_v15 = vcombine.high %v5342_v55, %v5342_v55 }
 0x55e   :  { %v15336_v26 = vpop.eup %15335  ;;  %15355 = vpow2.f32 %v12963_v2  ;;  %v5358_v41 = vmul.f32 %v15334_v9, %v5345_v4 }
 0x55f   :  { %v15338_v42 = vpop.eup %15337  ;;  %15357 = vpow2.f32 %v12964_v57  ;;  %v5359_v48 = vmul.f32 %v15336_v26, %v17731_v19  ;;  %v5373_v27 = vadd.f32 %v5365_v16, %v5357_v11  ;;  %v5470_v39 = vrot.slane %v5460_v24, %v16279_v45 }
 0x560   :  { %v15340_v47 = vpop.eup %15339  ;;  %15359 = vpow2.f32 %v12965_v40  ;;  %v5374_v51 = vadd.f32 %v5366_v34, %v5358_v41  ;;  %v5360_v7 = vmul.f32 %v15338_v42, %v5342_v55 }
 0x561   :  { %v15342_v29 = vpop.eup %15341  ;;  %15361 = vpow2.f32 %v12966_v6  ;;  %v5375_v50 = vadd.f32 %v5367_v32, %v5359_v48  ;;  %v5361_v52 = vmul.f32 %v15340_v47, %v5344_v28 }
 0x562   :  { %v15344_v8 = vpop.eup %15343  ;;  %15363 = vpow2.f32 %v12967_v23  ;;  %v5461_v22 = vcombine.low %v5373_v27, %v5374_v51  ;;  %v5362_v61 = vmul.f32 %v15342_v29, %v5346_v15 }
 0x563   :  { %v15346_v43 = vpop.eup %15345  ;;  %v5368_v59 = vmul.f32 %v15344_v8, %v17700_v3  ;;  %15365 = vtanh.f32 %v5371_v46 }
 0x564   :  { %v15348_v19 = vpop.eup %15347  ;;  %15367 = vtanh.f32 %v5372_v49  ;;  %v5477_v1 = vrot.slane %v5461_v22, %v16279_v45  ;;  %v5369_v25 = vmul.f32 %v15346_v43, %v17706_v36 }
 0x565   :  { %v15350_v35 = vpop.eup %15349  ;;  %15369 = vtanh.f32 %v5373_v27  ;;  %v5370_v38 = vmul.f32 %v15348_v19, %v17718_v30  ;;  %v5376_v13 = vadd.f32 %v5368_v59, %v5360_v7 }
 0x566   :  { %v15352_v63 = vpop.eup %15351  ;;  %v5273_v10 = vadd.f32 1.0, %v15350_v35  ;;  %v5492_v14 = vcombine.low %v5470_v39, %v5477_v1  ;;  %v5377_v62 = vadd.f32 %v5369_v25, %v5361_v52  ;;  %15371 = vtanh.f32 %v5374_v51 }
 0x567   :  { %v15354_v3 = vpop.eup %15353  ;;  %v5274_v31 = vadd.f32 1.0, %v15352_v63  ;;  %v5378_v54 = vadd.f32 %v5370_v38, %v5362_v61  ;;  %15373 = vtanh.f32 %v5375_v50  ;;  %v5462_v5 = vcombine.low %v5375_v50, %v5376_v13 }
 0x568   :  { %v15356_v60 = vpop.eup %15355  ;;  %v5275_v20 = vadd.f32 1.0, %v15354_v3  ;;  %15375 = vrcp.f32 %v5273_v10  ;;  %v17781_v28 = vrot.slane %v5492_v14, %v16279_v45 }
 0x569   :  { %v15358_v55 = vpop.eup %15357  ;;  %v5276_v36 = vadd.f32 1.0, %v15356_v60  ;;  %15377 = vrcp.f32 %v5274_v31  ;;  %v5463_v56 = vcombine.low %v5377_v62, %v5378_v54  ;;  %v5484_v18 = vrot.slane %v5462_v5, %v16279_v45 }
 0x56a   :  { %v15360_v58 = vpop.eup %15359  ;;  %v5277_v30 = vadd.f32 1.0, %v15358_v55  ;;  %15379 = vrcp.f32 %v5275_v20 }
 0x56b   :  { %v15362_v2 = vpop.eup %15361  ;;  %v5278_v46 = vadd.f32 1.0, %v15360_v58  ;;  %15381 = vrcp.f32 %v5276_v36  ;;  %v5491_v57 = vrot.slane %v5463_v56, %v16279_v45 }
 0x56c   :  { %v15364_v4 = vpop.eup %15363  ;;  %v5279_v49 = vadd.f32 1.0, %v15362_v2  ;;  %15383 = vrcp.f32 %v5277_v30 }
 0x56d   :  { %v15366_v21 = vpop.eup %15365  ;;  %v5280_v40 = vadd.f32 1.0, %v15364_v4  ;;  %15385 = vrcp.f32 %v5278_v46  ;;  %v5493_v6 = vcombine.low %v5484_v18, %v5491_v57 }
 0x56e   :  { %v15368_v9 = vpop.eup %15367  ;;  %15387 = vrcp.f32 %v5279_v49 }
 0x56f   :  { %v15370_v11 = vpop.eup %15369  ;;  %15389 = vrcp.f32 %v5280_v40  ;;  %v17784_v16 = vrot.slane %v5493_v6, %v16279_v45  ;;  %v14261_v6 = vld [vmem:[%s19688_s1] ss:$16 sps:$4 sm:$0xff]  }
 0x570   :  { %v15372_v24 = vpop.eup %15371  ;;  %15391 = vtanh.f32 %v5376_v13 }
 0x571   :  { %v15374_v26 = vpop.eup %15373  ;;  %15393 = vtanh.f32 %v5377_v62  ;;  %v5508_v23 = vcombine.low %v17781_v28, %v17784_v16  ;;  %v14393_v28 = vld [vmem:[%s19689_s2 + $0xc0] ss:$16 sps:$4 sm:$0xff]  }
 0x572   :  { %v15376_v41 = vpop.eup %15375  ;;  %15395 = vtanh.f32 %v5378_v54 }
 0x573   :  { %v15378_v34 = vpop.eup %15377  ;;  %v5387_v42 = vmul.f32 %v15376_v41, %v15366_v21  ;;  %v14272_v41 = vld [vmem:[%s19688_s1 + $0x2c] ss:$16 sps:$4 sm:$0xff]  }
 0x574   :  { %v15380_v48 = vpop.eup %15379  ;;  %v5388_v32 = vmul.f32 %v15378_v34, %v15368_v9  ;;  %v14264_v9 = vld [vmem:[%s19688_s1 + $0x8] ss:$16 sps:$4 sm:$0xff]   ;;  %v14267_v34 = vld [vmem:[%s19688_s1 + $0x20] ss:$16 sps:$4 sm:$0xff]  }
 0x575   :  { %v15382_v27 = vpop.eup %15381  ;;  %v5389_v47 = vmul.f32 %v15380_v48, %v15370_v11  ;;  %v5395_v7 = vpack.c.bf16 %v5387_v42, %v5387_v42  ;;  %v14270_v42 = vld [vmem:[%s19688_s1 + $0x28] ss:$16 sps:$4 sm:$0xff]   ;;  %v14275_v48 = vld [vmem:[%s19688_s1 + $0x44] ss:$16 sps:$4 sm:$0xff]  }
 0x576   :  { %v15384_v51 = vpop.eup %15383  ;;  %v5390_v15 = vmul.f32 %v15382_v27, %v15372_v24  ;;  %v5396_v29 = vpack.c.bf16 %v5388_v32, %v5388_v32  ;;  %v14278_v32 = vld [vmem:[%s19688_s1 + $0x4c] ss:$16 sps:$4 sm:$0xff]   ;;  %v14273_v27 = vld [vmem:[%s19688_s1 + $0x40] ss:$16 sps:$4 sm:$0xff]  }
 0x577   :  { %v15386_v50 = vpop.eup %15385  ;;  %v5391_v52 = vmul.f32 %v15384_v51, %v15374_v26  ;;  %v5397_v8 = vpack.c.bf16 %v5389_v47, %v5389_v47  ;;  %v5411_v25 = vunpack.c.l.b16 %v5395_v7  ;;  %v14269_v26 = vld [vmem:[%s19688_s1 + $0x24] ss:$16 sps:$4 sm:$0xff]   ;;  %v14276_v47 = vld [vmem:[%s19688_s1 + $0x48] ss:$16 sps:$4 sm:$0xff]   ;;  %v14279_v7 = vld [vmem:[%s19688_s1 + $0x60] ss:$16 sps:$4 sm:$0xff]  }
 0x578   :  { %v15388_v22 = vpop.eup %15387  ;;  %v5398_v61 = vpack.c.bf16 %v5390_v15, %v5390_v15  ;;  %v5412_v43 = vunpack.c.l.b16 %v5396_v29  ;;  %v14281_v51 = vld [vmem:[%s19688_s1 + $0x64] ss:$16 sps:$4 sm:$0xff]   ;;  %v14284_v15 = vld [vmem:[%s19688_s1 + $0x6c] ss:$16 sps:$4 sm:$0xff]   ;;  %v14282_v29 = vld [vmem:[%s19688_s1 + $0x68] ss:$16 sps:$4 sm:$0xff]  }
 0x579   :  { %v15390_v59 = vpop.eup %15389  ;;  %v5399_v19 = vpack.c.bf16 %v5391_v52, %v5391_v52  ;;  %v5413_v39 = vunpack.c.l.b16 %v5397_v8  ;;  %v14290_v52 = vld [vmem:[%s19688_s1 + $0x8c] ss:$16 sps:$4 sm:$0xff]   ;;  %v14285_v8 = vld [vmem:[%s19688_s1 + $0x80] ss:$16 sps:$4 sm:$0xff]  }
 0x57a   :  { %v15392_v1 = vpop.eup %15391  ;;  %v5414_v35 = vunpack.c.l.b16 %v5398_v61  ;;  %v5435_v38 = vrot.slane %v5412_v43, 7  ;;  %v14293_v61 = vld [vmem:[%s19688_s1 + $0xa4] ss:$16 sps:$4 sm:$0xff]   ;;  %v14296_v43 = vld [vmem:[%s19688_s1 + $0xac] ss:$16 sps:$4 sm:$0xff]  }
 0x57b   :  { %v15394_v13 = vpop.eup %15393  ;;  %v5392_v63 = vmul.f32 %v15392_v1, %v15386_v50  ;;  %v5415_v10 = vunpack.c.l.b16 %v5399_v19  ;;  %v5437_v14 = vrot.slane %v5413_v39, 6  ;;  %v14287_v50 = vld [vmem:[%s19688_s1 + $0x84] ss:$16 sps:$4 sm:$0xff]   ;;  %v14294_v19 = vld [vmem:[%s19688_s1 + $0xa8] ss:$16 sps:$4 sm:$0xff]  }
 0x57c   :  { %v15396_v62 = vpop.eup %15395  ;;  %v5393_v3 = vmul.f32 %v15394_v13, %v15388_v22  ;;  %v5436_v31 = vsel %vm769_vm0, %v5435_v38, %v5411_v25  ;;  %v5439_v54 = vrot.slane %v5414_v35, 5  ;;  %v14288_v22 = vld [vmem:[%s19688_s1 + $0x88] ss:$16 sps:$4 sm:$0xff]   ;;  %v14299_v39 = vld [vmem:[%s19688_s1 + $0xc4] ss:$16 sps:$4 sm:$0xff]  }
 0x57d   :  { %v5394_v5 = vmul.f32 %v15396_v62, %v15390_v59  ;;  %v5400_v60 = vpack.c.bf16 %v5392_v63, %v5392_v63  ;;  %v5438_v20 = vsel %vm772_vm1, %v5437_v14, %v5436_v31  ;;  %v5441_v55 = vrot.slane %v5415_v10, 4  ;;  %v14291_v59 = vld [vmem:[%s19688_s1 + $0xa0] ss:$16 sps:$4 sm:$0xff]   ;;  %v14302_v1 = vld [vmem:[%s19688_s1 + $0xcc] ss:$16 sps:$4 sm:$0xff]  }
 0x57e   :  { %v5401_v36 = vpack.c.bf16 %v5393_v3, %v5393_v3  ;;  %v5440_v56 = vsel %vm775_vm2, %v5439_v54, %v5438_v20  ;;  %v14297_v25 = vld [vmem:[%s19688_s1 + $0xc0] ss:$16 sps:$4 sm:$0xff]   ;;  %v14300_v35 = vld [vmem:[%s19688_s1 + $0xc8] ss:$16 sps:$4 sm:$0xff]   ;;  %v14305_v38 = vld [vmem:[%s19688_s1 + $0xe4] ss:$16 sps:$4 sm:$0xff]  }
 0x57f   :  { %v5402_v58 = vpack.c.bf16 %v5394_v5, %v5394_v5  ;;  %v5416_v30 = vunpack.c.l.b16 %v5400_v60  ;;  %v5442_v2 = vsel %vm778_vm3, %v5441_v55, %v5440_v56  ;;  %v14308_v13 = vld [vmem:[%s19688_s1 + $0xec] ss:$16 sps:$4 sm:$0xff]   ;;  %v14303_v63 = vld [vmem:[%s19688_s1 + $0xe0] ss:$16 sps:$4 sm:$0xff]   ;;  %v14306_v10 = vld [vmem:[%s19688_s1 + $0xe8] ss:$16 sps:$4 sm:$0xff]  }
 0x580   :  { %v5417_v46 = vunpack.c.l.b16 %v5401_v36  ;;  %v14311_v62 = vld [vmem:[#allocation4 + $0x4] ss:$16 sps:$4 sm:$0xff]   ;;  %v14314_v3 = vld [vmem:[#allocation4 + $0xc] ss:$16 sps:$4 sm:$0xff]   ;;  %v14309_v31 = vld [vmem:[#allocation4] ss:$16 sps:$4 sm:$0xff]  }
 0x581   :  { %v5418_v18 = vunpack.c.l.b16 %v5402_v58  ;;  %v5443_v57 = vrot.slane %v5416_v30, 3  ;;  %v14312_v54 = vld [vmem:[#allocation4 + $0x8] ss:$16 sps:$4 sm:$0xff]   ;;  %v14317_v5 = vld [vmem:[#allocation4 + $0x24] ss:$16 sps:$4 sm:$0xff]  }
 0x582   :  { %v5445_v4 = vrot.slane %v5417_v46, 2  ;;  %v14320_v60 = vld [vmem:[#allocation4 + $0x2c] ss:$16 sps:$4 sm:$0xff]   ;;  %v14315_v36 = vld [vmem:[#allocation4 + $0x20] ss:$16 sps:$4 sm:$0xff]  }
 0x583   :  { %v5444_v49 = vsel %vm781_vm4, %v5443_v57, %v5442_v2  ;;  %v5447_v21 = vrot.slane %v5418_v18, 1  ;;  %v14318_v56 = vld [vmem:[#allocation4 + $0x28] ss:$16 sps:$4 sm:$0xff]  }
 0x584   :  { %v5446_v40 = vsel %vm784_vm5, %v5445_v4, %v5444_v49  ;;  %v14323_v4 = vld [vmem:[#allocation4 + $0x44] ss:$16 sps:$4 sm:$0xff]   ;;  %v14326_v49 = vld [vmem:[#allocation4 + $0x4c] ss:$16 sps:$4 sm:$0xff]  }
 0x585   :  { %v5448_v11 = vsel %vm787_vm6, %v5447_v21, %v5446_v40  ;;  %v14321_v21 = vld [vmem:[#allocation4 + $0x40] ss:$16 sps:$4 sm:$0xff]   ;;  %v14324_v40 = vld [vmem:[#allocation4 + $0x48] ss:$16 sps:$4 sm:$0xff]  }
 0x586   :  { %v5449_v24 = vpack.c.b16 %v5448_v11, %v5448_v11  ;;  %v14327_v11 = vld [vmem:[#allocation4 + $0x60] ss:$16 sps:$4 sm:$0xff]  }
 0x588   :  { %5451 = vst [vmem:[#allocation2] sm:$0xf] %v5449_v24  ;;  %6027 = vmatmul.mubr.bf16.vlgmr.msra.gmra.mrb[44].mxu0 %v5449_v24  ;;  %6068 = vmatmul.mubr.bf16.vlgmr.msra.gmra.mrb[44].mxu1 %v5449_v24  ;;  %v14330_v24 = vld [vmem:[#allocation4 + $0x68] ss:$16 sps:$4 sm:$0xff]  }
 0x589   :  { %6471 = vmatpush1.bf16.msra.mxu0 %v14261_v6  ;;  %6512 = vmatpush1.bf16.msra.mxu1 %v14264_v9  ;;  %v14329_v6 = vld [vmem:[#allocation4 + $0x64] ss:$16 sps:$4 sm:$0xff]   ;;  %v14332_v9 = vld [vmem:[#allocation4 + $0x6c] ss:$16 sps:$4 sm:$0xff]  }
 0x58a   :  { %6472 = vmatprep.subr.bf16.mxu0 %v14269_v26  ;;  %6513 = vmatprep.subr.bf16.mxu1 %v14272_v41  ;;  %v14335_v26 = vld [vmem:[#allocation4 + $0x84] ss:$16 sps:$4 sm:$0xff]   ;;  %v14338_v41 = vld [vmem:[#allocation4 + $0x8c] ss:$16 sps:$4 sm:$0xff]  }
 0x58b   :  { %6502 = vmatprep.mubr.bf16.mxu0 %v16024_v0  ;;  %6543 = vmatprep.mubr.bf16.mxu1 %v16024_v0 }
 0x58d   :  { %6473 = vmatpush1.bf16.msra.mxu0 %v14267_v34  ;;  %6514 = vmatpush1.bf16.msra.mxu1 %v14270_v42  ;;  %v14333_v34 = vld [vmem:[#allocation4 + $0x80] ss:$16 sps:$4 sm:$0xff]   ;;  %v14336_v42 = vld [vmem:[#allocation4 + $0x88] ss:$16 sps:$4 sm:$0xff]  }
 0x58e   :  { %6474 = vmatprep.subr.bf16.mxu0 %v14275_v48  ;;  %6515 = vmatprep.subr.bf16.mxu1 %v14278_v32  ;;  %v14341_v48 = vld [vmem:[#allocation4 + $0xa4] ss:$16 sps:$4 sm:$0xff]   ;;  %v14344_v32 = vld [vmem:[#allocation4 + $0xac] ss:$16 sps:$4 sm:$0xff]  }
 0x58f   :  { %v6277_v14 = vld [vmem:[#allocation2] sm:$0xf] }
 0x591   :  { %6475 = vmatpush1.bf16.msra.mxu0 %v14273_v27  ;;  %6516 = vmatpush1.bf16.msra.mxu1 %v14276_v47  ;;  %v14339_v27 = vld [vmem:[#allocation4 + $0xa0] ss:$16 sps:$4 sm:$0xff]   ;;  %v14342_v47 = vld [vmem:[#allocation4 + $0xa8] ss:$16 sps:$4 sm:$0xff]  }
 0x592   :  { %6476 = vmatprep.subr.bf16.mxu0 %v14281_v51  ;;  %6517 = vmatprep.subr.bf16.mxu1 %v14284_v15  ;;  %v14347_v51 = vld [vmem:[#allocation4 + $0xc4] ss:$16 sps:$4 sm:$0xff]   ;;  %v14350_v15 = vld [vmem:[#allocation4 + $0xcc] ss:$16 sps:$4 sm:$0xff]  }
 0x595   :  { %6477 = vmatpush1.bf16.msra.mxu0 %v14279_v7  ;;  %6518 = vmatpush1.bf16.msra.mxu1 %v14282_v29  ;;  %v14345_v7 = vld [vmem:[#allocation4 + $0xc0] ss:$16 sps:$4 sm:$0xff]   ;;  %v14348_v29 = vld [vmem:[#allocation4 + $0xc8] ss:$16 sps:$4 sm:$0xff]  }
 0x596   :  { %6478 = vmatprep.subr.bf16.mxu0 %v14287_v50  ;;  %6519 = vmatprep.subr.bf16.mxu1 %v14290_v52  ;;  %v14353_v50 = vld [vmem:[#allocation4 + $0xe4] ss:$16 sps:$4 sm:$0xff]   ;;  %v14356_v52 = vld [vmem:[#allocation4 + $0xec] ss:$16 sps:$4 sm:$0xff]  }
 0x599   :  { %6479 = vmatpush1.bf16.msra.mxu0 %v14285_v8  ;;  %6520 = vmatpush1.bf16.msra.mxu1 %v14288_v22  ;;  %v14351_v8 = vld [vmem:[#allocation4 + $0xe0] ss:$16 sps:$4 sm:$0xff]   ;;  %v14354_v22 = vld [vmem:[#allocation4 + $0xe8] ss:$16 sps:$4 sm:$0xff]  }
 0x59a   :  { %6480 = vmatprep.subr.bf16.mxu0 %v14293_v61  ;;  %6521 = vmatprep.subr.bf16.mxu1 %v14296_v43  ;;  %v14359_v61 = vld [vmem:[%s19689_s2 + $0x4] ss:$16 sps:$4 sm:$0xff]   ;;  %v14362_v43 = vld [vmem:[%s19689_s2 + $0xc] ss:$16 sps:$4 sm:$0xff]  }
 0x59d   :  { %6481 = vmatpush1.bf16.msra.mxu0 %v14291_v59  ;;  %6522 = vmatpush1.bf16.msra.mxu1 %v14294_v19  ;;  %v6076_v59 = vld [vmem:[%s19691_s4] sm:$0xf] }
 0x59e   :  { %6482 = vmatprep.subr.bf16.mxu0 %v14299_v39  ;;  %6523 = vmatprep.subr.bf16.mxu1 %v14302_v1  ;;  %v6081_v19 = vrot.slane %v6076_v59, %v16524_v12 }
 0x5a1   :  { %6483 = vmatpush1.bf16.msra.mxu0 %v14297_v25  ;;  %6524 = vmatpush1.bf16.msra.mxu1 %v14300_v35  ;;  %v6085_v25 = vrot.slane %v6076_v59, %v16530_v44 }
 0x5a2   :  { %6484 = vmatprep.subr.bf16.mxu0 %v14305_v38  ;;  %6525 = vmatprep.subr.bf16.mxu1 %v14308_v13 }
 0x5a5   :  { %6485 = vmatpush1.bf16.msra.mxu0 %v14303_v63  ;;  %6526 = vmatpush1.bf16.msra.mxu1 %v14306_v10 }
 0x5a6   :  { %7288 = vmatprep.subr.bf16.mxu0 %v14311_v62  ;;  %7329 = vmatprep.subr.bf16.mxu1 %v14314_v3 }
 0x5a8   :  { %6503 = vmatmul.mubr.bf16.vlgmr.msra.gmra.mrb[48].mxu0 %v6277_v14  ;;  %6544 = vmatmul.mubr.bf16.vlgmr.msra.gmra.mrb[48].mxu1 %v6277_v14 }
 0x5a9   :  { %7320 = vmatprep.mubr.bf16.mxu0 %v16024_v0  ;;  %7361 = vmatprep.mubr.bf16.mxu1 %v16024_v0 }
 0x5aa   :  { %7289 = vmatpush1.bf16.msra.mxu0 %v14309_v31  ;;  %7330 = vmatpush1.bf16.msra.mxu1 %v14312_v54 }
 0x5ab   :  { %7290 = vmatprep.subr.bf16.mxu0 %v14317_v5  ;;  %7331 = vmatprep.subr.bf16.mxu1 %v14320_v60 }
 0x5ae   :  { %7291 = vmatpush1.bf16.msra.mxu0 %v14315_v36  ;;  %7332 = vmatpush1.bf16.msra.mxu1 %v14318_v56 }
 0x5af   :  { %7292 = vmatprep.subr.bf16.mxu0 %v14323_v4  ;;  %7333 = vmatprep.subr.bf16.mxu1 %v14326_v49 }
 0x5b2   :  { %7293 = vmatpush1.bf16.msra.mxu0 %v14321_v21  ;;  %7334 = vmatpush1.bf16.msra.mxu1 %v14324_v40 }
 0x5b3   :  { %7294 = vmatprep.subr.bf16.mxu0 %v14329_v6  ;;  %7335 = vmatprep.subr.bf16.mxu1 %v14332_v9 }
 0x5b6   :  { %7295 = vmatpush1.bf16.msra.mxu0 %v14327_v11  ;;  %7336 = vmatpush1.bf16.msra.mxu1 %v14330_v24 }
 0x5b7   :  { %7296 = vmatprep.subr.bf16.mxu0 %v14335_v26  ;;  %7337 = vmatprep.subr.bf16.mxu1 %v14338_v41 }
 0x5ba   :  { %7297 = vmatpush1.bf16.msra.mxu0 %v14333_v34  ;;  %7338 = vmatpush1.bf16.msra.mxu1 %v14336_v42 }
 0x5bb   :  { %7298 = vmatprep.subr.bf16.mxu0 %v14341_v48  ;;  %7339 = vmatprep.subr.bf16.mxu1 %v14344_v32 }
 0x5be   :  { %7299 = vmatpush1.bf16.msra.mxu0 %v14339_v27  ;;  %7340 = vmatpush1.bf16.msra.mxu1 %v14342_v47 }
 0x5bf   :  { %7300 = vmatprep.subr.bf16.mxu0 %v14347_v51  ;;  %7341 = vmatprep.subr.bf16.mxu1 %v14350_v15 }
 0x5c2   :  { %7301 = vmatpush1.bf16.msra.mxu0 %v14345_v7  ;;  %7342 = vmatpush1.bf16.msra.mxu1 %v14348_v29 }
 0x5c3   :  { %7302 = vmatprep.subr.bf16.mxu0 %v14353_v50  ;;  %7343 = vmatprep.subr.bf16.mxu1 %v14356_v52 }
 0x5c6   :  { %7303 = vmatpush1.bf16.msra.mxu0 %v14351_v8  ;;  %7344 = vmatpush1.bf16.msra.mxu1 %v14354_v22 }
 0x5c7   :  { %7546 = vmatprep.subr.bf16.mxu0 %v14359_v61  ;;  %7587 = vmatprep.subr.bf16.mxu1 %v14362_v43 }
 0x60a   :  { %v17889_v20 = vpop.f32.mrb[40].mxu0  ;;  %v17891_v55 = vpop.f32.mrb[40].mxu1 }
 0x60b   :  { %v17893_v58 = vpop.f32.mrb[41].mxu0  ;;  %v17895_v30 = vpop.f32.mrb[41].mxu1 }
 0x60c   :  { %v5774_v2 = vpop.f32.mrb[42].mxu0  ;;  %v5815_v46 = vpop.f32.mrb[42].mxu1 }
 0x60d   :  { %v5775_v18 = vpop.f32.mrb[43].mxu0  ;;  %v5816_v57 = vpop.f32.mrb[43].mxu1  ;;  %v6093_v2 = vrot.slane %v6076_v59, %v16539_v53 }
 0x65b   :  { %v6028_v39 = vpop.f32.mrb[44].mxu0  ;;  %v6069_v1 = vpop.f32.mrb[44].mxu1 }
 0x65c   :  { %v6029_v35 = vadd.f32 %v6028_v39, %v17889_v20  ;;  %v6070_v38 = vadd.f32 %v6069_v1, %v17891_v55  ;;  %v6030_v13 = vpop.f32.mrb[45].mxu0  ;;  %v6071_v63 = vpop.f32.mrb[45].mxu1  ;;  %v6089_v55 = vrot.slane %v6076_v59, %v16543_v17  ;;  %v13047_v59 = vld [vmem:[%s19687_s0 + $0x4] ss:$8 sm:$0xf] }
 0x65d   :  { %v6031_v10 = vadd.f32 %v6030_v13, %v17893_v58  ;;  %v6072_v14 = vadd.f32 %v6071_v63, %v17895_v30  ;;  %v6032_v62 = vpop.f32.mrb[46].mxu0  ;;  %v6073_v3 = vpop.f32.mrb[46].mxu1  ;;  %v13049_v63 = vld [vmem:[%s19687_s0 + $0x44] ss:$8 sm:$0xf] }
 0x65e   :  { %v6098_v31 = vadd.f32 %v6081_v19, %v6029_v35  ;;  %v6033_v54 = vpop.f32.mrb[47].mxu0  ;;  %v6074_v5 = vpop.f32.mrb[47].mxu1  ;;  %v6100_v18 = vadd.f32 %v6089_v55, %v6070_v38  ;;  %v13048_v19 = vld [vmem:[%s19687_s0 + $0x24] ss:$8 sm:$0xf] }
 0x65f   :  { %v6099_v60 = vadd.f32 %v6085_v25, %v6031_v10  ;;  %v6101_v20 = vadd.f32 %v6093_v2, %v6072_v14  ;;  %v13051_v25 = vld [vmem:[%s19687_s0 + $0x84] ss:$8 sm:$0xf] }
 0x660   :  { %v13040_v36 = vmul.f32 -1.442695, %v6098_v31  ;;  %v13052_v35 = vld [vmem:[%s19687_s0 + $0xa4] ss:$8 sm:$0xf] }
 0x661   :  { %v13041_v56 = vmul.f32 -1.442695, %v6099_v60  ;;  %v13042_v46 = vmul.f32 -1.442695, %v6101_v20 }
 0x662   :  { %15397 = vpow2.f32 %v13040_v36  ;;  %v13050_v10 = vld [vmem:[%s19687_s0 + $0x64] ss:$8 sm:$0xf] }
 0x663   :  { %15399 = vpow2.f32 %v13041_v56  ;;  %v13053_v3 = vld [vmem:[%s19687_s0 + $0xc4] ss:$8 sm:$0xf] }
 0x664   :  { %15401 = vpow2.f32 %v13042_v46  ;;  %v13054_v31 = vld [vmem:[%s19687_s0 + $0xe4] ss:$8 sm:$0xf] }
 0x665   :  { %15403 = vtanh.f32 %v6100_v18 }
 0x66c   :  { %v15398_v58 = vpop.eup %15397 }
 0x66d   :  { %v15400_v57 = vpop.eup %15399  ;;  %v6106_v30 = vadd.f32 1.0, %v15398_v58 }
 0x66e   :  { %v6112_v4 = vadd.f32 1.0, %v15400_v57  ;;  %v15402_v49 = vpop.eup %15401 }
 0x66f   :  { %15405 = vrcp.f32 %v6106_v30  ;;  %v15404_v21 = vpop.eup %15403  ;;  %v6119_v11 = vadd.f32 1.0, %v15402_v49 }
 0x670   :  { %15407 = vrcp.f32 %v6112_v4 }
 0x671   :  { %15409 = vrcp.f32 %v6119_v11 }
 0x679   :  { %v15406_v40 = vpop.eup %15405 }
 0x67a   :  { %v15408_v6 = vpop.eup %15407  ;;  %v6123_v9 = vmul.f32 %v15406_v40, %v15404_v21 }
 0x67b   :  { %v6122_v24 = vmul.f32 %v15408_v6, %v17459_v37  ;;  %v6504_v26 = vpop.f32.mrb[48].mxu0  ;;  %v6545_v41 = vpop.f32.mrb[48].mxu1 }
 0x67c   :  { %v6506_v34 = vpop.f32.mrb[49].mxu0  ;;  %v6547_v42 = vpop.f32.mrb[49].mxu1 }
 0x67d   :  { %v17915_v48 = vadd.f32 %v6123_v9, %v6122_v24  ;;  %v6556_v32 = vcombine.low %v6504_v26, %v6506_v34  ;;  %v6557_v27 = vcombine.high %v6504_v26, %v6506_v34  ;;  %v6558_v47 = vcombine.low %v6545_v41, %v6547_v42  ;;  %v6508_v51 = vpop.f32.mrb[50].mxu0  ;;  %v6549_v15 = vpop.f32.mrb[50].mxu1 }
 0x67e   :  { %v6559_v7 = vcombine.high %v6545_v41, %v6547_v42  ;;  %v6509_v29 = vpop.f32.mrb[51].mxu0  ;;  %v6550_v50 = vpop.f32.mrb[51].mxu1 }
 0x67f   :  { %15411 = vtanh.f32 %v17915_v48  ;;  %v6566_v52 = vrot.slane %v6556_v32, %v16279_v45  ;;  %v6573_v37 = vrot.slane %v6557_v27, %v16279_v45  ;;  %v6580_v8 = vrot.slane %v6558_v47, %v16279_v45  ;;  %v15410_v30 = vpop.eup %15409 }
 0x680   :  { %v6587_v22 = vrot.slane %v6559_v7, %v16279_v45 }
 0x681   :  { %v6588_v61 = vcombine.low %v6566_v52, %v6580_v8  ;;  %v6589_v43 = vcombine.high %v6566_v52, %v6580_v8 }
 0x682   :  { %v6590_v39 = vcombine.low %v6573_v37, %v6587_v22  ;;  %v6591_v1 = vcombine.high %v6573_v37, %v6587_v22  ;;  %v14357_v22 = vld [vmem:[%s19689_s2] ss:$16 sps:$4 sm:$0xff]  }
 0x683   :  { %v6598_v38 = vrot.slane %v6588_v61, %v16279_v45  ;;  %v6612_v13 = vrot.slane %v6589_v43, %v16279_v45 }
 0x684   :  { %v6605_v14 = vrot.slane %v6590_v39, %v16279_v45  ;;  %v6619_v62 = vrot.slane %v6591_v1, %v16279_v45 }
 0x685   :  { %v6620_v54 = vcombine.high %v6598_v38, %v6598_v38  ;;  %v6622_v5 = vcombine.high %v6612_v13, %v6612_v13  ;;  %v17950_v60 = vadd.f32 %v13047_v59, %v6598_v38  ;;  %v17952_v36 = vadd.f32 %v13048_v19, %v6612_v13 }
 0x686   :  { %v6621_v56 = vcombine.high %v6605_v14, %v6605_v14  ;;  %v6623_v2 = vcombine.high %v6619_v62, %v6619_v62  ;;  %v17954_v20 = vadd.f32 %v13051_v25, %v6605_v14  ;;  %v17956_v55 = vadd.f32 %v13052_v35, %v6619_v62  ;;  %v14360_v25 = vld [vmem:[%s19689_s2 + $0x8] ss:$16 sps:$4 sm:$0xff]   ;;  %v14365_v35 = vld [vmem:[%s19689_s2 + $0x24] ss:$16 sps:$4 sm:$0xff]  }
 0x687   :  { %v17958_v46 = vadd.f32 %v13049_v63, %v6620_v54  ;;  %v17960_v18 = vadd.f32 %v13050_v10, %v6622_v5  ;;  %v13087_v58 = vmul.f32 -1.442695, %v17950_v60  ;;  %v13088_v57 = vmul.f32 -1.442695, %v17952_v36 }
 0x688   :  { %v17964_v4 = vadd.f32 %v13053_v3, %v6621_v56  ;;  %v17966_v49 = vadd.f32 %v13054_v31, %v6623_v2  ;;  %v13091_v21 = vmul.f32 -1.442695, %v17954_v20  ;;  %v6697_v11 = vrot.slane %v17950_v60, 1  ;;  %v14368_v3 = vld [vmem:[%s19689_s2 + $0x2c] ss:$16 sps:$4 sm:$0xff]  }
 0x689   :  { %v15412_v40 = vpop.eup %15411  ;;  %15413 = vpow2.f32 %v13087_v58  ;;  %v13089_v6 = vmul.f32 -1.442695, %v17958_v46  ;;  %v13090_v9 = vmul.f32 -1.442695, %v17960_v18  ;;  %v13092_v26 = vmul.f32 -1.442695, %v17956_v55 }
 0x68a   :  { %v6126_v24 = vmul.f32 %v15412_v40, %v15410_v30  ;;  %15415 = vpow2.f32 %v13088_v57  ;;  %v13093_v41 = vmul.f32 -1.442695, %v17964_v4  ;;  %v6698_v34 = vrot.slane %v17952_v36, 1  ;;  %v6237_v58 = vld [vmem:[%s19692_s5] sm:$0x2] }
 0x68b   :  { %15417 = vpow2.f32 %v13089_v6  ;;  %v13094_v32 = vmul.f32 -1.442695, %v17966_v49  ;;  %v13095_v27 = vmul.f32 -1.442695, %v6697_v11  ;;  %v6240_v57 = vld [vmem:[%s19692_s5 + $0x4] sm:$0x2] }
 0x68c   :  { %v6127_v42 = vpack.c.bf16 %v6126_v24, %v6126_v24  ;;  %15419 = vpow2.f32 %v13090_v9  ;;  %v13096_v51 = vmul.f32 -1.442695, %v6698_v34  ;;  %v6243_v30 = vld [vmem:[%s19692_s5 + $0x8] sm:$0x2]  ;;  %v6246_v24 = vld [vmem:[%s19692_s5 + $0xc] sm:$0x2] }
 0x68d   :  { %15421 = vpow2.f32 %v13091_v21 }
 0x68e   :  { %v6137_v47 = vrot.slane %v6127_v42, %v16279_v45  ;;  %6128 = vst [vmem:[#allocation2 + $0x4] sm:$0xf] %v6127_v42  ;;  %15423 = vpow2.f32 %v13092_v26  ;;  %v6249_v26 = vld [vmem:[%s19692_s5 + $0x10] sm:$0x2] }
 0x68f   :  { %15425 = vpow2.f32 %v13093_v41  ;;  %v14363_v41 = vld [vmem:[%s19689_s2 + $0x20] ss:$16 sps:$4 sm:$0xff]  }
 0x690   :  { %v6138_v15 = vcombine.high %v6137_v47, %v6137_v47  ;;  %v6145_v7 = vrot.slane %v6137_v47, %v16279_v45  ;;  %15427 = vpow2.f32 %v13094_v32 }
 0x691   :  { %15429 = vpow2.f32 %v13095_v27 }
 0x692   :  { %v6152_v29 = vrot.slane %v6138_v15, %v16279_v45  ;;  %v6153_v50 = vcombine.high %v6145_v7, %v6145_v7  ;;  %v6156_v52 = vunpack.i.h.s16 %v6145_v7  ;;  %v13043_v37 = vpack.i.b16 %v6145_v7, %v6145_v7  ;;  %v14366_v15 = vld [vmem:[%s19689_s2 + $0x28] ss:$16 sps:$4 sm:$0xff]   ;;  %v14371_v7 = vld [vmem:[%s19689_s2 + $0x44] ss:$16 sps:$4 sm:$0xff]  }
 0x693   :  { %v15414_v8 = vpop.eup %15413  ;;  %15431 = vpow2.f32 %v13096_v51  ;;  %v6252_v51 = vld [vmem:[%s19692_s5 + $0x14] sm:$0x2] }
 0x694   :  { %v15416_v61 = vpop.eup %15415  ;;  %v6154_v43 = vcombine.high %v6152_v29, %v6152_v29  ;;  %v6158_v59 = vunpack.i.h.s16 %v6152_v29  ;;  %v6160_v19 = vunpack.i.h.s16 %v6153_v50  ;;  %v6164_v39 = vpack.i.b16 %v6156_v52, %v6156_v52 }
 0x695   :  { %v15418_v38 = vpop.eup %15417  ;;  %v13044_v13 = vpack.i.b16 %v6152_v29, %v6152_v29  ;;  %v13045_v63 = vpack.i.b16 %v6153_v50, %v6153_v50  ;;  %v6177_v10 = vrot.slane %v13043_v37, %v16610_v33  ;;  %v6665_v14 = vadd.f32 1.0, %v15414_v8  ;;  %v7095_v62 = vld [vmem:[#allocation2 + $0x4] sm:$0xf]  ;;  %v6255_v8 = vld [vmem:[%s19692_s5 + $0x18] sm:$0x2] }
 0x696   :  { %v15420_v31 = vpop.eup %15419  ;;  %v6162_v54 = vunpack.i.h.s16 %v6154_v43  ;;  %v6166_v5 = vpack.i.b16 %v6158_v59, %v6158_v59  ;;  %v6168_v56 = vpack.i.b16 %v6160_v19, %v6160_v19  ;;  %v13046_v2 = vpack.i.b16 %v6154_v43, %v6154_v43  ;;  %7321 = vmatmul.mubr.bf16.vlgmr.msra.gmra.mrb[52].mxu0 %v7095_v62  ;;  %7362 = vmatmul.mubr.bf16.vlgmr.msra.gmra.mrb[52].mxu1 %v7095_v62  ;;  %v14374_v43 = vld [vmem:[%s19689_s2 + $0x4c] ss:$16 sps:$4 sm:$0xff]   ;;  %v14369_v62 = vld [vmem:[%s19689_s2 + $0x40] ss:$16 sps:$4 sm:$0xff]  }
 0x697   :  { %v15422_v21 = vpop.eup %15421  ;;  %v6184_v40 = vrot.slane %v6164_v39, %v16610_v33  ;;  %v6191_v6 = vrot.slane %v13044_v13, %v16610_v33  ;;  %v6205_v9 = vrot.slane %v13045_v63, %v16610_v33  ;;  %v6238_v11 = vsel %vm17983_vm15, %v6177_v10, %v6237_v58  ;;  %7547 = vmatpush1.bf16.msra.mxu0 %v14357_v22  ;;  %v6258_v13 = vld [vmem:[%s19692_s5 + $0x1c] sm:$0x2] }
 0x698   :  { %v15424_v34 = vpop.eup %15423  ;;  %v6170_v42 = vpack.i.b16 %v6162_v54, %v6162_v54  ;;  %v6198_v32 = vrot.slane %v6166_v5, %v16610_v33  ;;  %v6212_v27 = vrot.slane %v6168_v56, %v16610_v33  ;;  %v6219_v47 = vrot.slane %v13046_v2, %v16610_v33  ;;  %6239 = vst [vmem:[%s19692_s5] sm:$0x2] %v6238_v11  ;;  %v14380_v2 = vld [vmem:[%s19689_s2 + $0x6c] ss:$16 sps:$4 sm:$0xff]  }
 0x699   :  { %7588 = vmatpush1.bf16.msra.mxu1 %v14360_v25  ;;  %v15426_v29 = vpop.eup %15425  ;;  %v6241_v50 = vsel %vm17983_vm15, %v6184_v40, %v6240_v57  ;;  %v6244_v52 = vsel %vm17983_vm15, %v6191_v6, %v6243_v30  ;;  %v6250_v37 = vsel %vm17983_vm15, %v6205_v9, %v6249_v26  ;;  %v6666_v22 = vadd.f32 1.0, %v15416_v61  ;;  %7548 = vmatprep.subr.bf16.mxu0 %v14365_v35  ;;  %v14375_v40 = vld [vmem:[%s19689_s2 + $0x60] ss:$16 sps:$4 sm:$0xff]   ;;  %v14378_v6 = vld [vmem:[%s19689_s2 + $0x68] ss:$16 sps:$4 sm:$0xff]  }
 0x69a   :  { %7589 = vmatprep.subr.bf16.mxu1 %v14368_v3  ;;  %v15428_v59 = vpop.eup %15427  ;;  %v6226_v19 = vrot.slane %v6170_v42, %v16610_v33  ;;  %6242 = vst [vmem:[%s19692_s5 + $0x4] sm:$0x2] %v6241_v50  ;;  %6245 = vst [vmem:[%s19692_s5 + $0x8] sm:$0x2] %v6244_v52  ;;  %v6247_v61 = vsel %vm17983_vm15, %v6198_v32, %v6246_v24  ;;  %v6253_v39 = vsel %vm17983_vm15, %v6212_v27, %v6252_v51  ;;  %v14383_v24 = vld [vmem:[%s19689_s2 + $0x84] ss:$16 sps:$4 sm:$0xff]  }
 0x69b   :  { %6251 = vst [vmem:[%s19692_s5 + $0x10] sm:$0x2] %v6250_v37  ;;  %v6256_v25 = vsel %vm17983_vm15, %v6219_v47, %v6255_v8  ;;  %7578 = vmatprep.mubr.bf16.mxu0 %v16024_v0  ;;  %v15430_v35 = vpop.eup %15429  ;;  %6248 = vst [vmem:[%s19692_s5 + $0xc] sm:$0x2] %v6247_v61  ;;  %v6667_v63 = vadd.f32 1.0, %v15418_v38  ;;  %v6668_v10 = vadd.f32 1.0, %v15420_v31  ;;  %7549 = vmatpush1.bf16.msra.mxu0 %v14363_v41  ;;  %15433 = vrcp.f32 %v6665_v14 }
 0x69c   :  { %6254 = vst [vmem:[%s19692_s5 + $0x14] sm:$0x2] %v6253_v39  ;;  %6257 = vst [vmem:[%s19692_s5 + $0x18] sm:$0x2] %v6256_v25  ;;  %7619 = vmatprep.mubr.bf16.mxu1 %v16024_v0  ;;  %v6259_v3 = vsel %vm17983_vm15, %v6226_v19, %v6258_v13  ;;  %v6669_v54 = vadd.f32 1.0, %v15422_v21  ;;  %v6699_v5 = vrot.slane %v17958_v46, 1  ;;  %7550 = vmatprep.subr.bf16.mxu0 %v14371_v7  ;;  %15435 = vrcp.f32 %v6666_v22 }
 0x69d   :  { %7590 = vmatpush1.bf16.msra.mxu1 %v14366_v15  ;;  %v14372_v38 = vld [vmem:[%s19689_s2 + $0x48] ss:$16 sps:$4 sm:$0xff]   ;;  %v14377_v31 = vld [vmem:[%s19689_s2 + $0x64] ss:$16 sps:$4 sm:$0xff]   ;;  %v15432_v56 = vpop.eup %15431  ;;  %6260 = vst [vmem:[%s19692_s5 + $0x1c] sm:$0x2] %v6259_v3  ;;  %15437 = vrcp.f32 %v6667_v63  ;;  %v6857_v13 = vrot.slane %v5508_v23, %v16279_v45 }
 0x69e   :  { %v6670_v1 = vadd.f32 1.0, %v15424_v34  ;;  %v6700_v14 = vrot.slane %v17960_v18, 1  ;;  %7591 = vmatprep.subr.bf16.mxu1 %v14374_v43  ;;  %v6671_v58 = vadd.f32 1.0, %v15426_v29  ;;  %v6701_v57 = vrot.slane %v17954_v20, 1  ;;  %v14386_v34 = vld [vmem:[%s19689_s2 + $0x8c] ss:$16 sps:$4 sm:$0xff]  }
 0x69f   :  { %v6672_v30 = vadd.f32 1.0, %v15428_v59  ;;  %15439 = vrcp.f32 %v6668_v10  ;;  %v6702_v21 = vrot.slane %v17956_v55, 1  ;;  %7551 = vmatpush1.bf16.msra.mxu0 %v14369_v62  ;;  %v6703_v9 = vrot.slane %v17964_v4, 1  ;;  %v14381_v27 = vld [vmem:[%s19689_s2 + $0x80] ss:$16 sps:$4 sm:$0xff]  }
 0x6a0   :  { %15441 = vrcp.f32 %v6669_v54  ;;  %v13097_v11 = vmul.f32 -1.442695, %v6699_v5  ;;  %7552 = vmatprep.subr.bf16.mxu0 %v14377_v31  ;;  %v6704_v26 = vrot.slane %v17966_v49, 1  ;;  %v13098_v41 = vmul.f32 -1.442695, %v6700_v14 }
 0x6a1   :  { %7592 = vmatpush1.bf16.msra.mxu1 %v14372_v38  ;;  %15443 = vrcp.f32 %v6670_v1  ;;  %v13099_v42 = vmul.f32 -1.442695, %v6701_v57  ;;  %v13100_v32 = vmul.f32 -1.442695, %v6702_v21  ;;  %v13101_v47 = vmul.f32 -1.442695, %v6703_v9 }
 0x6a2   :  { %7593 = vmatprep.subr.bf16.mxu1 %v14380_v2  ;;  %15445 = vrcp.f32 %v6671_v58  ;;  %v14384_v51 = vld [vmem:[%s19689_s2 + $0x88] ss:$16 sps:$4 sm:$0xff]   ;;  %v14389_v15 = vld [vmem:[%s19689_s2 + $0xa4] ss:$16 sps:$4 sm:$0xff]   ;;  %v13102_v7 = vmul.f32 -1.442695, %v6704_v26  ;;  %v13686_v59 = vcombine.low %v17784_v16, %v17784_v16  ;;  %v6865_v1 = vcombine.high %v6857_v13, %v6857_v13 }
 0x6a3   :  { %15447 = vrcp.f32 %v6672_v30  ;;  %7553 = vmatpush1.bf16.msra.mxu0 %v14375_v40  ;;  %v14392_v29 = vld [vmem:[%s19689_s2 + $0xac] ss:$16 sps:$4 sm:$0xff]   ;;  %v6737_v52 = vadd.f32 1.0, %v15430_v35  ;;  %v6738_v8 = vadd.f32 1.0, %v15432_v56  ;;  %v14387_v22 = vld [vmem:[%s19689_s2 + $0xa0] ss:$16 sps:$4 sm:$0xff]   ;;  %v18176_v14 = vrot.slane %v6857_v13, %v16279_v45 }
 0x6a4   :  { %15449 = vpow2.f32 %v13097_v11  ;;  %7554 = vmatprep.subr.bf16.mxu0 %v14383_v24  ;;  %v6761_v19 = vrot.slane %v17950_v60, 2  ;;  %v14390_v61 = vld [vmem:[%s19689_s2 + $0xa8] ss:$16 sps:$4 sm:$0xff]   ;;  %v14395_v39 = vld [vmem:[%s19689_s2 + $0xc4] ss:$16 sps:$4 sm:$0xff]   ;;  %v6762_v35 = vrot.slane %v17952_v36, 2  ;;  %v18165_v5 = vrot.slane %v13686_v59, %v16279_v45 }
 0x6a5   :  { %7594 = vmatpush1.bf16.msra.mxu1 %v14378_v6  ;;  %15451 = vpow2.f32 %v13098_v41  ;;  %v18124_v50 = vpop.eup %15433  ;;  %v14398_v63 = vld [vmem:[%s19689_s2 + $0xcc] ss:$16 sps:$4 sm:$0xff]   ;;  %v6763_v62 = vrot.slane %v17958_v46, 2  ;;  %v6764_v54 = vrot.slane %v17960_v18, 2  ;;  %v6765_v23 = vrot.slane %v17954_v20, 2 }
 0x6a6   :  { %7595 = vmatprep.subr.bf16.mxu1 %v14386_v34  ;;  %15453 = vpow2.f32 %v13099_v42  ;;  %v18126_v37 = vpop.eup %15435  ;;  %v14396_v38 = vld [vmem:[%s19689_s2 + $0xc8] ss:$16 sps:$4 sm:$0xff]   ;;  %v14401_v31 = vld [vmem:[%s19689_s2 + $0xe4] ss:$16 sps:$4 sm:$0xff]   ;;  %v14404_v2 = vld [vmem:[%s19689_s2 + $0xec] ss:$16 sps:$4 sm:$0xff]   ;;  %v18186_v9 = vrot.slane %v18165_v5, %v16279_v45  ;;  %v6866_v26 = vcombine.high %v18165_v5, %v18165_v5  ;;  %v18197_v42 = vrot.slane %v6865_v1, %v16279_v45 }
 0x6a7   :  { %15455 = vpow2.f32 %v13100_v32  ;;  %7555 = vmatpush1.bf16.msra.mxu0 %v14381_v27  ;;  %v18131_v43 = vpop.eup %15437  ;;  %v14399_v21 = vld [vmem:[%s19689_s2 + $0xe0] ss:$16 sps:$4 sm:$0xff]   ;;  %v14402_v11 = vld [vmem:[%s19689_s2 + $0xe8] ss:$16 sps:$4 sm:$0xff]   ;;  %v14407_v24 = vld [vmem:[%s19688_s1 + $0x4] ss:$16 sps:$4 sm:$0xff]   ;;  %v6895_v32 = vcombine.high %v18176_v14, %v18176_v14 }
 0x6a8   :  { %15457 = vpow2.f32 %v13101_v47  ;;  %7556 = vmatprep.subr.bf16.mxu0 %v14389_v15  ;;  %v14410_v27 = vld [vmem:[%s19688_s1 + $0xc] ss:$16 sps:$4 sm:$0xff]   ;;  %v6766_v15 = vrot.slane %v17956_v55, 2  ;;  %v6789_v13 = vrot.slane %v17954_v20, 3  ;;  %v6894_v1 = vrot.slane %v6866_v26, %v16279_v45 }
 0x6a9   :  { %7596 = vmatpush1.bf16.msra.mxu1 %v14384_v51  ;;  %v18142_v25 = vpop.eup %15439  ;;  %15459 = vpow2.f32 %v13102_v7  ;;  %v6785_v7 = vrot.slane %v17950_v60, 3  ;;  %v6788_v60 = vrot.slane %v17960_v18, 3 }
 0x6aa   :  { %7597 = vmatprep.subr.bf16.mxu1 %v14392_v29  ;;  %v18152_v10 = vpop.eup %15441  ;;  %15461 = vrcp.f32 %v6737_v52 }
 0x6ab   :  { %v18155_v3 = vpop.eup %15443  ;;  %15463 = vrcp.f32 %v6738_v8  ;;  %7557 = vmatpush1.bf16.msra.mxu0 %v14387_v22  ;;  %v6767_v8 = vrot.slane %v17964_v4, 2  ;;  %v6786_v22 = vrot.slane %v17952_v36, 3 }
 0x6ac   :  { %v18161_v16 = vpop.eup %15445  ;;  %15465 = vtanh.f32 %v6761_v19  ;;  %7558 = vmatprep.subr.bf16.mxu0 %v14395_v39  ;;  %v6787_v39 = vrot.slane %v17958_v46, 3  ;;  %v6791_v46 = vrot.slane %v17964_v4, 3  ;;  %v6897_v4 = vcombine.high %v18197_v42, %v18197_v42 }
 0x6ad   :  { %7598 = vmatpush1.bf16.msra.mxu1 %v14390_v61  ;;  %v18173_v56 = vpop.eup %15447  ;;  %15467 = vtanh.f32 %v6762_v35  ;;  %v6768_v61 = vrot.slane %v17966_v49, 2  ;;  %v13104_v5 = vmul.f32 -1.442695, %v6786_v22 }
 0x6ae   :  { %7599 = vmatprep.subr.bf16.mxu1 %v14398_v63  ;;  %v15450_v58 = vpop.eup %15449  ;;  %15469 = vtanh.f32 %v6763_v62  ;;  %v6790_v62 = vrot.slane %v17956_v55, 3  ;;  %v13105_v20 = vmul.f32 -1.442695, %v6787_v39  ;;  %v6792_v55 = vrot.slane %v17966_v49, 3 }
 0x6af   :  { %v15452_v57 = vpop.eup %15451  ;;  %v6739_v30 = vadd.f32 1.0, %v15450_v58  ;;  %15471 = vtanh.f32 %v6764_v54  ;;  %7559 = vmatpush1.bf16.msra.mxu0 %v14393_v28  ;;  %v13103_v54 = vmul.f32 -1.442695, %v6785_v7 }
 0x6b0   :  { %v15454_v40 = vpop.eup %15453  ;;  %v6740_v6 = vadd.f32 1.0, %v15452_v57  ;;  %15473 = vtanh.f32 %v6765_v23  ;;  %7560 = vmatprep.subr.bf16.mxu0 %v14401_v31 }
 0x6b1   :  { %7600 = vmatpush1.bf16.msra.mxu1 %v14396_v38  ;;  %v15456_v41 = vpop.eup %15455  ;;  %v6741_v34 = vadd.f32 1.0, %v15454_v40  ;;  %15475 = vrcp.f32 %v6739_v30  ;;  %v13107_v30 = vmul.f32 -1.442695, %v6789_v13  ;;  %v13108_v40 = vmul.f32 -1.442695, %v6790_v62 }
 0x6b2   :  { %7601 = vmatprep.subr.bf16.mxu1 %v14404_v2  ;;  %v15458_v47 = vpop.eup %15457  ;;  %v6742_v51 = vadd.f32 1.0, %v15456_v41  ;;  %15477 = vrcp.f32 %v6740_v6  ;;  %v13106_v2 = vmul.f32 -1.442695, %v6788_v60  ;;  %v13109_v6 = vmul.f32 -1.442695, %v6791_v46 }
 0x6b3   :  { %v15460_v29 = vpop.eup %15459  ;;  %v6743_v52 = vadd.f32 1.0, %v15458_v47  ;;  %15479 = vrcp.f32 %v6741_v34  ;;  %7561 = vmatpush1.bf16.msra.mxu0 %v14399_v21  ;;  %v13110_v34 = vmul.f32 -1.442695, %v6792_v55 }
 0x6b4   :  { %v15462_v59 = vpop.eup %15461  ;;  %v6744_v19 = vadd.f32 1.0, %v15460_v29  ;;  %15481 = vrcp.f32 %v6742_v51  ;;  %8023 = vmatprep.subr.bf16.mxu0 %v14407_v24 }
 0x6b5   :  { %7602 = vmatpush1.bf16.msra.mxu1 %v14402_v11  ;;  %v15464_v35 = vpop.eup %15463  ;;  %15483 = vrcp.f32 %v6743_v52  ;;  %v6907_v63 = vmul.f32 %v15462_v59, %v18176_v14 }
 0x6b6   :  { %8064 = vmatprep.subr.bf16.mxu1 %v14410_v27  ;;  %v15466_v36 = vpop.eup %15465  ;;  %15485 = vrcp.f32 %v6744_v19  ;;  %v6908_v28 = vmul.f32 %v15464_v35, %v18197_v42 }
 0x6b7   :  { %v15468_v23 = vpop.eup %15467  ;;  %15487 = vtanh.f32 %v6766_v15  ;;  %v6915_v38 = vmul.f32 %v15466_v36, %v18124_v50 }
 0x6b8   :  { %v15470_v18 = vpop.eup %15469  ;;  %15489 = vtanh.f32 %v6767_v8  ;;  %v6916_v31 = vmul.f32 %v15468_v23, %v18126_v37  ;;  %v6896_v37 = vcombine.high %v18186_v9, %v18186_v9 }
 0x6b9   :  { %v15472_v14 = vpop.eup %15471  ;;  %15491 = vtanh.f32 %v6768_v61  ;;  %v6923_v58 = vadd.f32 %v6915_v38, %v6907_v63  ;;  %v6917_v49 = vmul.f32 %v15470_v18, %v18131_v43 }
 0x6ba   :  { %v15474_v57 = vpop.eup %15473  ;;  %15493 = vpow2.f32 %v13103_v54  ;;  %v6924_v50 = vadd.f32 %v6916_v31, %v6908_v28  ;;  %v6918_v42 = vmul.f32 %v15472_v14, %v18142_v25 }
 0x6bb   :  { %v15476_v21 = vpop.eup %15475  ;;  %15495 = vpow2.f32 %v13104_v5  ;;  %v6919_v15 = vmul.f32 %v15474_v57, %v18152_v10 }
 0x6bc   :  { %v15478_v11 = vpop.eup %15477  ;;  %15497 = vpow2.f32 %v13105_v20  ;;  %v6909_v24 = vmul.f32 %v15476_v21, %v6895_v32  ;;  %v7012_v26 = vcombine.low %v6923_v58, %v6924_v50  ;;  %v6898_v32 = vcombine.high %v6894_v1, %v6894_v1 }
 0x6bd   :  { %v15480_v41 = vpop.eup %15479  ;;  %15499 = vpow2.f32 %v13106_v2  ;;  %v6910_v27 = vmul.f32 %v15478_v11, %v6897_v4 }
 0x6be   :  { %v15482_v47 = vpop.eup %15481  ;;  %15501 = vpow2.f32 %v13107_v30  ;;  %v6911_v51 = vmul.f32 %v15480_v41, %v18186_v9  ;;  %v6925_v7 = vadd.f32 %v6917_v49, %v6909_v24  ;;  %v7022_v10 = vrot.slane %v7012_v26, %v16279_v45 }
 0x6bf   :  { %v15484_v29 = vpop.eup %15483  ;;  %15503 = vpow2.f32 %v13108_v40  ;;  %v6926_v52 = vadd.f32 %v6918_v42, %v6910_v27  ;;  %v6912_v8 = vmul.f32 %v15482_v47, %v6894_v1 }
 0x6c0   :  { %v15486_v43 = vpop.eup %15485  ;;  %15505 = vpow2.f32 %v13109_v6  ;;  %v6927_v22 = vadd.f32 %v6919_v15, %v6911_v51  ;;  %v6913_v59 = vmul.f32 %v15484_v29, %v6896_v37 }
 0x6c1   :  { %v15488_v19 = vpop.eup %15487  ;;  %15507 = vpow2.f32 %v13110_v34  ;;  %v7013_v61 = vcombine.low %v6925_v7, %v6926_v52  ;;  %v6914_v25 = vmul.f32 %v15486_v43, %v6898_v32 }
 0x6c2   :  { %v15490_v39 = vpop.eup %15489  ;;  %v6920_v35 = vmul.f32 %v15488_v19, %v18155_v3  ;;  %15509 = vtanh.f32 %v6923_v58 }
 0x6c3   :  { %v15492_v9 = vpop.eup %15491  ;;  %15511 = vtanh.f32 %v6924_v50  ;;  %v7029_v60 = vrot.slane %v7013_v61, %v16279_v45  ;;  %v6921_v13 = vmul.f32 %v15490_v39, %v18161_v16 }
 0x6c4   :  { %v15494_v63 = vpop.eup %15493  ;;  %15513 = vtanh.f32 %v6925_v7  ;;  %v6922_v36 = vmul.f32 %v15492_v9, %v18173_v56  ;;  %v6928_v62 = vadd.f32 %v6920_v35, %v6912_v8 }
 0x6c5   :  { %v15496_v54 = vpop.eup %15495  ;;  %v6825_v28 = vadd.f32 1.0, %v15494_v63  ;;  %v7044_v23 = vcombine.low %v7022_v10, %v7029_v60  ;;  %v6929_v46 = vadd.f32 %v6921_v13, %v6913_v59  ;;  %15515 = vtanh.f32 %v6926_v52 }
 0x6c6   :  { %v15498_v3 = vpop.eup %15497  ;;  %v6826_v5 = vadd.f32 1.0, %v15496_v54  ;;  %v6930_v38 = vadd.f32 %v6922_v36, %v6914_v25  ;;  %15517 = vtanh.f32 %v6927_v22  ;;  %v7014_v18 = vcombine.low %v6927_v22, %v6928_v62 }
 0x6c7   :  { %v15500_v20 = vpop.eup %15499  ;;  %v6827_v31 = vadd.f32 1.0, %v15498_v3  ;;  %15519 = vrcp.f32 %v6825_v28  ;;  %v18236_v37 = vrot.slane %v7044_v23, %v16279_v45 }
 0x6c8   :  { %v15502_v1 = vpop.eup %15501  ;;  %v6828_v16 = vadd.f32 1.0, %v15500_v20  ;;  %15521 = vrcp.f32 %v6826_v5  ;;  %v7015_v14 = vcombine.low %v6929_v46, %v6930_v38  ;;  %v7036_v57 = vrot.slane %v7014_v18, %v16279_v45 }
 0x6c9   :  { %v15504_v55 = vpop.eup %15503  ;;  %v6829_v56 = vadd.f32 1.0, %v15502_v1  ;;  %15523 = vrcp.f32 %v6827_v31 }
 0x6ca   :  { %v15506_v2 = vpop.eup %15505  ;;  %v6830_v58 = vadd.f32 1.0, %v15504_v55  ;;  %15525 = vrcp.f32 %v6828_v16  ;;  %v7043_v30 = vrot.slane %v7015_v14, %v16279_v45 }
 0x6cb   :  { %v15508_v4 = vpop.eup %15507  ;;  %v6831_v50 = vadd.f32 1.0, %v15506_v2  ;;  %15527 = vrcp.f32 %v6829_v56 }
 0x6cc   :  { %v15510_v21 = vpop.eup %15509  ;;  %v6832_v40 = vadd.f32 1.0, %v15508_v4  ;;  %15529 = vrcp.f32 %v6830_v58  ;;  %v7045_v6 = vcombine.low %v7036_v57, %v7043_v30 }
 0x6cd   :  { %v15512_v11 = vpop.eup %15511  ;;  %15531 = vrcp.f32 %v6831_v50 }
 0x6ce   :  { %v15514_v24 = vpop.eup %15513  ;;  %15533 = vrcp.f32 %v6832_v40  ;;  %v18239_v49 = vrot.slane %v7045_v6, %v16279_v45  ;;  %v14405_v6 = vld [vmem:[%s19688_s1] ss:$16 sps:$4 sm:$0xff]  }
 0x6cf   :  { %v15516_v26 = vpop.eup %15515  ;;  %15535 = vtanh.f32 %v6928_v62 }
 0x6d0   :  { %v15518_v41 = vpop.eup %15517  ;;  %15537 = vtanh.f32 %v6929_v46  ;;  %v7060_v34 = vcombine.low %v18236_v37, %v18239_v49  ;;  %v14537_v37 = vld [vmem:[%s19689_s2 + $0xc0] ss:$16 sps:$4 sm:$0xff]  }
 0x6d1   :  { %v15520_v27 = vpop.eup %15519  ;;  %15539 = vtanh.f32 %v6930_v38 }
 0x6d2   :  { %v15522_v42 = vpop.eup %15521  ;;  %v6939_v47 = vmul.f32 %v15520_v27, %v15510_v21  ;;  %v14416_v27 = vld [vmem:[%s19688_s1 + $0x2c] ss:$16 sps:$4 sm:$0xff]  }
 0x6d3   :  { %v15524_v51 = vpop.eup %15523  ;;  %v6940_v15 = vmul.f32 %v15522_v42, %v15512_v11  ;;  %v14408_v11 = vld [vmem:[%s19688_s1 + $0x8] ss:$16 sps:$4 sm:$0xff]   ;;  %v14411_v42 = vld [vmem:[%s19688_s1 + $0x20] ss:$16 sps:$4 sm:$0xff]  }
 0x6d4   :  { %v15526_v7 = vpop.eup %15525  ;;  %v6941_v29 = vmul.f32 %v15524_v51, %v15514_v24  ;;  %v6947_v8 = vpack.c.bf16 %v6939_v47, %v6939_v47  ;;  %v14414_v47 = vld [vmem:[%s19688_s1 + $0x28] ss:$16 sps:$4 sm:$0xff]   ;;  %v14419_v51 = vld [vmem:[%s19688_s1 + $0x44] ss:$16 sps:$4 sm:$0xff]  }
 0x6d5   :  { %v15528_v52 = vpop.eup %15527  ;;  %v6942_v32 = vmul.f32 %v15526_v7, %v15516_v26  ;;  %v6948_v43 = vpack.c.bf16 %v6940_v15, %v6940_v15  ;;  %v14422_v15 = vld [vmem:[%s19688_s1 + $0x4c] ss:$16 sps:$4 sm:$0xff]   ;;  %v14417_v7 = vld [vmem:[%s19688_s1 + $0x40] ss:$16 sps:$4 sm:$0xff]  }
 0x6d6   :  { %v15530_v22 = vpop.eup %15529  ;;  %v6943_v59 = vmul.f32 %v15528_v52, %v15518_v41  ;;  %v6949_v19 = vpack.c.bf16 %v6941_v29, %v6941_v29  ;;  %v6963_v13 = vunpack.c.l.b16 %v6947_v8  ;;  %v14413_v41 = vld [vmem:[%s19688_s1 + $0x24] ss:$16 sps:$4 sm:$0xff]   ;;  %v14420_v29 = vld [vmem:[%s19688_s1 + $0x48] ss:$16 sps:$4 sm:$0xff]   ;;  %v14423_v8 = vld [vmem:[%s19688_s1 + $0x60] ss:$16 sps:$4 sm:$0xff]  }
 0x6d7   :  { %v15532_v61 = vpop.eup %15531  ;;  %v6950_v25 = vpack.c.bf16 %v6942_v32, %v6942_v32  ;;  %v6964_v39 = vunpack.c.l.b16 %v6948_v43  ;;  %v14425_v52 = vld [vmem:[%s19688_s1 + $0x64] ss:$16 sps:$4 sm:$0xff]   ;;  %v14428_v32 = vld [vmem:[%s19688_s1 + $0x6c] ss:$16 sps:$4 sm:$0xff]   ;;  %v14426_v43 = vld [vmem:[%s19688_s1 + $0x68] ss:$16 sps:$4 sm:$0xff]  }
 0x6d8   :  { %v15534_v35 = vpop.eup %15533  ;;  %v6951_v9 = vpack.c.bf16 %v6943_v59, %v6943_v59  ;;  %v6965_v10 = vunpack.c.l.b16 %v6949_v19  ;;  %v14434_v59 = vld [vmem:[%s19688_s1 + $0x8c] ss:$16 sps:$4 sm:$0xff]   ;;  %v14429_v19 = vld [vmem:[%s19688_s1 + $0x80] ss:$16 sps:$4 sm:$0xff]  }
 0x6d9   :  { %v15536_v60 = vpop.eup %15535  ;;  %v6966_v63 = vunpack.c.l.b16 %v6950_v25  ;;  %v6987_v36 = vrot.slane %v6964_v39, 7  ;;  %v14437_v25 = vld [vmem:[%s19688_s1 + $0xa4] ss:$16 sps:$4 sm:$0xff]   ;;  %v14440_v39 = vld [vmem:[%s19688_s1 + $0xac] ss:$16 sps:$4 sm:$0xff]  }
 0x6da   :  { %v15538_v62 = vpop.eup %15537  ;;  %v6944_v54 = vmul.f32 %v15536_v60, %v15530_v22  ;;  %v6967_v28 = vunpack.c.l.b16 %v6951_v9  ;;  %v6989_v23 = vrot.slane %v6965_v10, 6  ;;  %v14431_v22 = vld [vmem:[%s19688_s1 + $0x84] ss:$16 sps:$4 sm:$0xff]   ;;  %v14438_v9 = vld [vmem:[%s19688_s1 + $0xa8] ss:$16 sps:$4 sm:$0xff]  }
 0x6db   :  { %v15540_v46 = vpop.eup %15539  ;;  %v6945_v3 = vmul.f32 %v15538_v62, %v15532_v61  ;;  %v6988_v5 = vsel %vm769_vm0, %v6987_v36, %v6963_v13  ;;  %v6991_v38 = vrot.slane %v6966_v63, 5  ;;  %v14432_v61 = vld [vmem:[%s19688_s1 + $0x88] ss:$16 sps:$4 sm:$0xff]   ;;  %v14443_v10 = vld [vmem:[%s19688_s1 + $0xc4] ss:$16 sps:$4 sm:$0xff]  }
 0x6dc   :  { %v6946_v18 = vmul.f32 %v15540_v46, %v15534_v35  ;;  %v6952_v20 = vpack.c.bf16 %v6944_v54, %v6944_v54  ;;  %v6990_v31 = vsel %vm772_vm1, %v6989_v23, %v6988_v5  ;;  %v6993_v1 = vrot.slane %v6967_v28, 4  ;;  %v14435_v35 = vld [vmem:[%s19688_s1 + $0xa0] ss:$16 sps:$4 sm:$0xff]   ;;  %v14446_v60 = vld [vmem:[%s19688_s1 + $0xcc] ss:$16 sps:$4 sm:$0xff]  }
 0x6dd   :  { %v6953_v16 = vpack.c.bf16 %v6945_v3, %v6945_v3  ;;  %v6992_v14 = vsel %vm775_vm2, %v6991_v38, %v6990_v31  ;;  %v14441_v13 = vld [vmem:[%s19688_s1 + $0xc0] ss:$16 sps:$4 sm:$0xff]   ;;  %v14444_v63 = vld [vmem:[%s19688_s1 + $0xc8] ss:$16 sps:$4 sm:$0xff]   ;;  %v14449_v36 = vld [vmem:[%s19688_s1 + $0xe4] ss:$16 sps:$4 sm:$0xff]  }
 0x6de   :  { %v6954_v55 = vpack.c.bf16 %v6946_v18, %v6946_v18  ;;  %v6968_v56 = vunpack.c.l.b16 %v6952_v20  ;;  %v6994_v2 = vsel %vm778_vm3, %v6993_v1, %v6992_v14  ;;  %v14452_v62 = vld [vmem:[%s19688_s1 + $0xec] ss:$16 sps:$4 sm:$0xff]   ;;  %v14447_v54 = vld [vmem:[%s19688_s1 + $0xe0] ss:$16 sps:$4 sm:$0xff]   ;;  %v14450_v28 = vld [vmem:[%s19688_s1 + $0xe8] ss:$16 sps:$4 sm:$0xff]  }
 0x6df   :  { %v6969_v58 = vunpack.c.l.b16 %v6953_v16  ;;  %v14455_v46 = vld [vmem:[#allocation4 + $0x4] ss:$16 sps:$4 sm:$0xff]   ;;  %v14458_v3 = vld [vmem:[#allocation4 + $0xc] ss:$16 sps:$4 sm:$0xff]   ;;  %v14453_v5 = vld [vmem:[#allocation4] ss:$16 sps:$4 sm:$0xff]  }
 0x6e0   :  { %v6970_v57 = vunpack.c.l.b16 %v6954_v55  ;;  %v6995_v30 = vrot.slane %v6968_v56, 3  ;;  %v14456_v38 = vld [vmem:[#allocation4 + $0x8] ss:$16 sps:$4 sm:$0xff]   ;;  %v14461_v18 = vld [vmem:[#allocation4 + $0x24] ss:$16 sps:$4 sm:$0xff]  }
 0x6e1   :  { %v6997_v4 = vrot.slane %v6969_v58, 2  ;;  %v14464_v20 = vld [vmem:[#allocation4 + $0x2c] ss:$16 sps:$4 sm:$0xff]   ;;  %v14459_v16 = vld [vmem:[#allocation4 + $0x20] ss:$16 sps:$4 sm:$0xff]  }
 0x6e2   :  { %v6996_v50 = vsel %vm781_vm4, %v6995_v30, %v6994_v2  ;;  %v6999_v21 = vrot.slane %v6970_v57, 1  ;;  %v14462_v14 = vld [vmem:[#allocation4 + $0x28] ss:$16 sps:$4 sm:$0xff]  }
 0x6e3   :  { %v6998_v40 = vsel %vm784_vm5, %v6997_v4, %v6996_v50  ;;  %v14467_v4 = vld [vmem:[#allocation4 + $0x44] ss:$16 sps:$4 sm:$0xff]   ;;  %v14470_v50 = vld [vmem:[#allocation4 + $0x4c] ss:$16 sps:$4 sm:$0xff]  }
 0x6e4   :  { %v7000_v24 = vsel %vm787_vm6, %v6999_v21, %v6998_v40  ;;  %v14465_v21 = vld [vmem:[#allocation4 + $0x40] ss:$16 sps:$4 sm:$0xff]   ;;  %v14468_v40 = vld [vmem:[#allocation4 + $0x48] ss:$16 sps:$4 sm:$0xff]  }
 0x6e5   :  { %v7001_v26 = vpack.c.b16 %v7000_v24, %v7000_v24  ;;  %v14471_v24 = vld [vmem:[#allocation4 + $0x60] ss:$16 sps:$4 sm:$0xff]  }
 0x6e7   :  { %7579 = vmatmul.mubr.bf16.vlgmr.msra.gmra.mrb[56].mxu0 %v7001_v26  ;;  %7003 = vst [vmem:[#allocation2] sm:$0xf] %v7001_v26  ;;  %7620 = vmatmul.mubr.bf16.vlgmr.msra.gmra.mrb[56].mxu1 %v7001_v26  ;;  %v14474_v26 = vld [vmem:[#allocation4 + $0x68] ss:$16 sps:$4 sm:$0xff]  }
 0x6e8   :  { %8024 = vmatpush1.bf16.msra.mxu0 %v14405_v6  ;;  %8065 = vmatpush1.bf16.msra.mxu1 %v14408_v11  ;;  %v14473_v6 = vld [vmem:[#allocation4 + $0x64] ss:$16 sps:$4 sm:$0xff]   ;;  %v14476_v11 = vld [vmem:[#allocation4 + $0x6c] ss:$16 sps:$4 sm:$0xff]  }
 0x6e9   :  { %8025 = vmatprep.subr.bf16.mxu0 %v14413_v41  ;;  %8066 = vmatprep.subr.bf16.mxu1 %v14416_v27  ;;  %v14479_v41 = vld [vmem:[#allocation4 + $0x84] ss:$16 sps:$4 sm:$0xff]   ;;  %v14482_v27 = vld [vmem:[#allocation4 + $0x8c] ss:$16 sps:$4 sm:$0xff]  }
 0x6ea   :  { %8055 = vmatprep.mubr.bf16.mxu0 %v16024_v0  ;;  %8096 = vmatprep.mubr.bf16.mxu1 %v16024_v0 }
 0x6ec   :  { %8026 = vmatpush1.bf16.msra.mxu0 %v14411_v42  ;;  %8067 = vmatpush1.bf16.msra.mxu1 %v14414_v47  ;;  %v14477_v42 = vld [vmem:[#allocation4 + $0x80] ss:$16 sps:$4 sm:$0xff]   ;;  %v14480_v47 = vld [vmem:[#allocation4 + $0x88] ss:$16 sps:$4 sm:$0xff]  }
 0x6ed   :  { %8027 = vmatprep.subr.bf16.mxu0 %v14419_v51  ;;  %8068 = vmatprep.subr.bf16.mxu1 %v14422_v15  ;;  %v14485_v51 = vld [vmem:[#allocation4 + $0xa4] ss:$16 sps:$4 sm:$0xff]   ;;  %v14488_v15 = vld [vmem:[#allocation4 + $0xac] ss:$16 sps:$4 sm:$0xff]  }
 0x6ee   :  { %v7830_v23 = vld [vmem:[#allocation2] sm:$0xf] }
 0x6f0   :  { %8028 = vmatpush1.bf16.msra.mxu0 %v14417_v7  ;;  %8069 = vmatpush1.bf16.msra.mxu1 %v14420_v29  ;;  %v14483_v7 = vld [vmem:[#allocation4 + $0xa0] ss:$16 sps:$4 sm:$0xff]   ;;  %v14486_v29 = vld [vmem:[#allocation4 + $0xa8] ss:$16 sps:$4 sm:$0xff]  }
 0x6f1   :  { %8029 = vmatprep.subr.bf16.mxu0 %v14425_v52  ;;  %8070 = vmatprep.subr.bf16.mxu1 %v14428_v32  ;;  %v14491_v52 = vld [vmem:[#allocation4 + $0xc4] ss:$16 sps:$4 sm:$0xff]   ;;  %v14494_v32 = vld [vmem:[#allocation4 + $0xcc] ss:$16 sps:$4 sm:$0xff]  }
 0x6f4   :  { %8030 = vmatpush1.bf16.msra.mxu0 %v14423_v8  ;;  %8071 = vmatpush1.bf16.msra.mxu1 %v14426_v43  ;;  %v14489_v8 = vld [vmem:[#allocation4 + $0xc0] ss:$16 sps:$4 sm:$0xff]   ;;  %v14492_v43 = vld [vmem:[#allocation4 + $0xc8] ss:$16 sps:$4 sm:$0xff]  }
 0x6f5   :  { %8031 = vmatprep.subr.bf16.mxu0 %v14431_v22  ;;  %8072 = vmatprep.subr.bf16.mxu1 %v14434_v59  ;;  %v14497_v22 = vld [vmem:[#allocation4 + $0xe4] ss:$16 sps:$4 sm:$0xff]   ;;  %v14500_v59 = vld [vmem:[#allocation4 + $0xec] ss:$16 sps:$4 sm:$0xff]  }
 0x6f8   :  { %8032 = vmatpush1.bf16.msra.mxu0 %v14429_v19  ;;  %8073 = vmatpush1.bf16.msra.mxu1 %v14432_v61  ;;  %v14495_v19 = vld [vmem:[#allocation4 + $0xe0] ss:$16 sps:$4 sm:$0xff]   ;;  %v14498_v61 = vld [vmem:[#allocation4 + $0xe8] ss:$16 sps:$4 sm:$0xff]  }
 0x6f9   :  { %8033 = vmatprep.subr.bf16.mxu0 %v14437_v25  ;;  %8074 = vmatprep.subr.bf16.mxu1 %v14440_v39  ;;  %v14503_v25 = vld [vmem:[%s19689_s2 + $0x4] ss:$16 sps:$4 sm:$0xff]   ;;  %v14506_v39 = vld [vmem:[%s19689_s2 + $0xc] ss:$16 sps:$4 sm:$0xff]  }
 0x6fc   :  { %8034 = vmatpush1.bf16.msra.mxu0 %v14435_v35  ;;  %8075 = vmatpush1.bf16.msra.mxu1 %v14438_v9  ;;  %v7628_v35 = vld [vmem:[%s19691_s4] sm:$0xf] }
 0x6fd   :  { %8035 = vmatprep.subr.bf16.mxu0 %v14443_v10  ;;  %8076 = vmatprep.subr.bf16.mxu1 %v14446_v60  ;;  %v7633_v9 = vrot.slane %v7628_v35, %v16524_v12 }
 0x700   :  { %8036 = vmatpush1.bf16.msra.mxu0 %v14441_v13  ;;  %8077 = vmatpush1.bf16.msra.mxu1 %v14444_v63  ;;  %v7637_v13 = vrot.slane %v7628_v35, %v16530_v44 }
 0x701   :  { %8037 = vmatprep.subr.bf16.mxu0 %v14449_v36  ;;  %8078 = vmatprep.subr.bf16.mxu1 %v14452_v62 }
 0x704   :  { %8038 = vmatpush1.bf16.msra.mxu0 %v14447_v54  ;;  %8079 = vmatpush1.bf16.msra.mxu1 %v14450_v28 }
 0x705   :  { %8841 = vmatprep.subr.bf16.mxu0 %v14455_v46  ;;  %8882 = vmatprep.subr.bf16.mxu1 %v14458_v3 }
 0x707   :  { %8056 = vmatmul.mubr.bf16.vlgmr.msra.gmra.mrb[60].mxu0 %v7830_v23  ;;  %8097 = vmatmul.mubr.bf16.vlgmr.msra.gmra.mrb[60].mxu1 %v7830_v23 }
 0x708   :  { %8873 = vmatprep.mubr.bf16.mxu0 %v16024_v0  ;;  %8914 = vmatprep.mubr.bf16.mxu1 %v16024_v0 }
 0x709   :  { %8842 = vmatpush1.bf16.msra.mxu0 %v14453_v5  ;;  %8883 = vmatpush1.bf16.msra.mxu1 %v14456_v38 }
 0x70a   :  { %8843 = vmatprep.subr.bf16.mxu0 %v14461_v18  ;;  %8884 = vmatprep.subr.bf16.mxu1 %v14464_v20 }
 0x70d   :  { %8844 = vmatpush1.bf16.msra.mxu0 %v14459_v16  ;;  %8885 = vmatpush1.bf16.msra.mxu1 %v14462_v14 }
 0x70e   :  { %8845 = vmatprep.subr.bf16.mxu0 %v14467_v4  ;;  %8886 = vmatprep.subr.bf16.mxu1 %v14470_v50 }
 0x711   :  { %8846 = vmatpush1.bf16.msra.mxu0 %v14465_v21  ;;  %8887 = vmatpush1.bf16.msra.mxu1 %v14468_v40 }
 0x712   :  { %8847 = vmatprep.subr.bf16.mxu0 %v14473_v6  ;;  %8888 = vmatprep.subr.bf16.mxu1 %v14476_v11 }
 0x715   :  { %8848 = vmatpush1.bf16.msra.mxu0 %v14471_v24  ;;  %8889 = vmatpush1.bf16.msra.mxu1 %v14474_v26 }
 0x716   :  { %8849 = vmatprep.subr.bf16.mxu0 %v14479_v41  ;;  %8890 = vmatprep.subr.bf16.mxu1 %v14482_v27 }
 0x719   :  { %8850 = vmatpush1.bf16.msra.mxu0 %v14477_v42  ;;  %8891 = vmatpush1.bf16.msra.mxu1 %v14480_v47 }
 0x71a   :  { %8851 = vmatprep.subr.bf16.mxu0 %v14485_v51  ;;  %8892 = vmatprep.subr.bf16.mxu1 %v14488_v15 }
 0x71d   :  { %8852 = vmatpush1.bf16.msra.mxu0 %v14483_v7  ;;  %8893 = vmatpush1.bf16.msra.mxu1 %v14486_v29 }
 0x71e   :  { %8853 = vmatprep.subr.bf16.mxu0 %v14491_v52  ;;  %8894 = vmatprep.subr.bf16.mxu1 %v14494_v32 }
 0x721   :  { %8854 = vmatpush1.bf16.msra.mxu0 %v14489_v8  ;;  %8895 = vmatpush1.bf16.msra.mxu1 %v14492_v43 }
 0x722   :  { %8855 = vmatprep.subr.bf16.mxu0 %v14497_v22  ;;  %8896 = vmatprep.subr.bf16.mxu1 %v14500_v59 }
 0x725   :  { %8856 = vmatpush1.bf16.msra.mxu0 %v14495_v19  ;;  %8897 = vmatpush1.bf16.msra.mxu1 %v14498_v61 }
 0x726   :  { %9099 = vmatprep.subr.bf16.mxu0 %v14503_v25  ;;  %9140 = vmatprep.subr.bf16.mxu1 %v14506_v39 }
 0x769   :  { %v18344_v31 = vpop.f32.mrb[52].mxu0  ;;  %v18346_v1 = vpop.f32.mrb[52].mxu1 }
 0x76a   :  { %v18348_v55 = vpop.f32.mrb[53].mxu0  ;;  %v18350_v56 = vpop.f32.mrb[53].mxu1 }
 0x76b   :  { %v7326_v2 = vpop.f32.mrb[54].mxu0  ;;  %v7367_v58 = vpop.f32.mrb[54].mxu1 }
 0x76c   :  { %v7327_v57 = vpop.f32.mrb[55].mxu0  ;;  %v7368_v30 = vpop.f32.mrb[55].mxu1  ;;  %v7645_v2 = vrot.slane %v7628_v35, %v16539_v53 }
 0x7ba   :  { %v7580_v10 = vpop.f32.mrb[56].mxu0  ;;  %v7621_v60 = vpop.f32.mrb[56].mxu1 }
 0x7bb   :  { %v7581_v63 = vadd.f32 %v7580_v10, %v18344_v31  ;;  %v7622_v36 = vadd.f32 %v7621_v60, %v18346_v1  ;;  %v7582_v62 = vpop.f32.mrb[57].mxu0  ;;  %v7623_v54 = vpop.f32.mrb[57].mxu1  ;;  %v7641_v1 = vrot.slane %v7628_v35, %v16543_v17  ;;  %v13190_v35 = vld [vmem:[%s19687_s0 + $0x5] ss:$8 sm:$0xf] }
 0x7bc   :  { %v7583_v28 = vadd.f32 %v7582_v62, %v18348_v55  ;;  %v7624_v23 = vadd.f32 %v7623_v54, %v18350_v56  ;;  %v7584_v46 = vpop.f32.mrb[58].mxu0  ;;  %v7625_v3 = vpop.f32.mrb[58].mxu1  ;;  %v13192_v54 = vld [vmem:[%s19687_s0 + $0x45] ss:$8 sm:$0xf] }
 0x7bd   :  { %v7650_v5 = vadd.f32 %v7633_v9, %v7581_v63  ;;  %v7585_v38 = vpop.f32.mrb[59].mxu0  ;;  %v7626_v18 = vpop.f32.mrb[59].mxu1  ;;  %v7652_v57 = vadd.f32 %v7641_v1, %v7622_v36  ;;  %v13191_v9 = vld [vmem:[%s19687_s0 + $0x25] ss:$8 sm:$0xf] }
 0x7be   :  { %v7651_v20 = vadd.f32 %v7637_v13, %v7583_v28  ;;  %v7653_v31 = vadd.f32 %v7645_v2, %v7624_v23  ;;  %v13194_v13 = vld [vmem:[%s19687_s0 + $0x85] ss:$8 sm:$0xf] }
 0x7bf   :  { %v13183_v16 = vmul.f32 -1.442695, %v7650_v5  ;;  %v13195_v63 = vld [vmem:[%s19687_s0 + $0xa5] ss:$8 sm:$0xf] }
 0x7c0   :  { %v13184_v14 = vmul.f32 -1.442695, %v7651_v20  ;;  %v13185_v58 = vmul.f32 -1.442695, %v7653_v31 }
 0x7c1   :  { %15541 = vpow2.f32 %v13183_v16  ;;  %v13193_v28 = vld [vmem:[%s19687_s0 + $0x65] ss:$8 sm:$0xf] }
 0x7c2   :  { %15543 = vpow2.f32 %v13184_v14  ;;  %v13196_v3 = vld [vmem:[%s19687_s0 + $0xc5] ss:$8 sm:$0xf] }
 0x7c3   :  { %15545 = vpow2.f32 %v13185_v58  ;;  %v13197_v5 = vld [vmem:[%s19687_s0 + $0xe5] ss:$8 sm:$0xf] }
 0x7c4   :  { %15547 = vtanh.f32 %v7652_v57 }
 0x7cb   :  { %v15542_v55 = vpop.eup %15541 }
 0x7cc   :  { %v15544_v30 = vpop.eup %15543  ;;  %v7658_v56 = vadd.f32 1.0, %v15542_v55 }
 0x7cd   :  { %v7664_v4 = vadd.f32 1.0, %v15544_v30  ;;  %v15546_v50 = vpop.eup %15545 }
 0x7ce   :  { %15549 = vrcp.f32 %v7658_v56  ;;  %v15548_v21 = vpop.eup %15547  ;;  %v7671_v24 = vadd.f32 1.0, %v15546_v50 }
 0x7cf   :  { %15551 = vrcp.f32 %v7664_v4 }
 0x7d0   :  { %15553 = vrcp.f32 %v7671_v24 }
 0x7d8   :  { %v15550_v40 = vpop.eup %15549 }
 0x7d9   :  { %v15552_v6 = vpop.eup %15551  ;;  %v7675_v11 = vmul.f32 %v15550_v40, %v15548_v21 }
 0x7da   :  { %v7674_v26 = vmul.f32 %v15552_v6, %v17915_v48  ;;  %v8057_v41 = vpop.f32.mrb[60].mxu0  ;;  %v8098_v27 = vpop.f32.mrb[60].mxu1 }
 0x7db   :  { %v8059_v42 = vpop.f32.mrb[61].mxu0  ;;  %v8100_v47 = vpop.f32.mrb[61].mxu1 }
 0x7dc   :  { %v18370_v51 = vadd.f32 %v7675_v11, %v7674_v26  ;;  %v8109_v15 = vcombine.low %v8057_v41, %v8059_v42  ;;  %v8110_v7 = vcombine.high %v8057_v41, %v8059_v42  ;;  %v8111_v29 = vcombine.low %v8098_v27, %v8100_v47  ;;  %v8061_v52 = vpop.f32.mrb[62].mxu0  ;;  %v8102_v32 = vpop.f32.mrb[62].mxu1 }
 0x7dd   :  { %v8112_v8 = vcombine.high %v8098_v27, %v8100_v47  ;;  %v8062_v43 = vpop.f32.mrb[63].mxu0  ;;  %v8103_v22 = vpop.f32.mrb[63].mxu1 }
 0x7de   :  { %15555 = vtanh.f32 %v18370_v51  ;;  %v8119_v59 = vrot.slane %v8109_v15, %v16279_v45  ;;  %v8126_v48 = vrot.slane %v8110_v7, %v16279_v45  ;;  %v8133_v19 = vrot.slane %v8111_v29, %v16279_v45  ;;  %v15554_v56 = vpop.eup %15553 }
 0x7df   :  { %v8140_v61 = vrot.slane %v8112_v8, %v16279_v45 }
 0x7e0   :  { %v8141_v25 = vcombine.low %v8119_v59, %v8133_v19  ;;  %v8142_v39 = vcombine.high %v8119_v59, %v8133_v19 }
 0x7e1   :  { %v8143_v10 = vcombine.low %v8126_v48, %v8140_v61  ;;  %v8144_v60 = vcombine.high %v8126_v48, %v8140_v61  ;;  %v7790_v61 = vld [vmem:[%s19692_s5] sm:$0x4] }
 0x7e2   :  { %v8151_v36 = vrot.slane %v8141_v25, %v16279_v45  ;;  %v8165_v62 = vrot.slane %v8142_v39, %v16279_v45  ;;  %v14501_v25 = vld [vmem:[%s19689_s2] ss:$16 sps:$4 sm:$0xff]  }
 0x7e3   :  { %v8158_v23 = vrot.slane %v8143_v10, %v16279_v45  ;;  %v8172_v46 = vrot.slane %v8144_v60, %v16279_v45 }
 0x7e4   :  { %v8173_v38 = vcombine.high %v8151_v36, %v8151_v36  ;;  %v8175_v18 = vcombine.high %v8165_v62, %v8165_v62  ;;  %v18405_v20 = vadd.f32 %v13190_v35, %v8151_v36  ;;  %v18407_v16 = vadd.f32 %v13191_v9, %v8165_v62  ;;  %v14504_v36 = vld [vmem:[%s19689_s2 + $0x8] ss:$16 sps:$4 sm:$0xff]   ;;  %v14509_v62 = vld [vmem:[%s19689_s2 + $0x24] ss:$16 sps:$4 sm:$0xff]  }
 0x7e5   :  { %v8174_v14 = vcombine.high %v8158_v23, %v8158_v23  ;;  %v8176_v2 = vcombine.high %v8172_v46, %v8172_v46  ;;  %v18409_v31 = vadd.f32 %v13194_v13, %v8158_v23  ;;  %v18411_v1 = vadd.f32 %v13195_v63, %v8172_v46  ;;  %v7793_v63 = vld [vmem:[%s19692_s5 + $0x4] sm:$0x4] }
 0x7e6   :  { %v18413_v58 = vadd.f32 %v13192_v54, %v8173_v38  ;;  %v18415_v57 = vadd.f32 %v13193_v28, %v8175_v18  ;;  %v13230_v55 = vmul.f32 -1.442695, %v18405_v20  ;;  %v13231_v30 = vmul.f32 -1.442695, %v18407_v16  ;;  %v14512_v38 = vld [vmem:[%s19689_s2 + $0x2c] ss:$16 sps:$4 sm:$0xff]  }
 0x7e7   :  { %v18419_v4 = vadd.f32 %v13196_v3, %v8174_v14  ;;  %v18421_v50 = vadd.f32 %v13197_v5, %v8176_v2  ;;  %v13234_v21 = vmul.f32 -1.442695, %v18409_v31  ;;  %v8250_v24 = vrot.slane %v18405_v20, 1 }
 0x7e8   :  { %v15556_v40 = vpop.eup %15555  ;;  %15557 = vpow2.f32 %v13230_v55  ;;  %v13232_v6 = vmul.f32 -1.442695, %v18413_v58  ;;  %v13233_v11 = vmul.f32 -1.442695, %v18415_v57  ;;  %v13235_v41 = vmul.f32 -1.442695, %v18411_v1 }
 0x7e9   :  { %v7678_v26 = vmul.f32 %v15556_v40, %v15554_v56  ;;  %15559 = vpow2.f32 %v13231_v30  ;;  %v13236_v27 = vmul.f32 -1.442695, %v18419_v4  ;;  %v8251_v42 = vrot.slane %v18407_v16, 1  ;;  %v7796_v56 = vld [vmem:[%s19692_s5 + $0x8] sm:$0x4] }
 0x7ea   :  { %15561 = vpow2.f32 %v13232_v6  ;;  %v13237_v15 = vmul.f32 -1.442695, %v18421_v50  ;;  %v13238_v7 = vmul.f32 -1.442695, %v8250_v24  ;;  %v7802_v40 = vld [vmem:[%s19692_s5 + $0x10] sm:$0x4] }
 0x7eb   :  { %v7679_v47 = vpack.c.bf16 %v7678_v26, %v7678_v26  ;;  %15563 = vpow2.f32 %v13233_v11  ;;  %v13239_v52 = vmul.f32 -1.442695, %v8251_v42  ;;  %v7808_v42 = vld [vmem:[%s19692_s5 + $0x18] sm:$0x4] }
 0x7ec   :  { %15565 = vpow2.f32 %v13234_v21  ;;  %v7799_v21 = vld [vmem:[%s19692_s5 + $0xc] sm:$0x4] }
 0x7ed   :  { %v7689_v29 = vrot.slane %v7679_v47, %v16279_v45  ;;  %7680 = vst [vmem:[#allocation2 + $0x4] sm:$0xf] %v7679_v47  ;;  %15567 = vpow2.f32 %v13235_v41  ;;  %v14507_v47 = vld [vmem:[%s19689_s2 + $0x20] ss:$16 sps:$4 sm:$0xff]  }
 0x7ee   :  { %15569 = vpow2.f32 %v13236_v27  ;;  %v7805_v27 = vld [vmem:[%s19692_s5 + $0x14] sm:$0x4] }
 0x7ef   :  { %v7690_v32 = vcombine.high %v7689_v29, %v7689_v29  ;;  %v7697_v8 = vrot.slane %v7689_v29, %v16279_v45  ;;  %15571 = vpow2.f32 %v13237_v15 }
 0x7f0   :  { %15573 = vpow2.f32 %v13238_v7 }
 0x7f1   :  { %v7704_v43 = vrot.slane %v7690_v32, %v16279_v45  ;;  %v7705_v22 = vcombine.high %v7697_v8, %v7697_v8  ;;  %v7708_v59 = vunpack.i.h.s16 %v7697_v8  ;;  %v13186_v48 = vpack.i.b16 %v7697_v8, %v7697_v8  ;;  %v14510_v8 = vld [vmem:[%s19689_s2 + $0x28] ss:$16 sps:$4 sm:$0xff]  }
 0x7f2   :  { %v15558_v19 = vpop.eup %15557  ;;  %15575 = vpow2.f32 %v13239_v52 }
 0x7f3   :  { %v15560_v39 = vpop.eup %15559  ;;  %v7706_v35 = vcombine.high %v7704_v43, %v7704_v43  ;;  %v7710_v9 = vunpack.i.h.s16 %v7704_v43  ;;  %v7712_v10 = vunpack.i.h.s16 %v7705_v22  ;;  %v7716_v60 = vpack.i.b16 %v7708_v59, %v7708_v59 }
 0x7f4   :  { %v15562_v54 = vpop.eup %15561  ;;  %v13187_v28 = vpack.i.b16 %v7704_v43, %v7704_v43  ;;  %v13188_v23 = vpack.i.b16 %v7705_v22, %v7705_v22  ;;  %v7729_v46 = vrot.slane %v13186_v48, %v16610_v33  ;;  %v8218_v3 = vadd.f32 1.0, %v15558_v19  ;;  %v8648_v5 = vld [vmem:[#allocation2 + $0x4] sm:$0xf] }
 0x7f5   :  { %v15564_v18 = vpop.eup %15563  ;;  %v7714_v14 = vunpack.i.h.s16 %v7706_v35  ;;  %v7718_v2 = vpack.i.b16 %v7710_v9, %v7710_v9  ;;  %v7720_v55 = vpack.i.b16 %v7712_v10, %v7712_v10  ;;  %v13189_v30 = vpack.i.b16 %v7706_v35, %v7706_v35  ;;  %8874 = vmatmul.mubr.bf16.vlgmr.msra.gmra.mrb[64].mxu0 %v8648_v5  ;;  %8915 = vmatmul.mubr.bf16.vlgmr.msra.gmra.mrb[64].mxu1 %v8648_v5  ;;  %v14515_v43 = vld [vmem:[%s19689_s2 + $0x44] ss:$16 sps:$4 sm:$0xff]   ;;  %v14518_v35 = vld [vmem:[%s19689_s2 + $0x4c] ss:$16 sps:$4 sm:$0xff]  }
 0x7f6   :  { %v15566_v6 = vpop.eup %15565  ;;  %v7736_v11 = vrot.slane %v7716_v60, %v16610_v33  ;;  %v7743_v24 = vrot.slane %v13187_v28, %v16610_v33  ;;  %v7757_v26 = vrot.slane %v13188_v23, %v16610_v33  ;;  %v7791_v41 = vsel %vm18442_vm8, %v7729_v46, %v7790_v61  ;;  %9100 = vmatpush1.bf16.msra.mxu0 %v14501_v25  ;;  %v7811_v61 = vld [vmem:[%s19692_s5 + $0x1c] sm:$0x4]  ;;  %v14513_v23 = vld [vmem:[%s19689_s2 + $0x40] ss:$16 sps:$4 sm:$0xff]  }
 0x7f7   :  { %v15568_v15 = vpop.eup %15567  ;;  %v7722_v7 = vpack.i.b16 %v7714_v14, %v7714_v14  ;;  %v7750_v29 = vrot.slane %v7718_v2, %v16610_v33  ;;  %v7764_v52 = vrot.slane %v7720_v55, %v16610_v33  ;;  %v7771_v32 = vrot.slane %v13189_v30, %v16610_v33  ;;  %7792 = vst [vmem:[%s19692_s5] sm:$0x4] %v7791_v41  ;;  %v14524_v2 = vld [vmem:[%s19689_s2 + $0x6c] ss:$16 sps:$4 sm:$0xff]  }
 0x7f8   :  { %9141 = vmatpush1.bf16.msra.mxu1 %v14504_v36  ;;  %v15570_v22 = vpop.eup %15569  ;;  %v7794_v59 = vsel %vm18442_vm8, %v7736_v11, %v7793_v63  ;;  %v7797_v48 = vsel %vm18442_vm8, %v7743_v24, %v7796_v56  ;;  %v7803_v19 = vsel %vm18442_vm8, %v7757_v26, %v7802_v40  ;;  %v8219_v25 = vadd.f32 1.0, %v15560_v39  ;;  %9101 = vmatprep.subr.bf16.mxu0 %v14509_v62  ;;  %v14519_v40 = vld [vmem:[%s19689_s2 + $0x60] ss:$16 sps:$4 sm:$0xff]   ;;  %v14527_v26 = vld [vmem:[%s19689_s2 + $0x84] ss:$16 sps:$4 sm:$0xff]  }
 0x7f9   :  { %9142 = vmatprep.subr.bf16.mxu1 %v14512_v38  ;;  %v15572_v9 = vpop.eup %15571  ;;  %v7778_v10 = vrot.slane %v7722_v7, %v16610_v33  ;;  %7795 = vst [vmem:[%s19692_s5 + $0x4] sm:$0x4] %v7794_v59  ;;  %7798 = vst [vmem:[%s19692_s5 + $0x8] sm:$0x4] %v7797_v48  ;;  %v7800_v39 = vsel %vm18442_vm8, %v7750_v29, %v7799_v21  ;;  %v7806_v60 = vsel %vm18442_vm8, %v7764_v52, %v7805_v27  ;;  %v14525_v7 = vld [vmem:[%s19689_s2 + $0x80] ss:$16 sps:$4 sm:$0xff]  }
 0x7fa   :  { %7804 = vst [vmem:[%s19692_s5 + $0x10] sm:$0x4] %v7803_v19  ;;  %v7809_v63 = vsel %vm18442_vm8, %v7771_v32, %v7808_v42  ;;  %9131 = vmatprep.mubr.bf16.mxu0 %v16024_v0  ;;  %v15574_v36 = vpop.eup %15573  ;;  %7801 = vst [vmem:[%s19692_s5 + $0xc] sm:$0x4] %v7800_v39  ;;  %v8220_v62 = vadd.f32 1.0, %v15562_v54  ;;  %v8221_v28 = vadd.f32 1.0, %v15564_v18  ;;  %9102 = vmatpush1.bf16.msra.mxu0 %v14507_v47  ;;  %15577 = vrcp.f32 %v8218_v3 }
 0x7fb   :  { %7807 = vst [vmem:[%s19692_s5 + $0x14] sm:$0x4] %v7806_v60  ;;  %7810 = vst [vmem:[%s19692_s5 + $0x18] sm:$0x4] %v7809_v63  ;;  %9172 = vmatprep.mubr.bf16.mxu1 %v16024_v0  ;;  %v7812_v46 = vsel %vm18442_vm8, %v7778_v10, %v7811_v61  ;;  %v8222_v5 = vadd.f32 1.0, %v15566_v6  ;;  %v8252_v38 = vrot.slane %v18413_v58, 1  ;;  %9103 = vmatprep.subr.bf16.mxu0 %v14515_v43  ;;  %15579 = vrcp.f32 %v8219_v25 }
 0x7fc   :  { %9143 = vmatpush1.bf16.msra.mxu1 %v14510_v8  ;;  %v14516_v54 = vld [vmem:[%s19689_s2 + $0x48] ss:$16 sps:$4 sm:$0xff]   ;;  %v14521_v18 = vld [vmem:[%s19689_s2 + $0x64] ss:$16 sps:$4 sm:$0xff]   ;;  %v15576_v14 = vpop.eup %15575  ;;  %7813 = vst [vmem:[%s19692_s5 + $0x1c] sm:$0x4] %v7812_v46  ;;  %15581 = vrcp.f32 %v8220_v62 }
 0x7fd   :  { %v8223_v13 = vadd.f32 1.0, %v15568_v15  ;;  %v8253_v3 = vrot.slane %v18415_v57, 1  ;;  %9144 = vmatprep.subr.bf16.mxu1 %v14518_v35  ;;  %v8224_v55 = vadd.f32 1.0, %v15570_v22  ;;  %v8254_v30 = vrot.slane %v18409_v31, 1  ;;  %v14522_v6 = vld [vmem:[%s19689_s2 + $0x68] ss:$16 sps:$4 sm:$0xff]  }
 0x7fe   :  { %v8225_v56 = vadd.f32 1.0, %v15572_v9  ;;  %15583 = vrcp.f32 %v8221_v28  ;;  %v8255_v21 = vrot.slane %v18411_v1, 1  ;;  %9104 = vmatpush1.bf16.msra.mxu0 %v14513_v23  ;;  %v8256_v11 = vrot.slane %v18419_v4, 1  ;;  %v14530_v42 = vld [vmem:[%s19689_s2 + $0x8c] ss:$16 sps:$4 sm:$0xff]  }
 0x7ff   :  { %15585 = vrcp.f32 %v8222_v5  ;;  %v13240_v24 = vmul.f32 -1.442695, %v8252_v38  ;;  %9105 = vmatprep.subr.bf16.mxu0 %v14521_v18  ;;  %v8257_v41 = vrot.slane %v18421_v50, 1  ;;  %v13241_v27 = vmul.f32 -1.442695, %v8253_v3 }
 0x800   :  { %9145 = vmatpush1.bf16.msra.mxu1 %v14516_v54  ;;  %15587 = vrcp.f32 %v8223_v13  ;;  %v13242_v47 = vmul.f32 -1.442695, %v8254_v30  ;;  %v13243_v15 = vmul.f32 -1.442695, %v8255_v21  ;;  %v13244_v29 = vmul.f32 -1.442695, %v8256_v11 }
 0x801   :  { %9146 = vmatprep.subr.bf16.mxu1 %v14524_v2  ;;  %15589 = vrcp.f32 %v8224_v55  ;;  %v14528_v52 = vld [vmem:[%s19689_s2 + $0x88] ss:$16 sps:$4 sm:$0xff]   ;;  %v14533_v32 = vld [vmem:[%s19689_s2 + $0xa4] ss:$16 sps:$4 sm:$0xff]   ;;  %v13245_v8 = vmul.f32 -1.442695, %v8257_v41  ;;  %v13687_v35 = vcombine.low %v18239_v49, %v18239_v49 }
 0x802   :  { %15591 = vrcp.f32 %v8225_v56  ;;  %9106 = vmatpush1.bf16.msra.mxu0 %v14519_v40  ;;  %v14536_v43 = vld [vmem:[%s19689_s2 + $0xac] ss:$16 sps:$4 sm:$0xff]   ;;  %v8290_v59 = vadd.f32 1.0, %v15574_v36  ;;  %v8291_v19 = vadd.f32 1.0, %v15576_v14  ;;  %v14531_v61 = vld [vmem:[%s19689_s2 + $0xa0] ss:$16 sps:$4 sm:$0xff]   ;;  %v8410_v36 = vrot.slane %v7060_v34, %v16279_v45 }
 0x803   :  { %15593 = vpow2.f32 %v13240_v24  ;;  %9107 = vmatprep.subr.bf16.mxu0 %v14527_v26  ;;  %v8314_v9 = vrot.slane %v18405_v20, 2  ;;  %v14534_v10 = vld [vmem:[%s19689_s2 + $0xa8] ss:$16 sps:$4 sm:$0xff]   ;;  %v14539_v39 = vld [vmem:[%s19689_s2 + $0xc4] ss:$16 sps:$4 sm:$0xff]   ;;  %v8315_v63 = vrot.slane %v18407_v16, 2  ;;  %v18621_v38 = vrot.slane %v13687_v35, %v16279_v45 }
 0x804   :  { %9147 = vmatpush1.bf16.msra.mxu1 %v14522_v6  ;;  %15595 = vpow2.f32 %v13241_v27  ;;  %v18580_v22 = vpop.eup %15577  ;;  %v14542_v62 = vld [vmem:[%s19689_s2 + $0xcc] ss:$16 sps:$4 sm:$0xff]   ;;  %v8316_v23 = vrot.slane %v18413_v58, 2  ;;  %v8317_v5 = vrot.slane %v18415_v57, 2  ;;  %v8318_v34 = vrot.slane %v18409_v31, 2 }
 0x805   :  { %9148 = vmatprep.subr.bf16.mxu1 %v14530_v42  ;;  %15597 = vpow2.f32 %v13242_v47  ;;  %v18582_v48 = vpop.eup %15579  ;;  %v14540_v54 = vld [vmem:[%s19689_s2 + $0xc8] ss:$16 sps:$4 sm:$0xff]   ;;  %v14545_v18 = vld [vmem:[%s19689_s2 + $0xe4] ss:$16 sps:$4 sm:$0xff]   ;;  %v8418_v13 = vcombine.high %v8410_v36, %v8410_v36  ;;  %v18632_v3 = vrot.slane %v8410_v36, %v16279_v45  ;;  %v14548_v2 = vld [vmem:[%s19689_s2 + $0xec] ss:$16 sps:$4 sm:$0xff]   ;;  %v18642_v11 = vrot.slane %v18621_v38, %v16279_v45 }
 0x806   :  { %15599 = vpow2.f32 %v13243_v15  ;;  %9108 = vmatpush1.bf16.msra.mxu0 %v14525_v7  ;;  %v18587_v25 = vpop.eup %15581  ;;  %v14543_v21 = vld [vmem:[%s19689_s2 + $0xe0] ss:$16 sps:$4 sm:$0xff]   ;;  %v14546_v24 = vld [vmem:[%s19689_s2 + $0xe8] ss:$16 sps:$4 sm:$0xff]   ;;  %v14551_v26 = vld [vmem:[%s19688_s1 + $0x4] ss:$16 sps:$4 sm:$0xff]   ;;  %v8419_v41 = vcombine.high %v18621_v38, %v18621_v38 }
 0x807   :  { %15601 = vpow2.f32 %v13244_v29  ;;  %9109 = vmatprep.subr.bf16.mxu0 %v14533_v32  ;;  %v18653_v47 = vrot.slane %v8418_v13, %v16279_v45  ;;  %v8448_v15 = vcombine.high %v18632_v3, %v18632_v3  ;;  %v14554_v7 = vld [vmem:[%s19688_s1 + $0xc] ss:$16 sps:$4 sm:$0xff]   ;;  %v8319_v32 = vrot.slane %v18411_v1, 2 }
 0x808   :  { %9149 = vmatpush1.bf16.msra.mxu1 %v14528_v52  ;;  %v18598_v60 = vpop.eup %15583  ;;  %15603 = vpow2.f32 %v13245_v8  ;;  %v8338_v8 = vrot.slane %v18405_v20, 3  ;;  %v8341_v20 = vrot.slane %v18415_v57, 3  ;;  %v8342_v36 = vrot.slane %v18409_v31, 3 }
 0x809   :  { %9150 = vmatprep.subr.bf16.mxu1 %v14536_v43  ;;  %v18608_v28 = vpop.eup %15585  ;;  %15605 = vrcp.f32 %v8290_v59  ;;  %v8447_v13 = vrot.slane %v8419_v41, %v16279_v45 }
 0x80a   :  { %v18611_v46 = vpop.eup %15587  ;;  %15607 = vrcp.f32 %v8291_v19  ;;  %9110 = vmatpush1.bf16.msra.mxu0 %v14531_v61  ;;  %v8320_v19 = vrot.slane %v18419_v4, 2  ;;  %v8339_v61 = vrot.slane %v18407_v16, 3 }
 0x80b   :  { %v18617_v49 = vpop.eup %15589  ;;  %15609 = vtanh.f32 %v8314_v9  ;;  %9111 = vmatprep.subr.bf16.mxu0 %v14539_v39  ;;  %v8340_v39 = vrot.slane %v18413_v58, 3  ;;  %v8344_v58 = vrot.slane %v18419_v4, 3  ;;  %v8450_v4 = vcombine.high %v18653_v47, %v18653_v47 }
 0x80c   :  { %9151 = vmatpush1.bf16.msra.mxu1 %v14534_v10  ;;  %v18629_v14 = vpop.eup %15591  ;;  %15611 = vtanh.f32 %v8315_v63  ;;  %v8321_v10 = vrot.slane %v18421_v50, 2  ;;  %v13247_v38 = vmul.f32 -1.442695, %v8339_v61 }
 0x80d   :  { %9152 = vmatprep.subr.bf16.mxu1 %v14542_v62  ;;  %v15594_v55 = vpop.eup %15593  ;;  %15613 = vtanh.f32 %v8316_v23  ;;  %v8343_v23 = vrot.slane %v18411_v1, 3  ;;  %v13248_v31 = vmul.f32 -1.442695, %v8340_v39  ;;  %v8345_v1 = vrot.slane %v18421_v50, 3 }
 0x80e   :  { %v15596_v30 = vpop.eup %15595  ;;  %v8292_v56 = vadd.f32 1.0, %v15594_v55  ;;  %15615 = vtanh.f32 %v8317_v5  ;;  %9112 = vmatpush1.bf16.msra.mxu0 %v14537_v37  ;;  %v13246_v5 = vmul.f32 -1.442695, %v8338_v8 }
 0x80f   :  { %v15598_v40 = vpop.eup %15597  ;;  %v8293_v6 = vadd.f32 1.0, %v15596_v30  ;;  %15617 = vtanh.f32 %v8318_v34  ;;  %9113 = vmatprep.subr.bf16.mxu0 %v14545_v18 }
 0x810   :  { %9153 = vmatpush1.bf16.msra.mxu1 %v14540_v54  ;;  %v15600_v27 = vpop.eup %15599  ;;  %v8294_v42 = vadd.f32 1.0, %v15598_v40  ;;  %15619 = vrcp.f32 %v8292_v56  ;;  %v13250_v56 = vmul.f32 -1.442695, %v8342_v36  ;;  %v13251_v40 = vmul.f32 -1.442695, %v8343_v23 }
 0x811   :  { %9154 = vmatprep.subr.bf16.mxu1 %v14548_v2  ;;  %v15602_v29 = vpop.eup %15601  ;;  %v8295_v52 = vadd.f32 1.0, %v15600_v27  ;;  %15621 = vrcp.f32 %v8293_v6  ;;  %v13249_v2 = vmul.f32 -1.442695, %v8341_v20  ;;  %v13252_v6 = vmul.f32 -1.442695, %v8344_v58 }
 0x812   :  { %v15604_v43 = vpop.eup %15603  ;;  %v8296_v59 = vadd.f32 1.0, %v15602_v29  ;;  %15623 = vrcp.f32 %v8294_v42  ;;  %9114 = vmatpush1.bf16.msra.mxu0 %v14543_v21  ;;  %v13253_v42 = vmul.f32 -1.442695, %v8345_v1 }
 0x813   :  { %v15606_v35 = vpop.eup %15605  ;;  %v8297_v9 = vadd.f32 1.0, %v15604_v43  ;;  %15625 = vrcp.f32 %v8295_v52  ;;  %9575 = vmatprep.subr.bf16.mxu0 %v14551_v26 }
 0x814   :  { %9155 = vmatpush1.bf16.msra.mxu1 %v14546_v24  ;;  %v15608_v63 = vpop.eup %15607  ;;  %15627 = vrcp.f32 %v8296_v59  ;;  %v8460_v62 = vmul.f32 %v15606_v35, %v18632_v3 }
 0x815   :  { %9616 = vmatprep.subr.bf16.mxu1 %v14554_v7  ;;  %v15610_v16 = vpop.eup %15609  ;;  %15629 = vrcp.f32 %v8297_v9  ;;  %v8461_v37 = vmul.f32 %v15608_v63, %v18653_v47 }
 0x816   :  { %v15612_v34 = vpop.eup %15611  ;;  %15631 = vtanh.f32 %v8319_v32  ;;  %v8468_v54 = vmul.f32 %v15610_v16, %v18580_v22 }
 0x817   :  { %v15614_v57 = vpop.eup %15613  ;;  %15633 = vtanh.f32 %v8320_v19  ;;  %v8469_v18 = vmul.f32 %v15612_v34, %v18582_v48  ;;  %v8449_v48 = vcombine.high %v18642_v11, %v18642_v11 }
 0x818   :  { %v15616_v3 = vpop.eup %15615  ;;  %15635 = vtanh.f32 %v8321_v10  ;;  %v8476_v55 = vadd.f32 %v8468_v54, %v8460_v62  ;;  %v8470_v50 = vmul.f32 %v15614_v57, %v18587_v25 }
 0x819   :  { %v15618_v30 = vpop.eup %15617  ;;  %15637 = vpow2.f32 %v13246_v5  ;;  %v8477_v22 = vadd.f32 %v8469_v18, %v8461_v37  ;;  %v8471_v47 = vmul.f32 %v15616_v3, %v18598_v60 }
 0x81a   :  { %v15620_v21 = vpop.eup %15619  ;;  %15639 = vpow2.f32 %v13247_v38  ;;  %v8472_v32 = vmul.f32 %v15618_v30, %v18608_v28 }
 0x81b   :  { %v15622_v24 = vpop.eup %15621  ;;  %15641 = vpow2.f32 %v13248_v31  ;;  %v8462_v26 = vmul.f32 %v15620_v21, %v8448_v15  ;;  %v8565_v41 = vcombine.low %v8476_v55, %v8477_v22  ;;  %v8451_v15 = vcombine.high %v8447_v13, %v8447_v13 }
 0x81c   :  { %v15624_v27 = vpop.eup %15623  ;;  %15643 = vpow2.f32 %v13249_v2  ;;  %v8463_v7 = vmul.f32 %v15622_v24, %v8450_v4 }
 0x81d   :  { %v15626_v29 = vpop.eup %15625  ;;  %15645 = vpow2.f32 %v13250_v56  ;;  %v8464_v52 = vmul.f32 %v15624_v27, %v18642_v11  ;;  %v8478_v8 = vadd.f32 %v8470_v50, %v8462_v26  ;;  %v8575_v28 = vrot.slane %v8565_v41, %v16279_v45 }
 0x81e   :  { %v15628_v43 = vpop.eup %15627  ;;  %15647 = vpow2.f32 %v13251_v40  ;;  %v8479_v59 = vadd.f32 %v8471_v47, %v8463_v7  ;;  %v8465_v19 = vmul.f32 %v15626_v29, %v8447_v13 }
 0x81f   :  { %v15630_v25 = vpop.eup %15629  ;;  %15649 = vpow2.f32 %v13252_v6  ;;  %v8480_v61 = vadd.f32 %v8472_v32, %v8464_v52  ;;  %v8466_v35 = vmul.f32 %v15628_v43, %v8449_v48 }
 0x820   :  { %v15632_v9 = vpop.eup %15631  ;;  %15651 = vpow2.f32 %v13253_v42  ;;  %v8566_v10 = vcombine.low %v8478_v8, %v8479_v59  ;;  %v8467_v60 = vmul.f32 %v15630_v25, %v8451_v15 }
 0x821   :  { %v15634_v39 = vpop.eup %15633  ;;  %v8473_v63 = vmul.f32 %v15632_v9, %v18611_v46  ;;  %15653 = vtanh.f32 %v8476_v55 }
 0x822   :  { %v15636_v11 = vpop.eup %15635  ;;  %15655 = vtanh.f32 %v8477_v22  ;;  %v8582_v20 = vrot.slane %v8566_v10, %v16279_v45  ;;  %v8474_v36 = vmul.f32 %v15634_v39, %v18617_v49 }
 0x823   :  { %v15638_v62 = vpop.eup %15637  ;;  %15657 = vtanh.f32 %v8478_v8  ;;  %v8475_v16 = vmul.f32 %v15636_v11, %v18629_v14  ;;  %v8481_v23 = vadd.f32 %v8473_v63, %v8465_v19 }
 0x824   :  { %v15640_v5 = vpop.eup %15639  ;;  %v8378_v37 = vadd.f32 1.0, %v15638_v62  ;;  %v8597_v34 = vcombine.low %v8575_v28, %v8582_v20  ;;  %v8482_v58 = vadd.f32 %v8474_v36, %v8466_v35  ;;  %15659 = vtanh.f32 %v8479_v59 }
 0x825   :  { %v15642_v46 = vpop.eup %15641  ;;  %v8379_v38 = vadd.f32 1.0, %v15640_v5  ;;  %v8483_v54 = vadd.f32 %v8475_v16, %v8467_v60  ;;  %15661 = vtanh.f32 %v8480_v61  ;;  %v8567_v57 = vcombine.low %v8480_v61, %v8481_v23 }
 0x826   :  { %v15644_v31 = vpop.eup %15643  ;;  %v8380_v18 = vadd.f32 1.0, %v15642_v46  ;;  %15663 = vrcp.f32 %v8378_v37  ;;  %v18692_v48 = vrot.slane %v8597_v34, %v16279_v45 }
 0x827   :  { %v15646_v13 = vpop.eup %15645  ;;  %v8381_v49 = vadd.f32 1.0, %v15644_v31  ;;  %15665 = vrcp.f32 %v8379_v38  ;;  %v8568_v3 = vcombine.low %v8482_v58, %v8483_v54  ;;  %v8589_v30 = vrot.slane %v8567_v57, %v16279_v45 }
 0x828   :  { %v15648_v1 = vpop.eup %15647  ;;  %v8382_v14 = vadd.f32 1.0, %v15646_v13  ;;  %15667 = vrcp.f32 %v8380_v18 }
 0x829   :  { %v15650_v2 = vpop.eup %15649  ;;  %v8383_v55 = vadd.f32 1.0, %v15648_v1  ;;  %15669 = vrcp.f32 %v8381_v49  ;;  %v8596_v56 = vrot.slane %v8568_v3, %v16279_v45 }
 0x82a   :  { %v15652_v4 = vpop.eup %15651  ;;  %v8384_v22 = vadd.f32 1.0, %v15650_v2  ;;  %15671 = vrcp.f32 %v8382_v14 }
 0x82b   :  { %v15654_v21 = vpop.eup %15653  ;;  %v8385_v40 = vadd.f32 1.0, %v15652_v4  ;;  %15673 = vrcp.f32 %v8383_v55  ;;  %v8598_v6 = vcombine.low %v8589_v30, %v8596_v56 }
 0x82c   :  { %v15656_v24 = vpop.eup %15655  ;;  %15675 = vrcp.f32 %v8384_v22 }
 0x82d   :  { %v15658_v26 = vpop.eup %15657  ;;  %15677 = vrcp.f32 %v8385_v40  ;;  %v18695_v50 = vrot.slane %v8598_v6, %v16279_v45  ;;  %v14549_v6 = vld [vmem:[%s19688_s1] ss:$16 sps:$4 sm:$0xff]  }
 0x82e   :  { %v15660_v41 = vpop.eup %15659  ;;  %15679 = vtanh.f32 %v8481_v23 }
 0x82f   :  { %v15662_v27 = vpop.eup %15661  ;;  %15681 = vtanh.f32 %v8482_v58  ;;  %v8613_v42 = vcombine.low %v18692_v48, %v18695_v50  ;;  %v14681_v48 = vld [vmem:[%s19689_s2 + $0xc0] ss:$16 sps:$4 sm:$0xff]  }
 0x830   :  { %v15664_v7 = vpop.eup %15663  ;;  %15683 = vtanh.f32 %v8483_v54 }
 0x831   :  { %v15666_v47 = vpop.eup %15665  ;;  %v8492_v29 = vmul.f32 %v15664_v7, %v15654_v21  ;;  %v14560_v7 = vld [vmem:[%s19688_s1 + $0x2c] ss:$16 sps:$4 sm:$0xff]  }
 0x832   :  { %v15668_v52 = vpop.eup %15667  ;;  %v8493_v32 = vmul.f32 %v15666_v47, %v15656_v24  ;;  %v14552_v24 = vld [vmem:[%s19688_s1 + $0x8] ss:$16 sps:$4 sm:$0xff]   ;;  %v14555_v47 = vld [vmem:[%s19688_s1 + $0x20] ss:$16 sps:$4 sm:$0xff]  }
 0x833   :  { %v15670_v8 = vpop.eup %15669  ;;  %v8494_v43 = vmul.f32 %v15668_v52, %v15658_v26  ;;  %v8500_v19 = vpack.c.bf16 %v8492_v29, %v8492_v29  ;;  %v14558_v29 = vld [vmem:[%s19688_s1 + $0x28] ss:$16 sps:$4 sm:$0xff]   ;;  %v14563_v52 = vld [vmem:[%s19688_s1 + $0x44] ss:$16 sps:$4 sm:$0xff]  }
 0x834   :  { %v15672_v59 = vpop.eup %15671  ;;  %v8495_v15 = vmul.f32 %v15670_v8, %v15660_v41  ;;  %v8501_v25 = vpack.c.bf16 %v8493_v32, %v8493_v32  ;;  %v14566_v32 = vld [vmem:[%s19688_s1 + $0x4c] ss:$16 sps:$4 sm:$0xff]   ;;  %v14561_v8 = vld [vmem:[%s19688_s1 + $0x40] ss:$16 sps:$4 sm:$0xff]  }
 0x835   :  { %v15674_v61 = vpop.eup %15673  ;;  %v8496_v35 = vmul.f32 %v15672_v59, %v15662_v27  ;;  %v8502_v9 = vpack.c.bf16 %v8494_v43, %v8494_v43  ;;  %v8516_v36 = vunpack.c.l.b16 %v8500_v19  ;;  %v14557_v27 = vld [vmem:[%s19688_s1 + $0x24] ss:$16 sps:$4 sm:$0xff]   ;;  %v14564_v43 = vld [vmem:[%s19688_s1 + $0x48] ss:$16 sps:$4 sm:$0xff]   ;;  %v14567_v19 = vld [vmem:[%s19688_s1 + $0x60] ss:$16 sps:$4 sm:$0xff]  }
 0x836   :  { %v15676_v10 = vpop.eup %15675  ;;  %v8503_v60 = vpack.c.bf16 %v8495_v15, %v8495_v15  ;;  %v8517_v39 = vunpack.c.l.b16 %v8501_v25  ;;  %v14569_v59 = vld [vmem:[%s19688_s1 + $0x64] ss:$16 sps:$4 sm:$0xff]   ;;  %v14572_v15 = vld [vmem:[%s19688_s1 + $0x6c] ss:$16 sps:$4 sm:$0xff]   ;;  %v14570_v25 = vld [vmem:[%s19688_s1 + $0x68] ss:$16 sps:$4 sm:$0xff]  }
 0x837   :  { %v15678_v63 = vpop.eup %15677  ;;  %v8504_v11 = vpack.c.bf16 %v8496_v35, %v8496_v35  ;;  %v8518_v28 = vunpack.c.l.b16 %v8502_v9  ;;  %v14578_v35 = vld [vmem:[%s19688_s1 + $0x8c] ss:$16 sps:$4 sm:$0xff]   ;;  %v14573_v9 = vld [vmem:[%s19688_s1 + $0x80] ss:$16 sps:$4 sm:$0xff]  }
 0x838   :  { %v15680_v20 = vpop.eup %15679  ;;  %v8519_v62 = vunpack.c.l.b16 %v8503_v60  ;;  %v8540_v16 = vrot.slane %v8517_v39, 7  ;;  %v14581_v60 = vld [vmem:[%s19688_s1 + $0xa4] ss:$16 sps:$4 sm:$0xff]   ;;  %v14584_v39 = vld [vmem:[%s19688_s1 + $0xac] ss:$16 sps:$4 sm:$0xff]  }
 0x839   :  { %v15682_v23 = vpop.eup %15681  ;;  %v8497_v5 = vmul.f32 %v15680_v20, %v15674_v61  ;;  %v8520_v37 = vunpack.c.l.b16 %v8504_v11  ;;  %v8542_v34 = vrot.slane %v8518_v28, 6  ;;  %v14575_v61 = vld [vmem:[%s19688_s1 + $0x84] ss:$16 sps:$4 sm:$0xff]   ;;  %v14582_v11 = vld [vmem:[%s19688_s1 + $0xa8] ss:$16 sps:$4 sm:$0xff]  }
 0x83a   :  { %v15684_v58 = vpop.eup %15683  ;;  %v8498_v46 = vmul.f32 %v15682_v23, %v15676_v10  ;;  %v8541_v38 = vsel %vm769_vm0, %v8540_v16, %v8516_v36  ;;  %v8544_v54 = vrot.slane %v8519_v62, 5  ;;  %v14576_v10 = vld [vmem:[%s19688_s1 + $0x88] ss:$16 sps:$4 sm:$0xff]   ;;  %v14587_v28 = vld [vmem:[%s19688_s1 + $0xc4] ss:$16 sps:$4 sm:$0xff]  }
 0x83b   :  { %v8499_v57 = vmul.f32 %v15684_v58, %v15678_v63  ;;  %v8505_v31 = vpack.c.bf16 %v8497_v5, %v8497_v5  ;;  %v8543_v18 = vsel %vm772_vm1, %v8542_v34, %v8541_v38  ;;  %v8546_v13 = vrot.slane %v8520_v37, 4  ;;  %v14579_v63 = vld [vmem:[%s19688_s1 + $0xa0] ss:$16 sps:$4 sm:$0xff]   ;;  %v14590_v20 = vld [vmem:[%s19688_s1 + $0xcc] ss:$16 sps:$4 sm:$0xff]  }
 0x83c   :  { %v8506_v49 = vpack.c.bf16 %v8498_v46, %v8498_v46  ;;  %v8545_v3 = vsel %vm775_vm2, %v8544_v54, %v8543_v18  ;;  %v14585_v36 = vld [vmem:[%s19688_s1 + $0xc0] ss:$16 sps:$4 sm:$0xff]   ;;  %v14588_v62 = vld [vmem:[%s19688_s1 + $0xc8] ss:$16 sps:$4 sm:$0xff]   ;;  %v14593_v16 = vld [vmem:[%s19688_s1 + $0xe4] ss:$16 sps:$4 sm:$0xff]  }
 0x83d   :  { %v8507_v1 = vpack.c.bf16 %v8499_v57, %v8499_v57  ;;  %v8521_v14 = vunpack.c.l.b16 %v8505_v31  ;;  %v8547_v2 = vsel %vm778_vm3, %v8546_v13, %v8545_v3  ;;  %v14596_v23 = vld [vmem:[%s19688_s1 + $0xec] ss:$16 sps:$4 sm:$0xff]   ;;  %v14591_v5 = vld [vmem:[%s19688_s1 + $0xe0] ss:$16 sps:$4 sm:$0xff]   ;;  %v14594_v37 = vld [vmem:[%s19688_s1 + $0xe8] ss:$16 sps:$4 sm:$0xff]  }
 0x83e   :  { %v8522_v55 = vunpack.c.l.b16 %v8506_v49  ;;  %v14599_v58 = vld [vmem:[#allocation4 + $0x4] ss:$16 sps:$4 sm:$0xff]   ;;  %v14602_v46 = vld [vmem:[#allocation4 + $0xc] ss:$16 sps:$4 sm:$0xff]   ;;  %v14597_v38 = vld [vmem:[#allocation4] ss:$16 sps:$4 sm:$0xff]  }
 0x83f   :  { %v8523_v30 = vunpack.c.l.b16 %v8507_v1  ;;  %v8548_v56 = vrot.slane %v8521_v14, 3  ;;  %v14600_v54 = vld [vmem:[#allocation4 + $0x8] ss:$16 sps:$4 sm:$0xff]   ;;  %v14605_v57 = vld [vmem:[#allocation4 + $0x24] ss:$16 sps:$4 sm:$0xff]  }
 0x840   :  { %v8550_v4 = vrot.slane %v8522_v55, 2  ;;  %v14608_v31 = vld [vmem:[#allocation4 + $0x2c] ss:$16 sps:$4 sm:$0xff]   ;;  %v14603_v49 = vld [vmem:[#allocation4 + $0x20] ss:$16 sps:$4 sm:$0xff]  }
 0x841   :  { %v8549_v22 = vsel %vm781_vm4, %v8548_v56, %v8547_v2  ;;  %v8552_v21 = vrot.slane %v8523_v30, 1  ;;  %v14606_v3 = vld [vmem:[#allocation4 + $0x28] ss:$16 sps:$4 sm:$0xff]  }
 0x842   :  { %v8551_v40 = vsel %vm784_vm5, %v8550_v4, %v8549_v22  ;;  %v14611_v4 = vld [vmem:[#allocation4 + $0x44] ss:$16 sps:$4 sm:$0xff]   ;;  %v14614_v22 = vld [vmem:[#allocation4 + $0x4c] ss:$16 sps:$4 sm:$0xff]  }
 0x843   :  { %v8553_v26 = vsel %vm787_vm6, %v8552_v21, %v8551_v40  ;;  %v14609_v21 = vld [vmem:[#allocation4 + $0x40] ss:$16 sps:$4 sm:$0xff]   ;;  %v14612_v40 = vld [vmem:[#allocation4 + $0x48] ss:$16 sps:$4 sm:$0xff]  }
 0x844   :  { %v8554_v41 = vpack.c.b16 %v8553_v26, %v8553_v26  ;;  %v14615_v26 = vld [vmem:[#allocation4 + $0x60] ss:$16 sps:$4 sm:$0xff]  }
 0x846   :  { %9132 = vmatmul.mubr.bf16.vlgmr.msra.gmra.mrb[68].mxu0 %v8554_v41  ;;  %8556 = vst [vmem:[#allocation2] sm:$0xf] %v8554_v41  ;;  %9173 = vmatmul.mubr.bf16.vlgmr.msra.gmra.mrb[68].mxu1 %v8554_v41  ;;  %v14618_v41 = vld [vmem:[#allocation4 + $0x68] ss:$16 sps:$4 sm:$0xff]  }
 0x847   :  { %9576 = vmatpush1.bf16.msra.mxu0 %v14549_v6  ;;  %9617 = vmatpush1.bf16.msra.mxu1 %v14552_v24  ;;  %v14617_v6 = vld [vmem:[#allocation4 + $0x64] ss:$16 sps:$4 sm:$0xff]   ;;  %v14620_v24 = vld [vmem:[#allocation4 + $0x6c] ss:$16 sps:$4 sm:$0xff]  }
 0x848   :  { %9577 = vmatprep.subr.bf16.mxu0 %v14557_v27  ;;  %9618 = vmatprep.subr.bf16.mxu1 %v14560_v7  ;;  %v14623_v27 = vld [vmem:[#allocation4 + $0x84] ss:$16 sps:$4 sm:$0xff]   ;;  %v14626_v7 = vld [vmem:[#allocation4 + $0x8c] ss:$16 sps:$4 sm:$0xff]  }
 0x849   :  { %9607 = vmatprep.mubr.bf16.mxu0 %v16024_v0  ;;  %9648 = vmatprep.mubr.bf16.mxu1 %v16024_v0 }
 0x84b   :  { %9578 = vmatpush1.bf16.msra.mxu0 %v14555_v47  ;;  %9619 = vmatpush1.bf16.msra.mxu1 %v14558_v29  ;;  %v14621_v47 = vld [vmem:[#allocation4 + $0x80] ss:$16 sps:$4 sm:$0xff]   ;;  %v14624_v29 = vld [vmem:[#allocation4 + $0x88] ss:$16 sps:$4 sm:$0xff]  }
 0x84c   :  { %9579 = vmatprep.subr.bf16.mxu0 %v14563_v52  ;;  %9620 = vmatprep.subr.bf16.mxu1 %v14566_v32  ;;  %v14629_v52 = vld [vmem:[#allocation4 + $0xa4] ss:$16 sps:$4 sm:$0xff]   ;;  %v14632_v32 = vld [vmem:[#allocation4 + $0xac] ss:$16 sps:$4 sm:$0xff]  }
 0x84d   :  { %v9382_v34 = vld [vmem:[#allocation2] sm:$0xf] }
 0x84f   :  { %9580 = vmatpush1.bf16.msra.mxu0 %v14561_v8  ;;  %9621 = vmatpush1.bf16.msra.mxu1 %v14564_v43  ;;  %v14627_v8 = vld [vmem:[#allocation4 + $0xa0] ss:$16 sps:$4 sm:$0xff]   ;;  %v14630_v43 = vld [vmem:[#allocation4 + $0xa8] ss:$16 sps:$4 sm:$0xff]  }
 0x850   :  { %9581 = vmatprep.subr.bf16.mxu0 %v14569_v59  ;;  %9622 = vmatprep.subr.bf16.mxu1 %v14572_v15  ;;  %v14635_v59 = vld [vmem:[#allocation4 + $0xc4] ss:$16 sps:$4 sm:$0xff]   ;;  %v14638_v15 = vld [vmem:[#allocation4 + $0xcc] ss:$16 sps:$4 sm:$0xff]  }
 0x853   :  { %9582 = vmatpush1.bf16.msra.mxu0 %v14567_v19  ;;  %9623 = vmatpush1.bf16.msra.mxu1 %v14570_v25  ;;  %v14633_v19 = vld [vmem:[#allocation4 + $0xc0] ss:$16 sps:$4 sm:$0xff]   ;;  %v14636_v25 = vld [vmem:[#allocation4 + $0xc8] ss:$16 sps:$4 sm:$0xff]  }
 0x854   :  { %9583 = vmatprep.subr.bf16.mxu0 %v14575_v61  ;;  %9624 = vmatprep.subr.bf16.mxu1 %v14578_v35  ;;  %v14641_v61 = vld [vmem:[#allocation4 + $0xe4] ss:$16 sps:$4 sm:$0xff]   ;;  %v14644_v35 = vld [vmem:[#allocation4 + $0xec] ss:$16 sps:$4 sm:$0xff]  }
 0x857   :  { %9584 = vmatpush1.bf16.msra.mxu0 %v14573_v9  ;;  %9625 = vmatpush1.bf16.msra.mxu1 %v14576_v10  ;;  %v14639_v9 = vld [vmem:[#allocation4 + $0xe0] ss:$16 sps:$4 sm:$0xff]   ;;  %v14642_v10 = vld [vmem:[#allocation4 + $0xe8] ss:$16 sps:$4 sm:$0xff]  }
 0x858   :  { %9585 = vmatprep.subr.bf16.mxu0 %v14581_v60  ;;  %9626 = vmatprep.subr.bf16.mxu1 %v14584_v39  ;;  %v14647_v60 = vld [vmem:[%s19689_s2 + $0x4] ss:$16 sps:$4 sm:$0xff]   ;;  %v14650_v39 = vld [vmem:[%s19689_s2 + $0xc] ss:$16 sps:$4 sm:$0xff]  }
 0x85b   :  { %9586 = vmatpush1.bf16.msra.mxu0 %v14579_v63  ;;  %9627 = vmatpush1.bf16.msra.mxu1 %v14582_v11  ;;  %v9181_v63 = vld [vmem:[%s19691_s4] sm:$0xf] }
 0x85c   :  { %9587 = vmatprep.subr.bf16.mxu0 %v14587_v28  ;;  %9628 = vmatprep.subr.bf16.mxu1 %v14590_v20  ;;  %v9186_v11 = vrot.slane %v9181_v63, %v16524_v12 }
 0x85f   :  { %9588 = vmatpush1.bf16.msra.mxu0 %v14585_v36  ;;  %9629 = vmatpush1.bf16.msra.mxu1 %v14588_v62  ;;  %v9190_v36 = vrot.slane %v9181_v63, %v16530_v44 }
 0x860   :  { %9589 = vmatprep.subr.bf16.mxu0 %v14593_v16  ;;  %9630 = vmatprep.subr.bf16.mxu1 %v14596_v23 }
 0x863   :  { %9590 = vmatpush1.bf16.msra.mxu0 %v14591_v5  ;;  %9631 = vmatpush1.bf16.msra.mxu1 %v14594_v37 }
 0x864   :  { %10393 = vmatprep.subr.bf16.mxu0 %v14599_v58  ;;  %10434 = vmatprep.subr.bf16.mxu1 %v14602_v46 }
 0x866   :  { %9608 = vmatmul.mubr.bf16.vlgmr.msra.gmra.mrb[72].mxu0 %v9382_v34  ;;  %9649 = vmatmul.mubr.bf16.vlgmr.msra.gmra.mrb[72].mxu1 %v9382_v34 }
 0x867   :  { %10425 = vmatprep.mubr.bf16.mxu0 %v16024_v0  ;;  %10466 = vmatprep.mubr.bf16.mxu1 %v16024_v0 }
 0x868   :  { %10394 = vmatpush1.bf16.msra.mxu0 %v14597_v38  ;;  %10435 = vmatpush1.bf16.msra.mxu1 %v14600_v54 }
 0x869   :  { %10395 = vmatprep.subr.bf16.mxu0 %v14605_v57  ;;  %10436 = vmatprep.subr.bf16.mxu1 %v14608_v31 }
 0x86c   :  { %10396 = vmatpush1.bf16.msra.mxu0 %v14603_v49  ;;  %10437 = vmatpush1.bf16.msra.mxu1 %v14606_v3 }
 0x86d   :  { %10397 = vmatprep.subr.bf16.mxu0 %v14611_v4  ;;  %10438 = vmatprep.subr.bf16.mxu1 %v14614_v22 }
 0x870   :  { %10398 = vmatpush1.bf16.msra.mxu0 %v14609_v21  ;;  %10439 = vmatpush1.bf16.msra.mxu1 %v14612_v40 }
 0x871   :  { %10399 = vmatprep.subr.bf16.mxu0 %v14617_v6  ;;  %10440 = vmatprep.subr.bf16.mxu1 %v14620_v24 }
 0x874   :  { %10400 = vmatpush1.bf16.msra.mxu0 %v14615_v26  ;;  %10441 = vmatpush1.bf16.msra.mxu1 %v14618_v41 }
 0x875   :  { %10401 = vmatprep.subr.bf16.mxu0 %v14623_v27  ;;  %10442 = vmatprep.subr.bf16.mxu1 %v14626_v7 }
 0x878   :  { %10402 = vmatpush1.bf16.msra.mxu0 %v14621_v47  ;;  %10443 = vmatpush1.bf16.msra.mxu1 %v14624_v29 }
 0x879   :  { %10403 = vmatprep.subr.bf16.mxu0 %v14629_v52  ;;  %10444 = vmatprep.subr.bf16.mxu1 %v14632_v32 }
 0x87c   :  { %10404 = vmatpush1.bf16.msra.mxu0 %v14627_v8  ;;  %10445 = vmatpush1.bf16.msra.mxu1 %v14630_v43 }
 0x87d   :  { %10405 = vmatprep.subr.bf16.mxu0 %v14635_v59  ;;  %10446 = vmatprep.subr.bf16.mxu1 %v14638_v15 }
 0x880   :  { %10406 = vmatpush1.bf16.msra.mxu0 %v14633_v19  ;;  %10447 = vmatpush1.bf16.msra.mxu1 %v14636_v25 }
 0x881   :  { %10407 = vmatprep.subr.bf16.mxu0 %v14641_v61  ;;  %10448 = vmatprep.subr.bf16.mxu1 %v14644_v35 }
 0x884   :  { %10408 = vmatpush1.bf16.msra.mxu0 %v14639_v9  ;;  %10449 = vmatpush1.bf16.msra.mxu1 %v14642_v10 }
 0x885   :  { %10651 = vmatprep.subr.bf16.mxu0 %v14647_v60  ;;  %10692 = vmatprep.subr.bf16.mxu1 %v14650_v39 }
 0x8c8   :  { %v18800_v18 = vpop.f32.mrb[64].mxu0  ;;  %v18802_v13 = vpop.f32.mrb[64].mxu1 }
 0x8c9   :  { %v18804_v1 = vpop.f32.mrb[65].mxu0  ;;  %v18806_v14 = vpop.f32.mrb[65].mxu1 }
 0x8ca   :  { %v8879_v2 = vpop.f32.mrb[66].mxu0  ;;  %v8920_v55 = vpop.f32.mrb[66].mxu1 }
 0x8cb   :  { %v8880_v30 = vpop.f32.mrb[67].mxu0  ;;  %v8921_v56 = vpop.f32.mrb[67].mxu1  ;;  %v9198_v2 = vrot.slane %v9181_v63, %v16539_v53 }
 0x919   :  { %v9133_v28 = vpop.f32.mrb[68].mxu0  ;;  %v9174_v20 = vpop.f32.mrb[68].mxu1 }
 0x91a   :  { %v9134_v62 = vadd.f32 %v9133_v28, %v18800_v18  ;;  %v9175_v16 = vadd.f32 %v9174_v20, %v18802_v13  ;;  %v9135_v23 = vpop.f32.mrb[69].mxu0  ;;  %v9176_v5 = vpop.f32.mrb[69].mxu1  ;;  %v9194_v13 = vrot.slane %v9181_v63, %v16543_v17  ;;  %v13333_v63 = vld [vmem:[%s19687_s0 + $0x6] ss:$8 sm:$0xf] }
 0x91b   :  { %v9136_v37 = vadd.f32 %v9135_v23, %v18804_v1  ;;  %v9177_v34 = vadd.f32 %v9176_v5, %v18806_v14  ;;  %v9137_v58 = vpop.f32.mrb[70].mxu0  ;;  %v9178_v46 = vpop.f32.mrb[70].mxu1  ;;  %v13335_v5 = vld [vmem:[%s19687_s0 + $0x46] ss:$8 sm:$0xf] }
 0x91c   :  { %v9203_v38 = vadd.f32 %v9186_v11, %v9134_v62  ;;  %v9138_v54 = vpop.f32.mrb[71].mxu0  ;;  %v9179_v57 = vpop.f32.mrb[71].mxu1  ;;  %v9205_v30 = vadd.f32 %v9194_v13, %v9175_v16  ;;  %v13334_v11 = vld [vmem:[%s19687_s0 + $0x26] ss:$8 sm:$0xf] }
 0x91d   :  { %v9204_v31 = vadd.f32 %v9190_v36, %v9136_v37  ;;  %v9206_v18 = vadd.f32 %v9198_v2, %v9177_v34  ;;  %v13337_v36 = vld [vmem:[%s19687_s0 + $0x86] ss:$8 sm:$0xf] }
 0x91e   :  { %v13326_v49 = vmul.f32 -1.442695, %v9203_v38  ;;  %v13338_v62 = vld [vmem:[%s19687_s0 + $0xa6] ss:$8 sm:$0xf] }
 0x91f   :  { %v13327_v3 = vmul.f32 -1.442695, %v9204_v31  ;;  %v13328_v55 = vmul.f32 -1.442695, %v9206_v18 }
 0x920   :  { %15685 = vpow2.f32 %v13326_v49  ;;  %v13336_v37 = vld [vmem:[%s19687_s0 + $0x66] ss:$8 sm:$0xf] }
 0x921   :  { %15687 = vpow2.f32 %v13327_v3  ;;  %v13339_v46 = vld [vmem:[%s19687_s0 + $0xc6] ss:$8 sm:$0xf] }
 0x922   :  { %15689 = vpow2.f32 %v13328_v55  ;;  %v13340_v38 = vld [vmem:[%s19687_s0 + $0xe6] ss:$8 sm:$0xf] }
 0x923   :  { %15691 = vtanh.f32 %v9205_v30 }
 0x92a   :  { %v15686_v1 = vpop.eup %15685 }
 0x92b   :  { %v15688_v56 = vpop.eup %15687  ;;  %v9211_v14 = vadd.f32 1.0, %v15686_v1 }
 0x92c   :  { %v9217_v4 = vadd.f32 1.0, %v15688_v56  ;;  %v15690_v22 = vpop.eup %15689 }
 0x92d   :  { %15693 = vrcp.f32 %v9211_v14  ;;  %v15692_v21 = vpop.eup %15691  ;;  %v9224_v26 = vadd.f32 1.0, %v15690_v22 }
 0x92e   :  { %15695 = vrcp.f32 %v9217_v4 }
 0x92f   :  { %15697 = vrcp.f32 %v9224_v26 }
 0x937   :  { %v15694_v40 = vpop.eup %15693 }
 0x938   :  { %v15696_v6 = vpop.eup %15695  ;;  %v9228_v24 = vmul.f32 %v15694_v40, %v15692_v21 }
 0x939   :  { %v9227_v41 = vmul.f32 %v15696_v6, %v18370_v51  ;;  %v9609_v27 = vpop.f32.mrb[72].mxu0  ;;  %v9650_v7 = vpop.f32.mrb[72].mxu1 }
 0x93a   :  { %v9611_v47 = vpop.f32.mrb[73].mxu0  ;;  %v9652_v29 = vpop.f32.mrb[73].mxu1 }
 0x93b   :  { %v18826_v52 = vadd.f32 %v9228_v24, %v9227_v41  ;;  %v9661_v32 = vcombine.low %v9609_v27, %v9611_v47  ;;  %v9662_v8 = vcombine.high %v9609_v27, %v9611_v47  ;;  %v9663_v43 = vcombine.low %v9650_v7, %v9652_v29  ;;  %v9613_v59 = vpop.f32.mrb[74].mxu0  ;;  %v9654_v15 = vpop.f32.mrb[74].mxu1 }
 0x93c   :  { %v9664_v19 = vcombine.high %v9650_v7, %v9652_v29  ;;  %v9614_v25 = vpop.f32.mrb[75].mxu0  ;;  %v9655_v61 = vpop.f32.mrb[75].mxu1 }
 0x93d   :  { %15699 = vtanh.f32 %v18826_v52  ;;  %v9671_v35 = vrot.slane %v9661_v32, %v16279_v45  ;;  %v9678_v51 = vrot.slane %v9662_v8, %v16279_v45  ;;  %v9685_v9 = vrot.slane %v9663_v43, %v16279_v45  ;;  %v15698_v14 = vpop.eup %15697 }
 0x93e   :  { %v9692_v10 = vrot.slane %v9664_v19, %v16279_v45 }
 0x93f   :  { %v9693_v60 = vcombine.low %v9671_v35, %v9685_v9  ;;  %v9694_v39 = vcombine.high %v9671_v35, %v9685_v9 }
 0x940   :  { %v9695_v28 = vcombine.low %v9678_v51, %v9692_v10  ;;  %v9696_v20 = vcombine.high %v9678_v51, %v9692_v10  ;;  %v14645_v10 = vld [vmem:[%s19689_s2] ss:$16 sps:$4 sm:$0xff]  }
 0x941   :  { %v9703_v16 = vrot.slane %v9693_v60, %v16279_v45  ;;  %v9717_v23 = vrot.slane %v9694_v39, %v16279_v45 }
 0x942   :  { %v9710_v34 = vrot.slane %v9695_v28, %v16279_v45  ;;  %v9724_v58 = vrot.slane %v9696_v20, %v16279_v45 }
 0x943   :  { %v9725_v54 = vcombine.high %v9703_v16, %v9703_v16  ;;  %v9727_v57 = vcombine.high %v9717_v23, %v9717_v23  ;;  %v18861_v31 = vadd.f32 %v13333_v63, %v9703_v16  ;;  %v18863_v49 = vadd.f32 %v13334_v11, %v9717_v23 }
 0x944   :  { %v9726_v3 = vcombine.high %v9710_v34, %v9710_v34  ;;  %v9728_v2 = vcombine.high %v9724_v58, %v9724_v58  ;;  %v18865_v18 = vadd.f32 %v13337_v36, %v9710_v34  ;;  %v18867_v13 = vadd.f32 %v13338_v62, %v9724_v58  ;;  %v14648_v36 = vld [vmem:[%s19689_s2 + $0x8] ss:$16 sps:$4 sm:$0xff]   ;;  %v14653_v62 = vld [vmem:[%s19689_s2 + $0x24] ss:$16 sps:$4 sm:$0xff]  }
 0x945   :  { %v18869_v55 = vadd.f32 %v13335_v5, %v9725_v54  ;;  %v18871_v30 = vadd.f32 %v13336_v37, %v9727_v57  ;;  %v13373_v1 = vmul.f32 -1.442695, %v18861_v31  ;;  %v13374_v56 = vmul.f32 -1.442695, %v18863_v49 }
 0x946   :  { %v18875_v4 = vadd.f32 %v13339_v46, %v9726_v3  ;;  %v18877_v22 = vadd.f32 %v13340_v38, %v9728_v2  ;;  %v13377_v21 = vmul.f32 -1.442695, %v18865_v18  ;;  %v9802_v26 = vrot.slane %v18861_v31, 1  ;;  %v14656_v46 = vld [vmem:[%s19689_s2 + $0x2c] ss:$16 sps:$4 sm:$0xff]  }
 0x947   :  { %v15700_v40 = vpop.eup %15699  ;;  %15701 = vpow2.f32 %v13373_v1  ;;  %v13375_v6 = vmul.f32 -1.442695, %v18869_v55  ;;  %v13376_v24 = vmul.f32 -1.442695, %v18871_v30  ;;  %v13378_v27 = vmul.f32 -1.442695, %v18867_v13 }
 0x948   :  { %v9231_v41 = vmul.f32 %v15700_v40, %v15698_v14  ;;  %15703 = vpow2.f32 %v13374_v56  ;;  %v13379_v7 = vmul.f32 -1.442695, %v18875_v4  ;;  %v9803_v47 = vrot.slane %v18863_v49, 1  ;;  %v9342_v1 = vld [vmem:[%s19692_s5] sm:$0x4] }
 0x949   :  { %15705 = vpow2.f32 %v13375_v6  ;;  %v13380_v32 = vmul.f32 -1.442695, %v18877_v22  ;;  %v13381_v8 = vmul.f32 -1.442695, %v9802_v26  ;;  %v9345_v56 = vld [vmem:[%s19692_s5 + $0x4] sm:$0x4] }
 0x94a   :  { %v9232_v29 = vpack.c.bf16 %v9231_v41, %v9231_v41  ;;  %15707 = vpow2.f32 %v13376_v24  ;;  %v13382_v59 = vmul.f32 -1.442695, %v9803_v47  ;;  %v9348_v14 = vld [vmem:[%s19692_s5 + $0x8] sm:$0x4]  ;;  %v9351_v41 = vld [vmem:[%s19692_s5 + $0xc] sm:$0x4] }
 0x94b   :  { %15709 = vpow2.f32 %v13377_v21 }
 0x94c   :  { %v9242_v43 = vrot.slane %v9232_v29, %v16279_v45  ;;  %9233 = vst [vmem:[#allocation2 + $0x4] sm:$0xf] %v9232_v29  ;;  %15711 = vpow2.f32 %v13378_v27  ;;  %v9354_v27 = vld [vmem:[%s19692_s5 + $0x10] sm:$0x4] }
 0x94d   :  { %15713 = vpow2.f32 %v13379_v7  ;;  %v14651_v7 = vld [vmem:[%s19689_s2 + $0x20] ss:$16 sps:$4 sm:$0xff]  }
 0x94e   :  { %v9243_v15 = vcombine.high %v9242_v43, %v9242_v43  ;;  %v9250_v19 = vrot.slane %v9242_v43, %v16279_v45  ;;  %15715 = vpow2.f32 %v13380_v32 }
 0x94f   :  { %15717 = vpow2.f32 %v13381_v8 }
 0x950   :  { %v9257_v25 = vrot.slane %v9243_v15, %v16279_v45  ;;  %v9258_v61 = vcombine.high %v9250_v19, %v9250_v19  ;;  %v9261_v35 = vunpack.i.h.s16 %v9250_v19  ;;  %v13329_v51 = vpack.i.b16 %v9250_v19, %v9250_v19  ;;  %v14654_v15 = vld [vmem:[%s19689_s2 + $0x28] ss:$16 sps:$4 sm:$0xff]   ;;  %v14659_v19 = vld [vmem:[%s19689_s2 + $0x44] ss:$16 sps:$4 sm:$0xff]  }
 0x951   :  { %v15702_v9 = vpop.eup %15701  ;;  %15719 = vpow2.f32 %v13382_v59  ;;  %v9357_v59 = vld [vmem:[%s19692_s5 + $0x14] sm:$0x4] }
 0x952   :  { %v15704_v60 = vpop.eup %15703  ;;  %v9259_v39 = vcombine.high %v9257_v25, %v9257_v25  ;;  %v9263_v63 = vunpack.i.h.s16 %v9257_v25  ;;  %v9265_v11 = vunpack.i.h.s16 %v9258_v61  ;;  %v9269_v28 = vpack.i.b16 %v9261_v35, %v9261_v35 }
 0x953   :  { %v15706_v16 = vpop.eup %15705  ;;  %v13330_v23 = vpack.i.b16 %v9257_v25, %v9257_v25  ;;  %v13331_v5 = vpack.i.b16 %v9258_v61, %v9258_v61  ;;  %v9282_v37 = vrot.slane %v13329_v51, %v16610_v33  ;;  %v9770_v34 = vadd.f32 1.0, %v15702_v9  ;;  %v10200_v58 = vld [vmem:[#allocation2 + $0x4] sm:$0xf]  ;;  %v9360_v9 = vld [vmem:[%s19692_s5 + $0x18] sm:$0x4] }
 0x954   :  { %v15708_v38 = vpop.eup %15707  ;;  %v9267_v54 = vunpack.i.h.s16 %v9259_v39  ;;  %v9271_v57 = vpack.i.b16 %v9263_v63, %v9263_v63  ;;  %v9273_v3 = vpack.i.b16 %v9265_v11, %v9265_v11  ;;  %v13332_v2 = vpack.i.b16 %v9259_v39, %v9259_v39  ;;  %10426 = vmatmul.mubr.bf16.vlgmr.msra.gmra.mrb[76].mxu0 %v10200_v58  ;;  %10467 = vmatmul.mubr.bf16.vlgmr.msra.gmra.mrb[76].mxu1 %v10200_v58  ;;  %v14662_v39 = vld [vmem:[%s19689_s2 + $0x4c] ss:$16 sps:$4 sm:$0xff]   ;;  %v14657_v58 = vld [vmem:[%s19689_s2 + $0x40] ss:$16 sps:$4 sm:$0xff]  }
 0x955   :  { %v15710_v21 = vpop.eup %15709  ;;  %v9289_v40 = vrot.slane %v9269_v28, %v16610_v33  ;;  %v9296_v6 = vrot.slane %v13330_v23, %v16610_v33  ;;  %v9310_v24 = vrot.slane %v13331_v5, %v16610_v33  ;;  %v9343_v26 = vsel %vm18894_vm10, %v9282_v37, %v9342_v1  ;;  %10652 = vmatpush1.bf16.msra.mxu0 %v14645_v10  ;;  %v9363_v23 = vld [vmem:[%s19692_s5 + $0x1c] sm:$0x4] }
 0x956   :  { %v15712_v47 = vpop.eup %15711  ;;  %v9275_v29 = vpack.i.b16 %v9267_v54, %v9267_v54  ;;  %v9303_v32 = vrot.slane %v9271_v57, %v16610_v33  ;;  %v9317_v8 = vrot.slane %v9273_v3, %v16610_v33  ;;  %v9324_v43 = vrot.slane %v13332_v2, %v16610_v33  ;;  %9344 = vst [vmem:[%s19692_s5] sm:$0x4] %v9343_v26  ;;  %v14668_v2 = vld [vmem:[%s19689_s2 + $0x6c] ss:$16 sps:$4 sm:$0xff]  }
 0x957   :  { %10693 = vmatpush1.bf16.msra.mxu1 %v14648_v36  ;;  %v15714_v25 = vpop.eup %15713  ;;  %v9346_v61 = vsel %vm18894_vm10, %v9289_v40, %v9345_v56  ;;  %v9349_v35 = vsel %vm18894_vm10, %v9296_v6, %v9348_v14  ;;  %v9355_v51 = vsel %vm18894_vm10, %v9310_v24, %v9354_v27  ;;  %v9771_v10 = vadd.f32 1.0, %v15704_v60  ;;  %10653 = vmatprep.subr.bf16.mxu0 %v14653_v62  ;;  %v14663_v40 = vld [vmem:[%s19689_s2 + $0x60] ss:$16 sps:$4 sm:$0xff]   ;;  %v14666_v6 = vld [vmem:[%s19689_s2 + $0x68] ss:$16 sps:$4 sm:$0xff]  }
 0x958   :  { %10694 = vmatprep.subr.bf16.mxu1 %v14656_v46  ;;  %v15716_v63 = vpop.eup %15715  ;;  %v9331_v11 = vrot.slane %v9275_v29, %v16610_v33  ;;  %9347 = vst [vmem:[%s19692_s5 + $0x4] sm:$0x4] %v9346_v61  ;;  %9350 = vst [vmem:[%s19692_s5 + $0x8] sm:$0x4] %v9349_v35  ;;  %v9352_v60 = vsel %vm18894_vm10, %v9303_v32, %v9351_v41  ;;  %v9358_v28 = vsel %vm18894_vm10, %v9317_v8, %v9357_v59  ;;  %v14671_v41 = vld [vmem:[%s19689_s2 + $0x84] ss:$16 sps:$4 sm:$0xff]  }
 0x959   :  { %9356 = vst [vmem:[%s19692_s5 + $0x10] sm:$0x4] %v9355_v51  ;;  %v9361_v36 = vsel %vm18894_vm10, %v9324_v43, %v9360_v9  ;;  %10683 = vmatprep.mubr.bf16.mxu0 %v16024_v0  ;;  %v15718_v62 = vpop.eup %15717  ;;  %9353 = vst [vmem:[%s19692_s5 + $0xc] sm:$0x4] %v9352_v60  ;;  %v9772_v5 = vadd.f32 1.0, %v15706_v16  ;;  %v9773_v37 = vadd.f32 1.0, %v15708_v38  ;;  %10654 = vmatpush1.bf16.msra.mxu0 %v14651_v7  ;;  %15721 = vrcp.f32 %v9770_v34 }
 0x95a   :  { %9359 = vst [vmem:[%s19692_s5 + $0x14] sm:$0x4] %v9358_v28  ;;  %9362 = vst [vmem:[%s19692_s5 + $0x18] sm:$0x4] %v9361_v36  ;;  %10724 = vmatprep.mubr.bf16.mxu1 %v16024_v0  ;;  %v9364_v46 = vsel %vm18894_vm10, %v9331_v11, %v9363_v23  ;;  %v9774_v54 = vadd.f32 1.0, %v15710_v21  ;;  %v9804_v57 = vrot.slane %v18869_v55, 1  ;;  %10655 = vmatprep.subr.bf16.mxu0 %v14659_v19  ;;  %15723 = vrcp.f32 %v9771_v10 }
 0x95b   :  { %10695 = vmatpush1.bf16.msra.mxu1 %v14654_v15  ;;  %v14660_v16 = vld [vmem:[%s19689_s2 + $0x48] ss:$16 sps:$4 sm:$0xff]   ;;  %v14665_v38 = vld [vmem:[%s19689_s2 + $0x64] ss:$16 sps:$4 sm:$0xff]   ;;  %v15720_v3 = vpop.eup %15719  ;;  %9365 = vst [vmem:[%s19692_s5 + $0x1c] sm:$0x4] %v9364_v46  ;;  %15725 = vrcp.f32 %v9772_v5  ;;  %v9962_v23 = vrot.slane %v8613_v42, %v16279_v45 }
 0x95c   :  { %v9775_v20 = vadd.f32 1.0, %v15712_v47  ;;  %v9805_v34 = vrot.slane %v18871_v30, 1  ;;  %10696 = vmatprep.subr.bf16.mxu1 %v14662_v39  ;;  %v9776_v1 = vadd.f32 1.0, %v15714_v25  ;;  %v9806_v56 = vrot.slane %v18865_v18, 1  ;;  %v14674_v47 = vld [vmem:[%s19689_s2 + $0x8c] ss:$16 sps:$4 sm:$0xff]  }
 0x95d   :  { %v9777_v14 = vadd.f32 1.0, %v15716_v63  ;;  %15727 = vrcp.f32 %v9773_v37  ;;  %v9807_v21 = vrot.slane %v18867_v13, 1  ;;  %10656 = vmatpush1.bf16.msra.mxu0 %v14657_v58  ;;  %v9808_v24 = vrot.slane %v18875_v4, 1  ;;  %v14669_v8 = vld [vmem:[%s19689_s2 + $0x80] ss:$16 sps:$4 sm:$0xff]  }
 0x95e   :  { %15729 = vrcp.f32 %v9774_v54  ;;  %v13383_v26 = vmul.f32 -1.442695, %v9804_v57  ;;  %10657 = vmatprep.subr.bf16.mxu0 %v14665_v38  ;;  %v9809_v27 = vrot.slane %v18877_v22, 1  ;;  %v13384_v7 = vmul.f32 -1.442695, %v9805_v34 }
 0x95f   :  { %10697 = vmatpush1.bf16.msra.mxu1 %v14660_v16  ;;  %15731 = vrcp.f32 %v9775_v20  ;;  %v13385_v29 = vmul.f32 -1.442695, %v9806_v56  ;;  %v13386_v32 = vmul.f32 -1.442695, %v9807_v21  ;;  %v13387_v43 = vmul.f32 -1.442695, %v9808_v24 }
 0x960   :  { %10698 = vmatprep.subr.bf16.mxu1 %v14668_v2  ;;  %15733 = vrcp.f32 %v9776_v1  ;;  %v14672_v59 = vld [vmem:[%s19689_s2 + $0x88] ss:$16 sps:$4 sm:$0xff]   ;;  %v14677_v15 = vld [vmem:[%s19689_s2 + $0xa4] ss:$16 sps:$4 sm:$0xff]   ;;  %v13388_v19 = vmul.f32 -1.442695, %v9809_v27  ;;  %v13688_v63 = vcombine.low %v18695_v50, %v18695_v50  ;;  %v9970_v20 = vcombine.high %v9962_v23, %v9962_v23 }
 0x961   :  { %15735 = vrcp.f32 %v9777_v14  ;;  %10658 = vmatpush1.bf16.msra.mxu0 %v14663_v40  ;;  %v14680_v25 = vld [vmem:[%s19689_s2 + $0xac] ss:$16 sps:$4 sm:$0xff]   ;;  %v9842_v35 = vadd.f32 1.0, %v15718_v62  ;;  %v9843_v9 = vadd.f32 1.0, %v15720_v3  ;;  %v14675_v10 = vld [vmem:[%s19689_s2 + $0xa0] ss:$16 sps:$4 sm:$0xff]   ;;  %v19087_v34 = vrot.slane %v9962_v23, %v16279_v45 }
 0x962   :  { %15737 = vpow2.f32 %v13383_v26  ;;  %10659 = vmatprep.subr.bf16.mxu0 %v14671_v41  ;;  %v9866_v11 = vrot.slane %v18861_v31, 2  ;;  %v14678_v60 = vld [vmem:[%s19689_s2 + $0xa8] ss:$16 sps:$4 sm:$0xff]   ;;  %v14683_v28 = vld [vmem:[%s19689_s2 + $0xc4] ss:$16 sps:$4 sm:$0xff]   ;;  %v9867_v62 = vrot.slane %v18863_v49, 2  ;;  %v19076_v57 = vrot.slane %v13688_v63, %v16279_v45 }
 0x963   :  { %10699 = vmatpush1.bf16.msra.mxu1 %v14666_v6  ;;  %15739 = vpow2.f32 %v13384_v7  ;;  %v19035_v61 = vpop.eup %15721  ;;  %v14686_v5 = vld [vmem:[%s19689_s2 + $0xcc] ss:$16 sps:$4 sm:$0xff]   ;;  %v9868_v58 = vrot.slane %v18869_v55, 2  ;;  %v9869_v54 = vrot.slane %v18871_v30, 2  ;;  %v9870_v42 = vrot.slane %v18865_v18, 2 }
 0x964   :  { %10700 = vmatprep.subr.bf16.mxu1 %v14674_v47  ;;  %15741 = vpow2.f32 %v13385_v29  ;;  %v19037_v51 = vpop.eup %15723  ;;  %v14684_v16 = vld [vmem:[%s19689_s2 + $0xc8] ss:$16 sps:$4 sm:$0xff]   ;;  %v14689_v38 = vld [vmem:[%s19689_s2 + $0xe4] ss:$16 sps:$4 sm:$0xff]   ;;  %v14692_v2 = vld [vmem:[%s19689_s2 + $0xec] ss:$16 sps:$4 sm:$0xff]   ;;  %v19097_v24 = vrot.slane %v19076_v57, %v16279_v45  ;;  %v9971_v27 = vcombine.high %v19076_v57, %v19076_v57  ;;  %v19108_v29 = vrot.slane %v9970_v20, %v16279_v45 }
 0x965   :  { %15743 = vpow2.f32 %v13386_v32  ;;  %10660 = vmatpush1.bf16.msra.mxu0 %v14669_v8  ;;  %v19042_v39 = vpop.eup %15725  ;;  %v14687_v21 = vld [vmem:[%s19689_s2 + $0xe0] ss:$16 sps:$4 sm:$0xff]   ;;  %v14690_v26 = vld [vmem:[%s19689_s2 + $0xe8] ss:$16 sps:$4 sm:$0xff]   ;;  %v14695_v41 = vld [vmem:[%s19688_s1 + $0x4] ss:$16 sps:$4 sm:$0xff]   ;;  %v10000_v32 = vcombine.high %v19087_v34, %v19087_v34 }
 0x966   :  { %15745 = vpow2.f32 %v13387_v43  ;;  %10661 = vmatprep.subr.bf16.mxu0 %v14677_v15  ;;  %v14698_v8 = vld [vmem:[%s19688_s1 + $0xc] ss:$16 sps:$4 sm:$0xff]   ;;  %v9871_v15 = vrot.slane %v18867_v13, 2  ;;  %v9894_v23 = vrot.slane %v18865_v18, 3  ;;  %v9999_v20 = vrot.slane %v9971_v27, %v16279_v45 }
 0x967   :  { %10701 = vmatpush1.bf16.msra.mxu1 %v14672_v59  ;;  %v19053_v36 = vpop.eup %15727  ;;  %15747 = vpow2.f32 %v13388_v19  ;;  %v9890_v19 = vrot.slane %v18861_v31, 3  ;;  %v9893_v31 = vrot.slane %v18871_v30, 3 }
 0x968   :  { %10702 = vmatprep.subr.bf16.mxu1 %v14680_v25  ;;  %v19063_v37 = vpop.eup %15729  ;;  %15749 = vrcp.f32 %v9842_v35 }
 0x969   :  { %v19066_v46 = vpop.eup %15731  ;;  %15751 = vrcp.f32 %v9843_v9  ;;  %10662 = vmatpush1.bf16.msra.mxu0 %v14675_v10  ;;  %v9872_v9 = vrot.slane %v18875_v4, 2  ;;  %v9891_v10 = vrot.slane %v18863_v49, 3 }
 0x96a   :  { %v19072_v50 = vpop.eup %15733  ;;  %15753 = vtanh.f32 %v9866_v11  ;;  %10663 = vmatprep.subr.bf16.mxu0 %v14683_v28  ;;  %v9892_v28 = vrot.slane %v18869_v55, 3  ;;  %v9896_v55 = vrot.slane %v18875_v4, 3  ;;  %v10002_v4 = vcombine.high %v19108_v29, %v19108_v29 }
 0x96b   :  { %10703 = vmatpush1.bf16.msra.mxu1 %v14678_v60  ;;  %v19084_v3 = vpop.eup %15735  ;;  %15755 = vtanh.f32 %v9867_v62  ;;  %v9873_v60 = vrot.slane %v18877_v22, 2  ;;  %v13390_v57 = vmul.f32 -1.442695, %v9891_v10 }
 0x96c   :  { %10704 = vmatprep.subr.bf16.mxu1 %v14686_v5  ;;  %v15738_v1 = vpop.eup %15737  ;;  %15757 = vtanh.f32 %v9868_v58  ;;  %v9895_v58 = vrot.slane %v18867_v13, 3  ;;  %v13391_v18 = vmul.f32 -1.442695, %v9892_v28  ;;  %v9897_v13 = vrot.slane %v18877_v22, 3 }
 0x96d   :  { %v15740_v56 = vpop.eup %15739  ;;  %v9844_v14 = vadd.f32 1.0, %v15738_v1  ;;  %15759 = vtanh.f32 %v9869_v54  ;;  %10664 = vmatpush1.bf16.msra.mxu0 %v14681_v48  ;;  %v13389_v54 = vmul.f32 -1.442695, %v9890_v19 }
 0x96e   :  { %v15742_v40 = vpop.eup %15741  ;;  %v9845_v6 = vadd.f32 1.0, %v15740_v56  ;;  %15761 = vtanh.f32 %v9870_v42  ;;  %10665 = vmatprep.subr.bf16.mxu0 %v14689_v38 }
 0x96f   :  { %10705 = vmatpush1.bf16.msra.mxu1 %v14684_v16  ;;  %v15744_v7 = vpop.eup %15743  ;;  %v9846_v47 = vadd.f32 1.0, %v15742_v40  ;;  %15763 = vrcp.f32 %v9844_v14  ;;  %v13393_v14 = vmul.f32 -1.442695, %v9894_v23  ;;  %v13394_v40 = vmul.f32 -1.442695, %v9895_v58 }
 0x970   :  { %10706 = vmatprep.subr.bf16.mxu1 %v14692_v2  ;;  %v15746_v43 = vpop.eup %15745  ;;  %v9847_v59 = vadd.f32 1.0, %v15744_v7  ;;  %15765 = vrcp.f32 %v9845_v6  ;;  %v13392_v2 = vmul.f32 -1.442695, %v9893_v31  ;;  %v13395_v6 = vmul.f32 -1.442695, %v9896_v55 }
 0x971   :  { %v15748_v25 = vpop.eup %15747  ;;  %v9848_v35 = vadd.f32 1.0, %v15746_v43  ;;  %15767 = vrcp.f32 %v9846_v47  ;;  %10666 = vmatpush1.bf16.msra.mxu0 %v14687_v21  ;;  %v13396_v47 = vmul.f32 -1.442695, %v9897_v13 }
 0x972   :  { %v15750_v63 = vpop.eup %15749  ;;  %v9849_v11 = vadd.f32 1.0, %v15748_v25  ;;  %15769 = vrcp.f32 %v9847_v59  ;;  %11128 = vmatprep.subr.bf16.mxu0 %v14695_v41 }
 0x973   :  { %10707 = vmatpush1.bf16.msra.mxu1 %v14690_v26  ;;  %v15752_v62 = vpop.eup %15751  ;;  %15771 = vrcp.f32 %v9848_v35  ;;  %v10012_v5 = vmul.f32 %v15750_v63, %v19087_v34 }
 0x974   :  { %11169 = vmatprep.subr.bf16.mxu1 %v14698_v8  ;;  %v15754_v49 = vpop.eup %15753  ;;  %15773 = vrcp.f32 %v9849_v11  ;;  %v10013_v48 = vmul.f32 %v15752_v62, %v19108_v29 }
 0x975   :  { %v15756_v42 = vpop.eup %15755  ;;  %15775 = vtanh.f32 %v9871_v15  ;;  %v10020_v16 = vmul.f32 %v15754_v49, %v19035_v61 }
 0x976   :  { %v15758_v30 = vpop.eup %15757  ;;  %15777 = vtanh.f32 %v9872_v9  ;;  %v10021_v38 = vmul.f32 %v15756_v42, %v19037_v51  ;;  %v10001_v51 = vcombine.high %v19097_v24, %v19097_v24 }
 0x977   :  { %v15760_v34 = vpop.eup %15759  ;;  %15779 = vtanh.f32 %v9873_v60  ;;  %v10028_v1 = vadd.f32 %v10020_v16, %v10012_v5  ;;  %v10022_v22 = vmul.f32 %v15758_v30, %v19042_v39 }
 0x978   :  { %v15762_v56 = vpop.eup %15761  ;;  %15781 = vpow2.f32 %v13389_v54  ;;  %v10029_v61 = vadd.f32 %v10021_v38, %v10013_v48  ;;  %v10023_v29 = vmul.f32 %v15760_v34, %v19053_v36 }
 0x979   :  { %v15764_v21 = vpop.eup %15763  ;;  %15783 = vpow2.f32 %v13390_v57  ;;  %v10024_v15 = vmul.f32 %v15762_v56, %v19063_v37 }
 0x97a   :  { %v15766_v26 = vpop.eup %15765  ;;  %15785 = vpow2.f32 %v13391_v18  ;;  %v10014_v41 = vmul.f32 %v15764_v21, %v10000_v32  ;;  %v10117_v27 = vcombine.low %v10028_v1, %v10029_v61  ;;  %v10003_v32 = vcombine.high %v9999_v20, %v9999_v20 }
 0x97b   :  { %v15768_v7 = vpop.eup %15767  ;;  %15787 = vpow2.f32 %v13392_v2  ;;  %v10015_v8 = vmul.f32 %v15766_v26, %v10002_v4 }
 0x97c   :  { %v15770_v43 = vpop.eup %15769  ;;  %15789 = vpow2.f32 %v13393_v14  ;;  %v10016_v59 = vmul.f32 %v15768_v7, %v19097_v24  ;;  %v10030_v19 = vadd.f32 %v10022_v22, %v10014_v41  ;;  %v10127_v37 = vrot.slane %v10117_v27, %v16279_v45 }
 0x97d   :  { %v15772_v25 = vpop.eup %15771  ;;  %15791 = vpow2.f32 %v13394_v40  ;;  %v10031_v35 = vadd.f32 %v10023_v29, %v10015_v8  ;;  %v10017_v9 = vmul.f32 %v15770_v43, %v9999_v20 }
 0x97e   :  { %v15774_v39 = vpop.eup %15773  ;;  %15793 = vpow2.f32 %v13395_v6  ;;  %v10032_v10 = vadd.f32 %v10024_v15, %v10016_v59  ;;  %v10018_v63 = vmul.f32 %v15772_v25, %v10001_v51 }
 0x97f   :  { %v15776_v11 = vpop.eup %15775  ;;  %15795 = vpow2.f32 %v13396_v47  ;;  %v10118_v60 = vcombine.low %v10030_v19, %v10031_v35  ;;  %v10019_v36 = vmul.f32 %v15774_v39, %v10003_v32 }
 0x980   :  { %v15778_v28 = vpop.eup %15777  ;;  %v10025_v62 = vmul.f32 %v15776_v11, %v19066_v46  ;;  %15797 = vtanh.f32 %v10028_v1 }
 0x981   :  { %v15780_v24 = vpop.eup %15779  ;;  %15799 = vtanh.f32 %v10029_v61  ;;  %v10134_v31 = vrot.slane %v10118_v60, %v16279_v45  ;;  %v10026_v23 = vmul.f32 %v15778_v28, %v19072_v50 }
 0x982   :  { %v15782_v5 = vpop.eup %15781  ;;  %15801 = vtanh.f32 %v10030_v19  ;;  %v10027_v49 = vmul.f32 %v15780_v24, %v19084_v3  ;;  %v10033_v58 = vadd.f32 %v10025_v62, %v10017_v9 }
 0x983   :  { %v15784_v54 = vpop.eup %15783  ;;  %v9930_v48 = vadd.f32 1.0, %v15782_v5  ;;  %v10149_v42 = vcombine.low %v10127_v37, %v10134_v31  ;;  %v10034_v55 = vadd.f32 %v10026_v23, %v10018_v63  ;;  %15803 = vtanh.f32 %v10031_v35 }
 0x984   :  { %v15786_v46 = vpop.eup %15785  ;;  %v9931_v57 = vadd.f32 1.0, %v15784_v54  ;;  %v10035_v16 = vadd.f32 %v10027_v49, %v10019_v36  ;;  %15805 = vtanh.f32 %v10032_v10  ;;  %v10119_v30 = vcombine.low %v10032_v10, %v10033_v58 }
 0x985   :  { %v15788_v18 = vpop.eup %15787  ;;  %v9932_v38 = vadd.f32 1.0, %v15786_v46  ;;  %15807 = vrcp.f32 %v9930_v48  ;;  %v19147_v51 = vrot.slane %v10149_v42, %v16279_v45 }
 0x986   :  { %v15790_v20 = vpop.eup %15789  ;;  %v9933_v50 = vadd.f32 1.0, %v15788_v18  ;;  %15809 = vrcp.f32 %v9931_v57  ;;  %v10120_v34 = vcombine.low %v10034_v55, %v10035_v16  ;;  %v10141_v56 = vrot.slane %v10119_v30, %v16279_v45 }
 0x987   :  { %v15792_v13 = vpop.eup %15791  ;;  %v9934_v3 = vadd.f32 1.0, %v15790_v20  ;;  %15811 = vrcp.f32 %v9932_v38 }
 0x988   :  { %v15794_v2 = vpop.eup %15793  ;;  %v9935_v1 = vadd.f32 1.0, %v15792_v13  ;;  %15813 = vrcp.f32 %v9933_v50  ;;  %v10148_v14 = vrot.slane %v10120_v34, %v16279_v45 }
 0x989   :  { %v15796_v4 = vpop.eup %15795  ;;  %v9936_v61 = vadd.f32 1.0, %v15794_v2  ;;  %15815 = vrcp.f32 %v9934_v3 }
 0x98a   :  { %v15798_v21 = vpop.eup %15797  ;;  %v9937_v40 = vadd.f32 1.0, %v15796_v4  ;;  %15817 = vrcp.f32 %v9935_v1  ;;  %v10150_v6 = vcombine.low %v10141_v56, %v10148_v14 }
 0x98b   :  { %v15800_v26 = vpop.eup %15799  ;;  %15819 = vrcp.f32 %v9936_v61 }
 0x98c   :  { %v15802_v41 = vpop.eup %15801  ;;  %15821 = vrcp.f32 %v9937_v40  ;;  %v19150_v22 = vrot.slane %v10150_v6, %v16279_v45  ;;  %v14693_v6 = vld [vmem:[%s19688_s1] ss:$16 sps:$4 sm:$0xff]  }
 0x98d   :  { %v15804_v27 = vpop.eup %15803  ;;  %15823 = vtanh.f32 %v10033_v58 }
 0x98e   :  { %v15806_v7 = vpop.eup %15805  ;;  %15825 = vtanh.f32 %v10034_v55  ;;  %v10165_v47 = vcombine.low %v19147_v51, %v19150_v22  ;;  %v14825_v51 = vld [vmem:[%s19689_s2 + $0xc0] ss:$16 sps:$4 sm:$0xff]  }
 0x98f   :  { %v15808_v8 = vpop.eup %15807  ;;  %15827 = vtanh.f32 %v10035_v16 }
 0x990   :  { %v15810_v29 = vpop.eup %15809  ;;  %v10044_v43 = vmul.f32 %v15808_v8, %v15798_v21  ;;  %v14704_v8 = vld [vmem:[%s19688_s1 + $0x2c] ss:$16 sps:$4 sm:$0xff]  }
 0x991   :  { %v15812_v59 = vpop.eup %15811  ;;  %v10045_v15 = vmul.f32 %v15810_v29, %v15800_v26  ;;  %v14696_v26 = vld [vmem:[%s19688_s1 + $0x8] ss:$16 sps:$4 sm:$0xff]   ;;  %v14699_v29 = vld [vmem:[%s19688_s1 + $0x20] ss:$16 sps:$4 sm:$0xff]  }
 0x992   :  { %v15814_v19 = vpop.eup %15813  ;;  %v10046_v25 = vmul.f32 %v15812_v59, %v15802_v41  ;;  %v10052_v9 = vpack.c.bf16 %v10044_v43, %v10044_v43  ;;  %v14702_v43 = vld [vmem:[%s19688_s1 + $0x28] ss:$16 sps:$4 sm:$0xff]   ;;  %v14707_v59 = vld [vmem:[%s19688_s1 + $0x44] ss:$16 sps:$4 sm:$0xff]  }
 0x993   :  { %v15816_v35 = vpop.eup %15815  ;;  %v10047_v32 = vmul.f32 %v15814_v19, %v15804_v27  ;;  %v10053_v39 = vpack.c.bf16 %v10045_v15, %v10045_v15  ;;  %v14710_v15 = vld [vmem:[%s19688_s1 + $0x4c] ss:$16 sps:$4 sm:$0xff]   ;;  %v14705_v19 = vld [vmem:[%s19688_s1 + $0x40] ss:$16 sps:$4 sm:$0xff]  }
 0x994   :  { %v15818_v10 = vpop.eup %15817  ;;  %v10048_v63 = vmul.f32 %v15816_v35, %v15806_v7  ;;  %v10054_v11 = vpack.c.bf16 %v10046_v25, %v10046_v25  ;;  %v10068_v23 = vunpack.c.l.b16 %v10052_v9  ;;  %v14701_v7 = vld [vmem:[%s19688_s1 + $0x24] ss:$16 sps:$4 sm:$0xff]   ;;  %v14708_v25 = vld [vmem:[%s19688_s1 + $0x48] ss:$16 sps:$4 sm:$0xff]   ;;  %v14711_v9 = vld [vmem:[%s19688_s1 + $0x60] ss:$16 sps:$4 sm:$0xff]  }
 0x995   :  { %v15820_v60 = vpop.eup %15819  ;;  %v10055_v36 = vpack.c.bf16 %v10047_v32, %v10047_v32  ;;  %v10069_v28 = vunpack.c.l.b16 %v10053_v39  ;;  %v14713_v35 = vld [vmem:[%s19688_s1 + $0x64] ss:$16 sps:$4 sm:$0xff]   ;;  %v14716_v32 = vld [vmem:[%s19688_s1 + $0x6c] ss:$16 sps:$4 sm:$0xff]   ;;  %v14714_v39 = vld [vmem:[%s19688_s1 + $0x68] ss:$16 sps:$4 sm:$0xff]  }
 0x996   :  { %v15822_v62 = vpop.eup %15821  ;;  %v10056_v24 = vpack.c.bf16 %v10048_v63, %v10048_v63  ;;  %v10070_v37 = vunpack.c.l.b16 %v10054_v11  ;;  %v14722_v63 = vld [vmem:[%s19688_s1 + $0x8c] ss:$16 sps:$4 sm:$0xff]   ;;  %v14717_v11 = vld [vmem:[%s19688_s1 + $0x80] ss:$16 sps:$4 sm:$0xff]  }
 0x997   :  { %v15824_v31 = vpop.eup %15823  ;;  %v10071_v5 = vunpack.c.l.b16 %v10055_v36  ;;  %v10092_v49 = vrot.slane %v10069_v28, 7  ;;  %v14725_v36 = vld [vmem:[%s19688_s1 + $0xa4] ss:$16 sps:$4 sm:$0xff]   ;;  %v14728_v28 = vld [vmem:[%s19688_s1 + $0xac] ss:$16 sps:$4 sm:$0xff]  }
 0x998   :  { %v15826_v58 = vpop.eup %15825  ;;  %v10049_v54 = vmul.f32 %v15824_v31, %v15818_v10  ;;  %v10072_v48 = vunpack.c.l.b16 %v10056_v24  ;;  %v10094_v42 = vrot.slane %v10070_v37, 6  ;;  %v14719_v10 = vld [vmem:[%s19688_s1 + $0x84] ss:$16 sps:$4 sm:$0xff]   ;;  %v14726_v24 = vld [vmem:[%s19688_s1 + $0xa8] ss:$16 sps:$4 sm:$0xff]  }
 0x999   :  { %v15828_v55 = vpop.eup %15827  ;;  %v10050_v46 = vmul.f32 %v15826_v58, %v15820_v60  ;;  %v10093_v57 = vsel %vm769_vm0, %v10092_v49, %v10068_v23  ;;  %v10096_v16 = vrot.slane %v10071_v5, 5  ;;  %v14720_v60 = vld [vmem:[%s19688_s1 + $0x88] ss:$16 sps:$4 sm:$0xff]   ;;  %v14731_v37 = vld [vmem:[%s19688_s1 + $0xc4] ss:$16 sps:$4 sm:$0xff]  }
 0x99a   :  { %v10051_v30 = vmul.f32 %v15828_v55, %v15822_v62  ;;  %v10057_v18 = vpack.c.bf16 %v10049_v54, %v10049_v54  ;;  %v10095_v38 = vsel %vm772_vm1, %v10094_v42, %v10093_v57  ;;  %v10098_v20 = vrot.slane %v10072_v48, 4  ;;  %v14723_v62 = vld [vmem:[%s19688_s1 + $0xa0] ss:$16 sps:$4 sm:$0xff]   ;;  %v14734_v31 = vld [vmem:[%s19688_s1 + $0xcc] ss:$16 sps:$4 sm:$0xff]  }
 0x99b   :  { %v10058_v50 = vpack.c.bf16 %v10050_v46, %v10050_v46  ;;  %v10097_v34 = vsel %vm775_vm2, %v10096_v16, %v10095_v38  ;;  %v14729_v23 = vld [vmem:[%s19688_s1 + $0xc0] ss:$16 sps:$4 sm:$0xff]   ;;  %v14732_v5 = vld [vmem:[%s19688_s1 + $0xc8] ss:$16 sps:$4 sm:$0xff]   ;;  %v14737_v49 = vld [vmem:[%s19688_s1 + $0xe4] ss:$16 sps:$4 sm:$0xff]  }
 0x99c   :  { %v10059_v13 = vpack.c.bf16 %v10051_v30, %v10051_v30  ;;  %v10073_v3 = vunpack.c.l.b16 %v10057_v18  ;;  %v10099_v2 = vsel %vm778_vm3, %v10098_v20, %v10097_v34  ;;  %v14740_v58 = vld [vmem:[%s19688_s1 + $0xec] ss:$16 sps:$4 sm:$0xff]   ;;  %v14735_v54 = vld [vmem:[%s19688_s1 + $0xe0] ss:$16 sps:$4 sm:$0xff]   ;;  %v14738_v48 = vld [vmem:[%s19688_s1 + $0xe8] ss:$16 sps:$4 sm:$0xff]  }
 0x99d   :  { %v10074_v1 = vunpack.c.l.b16 %v10058_v50  ;;  %v14743_v55 = vld [vmem:[#allocation4 + $0x4] ss:$16 sps:$4 sm:$0xff]   ;;  %v14746_v46 = vld [vmem:[#allocation4 + $0xc] ss:$16 sps:$4 sm:$0xff]   ;;  %v14741_v57 = vld [vmem:[#allocation4] ss:$16 sps:$4 sm:$0xff]  }
 0x99e   :  { %v10075_v56 = vunpack.c.l.b16 %v10059_v13  ;;  %v10100_v14 = vrot.slane %v10073_v3, 3  ;;  %v14744_v16 = vld [vmem:[#allocation4 + $0x8] ss:$16 sps:$4 sm:$0xff]   ;;  %v14749_v30 = vld [vmem:[#allocation4 + $0x24] ss:$16 sps:$4 sm:$0xff]  }
 0x99f   :  { %v10102_v4 = vrot.slane %v10074_v1, 2  ;;  %v14752_v18 = vld [vmem:[#allocation4 + $0x2c] ss:$16 sps:$4 sm:$0xff]   ;;  %v14747_v50 = vld [vmem:[#allocation4 + $0x20] ss:$16 sps:$4 sm:$0xff]  }
 0x9a0   :  { %v10101_v61 = vsel %vm781_vm4, %v10100_v14, %v10099_v2  ;;  %v10104_v21 = vrot.slane %v10075_v56, 1  ;;  %v14750_v34 = vld [vmem:[#allocation4 + $0x28] ss:$16 sps:$4 sm:$0xff]  }
 0x9a1   :  { %v10103_v40 = vsel %vm784_vm5, %v10102_v4, %v10101_v61  ;;  %v14755_v4 = vld [vmem:[#allocation4 + $0x44] ss:$16 sps:$4 sm:$0xff]   ;;  %v14758_v61 = vld [vmem:[#allocation4 + $0x4c] ss:$16 sps:$4 sm:$0xff]  }
 0x9a2   :  { %v10105_v41 = vsel %vm787_vm6, %v10104_v21, %v10103_v40  ;;  %v14753_v21 = vld [vmem:[#allocation4 + $0x40] ss:$16 sps:$4 sm:$0xff]   ;;  %v14756_v40 = vld [vmem:[#allocation4 + $0x48] ss:$16 sps:$4 sm:$0xff]  }
 0x9a3   :  { %v10106_v27 = vpack.c.b16 %v10105_v41, %v10105_v41  ;;  %v14759_v41 = vld [vmem:[#allocation4 + $0x60] ss:$16 sps:$4 sm:$0xff]  }
 0x9a5   :  { %10684 = vmatmul.mubr.bf16.vlgmr.msra.gmra.mrb[80].mxu0 %v10106_v27  ;;  %10108 = vst [vmem:[#allocation2] sm:$0xf] %v10106_v27  ;;  %10725 = vmatmul.mubr.bf16.vlgmr.msra.gmra.mrb[80].mxu1 %v10106_v27  ;;  %v14762_v27 = vld [vmem:[#allocation4 + $0x68] ss:$16 sps:$4 sm:$0xff]  }
 0x9a6   :  { %11129 = vmatpush1.bf16.msra.mxu0 %v14693_v6  ;;  %11170 = vmatpush1.bf16.msra.mxu1 %v14696_v26  ;;  %v14761_v6 = vld [vmem:[#allocation4 + $0x64] ss:$16 sps:$4 sm:$0xff]   ;;  %v14764_v26 = vld [vmem:[#allocation4 + $0x6c] ss:$16 sps:$4 sm:$0xff]  }
 0x9a7   :  { %11130 = vmatprep.subr.bf16.mxu0 %v14701_v7  ;;  %11171 = vmatprep.subr.bf16.mxu1 %v14704_v8  ;;  %v14767_v7 = vld [vmem:[#allocation4 + $0x84] ss:$16 sps:$4 sm:$0xff]   ;;  %v14770_v8 = vld [vmem:[#allocation4 + $0x8c] ss:$16 sps:$4 sm:$0xff]  }
 0x9a8   :  { %11160 = vmatprep.mubr.bf16.mxu0 %v16024_v0  ;;  %11201 = vmatprep.mubr.bf16.mxu1 %v16024_v0 }
 0x9aa   :  { %11131 = vmatpush1.bf16.msra.mxu0 %v14699_v29  ;;  %11172 = vmatpush1.bf16.msra.mxu1 %v14702_v43  ;;  %v14765_v29 = vld [vmem:[#allocation4 + $0x80] ss:$16 sps:$4 sm:$0xff]   ;;  %v14768_v43 = vld [vmem:[#allocation4 + $0x88] ss:$16 sps:$4 sm:$0xff]  }
 0x9ab   :  { %11132 = vmatprep.subr.bf16.mxu0 %v14707_v59  ;;  %11173 = vmatprep.subr.bf16.mxu1 %v14710_v15  ;;  %v14773_v59 = vld [vmem:[#allocation4 + $0xa4] ss:$16 sps:$4 sm:$0xff]   ;;  %v14776_v15 = vld [vmem:[#allocation4 + $0xac] ss:$16 sps:$4 sm:$0xff]  }
 0x9ac   :  { %v10935_v42 = vld [vmem:[#allocation2] sm:$0xf] }
 0x9ae   :  { %11133 = vmatpush1.bf16.msra.mxu0 %v14705_v19  ;;  %11174 = vmatpush1.bf16.msra.mxu1 %v14708_v25  ;;  %v14771_v19 = vld [vmem:[#allocation4 + $0xa0] ss:$16 sps:$4 sm:$0xff]   ;;  %v14774_v25 = vld [vmem:[#allocation4 + $0xa8] ss:$16 sps:$4 sm:$0xff]  }
 0x9af   :  { %11134 = vmatprep.subr.bf16.mxu0 %v14713_v35  ;;  %11175 = vmatprep.subr.bf16.mxu1 %v14716_v32  ;;  %v14779_v35 = vld [vmem:[#allocation4 + $0xc4] ss:$16 sps:$4 sm:$0xff]   ;;  %v14782_v32 = vld [vmem:[#allocation4 + $0xcc] ss:$16 sps:$4 sm:$0xff]  }
 0x9b2   :  { %11135 = vmatpush1.bf16.msra.mxu0 %v14711_v9  ;;  %11176 = vmatpush1.bf16.msra.mxu1 %v14714_v39  ;;  %v14777_v9 = vld [vmem:[#allocation4 + $0xc0] ss:$16 sps:$4 sm:$0xff]   ;;  %v14780_v39 = vld [vmem:[#allocation4 + $0xc8] ss:$16 sps:$4 sm:$0xff]  }
 0x9b3   :  { %11136 = vmatprep.subr.bf16.mxu0 %v14719_v10  ;;  %11177 = vmatprep.subr.bf16.mxu1 %v14722_v63  ;;  %v14785_v10 = vld [vmem:[#allocation4 + $0xe4] ss:$16 sps:$4 sm:$0xff]   ;;  %v14788_v63 = vld [vmem:[#allocation4 + $0xec] ss:$16 sps:$4 sm:$0xff]  }
 0x9b6   :  { %11137 = vmatpush1.bf16.msra.mxu0 %v14717_v11  ;;  %11178 = vmatpush1.bf16.msra.mxu1 %v14720_v60  ;;  %v14783_v11 = vld [vmem:[#allocation4 + $0xe0] ss:$16 sps:$4 sm:$0xff]   ;;  %v14786_v60 = vld [vmem:[#allocation4 + $0xe8] ss:$16 sps:$4 sm:$0xff]  }
 0x9b7   :  { %11138 = vmatprep.subr.bf16.mxu0 %v14725_v36  ;;  %11179 = vmatprep.subr.bf16.mxu1 %v14728_v28  ;;  %v14791_v36 = vld [vmem:[%s19689_s2 + $0x4] ss:$16 sps:$4 sm:$0xff]   ;;  %v14794_v28 = vld [vmem:[%s19689_s2 + $0xc] ss:$16 sps:$4 sm:$0xff]  }
 0x9ba   :  { %11139 = vmatpush1.bf16.msra.mxu0 %v14723_v62  ;;  %11180 = vmatpush1.bf16.msra.mxu1 %v14726_v24  ;;  %v10733_v62 = vld [vmem:[%s19691_s4] sm:$0xf] }
 0x9bb   :  { %11140 = vmatprep.subr.bf16.mxu0 %v14731_v37  ;;  %11181 = vmatprep.subr.bf16.mxu1 %v14734_v31  ;;  %v10738_v24 = vrot.slane %v10733_v62, %v16524_v12 }
 0x9be   :  { %11141 = vmatpush1.bf16.msra.mxu0 %v14729_v23  ;;  %11182 = vmatpush1.bf16.msra.mxu1 %v14732_v5  ;;  %v10742_v23 = vrot.slane %v10733_v62, %v16530_v44 }
 0x9bf   :  { %11142 = vmatprep.subr.bf16.mxu0 %v14737_v49  ;;  %11183 = vmatprep.subr.bf16.mxu1 %v14740_v58 }
 0x9c2   :  { %11143 = vmatpush1.bf16.msra.mxu0 %v14735_v54  ;;  %11184 = vmatpush1.bf16.msra.mxu1 %v14738_v48 }
 0x9c3   :  { %11946 = vmatprep.subr.bf16.mxu0 %v14743_v55  ;;  %11987 = vmatprep.subr.bf16.mxu1 %v14746_v46 }
 0x9c5   :  { %11161 = vmatmul.mubr.bf16.vlgmr.msra.gmra.mrb[84].mxu0 %v10935_v42  ;;  %11202 = vmatmul.mubr.bf16.vlgmr.msra.gmra.mrb[84].mxu1 %v10935_v42 }
 0x9c6   :  { %11978 = vmatprep.mubr.bf16.mxu0 %v16024_v0  ;;  %12019 = vmatprep.mubr.bf16.mxu1 %v16024_v0 }
 0x9c7   :  { %11947 = vmatpush1.bf16.msra.mxu0 %v14741_v57  ;;  %11988 = vmatpush1.bf16.msra.mxu1 %v14744_v16 }
 0x9c8   :  { %11948 = vmatprep.subr.bf16.mxu0 %v14749_v30  ;;  %11989 = vmatprep.subr.bf16.mxu1 %v14752_v18 }
 0x9cb   :  { %11949 = vmatpush1.bf16.msra.mxu0 %v14747_v50  ;;  %11990 = vmatpush1.bf16.msra.mxu1 %v14750_v34 }
 0x9cc   :  { %11950 = vmatprep.subr.bf16.mxu0 %v14755_v4  ;;  %11991 = vmatprep.subr.bf16.mxu1 %v14758_v61 }
 0x9cf   :  { %11951 = vmatpush1.bf16.msra.mxu0 %v14753_v21  ;;  %11992 = vmatpush1.bf16.msra.mxu1 %v14756_v40 }
 0x9d0   :  { %11952 = vmatprep.subr.bf16.mxu0 %v14761_v6  ;;  %11993 = vmatprep.subr.bf16.mxu1 %v14764_v26 }
 0x9d3   :  { %11953 = vmatpush1.bf16.msra.mxu0 %v14759_v41  ;;  %11994 = vmatpush1.bf16.msra.mxu1 %v14762_v27 }
 0x9d4   :  { %11954 = vmatprep.subr.bf16.mxu0 %v14767_v7  ;;  %11995 = vmatprep.subr.bf16.mxu1 %v14770_v8 }
 0x9d7   :  { %11955 = vmatpush1.bf16.msra.mxu0 %v14765_v29  ;;  %11996 = vmatpush1.bf16.msra.mxu1 %v14768_v43 }
 0x9d8   :  { %11956 = vmatprep.subr.bf16.mxu0 %v14773_v59  ;;  %11997 = vmatprep.subr.bf16.mxu1 %v14776_v15 }
 0x9db   :  { %11957 = vmatpush1.bf16.msra.mxu0 %v14771_v19  ;;  %11998 = vmatpush1.bf16.msra.mxu1 %v14774_v25 }
 0x9dc   :  { %11958 = vmatprep.subr.bf16.mxu0 %v14779_v35  ;;  %11999 = vmatprep.subr.bf16.mxu1 %v14782_v32 }
 0x9df   :  { %11959 = vmatpush1.bf16.msra.mxu0 %v14777_v9  ;;  %12000 = vmatpush1.bf16.msra.mxu1 %v14780_v39 }
 0x9e0   :  { %11960 = vmatprep.subr.bf16.mxu0 %v14785_v10  ;;  %12001 = vmatprep.subr.bf16.mxu1 %v14788_v63 }
 0x9e3   :  { %11961 = vmatpush1.bf16.msra.mxu0 %v14783_v11  ;;  %12002 = vmatpush1.bf16.msra.mxu1 %v14786_v60 }
 0x9e4   :  { %12204 = vmatprep.subr.bf16.mxu0 %v14791_v36  ;;  %12245 = vmatprep.subr.bf16.mxu1 %v14794_v28 }
 0xa27   :  { %v19255_v38 = vpop.f32.mrb[76].mxu0  ;;  %v19257_v20 = vpop.f32.mrb[76].mxu1 }
 0xa28   :  { %v19259_v13 = vpop.f32.mrb[77].mxu0  ;;  %v19261_v3 = vpop.f32.mrb[77].mxu1 }
 0xa29   :  { %v10431_v2 = vpop.f32.mrb[78].mxu0  ;;  %v10472_v1 = vpop.f32.mrb[78].mxu1 }
 0xa2a   :  { %v10432_v56 = vpop.f32.mrb[79].mxu0  ;;  %v10473_v14 = vpop.f32.mrb[79].mxu1  ;;  %v10750_v2 = vrot.slane %v10733_v62, %v16539_v53 }
 0xa78   :  { %v10685_v37 = vpop.f32.mrb[80].mxu0  ;;  %v10726_v31 = vpop.f32.mrb[80].mxu1 }
 0xa79   :  { %v10686_v5 = vadd.f32 %v10685_v37, %v19255_v38  ;;  %v10727_v49 = vadd.f32 %v10726_v31, %v19257_v20  ;;  %v10687_v58 = vpop.f32.mrb[81].mxu0  ;;  %v10728_v54 = vpop.f32.mrb[81].mxu1  ;;  %v10746_v20 = vrot.slane %v10733_v62, %v16543_v17  ;;  %v13476_v62 = vld [vmem:[%s19687_s0 + $0x7] ss:$8 sm:$0xf] }
 0xa7a   :  { %v10688_v48 = vadd.f32 %v10687_v58, %v19259_v13  ;;  %v10729_v42 = vadd.f32 %v10728_v54, %v19261_v3  ;;  %v10689_v55 = vpop.f32.mrb[82].mxu0  ;;  %v10730_v46 = vpop.f32.mrb[82].mxu1  ;;  %v13478_v54 = vld [vmem:[%s19687_s0 + $0x47] ss:$8 sm:$0xf] }
 0xa7b   :  { %v10755_v57 = vadd.f32 %v10738_v24, %v10686_v5  ;;  %v10690_v16 = vpop.f32.mrb[83].mxu0  ;;  %v10731_v30 = vpop.f32.mrb[83].mxu1  ;;  %v10757_v56 = vadd.f32 %v10746_v20, %v10727_v49  ;;  %v13477_v24 = vld [vmem:[%s19687_s0 + $0x27] ss:$8 sm:$0xf] }
 0xa7c   :  { %v10756_v18 = vadd.f32 %v10742_v23, %v10688_v48  ;;  %v10758_v38 = vadd.f32 %v10750_v2, %v10729_v42  ;;  %v13480_v23 = vld [vmem:[%s19687_s0 + $0x87] ss:$8 sm:$0xf] }
 0xa7d   :  { %v13469_v50 = vmul.f32 -1.442695, %v10755_v57  ;;  %v13481_v5 = vld [vmem:[%s19687_s0 + $0xa7] ss:$8 sm:$0xf] }
 0xa7e   :  { %v13470_v34 = vmul.f32 -1.442695, %v10756_v18  ;;  %v13471_v1 = vmul.f32 -1.442695, %v10758_v38 }
 0xa7f   :  { %15829 = vpow2.f32 %v13469_v50  ;;  %v13479_v48 = vld [vmem:[%s19687_s0 + $0x67] ss:$8 sm:$0xf] }
 0xa80   :  { %15831 = vpow2.f32 %v13470_v34  ;;  %v13482_v46 = vld [vmem:[%s19687_s0 + $0xc7] ss:$8 sm:$0xf] }
 0xa81   :  { %15833 = vpow2.f32 %v13471_v1  ;;  %v13483_v57 = vld [vmem:[%s19687_s0 + $0xe7] ss:$8 sm:$0xf] }
 0xa82   :  { %15835 = vtanh.f32 %v10757_v56 }
 0xa89   :  { %v15830_v13 = vpop.eup %15829 }
 0xa8a   :  { %v15832_v14 = vpop.eup %15831  ;;  %v10763_v3 = vadd.f32 1.0, %v15830_v13 }
 0xa8b   :  { %v10769_v4 = vadd.f32 1.0, %v15832_v14  ;;  %v15834_v61 = vpop.eup %15833 }
 0xa8c   :  { %15837 = vrcp.f32 %v10763_v3  ;;  %v15836_v21 = vpop.eup %15835  ;;  %v10776_v41 = vadd.f32 1.0, %v15834_v61 }
 0xa8d   :  { %15839 = vrcp.f32 %v10769_v4 }
 0xa8e   :  { %15841 = vrcp.f32 %v10776_v41 }
 0xa96   :  { %v15838_v40 = vpop.eup %15837 }
 0xa97   :  { %v15840_v6 = vpop.eup %15839  ;;  %v10780_v26 = vmul.f32 %v15838_v40, %v15836_v21 }
 0xa98   :  { %v10779_v27 = vmul.f32 %v15840_v6, %v18826_v52  ;;  %v11162_v7 = vpop.f32.mrb[84].mxu0  ;;  %v11203_v8 = vpop.f32.mrb[84].mxu1 }
 0xa99   :  { %v11164_v29 = vpop.f32.mrb[85].mxu0  ;;  %v11205_v43 = vpop.f32.mrb[85].mxu1 }
 0xa9a   :  { %v19281_v59 = vadd.f32 %v10780_v26, %v10779_v27  ;;  %v11214_v15 = vcombine.low %v11162_v7, %v11164_v29  ;;  %v11215_v19 = vcombine.high %v11162_v7, %v11164_v29  ;;  %v11216_v25 = vcombine.low %v11203_v8, %v11205_v43  ;;  %v11166_v35 = vpop.f32.mrb[86].mxu0  ;;  %v11207_v32 = vpop.f32.mrb[86].mxu1 }
 0xa9b   :  { %v11217_v9 = vcombine.high %v11203_v8, %v11205_v43  ;;  %v11167_v39 = vpop.f32.mrb[87].mxu0  ;;  %v11208_v10 = vpop.f32.mrb[87].mxu1 }
 0xa9c   :  { %15843 = vtanh.f32 %v19281_v59  ;;  %v11224_v63 = vrot.slane %v11214_v15, %v16279_v45  ;;  %v11231_v52 = vrot.slane %v11215_v19, %v16279_v45  ;;  %v11238_v11 = vrot.slane %v11216_v25, %v16279_v45  ;;  %v15842_v3 = vpop.eup %15841 }
 0xa9d   :  { %v11245_v60 = vrot.slane %v11217_v9, %v16279_v45 }
 0xa9e   :  { %v11246_v36 = vcombine.low %v11224_v63, %v11238_v11  ;;  %v11247_v28 = vcombine.high %v11224_v63, %v11238_v11 }
 0xa9f   :  { %v11248_v37 = vcombine.low %v11231_v52, %v11245_v60  ;;  %v11249_v31 = vcombine.high %v11231_v52, %v11245_v60  ;;  %v10895_v60 = vld [vmem:[%s19692_s5] sm:$0x8] }
 0xaa0   :  { %v11256_v49 = vrot.slane %v11246_v36, %v16279_v45  ;;  %v11270_v58 = vrot.slane %v11247_v28, %v16279_v45  ;;  %v14789_v36 = vld [vmem:[%s19689_s2] ss:$16 sps:$4 sm:$0xff]  }
 0xaa1   :  { %v11263_v42 = vrot.slane %v11248_v37, %v16279_v45  ;;  %v11277_v55 = vrot.slane %v11249_v31, %v16279_v45 }
 0xaa2   :  { %v11278_v16 = vcombine.high %v11256_v49, %v11256_v49  ;;  %v11280_v30 = vcombine.high %v11270_v58, %v11270_v58  ;;  %v19316_v18 = vadd.f32 %v13476_v62, %v11256_v49  ;;  %v19318_v50 = vadd.f32 %v13477_v24, %v11270_v58  ;;  %v14792_v49 = vld [vmem:[%s19689_s2 + $0x8] ss:$16 sps:$4 sm:$0xff]   ;;  %v14797_v58 = vld [vmem:[%s19689_s2 + $0x24] ss:$16 sps:$4 sm:$0xff]  }
 0xaa3   :  { %v11279_v34 = vcombine.high %v11263_v42, %v11263_v42  ;;  %v11281_v2 = vcombine.high %v11277_v55, %v11277_v55  ;;  %v19320_v38 = vadd.f32 %v13480_v23, %v11263_v42  ;;  %v19322_v20 = vadd.f32 %v13481_v5, %v11277_v55  ;;  %v10898_v5 = vld [vmem:[%s19692_s5 + $0x4] sm:$0x8] }
 0xaa4   :  { %v19324_v1 = vadd.f32 %v13478_v54, %v11278_v16  ;;  %v19326_v56 = vadd.f32 %v13479_v48, %v11280_v30  ;;  %v13516_v13 = vmul.f32 -1.442695, %v19316_v18  ;;  %v13517_v14 = vmul.f32 -1.442695, %v19318_v50  ;;  %v14800_v16 = vld [vmem:[%s19689_s2 + $0x2c] ss:$16 sps:$4 sm:$0xff]  }
 0xaa5   :  { %v19330_v4 = vadd.f32 %v13482_v46, %v11279_v34  ;;  %v19332_v61 = vadd.f32 %v13483_v57, %v11281_v2  ;;  %v13520_v21 = vmul.f32 -1.442695, %v19320_v38  ;;  %v11355_v41 = vrot.slane %v19316_v18, 1 }
 0xaa6   :  { %v15844_v40 = vpop.eup %15843  ;;  %15845 = vpow2.f32 %v13516_v13  ;;  %v13518_v6 = vmul.f32 -1.442695, %v19324_v1  ;;  %v13519_v26 = vmul.f32 -1.442695, %v19326_v56  ;;  %v13521_v7 = vmul.f32 -1.442695, %v19322_v20 }
 0xaa7   :  { %v10783_v27 = vmul.f32 %v15844_v40, %v15842_v3  ;;  %15847 = vpow2.f32 %v13517_v14  ;;  %v13522_v8 = vmul.f32 -1.442695, %v19330_v4  ;;  %v11356_v29 = vrot.slane %v19318_v50, 1  ;;  %v10901_v3 = vld [vmem:[%s19692_s5 + $0x8] sm:$0x8] }
 0xaa8   :  { %15849 = vpow2.f32 %v13518_v6  ;;  %v13523_v15 = vmul.f32 -1.442695, %v19332_v61  ;;  %v13524_v19 = vmul.f32 -1.442695, %v11355_v41  ;;  %v10907_v40 = vld [vmem:[%s19692_s5 + $0x10] sm:$0x8] }
 0xaa9   :  { %v10784_v43 = vpack.c.bf16 %v10783_v27, %v10783_v27  ;;  %15851 = vpow2.f32 %v13519_v26  ;;  %v13525_v35 = vmul.f32 -1.442695, %v11356_v29  ;;  %v10913_v29 = vld [vmem:[%s19692_s5 + $0x18] sm:$0x8]  ;;  %v11358_v23 = vrot.slane %v19326_v56, 1 }
 0xaaa   :  { %15853 = vpow2.f32 %v13520_v21  ;;  %v10904_v21 = vld [vmem:[%s19692_s5 + $0xc] sm:$0x8] }
 0xaab   :  { %v10794_v25 = vrot.slane %v10784_v43, %v16279_v45  ;;  %10785 = vst [vmem:[#allocation2 + $0x4] sm:$0xf] %v10784_v43  ;;  %15855 = vpow2.f32 %v13521_v7  ;;  %v14795_v43 = vld [vmem:[%s19689_s2 + $0x20] ss:$16 sps:$4 sm:$0xff]  }
 0xaac   :  { %15857 = vpow2.f32 %v13522_v8  ;;  %v10910_v8 = vld [vmem:[%s19692_s5 + $0x14] sm:$0x8] }
 0xaad   :  { %v10795_v32 = vcombine.high %v10794_v25, %v10794_v25  ;;  %v10802_v9 = vrot.slane %v10794_v25, %v16279_v45  ;;  %15859 = vpow2.f32 %v13523_v15 }
 0xaae   :  { %15861 = vpow2.f32 %v13524_v19 }
 0xaaf   :  { %v10809_v39 = vrot.slane %v10795_v32, %v16279_v45  ;;  %v10810_v10 = vcombine.high %v10802_v9, %v10802_v9  ;;  %v10813_v63 = vunpack.i.h.s16 %v10802_v9  ;;  %v13472_v52 = vpack.i.b16 %v10802_v9, %v10802_v9  ;;  %v14798_v9 = vld [vmem:[%s19689_s2 + $0x28] ss:$16 sps:$4 sm:$0xff]  }
 0xab0   :  { %v15846_v11 = vpop.eup %15845  ;;  %15863 = vpow2.f32 %v13525_v35 }
 0xab1   :  { %v15848_v28 = vpop.eup %15847  ;;  %v10811_v62 = vcombine.high %v10809_v39, %v10809_v39  ;;  %v10815_v24 = vunpack.i.h.s16 %v10809_v39  ;;  %v10817_v37 = vunpack.i.h.s16 %v10810_v10  ;;  %v10821_v31 = vpack.i.b16 %v10813_v63, %v10813_v63 }
 0xab2   :  { %v15850_v54 = vpop.eup %15849  ;;  %v13473_v48 = vpack.i.b16 %v10809_v39, %v10809_v39  ;;  %v13474_v42 = vpack.i.b16 %v10810_v10, %v10810_v10  ;;  %v10834_v55 = vrot.slane %v13472_v52, %v16610_v33  ;;  %v11323_v46 = vadd.f32 1.0, %v15846_v11  ;;  %v11753_v57 = vld [vmem:[#allocation2 + $0x4] sm:$0xf] }
 0xab3   :  { %v15852_v30 = vpop.eup %15851  ;;  %v10819_v34 = vunpack.i.h.s16 %v10811_v62  ;;  %v10823_v2 = vpack.i.b16 %v10815_v24, %v10815_v24  ;;  %v10825_v13 = vpack.i.b16 %v10817_v37, %v10817_v37  ;;  %v13475_v14 = vpack.i.b16 %v10811_v62, %v10811_v62  ;;  %11979 = vmatmul.mubr.bf16.vlgmr.msra.gmra.mrb[88].mxu0 %v11753_v57  ;;  %12020 = vmatmul.mubr.bf16.vlgmr.msra.gmra.mrb[88].mxu1 %v11753_v57  ;;  %v14803_v39 = vld [vmem:[%s19689_s2 + $0x44] ss:$16 sps:$4 sm:$0xff]   ;;  %v14806_v62 = vld [vmem:[%s19689_s2 + $0x4c] ss:$16 sps:$4 sm:$0xff]  }
 0xab4   :  { %v15854_v6 = vpop.eup %15853  ;;  %v10841_v26 = vrot.slane %v10821_v31, %v16610_v33  ;;  %v10848_v41 = vrot.slane %v13473_v48, %v16610_v33  ;;  %v10862_v27 = vrot.slane %v13474_v42, %v16610_v33  ;;  %v10896_v7 = vsel %vm19353_vm12, %v10834_v55, %v10895_v60  ;;  %12205 = vmatpush1.bf16.msra.mxu0 %v14789_v36  ;;  %v10916_v60 = vld [vmem:[%s19692_s5 + $0x1c] sm:$0x8]  ;;  %v14801_v42 = vld [vmem:[%s19689_s2 + $0x40] ss:$16 sps:$4 sm:$0xff]  }
 0xab5   :  { %v15856_v15 = vpop.eup %15855  ;;  %v10827_v19 = vpack.i.b16 %v10819_v34, %v10819_v34  ;;  %v10855_v25 = vrot.slane %v10823_v2, %v16610_v33  ;;  %v10869_v35 = vrot.slane %v10825_v13, %v16610_v33  ;;  %v10876_v32 = vrot.slane %v13475_v14, %v16610_v33  ;;  %10897 = vst [vmem:[%s19692_s5] sm:$0x8] %v10896_v7 }
 0xab6   :  { %12246 = vmatpush1.bf16.msra.mxu1 %v14792_v49  ;;  %v15858_v10 = vpop.eup %15857  ;;  %v10899_v63 = vsel %vm19353_vm12, %v10841_v26, %v10898_v5  ;;  %v10902_v52 = vsel %vm19353_vm12, %v10848_v41, %v10901_v3  ;;  %v10908_v11 = vsel %vm19353_vm12, %v10862_v27, %v10907_v40  ;;  %v11324_v36 = vadd.f32 1.0, %v15848_v28  ;;  %12206 = vmatprep.subr.bf16.mxu0 %v14797_v58  ;;  %v14810_v40 = vld [vmem:[%s19689_s2 + $0x68] ss:$16 sps:$4 sm:$0xff]   ;;  %v14815_v41 = vld [vmem:[%s19689_s2 + $0x84] ss:$16 sps:$4 sm:$0xff]  }
 0xab7   :  { %12247 = vmatprep.subr.bf16.mxu1 %v14800_v16  ;;  %v15860_v24 = vpop.eup %15859  ;;  %v10883_v37 = vrot.slane %v10827_v19, %v16610_v33  ;;  %10900 = vst [vmem:[%s19692_s5 + $0x4] sm:$0x8] %v10899_v63  ;;  %10903 = vst [vmem:[%s19692_s5 + $0x8] sm:$0x8] %v10902_v52  ;;  %v10905_v28 = vsel %vm19353_vm12, %v10855_v25, %v10904_v21  ;;  %v10911_v31 = vsel %vm19353_vm12, %v10869_v35, %v10910_v8  ;;  %v14807_v21 = vld [vmem:[%s19689_s2 + $0x60] ss:$16 sps:$4 sm:$0xff]  }
 0xab8   :  { %10909 = vst [vmem:[%s19692_s5 + $0x10] sm:$0x8] %v10908_v11  ;;  %v10914_v5 = vsel %vm19353_vm12, %v10876_v32, %v10913_v29  ;;  %12236 = vmatprep.mubr.bf16.mxu0 %v16024_v0  ;;  %v15862_v49 = vpop.eup %15861  ;;  %10906 = vst [vmem:[%s19692_s5 + $0xc] sm:$0x8] %v10905_v28  ;;  %v11325_v58 = vadd.f32 1.0, %v15850_v54  ;;  %v11326_v48 = vadd.f32 1.0, %v15852_v30  ;;  %12207 = vmatpush1.bf16.msra.mxu0 %v14795_v43  ;;  %15865 = vrcp.f32 %v11323_v46 }
 0xab9   :  { %10912 = vst [vmem:[%s19692_s5 + $0x14] sm:$0x8] %v10911_v31  ;;  %10915 = vst [vmem:[%s19692_s5 + $0x18] sm:$0x8] %v10914_v5  ;;  %12277 = vmatprep.mubr.bf16.mxu1 %v16024_v0  ;;  %v10917_v55 = vsel %vm19353_vm12, %v10883_v37, %v10916_v60  ;;  %v11327_v57 = vadd.f32 1.0, %v15854_v6  ;;  %v11357_v16 = vrot.slane %v19324_v1, 1  ;;  %12208 = vmatprep.subr.bf16.mxu0 %v14803_v39  ;;  %15867 = vrcp.f32 %v11324_v36 }
 0xaba   :  { %12248 = vmatpush1.bf16.msra.mxu1 %v14798_v9  ;;  %v14804_v54 = vld [vmem:[%s19689_s2 + $0x48] ss:$16 sps:$4 sm:$0xff]   ;;  %v14809_v30 = vld [vmem:[%s19689_s2 + $0x64] ss:$16 sps:$4 sm:$0xff]   ;;  %v15864_v34 = vpop.eup %15863  ;;  %10918 = vst [vmem:[%s19692_s5 + $0x1c] sm:$0x8] %v10917_v55  ;;  %15869 = vrcp.f32 %v11325_v58  ;;  %v13689_v36 = vcombine.low %v19150_v22, %v19150_v22  ;;  %v11515_v5 = vrot.slane %v10165_v47, %v16279_v45 }
 0xabb   :  { %v11328_v0 = vadd.f32 1.0, %v15856_v15  ;;  %12249 = vmatprep.subr.bf16.mxu1 %v14806_v62  ;;  %v14812_v46 = vld [vmem:[%s19689_s2 + $0x6c] ss:$16 sps:$4 sm:$0xff]   ;;  %v11329_v2 = vadd.f32 1.0, %v15858_v10  ;;  %v11359_v13 = vrot.slane %v19320_v38, 1  ;;  %v11330_v14 = vadd.f32 1.0, %v15860_v24 }
 0xabc   :  { %15871 = vrcp.f32 %v11326_v48  ;;  %v11360_v3 = vrot.slane %v19322_v20, 1  ;;  %12209 = vmatpush1.bf16.msra.mxu0 %v14801_v42  ;;  %v11361_v6 = vrot.slane %v19330_v4, 1  ;;  %v13526_v26 = vmul.f32 -1.442695, %v11357_v16  ;;  %v14818_v8 = vld [vmem:[%s19689_s2 + $0x8c] ss:$16 sps:$4 sm:$0xff]  }
 0xabd   :  { %15873 = vrcp.f32 %v11327_v57  ;;  %12210 = vmatprep.subr.bf16.mxu0 %v14809_v30  ;;  %v11362_v27 = vrot.slane %v19332_v61, 1  ;;  %v13527_v7 = vmul.f32 -1.442695, %v11358_v23  ;;  %v13528_v29 = vmul.f32 -1.442695, %v11359_v13 }
 0xabe   :  { %12250 = vmatpush1.bf16.msra.mxu1 %v14804_v54  ;;  %15875 = vrcp.f32 %v11328_v0  ;;  %v13529_v43 = vmul.f32 -1.442695, %v11360_v3  ;;  %v14813_v15 = vld [vmem:[%s19689_s2 + $0x80] ss:$16 sps:$4 sm:$0xff]   ;;  %v13530_v19 = vmul.f32 -1.442695, %v11361_v6  ;;  %v19532_v57 = vrot.slane %v13689_v36, %v16279_v45 }
 0xabf   :  { %12251 = vmatprep.subr.bf16.mxu1 %v14812_v46  ;;  %15877 = vrcp.f32 %v11329_v2  ;;  %v14816_v25 = vld [vmem:[%s19689_s2 + $0x88] ss:$16 sps:$4 sm:$0xff]   ;;  %v14821_v35 = vld [vmem:[%s19689_s2 + $0xa4] ss:$16 sps:$4 sm:$0xff]   ;;  %v13531_v32 = vmul.f32 -1.442695, %v11362_v27  ;;  %v19546_v46 = vrot.slane %v11515_v5, %v16279_v45 }
 0xac0   :  { %15879 = vrcp.f32 %v11330_v14  ;;  %12211 = vmatpush1.bf16.msra.mxu0 %v14807_v21  ;;  %v14824_v9 = vld [vmem:[%s19689_s2 + $0xac] ss:$16 sps:$4 sm:$0xff]   ;;  %v11395_v10 = vadd.f32 1.0, %v15862_v49  ;;  %v11396_v52 = vadd.f32 1.0, %v15864_v34  ;;  %v14819_v11 = vld [vmem:[%s19689_s2 + $0xa0] ss:$16 sps:$4 sm:$0xff]   ;;  %v11523_v34 = vcombine.high %v11515_v5, %v11515_v5 }
 0xac1   :  { %15881 = vpow2.f32 %v13526_v26  ;;  %12212 = vmatprep.subr.bf16.mxu0 %v14815_v41  ;;  %v11419_v62 = vrot.slane %v19316_v18, 2  ;;  %v14822_v24 = vld [vmem:[%s19689_s2 + $0xa8] ss:$16 sps:$4 sm:$0xff]   ;;  %v14827_v37 = vld [vmem:[%s19689_s2 + $0xc4] ss:$16 sps:$4 sm:$0xff]   ;;  %v11420_v31 = vrot.slane %v19318_v50, 2 }
 0xac2   :  { %12252 = vmatpush1.bf16.msra.mxu1 %v14810_v40  ;;  %15883 = vpow2.f32 %v13527_v7  ;;  %v19491_v39 = vpop.eup %15865  ;;  %v14830_v49 = vld [vmem:[%s19689_s2 + $0xcc] ss:$16 sps:$4 sm:$0xff]   ;;  %v11421_v48 = vrot.slane %v19324_v1, 2  ;;  %v11422_v55 = vrot.slane %v19326_v56, 2  ;;  %v11423_v47 = vrot.slane %v19320_v38, 2 }
 0xac3   :  { %12253 = vmatprep.subr.bf16.mxu1 %v14818_v8  ;;  %15885 = vpow2.f32 %v13528_v29  ;;  %v19493_v63 = vpop.eup %15867  ;;  %v14828_v16 = vld [vmem:[%s19689_s2 + $0xc8] ss:$16 sps:$4 sm:$0xff]   ;;  %v14833_v54 = vld [vmem:[%s19689_s2 + $0xe4] ss:$16 sps:$4 sm:$0xff]   ;;  %v14836_v0 = vld [vmem:[%s19689_s2 + $0xec] ss:$16 sps:$4 sm:$0xff]   ;;  %v19553_v40 = vrot.slane %v19532_v57, %v16279_v45  ;;  %v19559_v27 = vrot.slane %v11523_v34, %v16279_v45  ;;  %v11524_v7 = vcombine.high %v19532_v57, %v19532_v57 }
 0xac4   :  { %15887 = vpow2.f32 %v13529_v43  ;;  %12213 = vmatpush1.bf16.msra.mxu0 %v14813_v15  ;;  %v19498_v60 = vpop.eup %15869  ;;  %v14831_v14 = vld [vmem:[%s19689_s2 + $0xe0] ss:$16 sps:$4 sm:$0xff]   ;;  %v14834_v6 = vld [vmem:[%s19689_s2 + $0xe8] ss:$16 sps:$4 sm:$0xff]   ;;  %v11443_v43 = vrot.slane %v19316_v18, 3  ;;  %v11553_v15 = vcombine.high %v19546_v46, %v19546_v46  ;;  %v11426_v36 = vrot.slane %v19332_v61, 2 }
 0xac5   :  { %15889 = vpow2.f32 %v13530_v19  ;;  %12214 = vmatprep.subr.bf16.mxu0 %v14821_v35  ;;  %v11424_v35 = vrot.slane %v19322_v20, 2 }
 0xac6   :  { %12254 = vmatpush1.bf16.msra.mxu1 %v14816_v25  ;;  %v19509_v28 = vpop.eup %15871  ;;  %15891 = vpow2.f32 %v13531_v32  ;;  %v11444_v32 = vrot.slane %v19318_v50, 3  ;;  %v11447_v50 = vrot.slane %v19320_v38, 3  ;;  %v11450_v38 = vrot.slane %v19332_v61, 3 }
 0xac7   :  { %12255 = vmatprep.subr.bf16.mxu1 %v14824_v9  ;;  %v19519_v58 = vpop.eup %15873  ;;  %15893 = vrcp.f32 %v11395_v10 }
 0xac8   :  { %v19522_v42 = vpop.eup %15875  ;;  %15895 = vrcp.f32 %v11396_v52  ;;  %12215 = vmatpush1.bf16.msra.mxu0 %v14819_v11  ;;  %v11425_v52 = vrot.slane %v19330_v4, 2  ;;  %v11445_v11 = vrot.slane %v19324_v1, 3  ;;  %v11448_v1 = vrot.slane %v19322_v20, 3 }
 0xac9   :  { %v19528_v22 = vpop.eup %15877  ;;  %15897 = vtanh.f32 %v11419_v62  ;;  %12216 = vmatprep.subr.bf16.mxu0 %v14827_v37  ;;  %v11446_v62 = vrot.slane %v19326_v56, 3  ;;  %v11449_v56 = vrot.slane %v19330_v4, 3  ;;  %v11555_v4 = vcombine.high %v19559_v27, %v19559_v27 }
 0xaca   :  { %12256 = vmatpush1.bf16.msra.mxu1 %v14822_v24  ;;  %v19540_v30 = vpop.eup %15879  ;;  %15899 = vtanh.f32 %v11420_v31  ;;  %v13532_v31 = vmul.f32 -1.442695, %v11443_v43 }
 0xacb   :  { %12257 = vmatprep.subr.bf16.mxu1 %v14830_v49  ;;  %v15882_v23 = vpop.eup %15881  ;;  %15901 = vtanh.f32 %v11421_v48  ;;  %v13533_v48 = vmul.f32 -1.442695, %v11444_v32  ;;  %v13538_v61 = vmul.f32 -1.442695, %v11449_v56 }
 0xacc   :  { %v15884_v2 = vpop.eup %15883  ;;  %v11397_v13 = vadd.f32 1.0, %v15882_v23  ;;  %15903 = vtanh.f32 %v11422_v55  ;;  %12217 = vmatpush1.bf16.msra.mxu0 %v14825_v51  ;;  %v13536_v23 = vmul.f32 -1.442695, %v11447_v50 }
 0xacd   :  { %v15886_v3 = vpop.eup %15885  ;;  %v11398_v21 = vadd.f32 1.0, %v15884_v2  ;;  %15905 = vtanh.f32 %v11423_v47  ;;  %12218 = vmatprep.subr.bf16.mxu0 %v14833_v54  ;;  %v13534_v47 = vmul.f32 -1.442695, %v11445_v11  ;;  %v13535_v54 = vmul.f32 -1.442695, %v11446_v62 }
 0xace   :  { %12258 = vmatpush1.bf16.msra.mxu1 %v14828_v16  ;;  %v15888_v26 = vpop.eup %15887  ;;  %v11399_v41 = vadd.f32 1.0, %v15886_v3  ;;  %15907 = vrcp.f32 %v11397_v13  ;;  %v13537_v2 = vmul.f32 -1.442695, %v11448_v1 }
 0xacf   :  { %12259 = vmatprep.subr.bf16.mxu1 %v14836_v0  ;;  %v15890_v8 = vpop.eup %15889  ;;  %v11400_v29 = vadd.f32 1.0, %v15888_v26  ;;  %15909 = vrcp.f32 %v11398_v21 }
 0xad0   :  { %v15892_v19 = vpop.eup %15891  ;;  %v11401_v25 = vadd.f32 1.0, %v15890_v8  ;;  %15911 = vrcp.f32 %v11399_v41  ;;  %12219 = vmatpush1.bf16.msra.mxu0 %v14831_v14 }
 0xad1   :  { %v15894_v9 = vpop.eup %15893  ;;  %v11402_v10 = vadd.f32 1.0, %v15892_v19  ;;  %15913 = vrcp.f32 %v11400_v29 }
 0xad2   :  { %12260 = vmatpush1.bf16.msra.mxu1 %v14834_v6  ;;  %v15896_v18 = vpop.eup %15895  ;;  %15915 = vrcp.f32 %v11401_v25  ;;  %v11565_v24 = vmul.f32 %v15894_v9, %v19546_v46  ;;  %v11552_v46 = vrot.slane %v11524_v7, %v16279_v45  ;;  %v13539_v6 = vmul.f32 -1.442695, %v11450_v38 }
 0xad3   :  { %v15898_v37 = vpop.eup %15897  ;;  %15917 = vrcp.f32 %v11402_v10  ;;  %v11566_v5 = vmul.f32 %v15896_v18, %v19559_v27 }
 0xad4   :  { %v15900_v49 = vpop.eup %15899  ;;  %15919 = vtanh.f32 %v11424_v35  ;;  %v11573_v55 = vmul.f32 %v15898_v37, %v19491_v39  ;;  %v11556_v25 = vcombine.high %v11552_v46, %v11552_v46 }
 0xad5   :  { %v15902_v51 = vpop.eup %15901  ;;  %15921 = vtanh.f32 %v11425_v52  ;;  %v11574_v57 = vmul.f32 %v15900_v49, %v19493_v63  ;;  %v11554_v63 = vcombine.high %v19553_v40, %v19553_v40 }
 0xad6   :  { %v15904_v16 = vpop.eup %15903  ;;  %15923 = vtanh.f32 %v11426_v36  ;;  %v11581_v34 = vadd.f32 %v11573_v55, %v11565_v24  ;;  %v11575_v3 = vmul.f32 %v15902_v51, %v19498_v60 }
 0xad7   :  { %v15906_v0 = vpop.eup %15905  ;;  %15925 = vpow2.f32 %v13532_v31  ;;  %v11582_v20 = vadd.f32 %v11574_v57, %v11566_v5  ;;  %v11576_v41 = vmul.f32 %v15904_v16, %v19509_v28 }
 0xad8   :  { %v15908_v39 = vpop.eup %15907  ;;  %15927 = vpow2.f32 %v13533_v48  ;;  %v11577_v27 = vmul.f32 %v15906_v0, %v19519_v58 }
 0xad9   :  { %v15910_v13 = vpop.eup %15909  ;;  %15929 = vpow2.f32 %v13534_v47  ;;  %v11567_v14 = vmul.f32 %v15908_v39, %v11553_v15 }
 0xada   :  { %v15912_v21 = vpop.eup %15911  ;;  %15931 = vpow2.f32 %v13535_v54  ;;  %v11568_v26 = vmul.f32 %v15910_v13, %v11555_v4 }
 0xadb   :  { %v15914_v7 = vpop.eup %15913  ;;  %15933 = vpow2.f32 %v13536_v23  ;;  %v11569_v8 = vmul.f32 %v15912_v21, %v19553_v40  ;;  %v11583_v29 = vadd.f32 %v11575_v3, %v11567_v14 }
 0xadc   :  { %v15916_v43 = vpop.eup %15915  ;;  %15935 = vpow2.f32 %v13537_v2  ;;  %v11584_v19 = vadd.f32 %v11576_v41, %v11568_v26  ;;  %v11570_v15 = vmul.f32 %v15914_v7, %v11552_v46 }
 0xadd   :  { %v15918_v35 = vpop.eup %15917  ;;  %15937 = vpow2.f32 %v13538_v61  ;;  %v11585_v60 = vadd.f32 %v11577_v27, %v11569_v8  ;;  %v11571_v32 = vmul.f32 %v15916_v43, %v11554_v63 }
 0xade   :  { %v15920_v9 = vpop.eup %15919  ;;  %15939 = vpow2.f32 %v13539_v6  ;;  %v11572_v10 = vmul.f32 %v15918_v35, %v11556_v25 }
 0xadf   :  { %v15922_v28 = vpop.eup %15921  ;;  %v11578_v52 = vmul.f32 %v15920_v9, %v19522_v42  ;;  %15941 = vtanh.f32 %v11581_v34 }
 0xae0   :  { %v15924_v40 = vpop.eup %15923  ;;  %15943 = vtanh.f32 %v11582_v20  ;;  %v11579_v58 = vmul.f32 %v15922_v28, %v19528_v22 }
 0xae1   :  { %v15926_v11 = vpop.eup %15925  ;;  %15945 = vtanh.f32 %v11583_v29  ;;  %v11580_v18 = vmul.f32 %v15924_v40, %v19540_v30  ;;  %v11586_v36 = vadd.f32 %v11578_v52, %v11570_v15 }
 0xae2   :  { %v15928_v62 = vpop.eup %15927  ;;  %v11483_v24 = vadd.f32 1.0, %v15926_v11  ;;  %v11587_v37 = vadd.f32 %v11579_v58, %v11571_v32  ;;  %15947 = vtanh.f32 %v11584_v19 }
 0xae3   :  { %v15930_v50 = vpop.eup %15929  ;;  %v11484_v31 = vadd.f32 1.0, %v15928_v62  ;;  %v11588_v5 = vadd.f32 %v11580_v18, %v11572_v10  ;;  %15949 = vtanh.f32 %v11585_v60 }
 0xae4   :  { %v15932_v49 = vpop.eup %15931  ;;  %v11485_v42 = vadd.f32 1.0, %v15930_v50  ;;  %15951 = vrcp.f32 %v11483_v24 }
 0xae5   :  { %v15934_v1 = vpop.eup %15933  ;;  %v11486_v48 = vadd.f32 1.0, %v15932_v49  ;;  %15953 = vrcp.f32 %v11484_v31 }
 0xae6   :  { %v15936_v22 = vpop.eup %15935  ;;  %v11487_v55 = vadd.f32 1.0, %v15934_v1  ;;  %15955 = vrcp.f32 %v11485_v42 }
 0xae7   :  { %v15938_v51 = vpop.eup %15937  ;;  %v11488_v30 = vadd.f32 1.0, %v15936_v22  ;;  %15957 = vrcp.f32 %v11486_v48 }
 0xae8   :  { %v15940_v56 = vpop.eup %15939  ;;  %v11489_v47 = vadd.f32 1.0, %v15938_v51  ;;  %15959 = vrcp.f32 %v11487_v55 }
 0xae9   :  { %v15942_v57 = vpop.eup %15941  ;;  %v11490_v16 = vadd.f32 1.0, %v15940_v56  ;;  %15961 = vrcp.f32 %v11488_v30 }
 0xaea   :  { %v15944_v38 = vpop.eup %15943  ;;  %15963 = vrcp.f32 %v11489_v47 }
 0xaeb   :  { %v15946_v54 = vpop.eup %15945  ;;  %15965 = vrcp.f32 %v11490_v16 }
 0xaec   :  { %v15948_v34 = vpop.eup %15947  ;;  %15967 = vtanh.f32 %v11586_v36 }
 0xaed   :  { %v15950_v0 = vpop.eup %15949  ;;  %15969 = vtanh.f32 %v11587_v37 }
 0xaee   :  { %v15952_v23 = vpop.eup %15951  ;;  %15971 = vtanh.f32 %v11588_v5 }
 0xaef   :  { %v15954_v20 = vpop.eup %15953  ;;  %v11597_v46 = vmul.f32 %v15952_v23, %v15942_v57 }
 0xaf0   :  { %v15956_v39 = vpop.eup %15955  ;;  %v11598_v2 = vmul.f32 %v15954_v20, %v15944_v38  ;;  %v12286_v20 = vld [vmem:[%s19691_s4] sm:$0xf] }
 0xaf1   :  { %v15958_v4 = vpop.eup %15957  ;;  %v11599_v63 = vmul.f32 %v15956_v39, %v15946_v54  ;;  %v11605_v14 = vpack.c.bf16 %v11597_v46, %v11597_v46  ;;  %v12291_v46 = vrot.slane %v12286_v20, %v16524_v12  ;;  %v12303_v12 = vrot.slane %v12286_v20, %v16539_v53 }
 0xaf2   :  { %v15960_v13 = vpop.eup %15959  ;;  %v11600_v61 = vmul.f32 %v15958_v4, %v15948_v34  ;;  %v11606_v3 = vpack.c.bf16 %v11598_v2, %v11598_v2  ;;  %v12295_v4 = vrot.slane %v12286_v20, %v16530_v44  ;;  %v12299_v44 = vrot.slane %v12286_v20, %v16543_v17 }
 0xaf3   :  { %v15962_v21 = vpop.eup %15961  ;;  %v11601_v6 = vmul.f32 %v15960_v13, %v15950_v0  ;;  %v11607_v26 = vpack.c.bf16 %v11599_v63, %v11599_v63  ;;  %v11621_v25 = vunpack.c.l.b16 %v11605_v14 }
 0xaf4   :  { %v15964_v41 = vpop.eup %15963  ;;  %v11608_v7 = vpack.c.bf16 %v11600_v61, %v11600_v61  ;;  %v11622_v8 = vunpack.c.l.b16 %v11606_v3 }
 0xaf5   :  { %v15966_v27 = vpop.eup %15965  ;;  %v11609_v29 = vpack.c.bf16 %v11601_v6, %v11601_v6  ;;  %v11623_v43 = vunpack.c.l.b16 %v11607_v26 }
 0xaf6   :  { %v15968_v19 = vpop.eup %15967  ;;  %v11624_v15 = vunpack.c.l.b16 %v11608_v7  ;;  %v11645_v35 = vrot.slane %v11622_v8, 7 }
 0xaf7   :  { %v15970_v60 = vpop.eup %15969  ;;  %v11602_v32 = vmul.f32 %v15968_v19, %v15962_v21  ;;  %v11625_v9 = vunpack.c.l.b16 %v11609_v29  ;;  %v11647_v10 = vrot.slane %v11623_v43, 6 }
 0xaf8   :  { %v15972_v28 = vpop.eup %15971  ;;  %v11603_v52 = vmul.f32 %v15970_v60, %v15964_v41  ;;  %v11646_v40 = vsel %vm769_vm0, %v11645_v35, %v11621_v25  ;;  %v11649_v58 = vrot.slane %v11624_v15, 5  ;;  %vm12445_vm0 = vsmask.f32 7950 }
 0xaf9   :  { %v11604_v11 = vmul.f32 %v15972_v28, %v15966_v27  ;;  %v11610_v18 = vpack.c.bf16 %v11602_v32, %v11602_v32  ;;  %v11648_v36 = vsel %vm772_vm1, %v11647_v10, %v11646_v40  ;;  %v11651_v62 = vrot.slane %v11625_v9, 4  ;;  %vm19611_vm1 = vmand %vm775_vm2, %vm12445_vm0 }
 0xafa   :  { %v11611_v24 = vpack.c.bf16 %v11603_v52, %v11603_v52  ;;  %v11650_v37 = vsel %vm775_vm2, %v11649_v58, %v11648_v36 }
 0xafb   :  { %v11612_v50 = vpack.c.bf16 %v11604_v11, %v11604_v11  ;;  %v11626_v31 = vunpack.c.l.b16 %v11610_v18  ;;  %v11652_v5 = vsel %vm778_vm3, %v11651_v62, %v11650_v37 }
 0xafc   :  { %v11627_v49 = vunpack.c.l.b16 %v11611_v24 }
 0xafd   :  { %v11628_v42 = vunpack.c.l.b16 %v11612_v50  ;;  %v11653_v1 = vrot.slane %v11626_v31, 3 }
 0xafe   :  { %v11655_v48 = vrot.slane %v11627_v49, 2 }
 0xaff   :  { %v11654_v22 = vsel %vm781_vm4, %v11653_v1, %v11652_v5  ;;  %v11657_v55 = vrot.slane %v11628_v42, 1 }
 0xb00   :  { %v11656_v51 = vsel %vm784_vm5, %v11655_v48, %v11654_v22 }
 0xb01   :  { %v11658_v30 = vsel %vm787_vm6, %v11657_v55, %v11656_v51 }
 0xb02   :  { %v11659_v56 = vpack.c.b16 %v11658_v30, %v11658_v30 }
 0xb04   :  { %11661 = vst [vmem:[#allocation2] sm:$0xf] %v11659_v56  ;;  %12237 = vmatmul.mubr.bf16.vlgmr.msra.gmra.mrb[92].mxu0 %v11659_v56  ;;  %12278 = vmatmul.mubr.bf16.vlgmr.msra.gmra.mrb[92].mxu1 %v11659_v56 }
 0xb86   :  { %v11980_v47 = vpop.f32.mrb[88].mxu0  ;;  %v12021_v57 = vpop.f32.mrb[88].mxu1 }
 0xb87   :  { %v11982_v16 = vpop.f32.mrb[89].mxu0  ;;  %v12023_v38 = vpop.f32.mrb[89].mxu1 }
 0xb88   :  { %v11984_v54 = vpop.f32.mrb[90].mxu0  ;;  %v12025_v34 = vpop.f32.mrb[90].mxu1 }
 0xb89   :  { %v11985_v0 = vpop.f32.mrb[91].mxu0  ;;  %v12026_v23 = vpop.f32.mrb[91].mxu1  ;;  %v12447_v54 = vld [vmem:[%s19692_s5] sm:$0x8] }
 0xbd7   :  { %v12238_v39 = vpop.f32.mrb[92].mxu0  ;;  %v12279_v2 = vpop.f32.mrb[92].mxu1 }
 0xbd8   :  { %v12239_v63 = vadd.f32 %v12238_v39, %v11980_v47  ;;  %v12280_v13 = vadd.f32 %v12279_v2, %v12021_v57  ;;  %v12240_v61 = vpop.f32.mrb[93].mxu0  ;;  %v12281_v14 = vpop.f32.mrb[93].mxu1 }
 0xbd9   :  { %v12241_v3 = vadd.f32 %v12240_v61, %v11982_v16  ;;  %v12282_v21 = vadd.f32 %v12281_v14, %v12023_v38  ;;  %v12242_v6 = vpop.f32.mrb[94].mxu0  ;;  %v12283_v26 = vpop.f32.mrb[94].mxu1  ;;  %v12459_v61 = vld [vmem:[%s19692_s5 + $0x10] sm:$0x8] }
 0xbda   :  { %v12308_v41 = vadd.f32 %v12291_v46, %v12239_v63  ;;  %v12243_v7 = vpop.f32.mrb[95].mxu0  ;;  %v12284_v8 = vpop.f32.mrb[95].mxu1  ;;  %v12310_v15 = vadd.f32 %v12299_v44, %v12280_v13  ;;  %v12450_v63 = vld [vmem:[%s19692_s5 + $0x4] sm:$0x8]  ;;  %v12453_v13 = vld [vmem:[%s19692_s5 + $0x8] sm:$0x8] }
 0xbdb   :  { %v12309_v27 = vadd.f32 %v12295_v4, %v12241_v3  ;;  %v12311_v19 = vadd.f32 %v12303_v12, %v12282_v21  ;;  %v12456_v21 = vld [vmem:[%s19692_s5 + $0xc] sm:$0x8]  ;;  %v12462_v26 = vld [vmem:[%s19692_s5 + $0x14] sm:$0x8] }
 0xbdc   :  { %v13612_v29 = vmul.f32 -1.442695, %v12308_v41  ;;  %v12465_v41 = vld [vmem:[%s19692_s5 + $0x18] sm:$0x8] }
 0xbdd   :  { %v13613_v43 = vmul.f32 -1.442695, %v12309_v27  ;;  %v13614_v25 = vmul.f32 -1.442695, %v12311_v19 }
 0xbde   :  { %15973 = vpow2.f32 %v13612_v29  ;;  %v12468_v29 = vld [vmem:[%s19692_s5 + $0x1c] sm:$0x8] }
 0xbdf   :  { %15975 = vpow2.f32 %v13613_v43 }
 0xbe0   :  { %15977 = vpow2.f32 %v13614_v25 }
 0xbe1   :  { %15979 = vtanh.f32 %v12310_v15 }
 0xbe8   :  { %v15974_v35 = vpop.eup %15973 }
 0xbe9   :  { %v15976_v60 = vpop.eup %15975  ;;  %v12316_v32 = vadd.f32 1.0, %v15974_v35 }
 0xbea   :  { %v12322_v9 = vadd.f32 1.0, %v15976_v60  ;;  %v15978_v10 = vpop.eup %15977 }
 0xbeb   :  { %15981 = vrcp.f32 %v12316_v32  ;;  %v15980_v28 = vpop.eup %15979  ;;  %v12329_v58 = vadd.f32 1.0, %v15978_v10 }
 0xbec   :  { %15983 = vrcp.f32 %v12322_v9 }
 0xbed   :  { %15985 = vrcp.f32 %v12329_v58 }
 0xbf5   :  { %v15982_v52 = vpop.eup %15981 }
 0xbf6   :  { %v15984_v40 = vpop.eup %15983  ;;  %v12333_v53 = vmul.f32 %v15982_v52, %v15980_v28 }
 0xbf7   :  { %v12332_v11 = vmul.f32 %v15984_v40, %v19281_v59  ;;  %v15986_v17 = vpop.eup %15985 }
 0xbf9   :  { %v12334_v18 = vadd.f32 %v12333_v53, %v12332_v11 }
 0xbfb   :  { %15987 = vtanh.f32 %v12334_v18 }
 0xc05   :  { %v15988_v36 = vpop.eup %15987 }
 0xc06   :  { %v12336_v62 = vmul.f32 %v15988_v36, %v15986_v17 }
 0xc08   :  { %v12337_v24 = vpack.c.bf16 %v12336_v62, %v12336_v62 }
 0xc0a   :  { %12338 = vst [vmem:[#allocation2 + $0x4] sm:$0xf] %v12337_v24  ;;  %v12347_v37 = vrot.slane %v12337_v24, %v16279_v45 }
 0xc0c   :  { %v12348_v50 = vcombine.high %v12347_v37, %v12347_v37  ;;  %v12355_v31 = vrot.slane %v12347_v37, %v16279_v45 }
 0xc0e   :  { %v12362_v5 = vrot.slane %v12348_v50, %v16279_v45  ;;  %v12363_v49 = vcombine.high %v12355_v31, %v12355_v31  ;;  %v12366_v42 = vunpack.i.h.s16 %v12355_v31  ;;  %v13615_v1 = vpack.i.b16 %v12355_v31, %v12355_v31 }
 0xc10   :  { %v12364_v59 = vcombine.high %v12362_v5, %v12362_v5  ;;  %v12368_v48 = vunpack.i.h.s16 %v12362_v5  ;;  %v12370_v22 = vunpack.i.h.s16 %v12363_v49  ;;  %v12374_v55 = vpack.i.b16 %v12366_v42, %v12366_v42 }
 0xc11   :  { %v13616_v30 = vpack.i.b16 %v12362_v5, %v12362_v5  ;;  %v13617_v56 = vpack.i.b16 %v12363_v49, %v12363_v49  ;;  %v12387_v47 = vrot.slane %v13615_v1, %v16610_v33 }
 0xc12   :  { %v12372_v57 = vunpack.i.h.s16 %v12364_v59  ;;  %v12376_v16 = vpack.i.b16 %v12368_v48, %v12368_v48  ;;  %v12378_v38 = vpack.i.b16 %v12370_v22, %v12370_v22  ;;  %v13618_v45 = vpack.i.b16 %v12364_v59, %v12364_v59 }
 0xc13   :  { %v12394_v34 = vrot.slane %v12374_v55, %v16610_v33  ;;  %v12401_v0 = vrot.slane %v13616_v30, %v16610_v33  ;;  %v12415_v23 = vrot.slane %v13617_v56, %v16610_v33  ;;  %v12448_v20 = vsel %vm19611_vm1, %v12387_v47, %v12447_v54 }
 0xc14   :  { %v12380_v46 = vpack.i.b16 %v12372_v57, %v12372_v57  ;;  %v12408_v39 = vrot.slane %v12376_v16, %v16610_v33  ;;  %v12422_v2 = vrot.slane %v12378_v38, %v16610_v33  ;;  %v12429_v4 = vrot.slane %v13618_v45, %v16610_v33  ;;  %12449 = vst [vmem:[%s19692_s5] sm:$0x8] %v12448_v20 }
 0xc15   :  { %v12451_v14 = vsel %vm19611_vm1, %v12394_v34, %v12450_v63  ;;  %v12454_v3 = vsel %vm19611_vm1, %v12401_v0, %v12453_v13  ;;  %v12460_v6 = vsel %vm19611_vm1, %v12415_v23, %v12459_v61 }
 0xc16   :  { %v12436_v7 = vrot.slane %v12380_v46, %v16610_v33  ;;  %12452 = vst [vmem:[%s19692_s5 + $0x4] sm:$0x8] %v12451_v14  ;;  %12455 = vst [vmem:[%s19692_s5 + $0x8] sm:$0x8] %v12454_v3  ;;  %v12457_v8 = vsel %vm19611_vm1, %v12408_v39, %v12456_v21  ;;  %v12463_v27 = vsel %vm19611_vm1, %v12422_v2, %v12462_v26 }
 0xc17   :  { %12461 = vst [vmem:[%s19692_s5 + $0x10] sm:$0x8] %v12460_v6  ;;  %v12466_v33 = vsel %vm19611_vm1, %v12429_v4, %v12465_v41  ;;  %12458 = vst [vmem:[%s19692_s5 + $0xc] sm:$0x8] %v12457_v8 }
 0xc18   :  { %12464 = vst [vmem:[%s19692_s5 + $0x14] sm:$0x8] %v12463_v27  ;;  %12467 = vst [vmem:[%s19692_s5 + $0x18] sm:$0x8] %v12466_v33  ;;  %v12469_v43 = vsel %vm19611_vm1, %v12436_v7, %v12468_v29 }
 0xc19   :  { %12470 = vst [vmem:[%s19692_s5 + $0x1c] sm:$0x8] %v12469_v43 }
 0xc1a   :  { %12475 = vsyncpa [#allocation5], 1 }

</bundles_post_ra>
